<compile_context>
chip_gen: v6e
topology: v6e:2x2x1
jax: 0.10.0
libtpu: 0.0.40
codegen_flags: <defaults>
</compile_context>

<pallas_src>
import numpy as np
import jax
import jax.numpy as jnp
from jax.experimental import pallas as pl
from jax.experimental.pallas import tpu as pltpu

# ---------------- model hyper-parameters (from KcrNet.__init__) ---------------
VOCAB_SIZE = 1          # len(word2id_dict) == 1
EMBEDDING_SIZE = 29     # conv length L
INPUT_CLASSES = 21      # conv1 in_channels
NUM_CLASSES = 2
KSIZE = 5
PAD = 2


def conv1d_out_len(L, stride, pad=PAD, k=KSIZE):
    return (L + 2 * pad - k) // stride + 1


L1 = conv1d_out_len(EMBEDDING_SIZE, 1)   # 29 after conv1
L2 = conv1d_out_len(L1, 2)               # 15 after conv2
L3 = conv1d_out_len(L2, 2)               # 8  after conv3  -> 32*8 = 256 = linear1 in


def _round_up(x, m):
    return ((x + m - 1) // m) * m


def _cdiv(a, b):
    return -(-a // b)


# Lane-aligned (multiple-of-128) feature widths for the chained matmuls.
F0 = _round_up(INPUT_CLASSES * EMBEDDING_SIZE, 128)   # 609 -> 640
F1 = _round_up(32 * L1, 128)                          # 928 -> 1024
F2 = _round_up(32 * L2, 128)                          # 480 -> 512
F3 = _round_up(32 * L3, 128)                          # 256
F4 = 128                                              # linear1 out
F5 = _round_up(NUM_CLASSES, 128)                      # 2 -> 128 (lane-dense logits)


# ------------------------ generation-tuned tiling policy -----------------------
def _select_tiling():
    """Returns (MAX_TB, vmem_limit_bytes, min_grid_steps) per TPU generation."""
    try:
        kind = jax.devices()[0].device_kind.lower()
    except Exception:
        kind = ""
    if "v7" in kind:
        # 64 MiB VMEM/TC, 2 TensorCores -> want >=4 grid steps for occupancy.
        return 1024, 48 * 1024 * 1024, 4
    if "v6" in kind:
        # 128 MiB VMEM, 918 TF/s -> big tiles amortize the ~0.35us/step overhead.
        return 1536, 64 * 1024 * 1024, 2
    if "v5e" in kind or "v5 lite" in kind or "v5lite" in kind:
        # 197 TF/s: a 512-row step is ~7us, step overhead already <5%.
        return 512, 32 * 1024 * 1024, 2
    # Conservative default (matches the previously validated configuration).
    return 512, 32 * 1024 * 1024, 2


def _choose_tb(B, max_tb, min_steps):
    """Occupancy-aware, padding-minimizing batch tile (multiple of 16)."""
    n_tiles = max(min_steps, _cdiv(B, max_tb), 1)
    tb = _round_up(_cdiv(B, n_tiles), 16)
    return max(16, min(tb, max_tb))


# ---------------------------- parameter plumbing ------------------------------
def build_conv_matrix(w, L_in, stride, rows, cols, pad=PAD):
    """Dense M (rows, cols) such that flat(conv1d(x)) == flat(x) @ M.

    flat is channel-major (c*L + t).  Padded rows/cols stay zero."""
    w = np.asarray(w, np.float32)
    C_out, C_in, k = w.shape
    L_out = (L_in + 2 * pad - k) // stride + 1
    assert rows >= C_in * L_in and cols >= C_out * L_out
    M = np.zeros((rows, cols), dtype=np.float32)
    t = np.arange(L_out)
    for co in range(C_out):
        for ci in range(C_in):
            for kk in range(k):
                l = t * stride + kk - pad
                valid = (l >= 0) & (l < L_in)
                M[ci * L_in + l[valid], co * L_out + t[valid]] = w[co, ci, kk]
    return M


def broadcast_bias(b, L_out, cols):
    """flat bias at index co*L_out + t == b[co]; zero in padded lanes."""
    b = np.asarray(b, np.float32)
    out = np.zeros((1, cols), np.float32)
    out[0, : b.shape[0] * L_out] = np.repeat(b, L_out)
    return out


def init_params(key):
    ks = jax.random.split(key, 11)

    def u(k, shape, fan_in):
        bound = 1.0 / np.sqrt(fan_in)
        return jax.random.uniform(k, shape, jnp.float32, -bound, bound)

    emb = jax.random.normal(ks[0], (VOCAB_SIZE, EMBEDDING_SIZE), jnp.float32)
    w1 = u(ks[1], (32, INPUT_CLASSES, KSIZE), INPUT_CLASSES * KSIZE)
    bb1 = u(ks[2], (32,), INPUT_CLASSES * KSIZE)
    w2 = u(ks[3], (32, 32, KSIZE), 32 * KSIZE)
    bb2 = u(ks[4], (32,), 32 * KSIZE)
    w3 = u(ks[5], (32, 32, KSIZE), 32 * KSIZE)
    bb3 = u(ks[6], (32,), 32 * KSIZE)
    W4 = u(ks[7], (32 * L3, 128), 32 * L3)          # linear1 (input-major)
    b4 = u(ks[8], (128,), 32 * L3)
    W5 = u(ks[9], (128, NUM_CLASSES), 128)          # linear2 (input-major)
    b5 = u(ks[10], (NUM_CLASSES,), 128)

    raw = dict(emb=emb, w1=w1, bb1=bb1, w2=w2, bb2=bb2, w3=w3, bb3=bb3,
               W4=W4, b4=b4, W5=W5, b5=b5)

    # Padded, bf16 matmul operands; f32 biases (added on the f32 accumulator).
    W4_p = np.zeros((F3, F4), np.float32)
    W4_p[: 32 * L3, :128] = np.asarray(W4)
    W5_p = np.zeros((F4, F5), np.float32)
    W5_p[:128, :NUM_CLASSES] = np.asarray(W5)
    b4_p = np.zeros((1, F4), np.float32)
    b4_p[0, :128] = np.asarray(b4)
    b5_p = np.zeros((1, F5), np.float32)
    b5_p[0, :NUM_CLASSES] = np.asarray(b5)

    params = dict(
        emb=emb,
        M1=jnp.asarray(build_conv_matrix(w1, EMBEDDING_SIZE, 1, F0, F1), jnp.bfloat16),
        b1f=jnp.asarray(broadcast_bias(bb1, L1, F1)),
        M2=jnp.asarray(build_conv_matrix(w2, L1, 2, F1, F2), jnp.bfloat16),
        b2f=jnp.asarray(broadcast_bias(bb2, L2, F2)),
        M3=jnp.asarray(build_conv_matrix(w3, L2, 2, F2, F3), jnp.bfloat16),
        b3f=jnp.asarray(broadcast_bias(bb3, L3, F3)),
        W4=jnp.asarray(W4_p, jnp.bfloat16), b4=jnp.asarray(b4_p),
        W5=jnp.asarray(W5_p, jnp.bfloat16), b5=jnp.asarray(b5_p),
    )
    return raw, params


# --------------------------------- kernel -------------------------------------
def kcrnet_kernel(x_ref, m1_ref, b1_ref, m2_ref, b2_ref, m3_ref, b3_ref,
                  w4_ref, b4_ref, w5_ref, b5_ref, out_ref):
    # Dropout layers are identity in eval mode.
    def layer(h_bf16, w_ref, b_ref, relu=True):
        acc = jnp.dot(h_bf16, w_ref[...],
                      preferred_element_type=jnp.float32) + b_ref[...]
        return jnp.maximum(acc, 0.0) if relu else acc

    h = layer(x_ref[...], m1_ref, b1_ref).astype(jnp.bfloat16)   # conv1 + relu
    h = layer(h, m2_ref, b2_ref).astype(jnp.bfloat16)            # conv2 + relu
    h = layer(h, m3_ref, b3_ref).astype(jnp.bfloat16)            # conv3 + relu
    h = layer(h, w4_ref, b4_ref).astype(jnp.bfloat16)            # linear1 + relu
    # linear2: f32 accumulate, bf16 store (halves output HBM traffic).
    out_ref[...] = layer(h, w5_ref, b5_ref, relu=False).astype(out_ref.dtype)


def _run_pallas(args, TB, B_pad, vmem_limit, cost, buffered_weights):
    const = lambda i: (0, 0)   # weights/biases stay VMEM-resident across the grid

    def wspec(shape):
        if buffered_weights:
            # Constant-index operands never change -> single buffer saves ~2.7 MB.
            return pl.BlockSpec(shape, const, pipeline_mode=pl.Buffered(1))
        return pl.BlockSpec(shape, const)

    in_specs = [
        pl.BlockSpec((TB, F0), lambda i: (i, 0)),
        wspec((F0, F1)), wspec((1, F1)),
        wspec((F1, F2)), wspec((1, F2)),
        wspec((F2, F3)), wspec((1, F3)),
        wspec((F3, F4)), wspec((1, F4)),
        wspec((F4, F5)), wspec((1, F5)),
    ]
    out_specs = pl.BlockSpec((TB, F5), lambda i: (i, 0))

    return pl.pallas_call(
        kcrnet_kernel,
        out_shape=jax.ShapeDtypeStruct((B_pad, F5), jnp.bfloat16),
        grid=(B_pad // TB,),
        in_specs=in_specs,
        out_specs=out_specs,
        compiler_params=pltpu.CompilerParams(
            dimension_semantics=("parallel",),
            vmem_limit_bytes=vmem_limit,
        ),
        cost_estimate=cost,
    )(*args)


def kcrnet_forward(x_tokens, params):
    # Embedding lookup + channel-major flatten + padding are layout glue (plain JAX).
    emb = params["emb"][x_tokens]                                    # (B, 21, 29)
    x_flat = emb.reshape(emb.shape[0], INPUT_CLASSES * EMBEDDING_SIZE)
    B = x_flat.shape[0]

    max_tb, vmem_limit, min_steps = _select_tiling()
    TB = _choose_tb(B, max_tb, min_steps)
    B_pad = _round_up(B, TB)
    x_p = jnp.pad(x_flat.astype(jnp.float32),
                  ((0, B_pad - B), (0, F0 - INPUT_CLASSES * EMBEDDING_SIZE))
                  ).astype(jnp.bfloat16)                             # (B_pad, F0)

    args = (x_p,
            params["M1"], params["b1f"],
            params["M2"], params["b2f"],
            params["M3"], params["b3f"],
            params["W4"], params["b4"],
            params["W5"], params["b5"])

    mac = F0 * F1 + F1 * F2 + F2 * F3 + F3 * F4 + F4 * F5
    weight_bytes = 2 * mac + 4 * (F1 + F2 + F3 + F4 + F5)
    cost = pl.CostEstimate(
        flops=2 * B_pad * mac,
        transcendentals=0,
        bytes_accessed=B_pad * (2 * F0 + 2 * F5) + weight_bytes,
    )

    try:
        out_pad = _run_pallas(args, TB, B_pad, vmem_limit, cost,
                              buffered_weights=True)
    except Exception:
        # Fallback for JAX builds without pipeline_mode / Buffered(1) support.
        out_pad = _run_pallas(args, TB, B_pad, vmem_limit, cost,
                              buffered_weights=False)

    return out_pad[:B, :NUM_CLASSES].astype(jnp.float32)


# ------------------------------ numpy reference --------------------------------
def np_conv1d(x, w, b, stride, pad=PAD):
    B, Cin, L = x.shape
    Cout, _, k = w.shape
    Lout = (L + 2 * pad - k) // stride + 1
    xp = np.pad(x, ((0, 0), (0, 0), (pad, pad)))
    y = np.zeros((B, Cout, Lout), np.float64)
    for t in range(Lout):
        patch = xp[:, :, t * stride:t * stride + k]          # (B, Cin, k)
        y[:, :, t] = np.einsum("bck,ock->bo", patch, w)
    return y + np.asarray(b, np.float64)[None, :, None]


def reference_forward(x_tokens, raw):
    emb = np.asarray(raw["emb"], np.float64)[np.asarray(x_tokens)]   # (B, 21, 29)
    h = np.maximum(np_conv1d(emb, np.asarray(raw["w1"]), raw["bb1"], 1), 0.0)
    h = np.maximum(np_conv1d(h, np.asarray(raw["w2"]), raw["bb2"], 2), 0.0)
    h = np.maximum(np_conv1d(h, np.asarray(raw["w3"]), raw["bb3"], 2), 0.0)
    h = h.reshape(h.shape[0], -1)                                    # (B, 256)
    h = np.maximum(h @ np.asarray(raw["W4"], np.float64)
                   + np.asarray(raw["b4"], np.float64), 0.0)
    return h @ np.asarray(raw["W5"], np.float64) + np.asarray(raw["b5"], np.float64)


# ---------------------------------- main ---------------------------------------
if __name__ == "__main__":
    key = jax.random.PRNGKey(0)
    pkey, xkey = jax.random.split(key)
    raw, params = init_params(pkey)

    B = 2
    # Token indices in [0, vocab_size) — vocab_size == 1, so all zeros.
    x_tokens = jax.random.randint(xkey, (B, INPUT_CLASSES), 0, VOCAB_SIZE)

    out = kcrnet_forward(x_tokens, params)
    out = jax.block_until_ready(out)

    ref = reference_forward(np.asarray(x_tokens), raw)
    assert out.shape == (B, NUM_CLASSES)
    # Tolerance is loose because weights/activations (and now logits) are bf16.
    np.testing.assert_allclose(np.asarray(out, np.float64), ref, rtol=5e-2, atol=5e-2)

    print("KERNEL_OK")
</pallas_src>

<mosaic_0001>
module attributes {stable_mosaic.version = 11 : i64} {
  func.func @kcrnet_kernel(%arg0: i32, %arg1: memref<16x640xbf16, #tpu.memory_space<vmem>>, %arg2: memref<640x1024xbf16, #tpu.memory_space<vmem>>, %arg3: memref<1x1024xf32, #tpu.memory_space<vmem>>, %arg4: memref<1024x512xbf16, #tpu.memory_space<vmem>>, %arg5: memref<1x512xf32, #tpu.memory_space<vmem>>, %arg6: memref<512x256xbf16, #tpu.memory_space<vmem>>, %arg7: memref<1x256xf32, #tpu.memory_space<vmem>>, %arg8: memref<256x128xbf16, #tpu.memory_space<vmem>>, %arg9: memref<1x128xf32, #tpu.memory_space<vmem>>, %arg10: memref<128x128xbf16, #tpu.memory_space<vmem>>, %arg11: memref<1x128xf32, #tpu.memory_space<vmem>>, %arg12: memref<16x128xbf16, #tpu.memory_space<vmem>>) attributes {dimension_semantics = [#tpu.dimension_semantics<parallel>], iteration_bounds = array<i64: 1>, scalar_prefetch = 0 : i64, scratch_operands = 0 : i64, tpu.core_type = #tpu.core_type<tc>, window_params = [{transform_indices = @transform_0, window_bounds = array<i64: 16, 640>}, {pipeline_mode = #tpu.pipeline_mode<synchronous>, transform_indices = @transform_1, window_bounds = array<i64: 640, 1024>}, {pipeline_mode = #tpu.pipeline_mode<synchronous>, transform_indices = @transform_2, window_bounds = array<i64: 1, 1024>}, {pipeline_mode = #tpu.pipeline_mode<synchronous>, transform_indices = @transform_3, window_bounds = array<i64: 1024, 512>}, {pipeline_mode = #tpu.pipeline_mode<synchronous>, transform_indices = @transform_4, window_bounds = array<i64: 1, 512>}, {pipeline_mode = #tpu.pipeline_mode<synchronous>, transform_indices = @transform_5, window_bounds = array<i64: 512, 256>}, {pipeline_mode = #tpu.pipeline_mode<synchronous>, transform_indices = @transform_6, window_bounds = array<i64: 1, 256>}, {pipeline_mode = #tpu.pipeline_mode<synchronous>, transform_indices = @transform_7, window_bounds = array<i64: 256, 128>}, {pipeline_mode = #tpu.pipeline_mode<synchronous>, transform_indices = @transform_8, window_bounds = array<i64: 1, 128>}, {pipeline_mode = #tpu.pipeline_mode<synchronous>, transform_indices = @transform_9, window_bounds = array<i64: 128, 128>}, {pipeline_mode = #tpu.pipeline_mode<synchronous>, transform_indices = @transform_10, window_bounds = array<i64: 1, 128>}, {transform_indices = @transform_11, window_bounds = array<i64: 16, 128>}]} {
    %c0 = arith.constant 0 : index
    %c0_0 = arith.constant 0 : index
    %0 = vector.load %arg1[%c0, %c0_0] : memref<16x640xbf16, #tpu.memory_space<vmem>>, vector<16x640xbf16>
    %c0_1 = arith.constant 0 : index
    %c0_2 = arith.constant 0 : index
    %1 = vector.load %arg2[%c0_1, %c0_2] : memref<640x1024xbf16, #tpu.memory_space<vmem>>, vector<640x1024xbf16>
    %cst = arith.constant dense<0.000000e+00> : vector<16x1024xf32>
    %2 = tpu.matmul %0, %1, %cst {dimension_numbers = #tpu.dot_dimension_numbers<[1], [0], [0], [1], [0, 0, 1, 1], [], []>} : vector<16x640xbf16>, vector<640x1024xbf16>, vector<16x1024xf32> -> vector<16x1024xf32>
    %c0_3 = arith.constant 0 : index
    %c0_4 = arith.constant 0 : index
    %3 = vector.load %arg3[%c0_3, %c0_4] : memref<1x1024xf32, #tpu.memory_space<vmem>>, vector<1x1024xf32>
    %4 = vector.broadcast %3 : vector<1x1024xf32> to vector<16x1024xf32>
    %5 = arith.addf %2, %4 : vector<16x1024xf32>
    %cst_5 = arith.constant 0.000000e+00 : f32
    %6 = vector.broadcast %cst_5 : f32 to vector<16x1024xf32>
    %7 = arith.maximumf %5, %6 : vector<16x1024xf32>
    %8 = arith.truncf %7 : vector<16x1024xf32> to vector<16x1024xbf16>
    %c0_6 = arith.constant 0 : index
    %c0_7 = arith.constant 0 : index
    %9 = vector.load %arg4[%c0_6, %c0_7] : memref<1024x512xbf16, #tpu.memory_space<vmem>>, vector<1024x512xbf16>
    %cst_8 = arith.constant dense<0.000000e+00> : vector<16x512xf32>
    %10 = tpu.matmul %8, %9, %cst_8 {dimension_numbers = #tpu.dot_dimension_numbers<[1], [0], [0], [1], [0, 0, 1, 1], [], []>} : vector<16x1024xbf16>, vector<1024x512xbf16>, vector<16x512xf32> -> vector<16x512xf32>
    %c0_9 = arith.constant 0 : index
    %c0_10 = arith.constant 0 : index
    %11 = vector.load %arg5[%c0_9, %c0_10] : memref<1x512xf32, #tpu.memory_space<vmem>>, vector<1x512xf32>
    %12 = vector.broadcast %11 : vector<1x512xf32> to vector<16x512xf32>
    %13 = arith.addf %10, %12 : vector<16x512xf32>
    %cst_11 = arith.constant 0.000000e+00 : f32
    %14 = vector.broadcast %cst_11 : f32 to vector<16x512xf32>
    %15 = arith.maximumf %13, %14 : vector<16x512xf32>
    %16 = arith.truncf %15 : vector<16x512xf32> to vector<16x512xbf16>
    %c0_12 = arith.constant 0 : index
    %c0_13 = arith.constant 0 : index
    %17 = vector.load %arg6[%c0_12, %c0_13] : memref<512x256xbf16, #tpu.memory_space<vmem>>, vector<512x256xbf16>
    %cst_14 = arith.constant dense<0.000000e+00> : vector<16x256xf32>
    %18 = tpu.matmul %16, %17, %cst_14 {dimension_numbers = #tpu.dot_dimension_numbers<[1], [0], [0], [1], [0, 0, 1, 1], [], []>} : vector<16x512xbf16>, vector<512x256xbf16>, vector<16x256xf32> -> vector<16x256xf32>
    %c0_15 = arith.constant 0 : index
    %c0_16 = arith.constant 0 : index
    %19 = vector.load %arg7[%c0_15, %c0_16] : memref<1x256xf32, #tpu.memory_space<vmem>>, vector<1x256xf32>
    %20 = vector.broadcast %19 : vector<1x256xf32> to vector<16x256xf32>
    %21 = arith.addf %18, %20 : vector<16x256xf32>
    %cst_17 = arith.constant 0.000000e+00 : f32
    %22 = vector.broadcast %cst_17 : f32 to vector<16x256xf32>
    %23 = arith.maximumf %21, %22 : vector<16x256xf32>
    %24 = arith.truncf %23 : vector<16x256xf32> to vector<16x256xbf16>
    %c0_18 = arith.constant 0 : index
    %c0_19 = arith.constant 0 : index
    %25 = vector.load %arg8[%c0_18, %c0_19] : memref<256x128xbf16, #tpu.memory_space<vmem>>, vector<256x128xbf16>
    %cst_20 = arith.constant dense<0.000000e+00> : vector<16x128xf32>
    %26 = tpu.matmul %24, %25, %cst_20 {dimension_numbers = #tpu.dot_dimension_numbers<[1], [0], [0], [1], [0, 0, 1, 1], [], []>} : vector<16x256xbf16>, vector<256x128xbf16>, vector<16x128xf32> -> vector<16x128xf32>
    %c0_21 = arith.constant 0 : index
    %c0_22 = arith.constant 0 : index
    %27 = vector.load %arg9[%c0_21, %c0_22] : memref<1x128xf32, #tpu.memory_space<vmem>>, vector<1x128xf32>
    %28 = vector.broadcast %27 : vector<1x128xf32> to vector<16x128xf32>
    %29 = arith.addf %26, %28 : vector<16x128xf32>
    %cst_23 = arith.constant 0.000000e+00 : f32
    %30 = vector.broadcast %cst_23 : f32 to vector<16x128xf32>
    %31 = arith.maximumf %29, %30 : vector<16x128xf32>
    %32 = arith.truncf %31 : vector<16x128xf32> to vector<16x128xbf16>
    %c0_24 = arith.constant 0 : index
    %c0_25 = arith.constant 0 : index
    %33 = vector.load %arg10[%c0_24, %c0_25] : memref<128x128xbf16, #tpu.memory_space<vmem>>, vector<128x128xbf16>
    %cst_26 = arith.constant dense<0.000000e+00> : vector<16x128xf32>
    %34 = tpu.matmul %32, %33, %cst_26 {dimension_numbers = #tpu.dot_dimension_numbers<[1], [0], [0], [1], [0, 0, 1, 1], [], []>} : vector<16x128xbf16>, vector<128x128xbf16>, vector<16x128xf32> -> vector<16x128xf32>
    %c0_27 = arith.constant 0 : index
    %c0_28 = arith.constant 0 : index
    %35 = vector.load %arg11[%c0_27, %c0_28] : memref<1x128xf32, #tpu.memory_space<vmem>>, vector<1x128xf32>
    %36 = vector.broadcast %35 : vector<1x128xf32> to vector<16x128xf32>
    %37 = arith.addf %34, %36 : vector<16x128xf32>
    %38 = arith.truncf %37 : vector<16x128xf32> to vector<16x128xbf16>
    %c0_29 = arith.constant 0 : index
    %c0_30 = arith.constant 0 : index
    %39 = vector.load %arg12[%c0_29, %c0_30] : memref<16x128xbf16, #tpu.memory_space<vmem>>, vector<16x128xbf16>
    tpu.vector_store %arg12[%c0_29, %c0_30], %38 {strides = array<i32>} : memref<16x128xbf16, #tpu.memory_space<vmem>>, vector<16x128xbf16>,
    return
  }
  func.func @transform_0(%arg0: i32) -> (i32, i32) {
    %c0_i32 = arith.constant 0 : i32
    %c0_i32_0 = arith.constant 0 : i32
    return %arg0, %c0_i32 : i32, i32
  }
  func.func @transform_1(%arg0: i32) -> (i32, i32) {
    %c0_i32 = arith.constant 0 : i32
    %c0_i32_0 = arith.constant 0 : i32
    %c0_i32_1 = arith.constant 0 : i32
    return %c0_i32, %c0_i32_0 : i32, i32
  }
  func.func @transform_2(%arg0: i32) -> (i32, i32) {
    %c0_i32 = arith.constant 0 : i32
    %c0_i32_0 = arith.constant 0 : i32
    %c0_i32_1 = arith.constant 0 : i32
    return %c0_i32, %c0_i32_0 : i32, i32
  }
  func.func @transform_3(%arg0: i32) -> (i32, i32) {
    %c0_i32 = arith.constant 0 : i32
    %c0_i32_0 = arith.constant 0 : i32
    %c0_i32_1 = arith.constant 0 : i32
    return %c0_i32, %c0_i32_0 : i32, i32
  }
  func.func @transform_4(%arg0: i32) -> (i32, i32) {
    %c0_i32 = arith.constant 0 : i32
    %c0_i32_0 = arith.constant 0 : i32
    %c0_i32_1 = arith.constant 0 : i32
    return %c0_i32, %c0_i32_0 : i32, i32
  }
  func.func @transform_5(%arg0: i32) -> (i32, i32) {
    %c0_i32 = arith.constant 0 : i32
    %c0_i32_0 = arith.constant 0 : i32
    %c0_i32_1 = arith.constant 0 : i32
    return %c0_i32, %c0_i32_0 : i32, i32
  }
  func.func @transform_6(%arg0: i32) -> (i32, i32) {
    %c0_i32 = arith.constant 0 : i32
    %c0_i32_0 = arith.constant 0 : i32
    %c0_i32_1 = arith.constant 0 : i32
    return %c0_i32, %c0_i32_0 : i32, i32
  }
  func.func @transform_7(%arg0: i32) -> (i32, i32) {
    %c0_i32 = arith.constant 0 : i32
    %c0_i32_0 = arith.constant 0 : i32
    %c0_i32_1 = arith.constant 0 : i32
    return %c0_i32, %c0_i32_0 : i32, i32
  }
  func.func @transform_8(%arg0: i32) -> (i32, i32) {
    %c0_i32 = arith.constant 0 : i32
    %c0_i32_0 = arith.constant 0 : i32
    %c0_i32_1 = arith.constant 0 : i32
    return %c0_i32, %c0_i32_0 : i32, i32
  }
  func.func @transform_9(%arg0: i32) -> (i32, i32) {
    %c0_i32 = arith.constant 0 : i32
    %c0_i32_0 = arith.constant 0 : i32
    %c0_i32_1 = arith.constant 0 : i32
    return %c0_i32, %c0_i32_0 : i32, i32
  }
  func.func @transform_10(%arg0: i32) -> (i32, i32) {
    %c0_i32 = arith.constant 0 : i32
    %c0_i32_0 = arith.constant 0 : i32
    %c0_i32_1 = arith.constant 0 : i32
    return %c0_i32, %c0_i32_0 : i32, i32
  }
  func.func @transform_11(%arg0: i32) -> (i32, i32) {
    %c0_i32 = arith.constant 0 : i32
    %c0_i32_0 = arith.constant 0 : i32
    return %arg0, %c0_i32 : i32, i32
  }
}

module attributes {stable_mosaic.version = 11 : i64} {
  func.func @kcrnet_kernel(%arg0: i32, %arg1: memref<16x640xbf16, #tpu.memory_space<vmem>>, %arg2: memref<640x1024xbf16, #tpu.memory_space<vmem>>, %arg3: memref<1x1024xf32, #tpu.memory_space<vmem>>, %arg4: memref<1024x512xbf16, #tpu.memory_space<vmem>>, %arg5: memref<1x512xf32, #tpu.memory_space<vmem>>, %arg6: memref<512x256xbf16, #tpu.memory_space<vmem>>, %arg7: memref<1x256xf32, #tpu.memory_space<vmem>>, %arg8: memref<256x128xbf16, #tpu.memory_space<vmem>>, %arg9: memref<1x128xf32, #tpu.memory_space<vmem>>, %arg10: memref<128x128xbf16, #tpu.memory_space<vmem>>, %arg11: memref<1x128xf32, #tpu.memory_space<vmem>>, %arg12: memref<16x128xbf16, #tpu.memory_space<vmem>>) attributes {dimension_semantics = [#tpu.dimension_semantics<parallel>], iteration_bounds = array<i64: 1>, scalar_prefetch = 0 : i64, scratch_operands = 0 : i64, tpu.core_type = #tpu.core_type<tc>, window_params = [{transform_indices = @transform_0, window_bounds = array<i64: 16, 640>}, {pipeline_mode = #tpu.pipeline_mode<synchronous>, transform_indices = @transform_1, window_bounds = array<i64: 640, 1024>}, {pipeline_mode = #tpu.pipeline_mode<synchronous>, transform_indices = @transform_2, window_bounds = array<i64: 1, 1024>}, {pipeline_mode = #tpu.pipeline_mode<synchronous>, transform_indices = @transform_3, window_bounds = array<i64: 1024, 512>}, {pipeline_mode = #tpu.pipeline_mode<synchronous>, transform_indices = @transform_4, window_bounds = array<i64: 1, 512>}, {pipeline_mode = #tpu.pipeline_mode<synchronous>, transform_indices = @transform_5, window_bounds = array<i64: 512, 256>}, {pipeline_mode = #tpu.pipeline_mode<synchronous>, transform_indices = @transform_6, window_bounds = array<i64: 1, 256>}, {pipeline_mode = #tpu.pipeline_mode<synchronous>, transform_indices = @transform_7, window_bounds = array<i64: 256, 128>}, {pipeline_mode = #tpu.pipeline_mode<synchronous>, transform_indices = @transform_8, window_bounds = array<i64: 1, 128>}, {pipeline_mode = #tpu.pipeline_mode<synchronous>, transform_indices = @transform_9, window_bounds = array<i64: 128, 128>}, {pipeline_mode = #tpu.pipeline_mode<synchronous>, transform_indices = @transform_10, window_bounds = array<i64: 1, 128>}, {transform_indices = @transform_11, window_bounds = array<i64: 16, 128>}]} {
    %c0 = arith.constant 0 : index
    %c0_0 = arith.constant 0 : index
    %0 = vector.load %arg1[%c0, %c0_0] : memref<16x640xbf16, #tpu.memory_space<vmem>>, vector<16x640xbf16>
    %c0_1 = arith.constant 0 : index
    %c0_2 = arith.constant 0 : index
    %1 = vector.load %arg2[%c0_1, %c0_2] : memref<640x1024xbf16, #tpu.memory_space<vmem>>, vector<640x1024xbf16>
    %cst = arith.constant dense<0.000000e+00> : vector<16x1024xf32>
    %2 = tpu.matmul %0, %1, %cst {dimension_numbers = #tpu.dot_dimension_numbers<[1], [0], [0], [1], [0, 0, 1, 1], [], []>} : vector<16x640xbf16>, vector<640x1024xbf16>, vector<16x1024xf32> -> vector<16x1024xf32>
    %c0_3 = arith.constant 0 : index
    %c0_4 = arith.constant 0 : index
    %3 = vector.load %arg3[%c0_3, %c0_4] : memref<1x1024xf32, #tpu.memory_space<vmem>>, vector<1x1024xf32>
    %4 = vector.broadcast %3 : vector<1x1024xf32> to vector<16x1024xf32>
    %5 = arith.addf %2, %4 : vector<16x1024xf32>
    %cst_5 = arith.constant 0.000000e+00 : f32
    %6 = vector.broadcast %cst_5 : f32 to vector<16x1024xf32>
    %7 = arith.maximumf %5, %6 : vector<16x1024xf32>
    %8 = arith.truncf %7 : vector<16x1024xf32> to vector<16x1024xbf16>
    %c0_6 = arith.constant 0 : index
    %c0_7 = arith.constant 0 : index
    %9 = vector.load %arg4[%c0_6, %c0_7] : memref<1024x512xbf16, #tpu.memory_space<vmem>>, vector<1024x512xbf16>
    %cst_8 = arith.constant dense<0.000000e+00> : vector<16x512xf32>
    %10 = tpu.matmul %8, %9, %cst_8 {dimension_numbers = #tpu.dot_dimension_numbers<[1], [0], [0], [1], [0, 0, 1, 1], [], []>} : vector<16x1024xbf16>, vector<1024x512xbf16>, vector<16x512xf32> -> vector<16x512xf32>
    %c0_9 = arith.constant 0 : index
    %c0_10 = arith.constant 0 : index
    %11 = vector.load %arg5[%c0_9, %c0_10] : memref<1x512xf32, #tpu.memory_space<vmem>>, vector<1x512xf32>
    %12 = vector.broadcast %11 : vector<1x512xf32> to vector<16x512xf32>
    %13 = arith.addf %10, %12 : vector<16x512xf32>
    %cst_11 = arith.constant 0.000000e+00 : f32
    %14 = vector.broadcast %cst_11 : f32 to vector<16x512xf32>
    %15 = arith.maximumf %13, %14 : vector<16x512xf32>
    %16 = arith.truncf %15 : vector<16x512xf32> to vector<16x512xbf16>
    %c0_12 = arith.constant 0 : index
    %c0_13 = arith.constant 0 : index
    %17 = vector.load %arg6[%c0_12, %c0_13] : memref<512x256xbf16, #tpu.memory_space<vmem>>, vector<512x256xbf16>
    %cst_14 = arith.constant dense<0.000000e+00> : vector<16x256xf32>
    %18 = tpu.matmul %16, %17, %cst_14 {dimension_numbers = #tpu.dot_dimension_numbers<[1], [0], [0], [1], [0, 0, 1, 1], [], []>} : vector<16x512xbf16>, vector<512x256xbf16>, vector<16x256xf32> -> vector<16x256xf32>
    %c0_15 = arith.constant 0 : index
    %c0_16 = arith.constant 0 : index
    %19 = vector.load %arg7[%c0_15, %c0_16] : memref<1x256xf32, #tpu.memory_space<vmem>>, vector<1x256xf32>
    %20 = vector.broadcast %19 : vector<1x256xf32> to vector<16x256xf32>
    %21 = arith.addf %18, %20 : vector<16x256xf32>
    %cst_17 = arith.constant 0.000000e+00 : f32
    %22 = vector.broadcast %cst_17 : f32 to vector<16x256xf32>
    %23 = arith.maximumf %21, %22 : vector<16x256xf32>
    %24 = arith.truncf %23 : vector<16x256xf32> to vector<16x256xbf16>
    %c0_18 = arith.constant 0 : index
    %c0_19 = arith.constant 0 : index
    %25 = vector.load %arg8[%c0_18, %c0_19] : memref<256x128xbf16, #tpu.memory_space<vmem>>, vector<256x128xbf16>
    %cst_20 = arith.constant dense<0.000000e+00> : vector<16x128xf32>
    %26 = tpu.matmul %24, %25, %cst_20 {dimension_numbers = #tpu.dot_dimension_numbers<[1], [0], [0], [1], [0, 0, 1, 1], [], []>} : vector<16x256xbf16>, vector<256x128xbf16>, vector<16x128xf32> -> vector<16x128xf32>
    %c0_21 = arith.constant 0 : index
    %c0_22 = arith.constant 0 : index
    %27 = vector.load %arg9[%c0_21, %c0_22] : memref<1x128xf32, #tpu.memory_space<vmem>>, vector<1x128xf32>
    %28 = vector.broadcast %27 : vector<1x128xf32> to vector<16x128xf32>
    %29 = arith.addf %26, %28 : vector<16x128xf32>
    %cst_23 = arith.constant 0.000000e+00 : f32
    %30 = vector.broadcast %cst_23 : f32 to vector<16x128xf32>
    %31 = arith.maximumf %29, %30 : vector<16x128xf32>
    %32 = arith.truncf %31 : vector<16x128xf32> to vector<16x128xbf16>
    %c0_24 = arith.constant 0 : index
    %c0_25 = arith.constant 0 : index
    %33 = vector.load %arg10[%c0_24, %c0_25] : memref<128x128xbf16, #tpu.memory_space<vmem>>, vector<128x128xbf16>
    %cst_26 = arith.constant dense<0.000000e+00> : vector<16x128xf32>
    %34 = tpu.matmul %32, %33, %cst_26 {dimension_numbers = #tpu.dot_dimension_numbers<[1], [0], [0], [1], [0, 0, 1, 1], [], []>} : vector<16x128xbf16>, vector<128x128xbf16>, vector<16x128xf32> -> vector<16x128xf32>
    %c0_27 = arith.constant 0 : index
    %c0_28 = arith.constant 0 : index
    %35 = vector.load %arg11[%c0_27, %c0_28] : memref<1x128xf32, #tpu.memory_space<vmem>>, vector<1x128xf32>
    %36 = vector.broadcast %35 : vector<1x128xf32> to vector<16x128xf32>
    %37 = arith.addf %34, %36 : vector<16x128xf32>
    %38 = arith.truncf %37 : vector<16x128xf32> to vector<16x128xbf16>
    %c0_29 = arith.constant 0 : index
    %c0_30 = arith.constant 0 : index
    %39 = vector.load %arg12[%c0_29, %c0_30] : memref<16x128xbf16, #tpu.memory_space<vmem>>, vector<16x128xbf16>
    tpu.vector_store %arg12[%c0_29, %c0_30], %38 {strides = array<i32>} : memref<16x128xbf16, #tpu.memory_space<vmem>>, vector<16x128xbf16>,
    return
  }
  func.func @transform_0(%arg0: i32) -> (i32, i32) {
    %c0_i32 = arith.constant 0 : i32
    %c0_i32_0 = arith.constant 0 : i32
    return %arg0, %c0_i32 : i32, i32
  }
  func.func @transform_1(%arg0: i32) -> (i32, i32) {
    %c0_i32 = arith.constant 0 : i32
    %c0_i32_0 = arith.constant 0 : i32
    %c0_i32_1 = arith.constant 0 : i32
    return %c0_i32, %c0_i32_0 : i32, i32
  }
  func.func @transform_2(%arg0: i32) -> (i32, i32) {
    %c0_i32 = arith.constant 0 : i32
    %c0_i32_0 = arith.constant 0 : i32
    %c0_i32_1 = arith.constant 0 : i32
    return %c0_i32, %c0_i32_0 : i32, i32
  }
  func.func @transform_3(%arg0: i32) -> (i32, i32) {
    %c0_i32 = arith.constant 0 : i32
    %c0_i32_0 = arith.constant 0 : i32
    %c0_i32_1 = arith.constant 0 : i32
    return %c0_i32, %c0_i32_0 : i32, i32
  }
  func.func @transform_4(%arg0: i32) -> (i32, i32) {
    %c0_i32 = arith.constant 0 : i32
    %c0_i32_0 = arith.constant 0 : i32
    %c0_i32_1 = arith.constant 0 : i32
    return %c0_i32, %c0_i32_0 : i32, i32
  }
  func.func @transform_5(%arg0: i32) -> (i32, i32) {
    %c0_i32 = arith.constant 0 : i32
    %c0_i32_0 = arith.constant 0 : i32
    %c0_i32_1 = arith.constant 0 : i32
    return %c0_i32, %c0_i32_0 : i32, i32
  }
  func.func @transform_6(%arg0: i32) -> (i32, i32) {
    %c0_i32 = arith.constant 0 : i32
    %c0_i32_0 = arith.constant 0 : i32
    %c0_i32_1 = arith.constant 0 : i32
    return %c0_i32, %c0_i32_0 : i32, i32
  }
  func.func @transform_7(%arg0: i32) -> (i32, i32) {
    %c0_i32 = arith.constant 0 : i32
    %c0_i32_0 = arith.constant 0 : i32
    %c0_i32_1 = arith.constant 0 : i32
    return %c0_i32, %c0_i32_0 : i32, i32
  }
  func.func @transform_8(%arg0: i32) -> (i32, i32) {
    %c0_i32 = arith.constant 0 : i32
    %c0_i32_0 = arith.constant 0 : i32
    %c0_i32_1 = arith.constant 0 : i32
    return %c0_i32, %c0_i32_0 : i32, i32
  }
  func.func @transform_9(%arg0: i32) -> (i32, i32) {
    %c0_i32 = arith.constant 0 : i32
    %c0_i32_0 = arith.constant 0 : i32
    %c0_i32_1 = arith.constant 0 : i32
    return %c0_i32, %c0_i32_0 : i32, i32
  }
  func.func @transform_10(%arg0: i32) -> (i32, i32) {
    %c0_i32 = arith.constant 0 : i32
    %c0_i32_0 = arith.constant 0 : i32
    %c0_i32_1 = arith.constant 0 : i32
    return %c0_i32, %c0_i32_0 : i32, i32
  }
  func.func @transform_11(%arg0: i32) -> (i32, i32) {
    %c0_i32 = arith.constant 0 : i32
    %c0_i32_0 = arith.constant 0 : i32
    return %arg0, %c0_i32 : i32, i32
  }
}

</mosaic_0001>

<bundles_post_ra>
// kernel: tpu_custom_call.1
= control target key start
LH: loop header
LB: loop body
LE: loop exit
PB: predicated region body
PF: predicated region fallthrough
CT: control target
= control target key end

     0   :  { %16 = vsyncpa [#allocation3], 0  ;;  %s7247_s0 = inlined_call_operand.hbm [shape: bf16[16,640], index: 0, kind: input, shape index: {}]   ;;  %s7248_s1 = inlined_call_operand.hbm [shape: bf16[640,1024], index: 1, kind: input, shape index: {}]   ;;  %s7249_s2 = inlined_call_operand.hbm [shape: f32[1,1024], index: 2, kind: input, shape index: {}]   ;;  %s7250_s3 = inlined_call_operand.hbm [shape: bf16[1024,512], index: 3, kind: input, shape index: {}]   ;;  %s7251_s4 = inlined_call_operand.hbm [shape: f32[1,512], index: 4, kind: input, shape index: {}]   ;;  %s7252_s5 = inlined_call_operand.hbm [shape: bf16[512,256], index: 5, kind: input, shape index: {}]   ;;  %s7253_s6 = inlined_call_operand.hbm [shape: f32[1,256], index: 6, kind: input, shape index: {}]   ;;  %s7254_s7 = inlined_call_operand.hbm [shape: bf16[256,128], index: 7, kind: input, shape index: {}]   ;;  %s7255_s8 = inlined_call_operand.hbm [shape: f32[1,128], index: 8, kind: input, shape index: {}]   ;;  %s7256_s9 = inlined_call_operand.hbm [shape: bf16[128,128], index: 9, kind: input, shape index: {}]   ;;  %s7257_s10 = inlined_call_operand.hbm [shape: f32[1,128], index: 10, kind: input, shape index: {}]   ;;  %s7258_s11 = inlined_call_operand.hbm [shape: bf16[16,128], index: 11, kind: output, shape index: {}]  }
   0x1   :  { %17 = vsyncpa [#allocation6], 0 }
   0x2   :  { %18 = vsyncpa [#allocation9], 0 }
   0x3   :  { %19 = vsyncpa [#allocation12], 0 }
   0x4   :  { %20 = vsyncpa [#allocation15], 0 }
   0x5   :  { %21 = vsyncpa [#allocation18], 0 }
   0x6   :  { %22 = vsyncpa [#allocation4], 0  ;;  %s6965_s17 = smov [#allocation5]  }
   0x7   :  { %s40_s18 = sshll.u32 %s6965_s17, 4  ;;  %s41_s18 = int_to_ptr.vmem [resolvable:$true] %s40_s18 }
   0x8   :  { %s6719_s19 = scalar_lea.vmem %s41_s18, 40960  ;;  %p6724_p1 = scmp.lt.s32.totalorder %s41_s18, %s41_s18 }
   0x9   :  { %p6720_p0 = scmp.ne.s32.totalorder %s41_s18, %s6719_s19  ;;  %p6725_p2 = scmp.lt.s32.totalorder %s6719_s19, %s6719_s19 }
   0xb   :  { %p6726_p3 = por %p6725_p2, %p6724_p1 }
   0xd   :  { %p6727_p4 = pnand %p6726_p3, %p6720_p0 }
   0xf   :  { %6730 = shalt.err (!%p6727_p4)
}
  0x10   :  { %s6966_s20 = smov 512   ;;  %s6967_s21 = smov 32  }
  0x11   :  { %46 = dma.hbm_to_vmem [thread:$0]  %s7248_s1, 40960, %s41_s18, [#allocation6], %s6966_s20, %s6966_s20, %s6967_s21  }
  0x12   :  { %s6968_s24 = smov [#allocation8]  }
  0x13   :  { %s62_s25 = sshll.u32 %s6968_s24, 4  ;;  %s63_s25 = int_to_ptr.vmem [resolvable:$true] %s62_s25 }
  0x14   :  { %s6739_s26 = scalar_lea.vmem %s63_s25, 32768  ;;  %p6744_p6 = scmp.lt.s32.totalorder %s63_s25, %s63_s25 }
  0x15   :  { %p6740_p5 = scmp.ne.s32.totalorder %s63_s25, %s6739_s26  ;;  %p6745_p7 = scmp.lt.s32.totalorder %s6739_s26, %s6739_s26 }
  0x17   :  { %p6746_p8 = por %p6745_p7, %p6744_p6 }
  0x19   :  { %p6747_p9 = pnand %p6746_p8, %p6740_p5 }
  0x1b   :  { %6750 = shalt.err (!%p6747_p9)
}
  0x1c   :  { %s6969_s27 = smov 256   ;;  %s6970_s28 = smov 16  }
  0x1d   :  { %68 = dma.hbm_to_vmem [thread:$0]  %s7250_s3, 32768, %s63_s25, [#allocation9], %s6969_s27, %s6969_s27, %s6970_s28  }
  0x1e   :  { %s6971_s12 = smov [#allocation11]  }
  0x1f   :  { %s84_s13 = sshll.u32 %s6971_s12, 4  ;;  %s85_s13 = int_to_ptr.vmem [resolvable:$true] %s84_s13 }
  0x20   :  { %s6759_s1 = scalar_lea.vmem %s85_s13, 8192  ;;  %p6764_p11 = scmp.lt.s32.totalorder %s85_s13, %s85_s13 }
  0x21   :  { %p6760_p10 = scmp.ne.s32.totalorder %s85_s13, %s6759_s1  ;;  %p6765_p12 = scmp.lt.s32.totalorder %s6759_s1, %s6759_s1 }
  0x23   :  { %p6766_p13 = por %p6765_p12, %p6764_p11 }
  0x25   :  { %p6767_p0 = pnand %p6766_p13, %p6760_p10 }
  0x27   :  { %6770 = shalt.err (!%p6767_p0)
}
  0x28   :  { %s6972_s14 = smov 128   ;;  %s6973_s15 = smov 8  }
  0x29   :  { %90 = dma.hbm_to_vmem [thread:$0]  %s7252_s5, 8192, %s85_s13, [#allocation12], %s6972_s14, %s6972_s14, %s6973_s15  }
  0x2a   :  { %s6974_s18 = smov [#allocation14]  }
  0x2b   :  { %s106_s19 = sshll.u32 %s6974_s18, 4  ;;  %s107_s19 = int_to_ptr.vmem [resolvable:$true] %s106_s19 }
  0x2c   :  { %s6779_s3 = scalar_lea.vmem %s107_s19, 2048  ;;  %p6784_p2 = scmp.lt.s32.totalorder %s107_s19, %s107_s19 }
  0x2d   :  { %p6780_p1 = scmp.ne.s32.totalorder %s107_s19, %s6779_s3  ;;  %p6785_p3 = scmp.lt.s32.totalorder %s6779_s3, %s6779_s3 }
  0x2f   :  { %p6786_p4 = por %p6785_p3, %p6784_p2 }
  0x31   :  { %p6787_p5 = pnand %p6786_p4, %p6780_p1 }
  0x33   :  { %6790 = shalt.err (!%p6787_p5)
}
  0x34   :  { %s6975_s20 = smov 64   ;;  %s6976_s21 = smov 4  }
  0x35   :  { %112 = dma.hbm_to_vmem [thread:$0]  %s7254_s7, 2048, %s107_s19, [#allocation15], %s6975_s20, %s6975_s20, %s6976_s21  }
  0x36   :  { %s6977_s5 = smov [#allocation17]   ;;  %s6978_s25 = smov [#allocation2]  }
  0x37   :  { %s128_s24 = sshll.u32 %s6977_s5, 4  ;;  %s28_s26 = sshll.u32 %s6978_s25, 4  ;;  %s129_s24 = int_to_ptr.vmem [resolvable:$true] %s128_s24  ;;  %s29_s26 = int_to_ptr.vmem [resolvable:$true] %s28_s26 }
  0x38   :  { %s6799_s27 = scalar_lea.vmem %s129_s24, 1024  ;;  %p6804_p7 = scmp.lt.s32.totalorder %s129_s24, %s129_s24 }
  0x39   :  { %p6800_p6 = scmp.ne.s32.totalorder %s129_s24, %s6799_s27  ;;  %p6805_p8 = scmp.lt.s32.totalorder %s6799_s27, %s6799_s27 }
  0x3b   :  { %p6806_p9 = por %p6805_p8, %p6804_p7 }
  0x3d   :  { %p6807_p10 = pnand %p6806_p9, %p6800_p6 }
  0x3f   :  { %6810 = shalt.err (!%p6807_p10)
}
  0x40   :  { %134 = dma.hbm_to_vmem [thread:$0]  %s7256_s9, 1024, %s129_s24, [#allocation18], %s6975_s20, %s6975_s20, %s6976_s21  }
  0x41   :  { %s6819_s7 = scalar_lea.vmem %s29_s26, 640  ;;  %p6824_p12 = scmp.lt.s32.totalorder %s29_s26, %s29_s26 }
  0x42   :  { %p6820_p11 = scmp.ne.s32.totalorder %s29_s26, %s6819_s7  ;;  %p6825_p13 = scmp.lt.s32.totalorder %s6819_s7, %s6819_s7 }
  0x44   :  { %p6826_p0 = por %p6825_p13, %p6824_p12 }
  0x46   :  { %p6827_p1 = pnand %p6826_p0, %p6820_p11 }
  0x48   :  { %6830 = shalt.err (!%p6827_p1)
}
  0x49   :  { %s6979_s30 = smov 320   ;;  %s6980_s12 = smov 20  }
  0x4a   :  { %34 = dma.hbm_to_vmem [thread:$0]  %s7247_s0, 640, %s29_s26, [#allocation3], %s6979_s30, %s6979_s30, %s6980_s12  }
  0x4b   :  { %s6981_s14 = smov [#allocation7]   ;;  %s6982_s16 = smov [#allocation10]  }
  0x4c   :  { %s53_s15 = sshll.u32 %s6981_s14, 4  ;;  %s75_s17 = sshll.u32 %s6982_s16, 4  ;;  %s54_s15 = int_to_ptr.vmem [resolvable:$true] %s53_s15  ;;  %s76_s17 = int_to_ptr.vmem [resolvable:$true] %s75_s17 }
  0x4d   :  { %s6839_s9 = scalar_lea.vmem %s54_s15, 128  ;;  %p6844_p3 = scmp.lt.s32.totalorder %s54_s15, %s54_s15 }
  0x4e   :  { %p6840_p2 = scmp.ne.s32.totalorder %s54_s15, %s6839_s9  ;;  %p6845_p4 = scmp.lt.s32.totalorder %s6839_s9, %s6839_s9 }
  0x50   :  { %p6846_p5 = por %p6845_p4, %p6844_p3 }
  0x52   :  { %p6847_p6 = pnand %p6846_p5, %p6840_p2 }
  0x54   :  { %6850 = shalt.err (!%p6847_p6)
}
  0x55   :  { %56 = dma.hbm_to_vmem [thread:$0]  %s7249_s2, 128, %s54_s15, [#allocation6]  }
  0x56   :  { %s6859_s3 = scalar_lea.vmem %s76_s17, 64  ;;  %p6864_p8 = scmp.lt.s32.totalorder %s76_s17, %s76_s17 }
  0x57   :  { %p6860_p7 = scmp.ne.s32.totalorder %s76_s17, %s6859_s3  ;;  %p6865_p9 = scmp.lt.s32.totalorder %s6859_s3, %s6859_s3 }
  0x59   :  { %p6866_p10 = por %p6865_p9, %p6864_p8 }
  0x5b   :  { %p6867_p11 = pnand %p6866_p10, %p6860_p7 }
  0x5d   :  { %6870 = shalt.err (!%p6867_p11)
}
  0x5e   :  { %78 = dma.hbm_to_vmem [thread:$0]  %s7251_s4, 64, %s76_s17, [#allocation9]  }
  0x5f   :  { %s6983_s23 = smov [#allocation13]   ;;  %s6984_s24 = smov [#allocation16]  }
  0x60   :  { %s97_s5 = sshll.u32 %s6983_s23, 4  ;;  %s119_s25 = sshll.u32 %s6984_s24, 4  ;;  %s98_s5 = int_to_ptr.vmem [resolvable:$true] %s97_s5  ;;  %s120_s25 = int_to_ptr.vmem [resolvable:$true] %s119_s25 }
  0x61   :  { %s6879_s26 = scalar_lea.vmem %s98_s5, 32  ;;  %p6884_p13 = scmp.lt.s32.totalorder %s98_s5, %s98_s5 }
  0x62   :  { %p6880_p12 = scmp.ne.s32.totalorder %s98_s5, %s6879_s26  ;;  %p6885_p0 = scmp.lt.s32.totalorder %s6879_s26, %s6879_s26 }
  0x64   :  { %p6886_p1 = por %p6885_p0, %p6884_p13 }
  0x66   :  { %p6887_p2 = pnand %p6886_p1, %p6880_p12 }
  0x68   :  { %6890 = shalt.err (!%p6887_p2)
}
  0x69   :  { %100 = dma.hbm_to_vmem [thread:$0]  %s7253_s6, 32, %s98_s5, [#allocation12]  }
  0x6a   :  { %s6899_s28 = scalar_lea.vmem %s120_s25, 16  ;;  %s6903_s4 = scalar_lea.vmem %s120_s25, 32 }
  0x6b   :  { %p6900_p3 = scmp.ne.s32.totalorder %s120_s25, %s6899_s28  ;;  %p6904_p4 = scmp.lt.s32.totalorder %s120_s25, %s120_s25 }
  0x6c   :  { %p6905_p5 = scmp.lt.s32.totalorder %s6903_s4, %s6899_s28 }
  0x6e   :  { %p6906_p6 = por %p6905_p5, %p6904_p4 }
  0x70   :  { %p6907_p7 = pnand %p6906_p6, %p6900_p3 }
  0x72   :  { %6910 = shalt.err (!%p6907_p7)
}
  0x73   :  { %122 = dma.hbm_to_vmem [thread:$0]  %s7255_s8, 16, %s120_s25, [#allocation15]  }
  0x74   :  { %s6985_s30 = smov [#allocation19]  }
  0x75   :  { %s141_s12 = sshll.u32 %s6985_s30, 4  ;;  %s142_s12 = int_to_ptr.vmem [resolvable:$true] %s141_s12 }
  0x76   :  { %s6919_s13 = scalar_lea.vmem %s142_s12, 16  ;;  %s6923_s1 = scalar_lea.vmem %s142_s12, 32 }
  0x77   :  { %p6920_p8 = scmp.ne.s32.totalorder %s142_s12, %s6919_s13  ;;  %p6924_p9 = scmp.lt.s32.totalorder %s142_s12, %s142_s12 }
  0x78   :  { %p6925_p10 = scmp.lt.s32.totalorder %s6923_s1, %s6919_s13 }
  0x7a   :  { %p6926_p11 = por %p6925_p10, %p6924_p9 }
  0x7c   :  { %p6927_p12 = pnand %p6926_p11, %p6920_p8 }
  0x7e   :  { %6930 = shalt.err (!%p6927_p12)
}
  0x7f   :  { %144 = dma.hbm_to_vmem [thread:$0]  %s7257_s10, 16, %s142_s12, [#allocation18]  }
  0x80   :  { %6951 = dma.done.wait [#allocation3], 640  }
  0x81   :  { %6952 = vsyncadd [#allocation3], 4294966656 }
  0x82   :  { %6953 = dma.done.wait [#allocation6], 41088  }
  0x83   :  { %6954 = vsyncadd [#allocation6], 4294926208 }
  0x84   :  { %6955 = dma.done.wait [#allocation9], 32832  }
  0x85   :  { %6956 = vsyncadd [#allocation9], 4294934464 }
  0x86   :  { %6957 = dma.done.wait [#allocation12], 8224  }
  0x87   :  { %6958 = vsyncadd [#allocation12], 4294959072 }
  0x88   :  { %6959 = dma.done.wait [#allocation15], 2064  }
  0x89   :  { %6960 = vsyncadd [#allocation15], 4294965232 }
  0x8a   :  { %6961 = dma.done.wait [#allocation18], 1040  }
  0x8b   :  { %6962 = vsyncadd [#allocation18], 4294966256  ;;  %v241_v0 = vld [vmem:[#allocation5 + $0x1c0] sm:$0xff]  ;;  %v7089_v56 = vld [vmem:[#allocation2 + $0x4] ss:$20 sps:$4 sm:$0xff]   ;;  %vm6988_vm0 = vmmov 0  }
  0x8c   :  { %v245_v1 = vld [vmem:[#allocation5 + $0x1e0] sm:$0xff]  ;;  %2205 = vmatprep.mubr.bf16.mxu0 %v7089_v56  ;;  %s6989_s8 = smov [#allocation20]  }
  0x8d   :  { %v369_v2 = vld [vmem:[#allocation5 + $0x5c0] sm:$0xff]  ;;  %v5500_v3 = vcombine.high %v241_v0, %v245_v1  ;;  %v5499_v5 = vcombine.low %v241_v0, %v245_v1  ;;  %s5421_s10 = sshll.u32 %s6989_s8, 4  ;;  %s5422_s10 = int_to_ptr.vmem [resolvable:$true] %s5421_s10 }
  0x8e   :  { %v373_v4 = vld [vmem:[#allocation5 + $0x5e0] sm:$0xff]  ;;  %s6931_s15 = scalar_lea.vmem %s5422_s10, 128  ;;  %p6936_p0 = scmp.lt.s32.totalorder %s5422_s10, %s5422_s10 }
  0x8f   :  { %v233_v6 = vld [vmem:[#allocation5 + $0x180] sm:$0xff]  ;;  %v5628_v8 = vcombine.high %v369_v2, %v373_v4  ;;  %v5627_v9 = vcombine.low %v369_v2, %v373_v4  ;;  %2173 = vmatprep.subr.bf16.mxu0 %v5500_v3  ;;  %p6932_p13 = scmp.ne.s32.totalorder %s5422_s10, %s6931_s15  ;;  %p6937_p1 = scmp.lt.s32.totalorder %s6931_s15, %s6931_s15 }
  0x90   :  { %v237_v7 = vld [vmem:[#allocation5 + $0x1a0] sm:$0xff]  ;;  %2174 = vmatpush1.bf16.msra.mxu0 %v5499_v5 }
  0x91   :  { %v5492_v10 = vcombine.high %v233_v6, %v237_v7  ;;  %v361_v11 = vld [vmem:[#allocation5 + $0x580] sm:$0xff]  ;;  %2216 = vmatprep.subr.bf16.mxu1 %v5628_v8  ;;  %v5491_v18 = vcombine.low %v233_v6, %v237_v7  ;;  %p6938_p2 = por %p6937_p1, %p6936_p0 }
  0x92   :  { %v365_v12 = vld [vmem:[#allocation5 + $0x5a0] sm:$0xff]  ;;  %2217 = vmatpush1.bf16.msra.mxu1 %v5627_v9 }
  0x93   :  { %v225_v13 = vld [vmem:[#allocation5 + $0x140] sm:$0xff]  ;;  %v5620_v14 = vcombine.high %v361_v11, %v365_v12  ;;  %2175 = vmatprep.subr.bf16.mxu0 %v5492_v10  ;;  %v5619_v19 = vcombine.low %v361_v11, %v365_v12  ;;  %p6939_p3 = pnand %p6938_p2, %p6932_p13 }
  0x94   :  { %v229_v15 = vld [vmem:[#allocation5 + $0x160] sm:$0xff]  ;;  %2176 = vmatpush1.bf16.msra.mxu0 %v5491_v18 }
  0x95   :  { %v353_v16 = vld [vmem:[#allocation5 + $0x540] sm:$0xff]  ;;  %v5484_v20 = vcombine.high %v225_v13, %v229_v15  ;;  %2218 = vmatprep.subr.bf16.mxu1 %v5620_v14  ;;  %v5483_v26 = vcombine.low %v225_v13, %v229_v15 }
  0x96   :  { %v357_v17 = vld [vmem:[#allocation5 + $0x560] sm:$0xff]  ;;  %2219 = vmatpush1.bf16.msra.mxu1 %v5619_v19 }
  0x97   :  { %v5612_v21 = vcombine.high %v353_v16, %v357_v17  ;;  %v217_v22 = vld [vmem:[#allocation5 + $0x100] sm:$0xff]  ;;  %2177 = vmatprep.subr.bf16.mxu0 %v5484_v20  ;;  %v5611_v27 = vcombine.low %v353_v16, %v357_v17 }
  0x98   :  { %v221_v23 = vld [vmem:[#allocation5 + $0x120] sm:$0xff]  ;;  %2178 = vmatpush1.bf16.msra.mxu0 %v5483_v26 }
  0x99   :  { %v345_v24 = vld [vmem:[#allocation5 + $0x500] sm:$0xff]  ;;  %v5476_v28 = vcombine.high %v217_v22, %v221_v23  ;;  %2220 = vmatprep.subr.bf16.mxu1 %v5612_v21  ;;  %v5475_v34 = vcombine.low %v217_v22, %v221_v23 }
  0x9a   :  { %v349_v25 = vld [vmem:[#allocation5 + $0x520] sm:$0xff]  ;;  %2221 = vmatpush1.bf16.msra.mxu1 %v5611_v27 }
  0x9b   :  { %v5604_v29 = vcombine.high %v345_v24, %v349_v25  ;;  %v209_v30 = vld [vmem:[#allocation5 + $0xc0] sm:$0xff]  ;;  %2179 = vmatprep.subr.bf16.mxu0 %v5476_v28  ;;  %v5603_v35 = vcombine.low %v345_v24, %v349_v25 }
  0x9c   :  { %v213_v31 = vld [vmem:[#allocation5 + $0xe0] sm:$0xff]  ;;  %2180 = vmatpush1.bf16.msra.mxu0 %v5475_v34 }
  0x9d   :  { %v337_v32 = vld [vmem:[#allocation5 + $0x4c0] sm:$0xff]  ;;  %v5468_v36 = vcombine.high %v209_v30, %v213_v31  ;;  %2222 = vmatprep.subr.bf16.mxu1 %v5604_v29  ;;  %v5467_v42 = vcombine.low %v209_v30, %v213_v31 }
  0x9e   :  { %v341_v33 = vld [vmem:[#allocation5 + $0x4e0] sm:$0xff]  ;;  %2223 = vmatpush1.bf16.msra.mxu1 %v5603_v35 }
  0x9f   :  { %v5596_v37 = vcombine.high %v337_v32, %v341_v33  ;;  %v201_v38 = vld [vmem:[#allocation5 + $0x80] sm:$0xff]  ;;  %2181 = vmatprep.subr.bf16.mxu0 %v5468_v36  ;;  %v5595_v43 = vcombine.low %v337_v32, %v341_v33 }
  0xa0   :  { %v205_v39 = vld [vmem:[#allocation5 + $0xa0] sm:$0xff]  ;;  %2182 = vmatpush1.bf16.msra.mxu0 %v5467_v42 }
  0xa1   :  { %v329_v40 = vld [vmem:[#allocation5 + $0x480] sm:$0xff]  ;;  %v5460_v44 = vcombine.high %v201_v38, %v205_v39  ;;  %2224 = vmatprep.subr.bf16.mxu1 %v5596_v37  ;;  %v5459_v50 = vcombine.low %v201_v38, %v205_v39 }
  0xa2   :  { %v333_v41 = vld [vmem:[#allocation5 + $0x4a0] sm:$0xff]  ;;  %2225 = vmatpush1.bf16.msra.mxu1 %v5595_v43 }
  0xa3   :  { %v5588_v45 = vcombine.high %v329_v40, %v333_v41  ;;  %v193_v46 = vld [vmem:[#allocation5 + $0x40] sm:$0xff]  ;;  %2183 = vmatprep.subr.bf16.mxu0 %v5460_v44  ;;  %v5587_v52 = vcombine.low %v329_v40, %v333_v41 }
  0xa4   :  { %v197_v47 = vld [vmem:[#allocation5 + $0x60] sm:$0xff]  ;;  %2184 = vmatpush1.bf16.msra.mxu0 %v5459_v50 }
  0xa5   :  { %v321_v48 = vld [vmem:[#allocation5 + $0x440] sm:$0xff]  ;;  %v5452_v53 = vcombine.high %v193_v46, %v197_v47  ;;  %2226 = vmatprep.subr.bf16.mxu1 %v5588_v45  ;;  %v5451_v60 = vcombine.low %v193_v46, %v197_v47 }
  0xa6   :  { %v325_v49 = vld [vmem:[#allocation5 + $0x460] sm:$0xff]  ;;  %2227 = vmatpush1.bf16.msra.mxu1 %v5587_v52 }
  0xa7   :  { %v185_v51 = vld [vmem:[#allocation5] sm:$0xff]  ;;  %v5580_v55 = vcombine.high %v321_v48, %v325_v49  ;;  %2185 = vmatprep.subr.bf16.mxu0 %v5452_v53  ;;  %v5579_v61 = vcombine.low %v321_v48, %v325_v49 }
  0xa8   :  { %v189_v54 = vld [vmem:[#allocation5 + $0x20] sm:$0xff]  ;;  %2186 = vmatpush1.bf16.msra.mxu0 %v5451_v60 }
  0xa9   :  { %v313_v57 = vld [vmem:[#allocation5 + $0x400] sm:$0xff]  ;;  %v5444_v62 = vcombine.high %v185_v51, %v189_v54  ;;  %2228 = vmatprep.subr.bf16.mxu1 %v5580_v55  ;;  %v5443_v4 = vcombine.low %v185_v51, %v189_v54 }
  0xaa   :  { %v317_v58 = vld [vmem:[#allocation5 + $0x420] sm:$0xff]  ;;  %2229 = vmatpush1.bf16.msra.mxu1 %v5579_v61 }
  0xab   :  { %v7091_v59 = vld [vmem:[#allocation2 + $0xc] ss:$20 sps:$4 sm:$0xff]   ;;  %v5572_v63 = vcombine.high %v313_v57, %v317_v58  ;;  %2187 = vmatprep.subr.bf16.mxu0 %v5444_v62  ;;  %v5571_v5 = vcombine.low %v313_v57, %v317_v58 }
  0xac   :  { %v305_v0 = vld [vmem:[#allocation5 + $0x3c0] sm:$0xff]  ;;  %2248 = vmatprep.mubr.bf16.mxu1 %v7091_v59  ;;  %2188 = vmatpush1.bf16.msra.mxu0 %v5443_v4  ;;  %v242_v4 = vld [vmem:[#allocation5 + $0x1c8] sm:$0xff] }
  0xad   :  { %v309_v1 = vld [vmem:[#allocation5 + $0x3e0] sm:$0xff]  ;;  %2230 = vmatprep.subr.bf16.mxu1 %v5572_v63 }
  0xae   :  { %v433_v2 = vld [vmem:[#allocation5 + $0x7c0] sm:$0xff]  ;;  %v5564_v6 = vcombine.high %v305_v0, %v309_v1  ;;  %v5563_v12 = vcombine.low %v305_v0, %v309_v1  ;;  %2231 = vmatpush1.bf16.msra.mxu1 %v5571_v5  ;;  %v246_v5 = vld [vmem:[#allocation5 + $0x1e8] sm:$0xff] }
  0xaf   :  { %v437_v3 = vld [vmem:[#allocation5 + $0x7e0] sm:$0xff] }
  0xb0   :  { %v5692_v7 = vcombine.high %v433_v2, %v437_v3  ;;  %v297_v8 = vld [vmem:[#allocation5 + $0x380] sm:$0xff]  ;;  %2189 = vmatprep.subr.bf16.mxu0 %v5564_v6  ;;  %v5691_v13 = vcombine.low %v433_v2, %v437_v3 }
  0xb1   :  { %v301_v9 = vld [vmem:[#allocation5 + $0x3a0] sm:$0xff]  ;;  %2190 = vmatpush2.bf16.msra.mxu0 %v5563_v12  ;;  %v7095_v12 = vld [vmem:[#allocation2] ss:$20 sps:$4 sm:$0xff]  }
  0xb2   :  { %v425_v10 = vld [vmem:[#allocation5 + $0x780] sm:$0xff]  ;;  %v5556_v14 = vcombine.high %v297_v8, %v301_v9  ;;  %2232 = vmatprep.subr.bf16.mxu1 %v5692_v7  ;;  %v5555_v20 = vcombine.low %v297_v8, %v301_v9  ;;  %v5502_v9 = vcombine.high %v242_v4, %v246_v5 }
  0xb3   :  { %v429_v11 = vld [vmem:[#allocation5 + $0x7a0] sm:$0xff]  ;;  %2233 = vmatpush2.bf16.msra.mxu1 %v5691_v13  ;;  %v234_v13 = vld [vmem:[#allocation5 + $0x188] sm:$0xff] }
  0xb4   :  { %v5684_v15 = vcombine.high %v425_v10, %v429_v11  ;;  %v289_v16 = vld [vmem:[#allocation5 + $0x340] sm:$0xff]  ;;  %2191 = vmatprep.subr.bf16.mxu0 %v5556_v14  ;;  %v5683_v21 = vcombine.low %v425_v10, %v429_v11  ;;  %v238_v14 = vld [vmem:[#allocation5 + $0x1a8] sm:$0xff] }
  0xb5   :  { %v293_v17 = vld [vmem:[#allocation5 + $0x360] sm:$0xff]  ;;  %2192 = vmatpush2.bf16.msra.mxu0 %v5555_v20 }
  0xb6   :  { %v417_v18 = vld [vmem:[#allocation5 + $0x740] sm:$0xff]  ;;  %v5548_v22 = vcombine.high %v289_v16, %v293_v17  ;;  %2234 = vmatprep.subr.bf16.mxu1 %v5684_v15  ;;  %v5547_v28 = vcombine.low %v289_v16, %v293_v17  ;;  %v5501_v17 = vcombine.low %v242_v4, %v246_v5  ;;  %v306_v5 = vld [vmem:[#allocation5 + $0x3c8] sm:$0xff] }
  0xb7   :  { %v421_v19 = vld [vmem:[#allocation5 + $0x760] sm:$0xff]  ;;  %2235 = vmatpush2.bf16.msra.mxu1 %v5683_v21 }
  0xb8   :  { %v5676_v23 = vcombine.high %v417_v18, %v421_v19  ;;  %v281_v24 = vld [vmem:[#allocation5 + $0x300] sm:$0xff]  ;;  %2193 = vmatprep.subr.bf16.mxu0 %v5548_v22  ;;  %v5675_v29 = vcombine.low %v417_v18, %v421_v19  ;;  %v5494_v19 = vcombine.high %v234_v13, %v238_v14  ;;  %v226_v22 = vld [vmem:[#allocation5 + $0x148] sm:$0xff] }
  0xb9   :  { %v285_v25 = vld [vmem:[#allocation5 + $0x320] sm:$0xff]  ;;  %2194 = vmatpush2.bf16.msra.mxu0 %v5547_v28 }
  0xba   :  { %v409_v26 = vld [vmem:[#allocation5 + $0x700] sm:$0xff]  ;;  %v5540_v30 = vcombine.high %v281_v24, %v285_v25  ;;  %2236 = vmatprep.subr.bf16.mxu1 %v5676_v23  ;;  %v5539_v36 = vcombine.low %v281_v24, %v285_v25  ;;  %v230_v23 = vld [vmem:[#allocation5 + $0x168] sm:$0xff]  ;;  %v5493_v25 = vcombine.low %v234_v13, %v238_v14 }
  0xbb   :  { %v413_v27 = vld [vmem:[#allocation5 + $0x720] sm:$0xff]  ;;  %2237 = vmatpush2.bf16.msra.mxu1 %v5675_v29  ;;  %v218_v29 = vld [vmem:[#allocation5 + $0x108] sm:$0xff] }
  0xbc   :  { %v5668_v31 = vcombine.high %v409_v26, %v413_v27  ;;  %v273_v32 = vld [vmem:[#allocation5 + $0x2c0] sm:$0xff]  ;;  %2195 = vmatprep.subr.bf16.mxu0 %v5540_v30  ;;  %v5667_v37 = vcombine.low %v409_v26, %v413_v27  ;;  %v5486_v30 = vcombine.high %v226_v22, %v230_v23  ;;  %v7103_v13 = vld [vmem:[#allocation2 + $0x10] ss:$20 sps:$4 sm:$0xff]  }
  0xbd   :  { %v277_v33 = vld [vmem:[#allocation5 + $0x2e0] sm:$0xff]  ;;  %2196 = vmatpush2.bf16.msra.mxu0 %v5539_v36 }
  0xbe   :  { %v401_v34 = vld [vmem:[#allocation5 + $0x6c0] sm:$0xff]  ;;  %v5532_v38 = vcombine.high %v273_v32, %v277_v33  ;;  %2238 = vmatprep.subr.bf16.mxu1 %v5668_v31  ;;  %v5531_v44 = vcombine.low %v273_v32, %v277_v33  ;;  %v222_v31 = vld [vmem:[#allocation5 + $0x128] sm:$0xff]  ;;  %v6986_v32 = vmov 0  }
  0xbf   :  { %v405_v35 = vld [vmem:[#allocation5 + $0x6e0] sm:$0xff]  ;;  %2239 = vmatpush2.bf16.msra.mxu1 %v5667_v37 }
  0xc0   :  { %v5660_v39 = vcombine.high %v401_v34, %v405_v35  ;;  %v265_v40 = vld [vmem:[#allocation5 + $0x280] sm:$0xff]  ;;  %2197 = vmatprep.subr.bf16.mxu0 %v5532_v38  ;;  %v5659_v45 = vcombine.low %v401_v34, %v405_v35  ;;  %v5485_v34 = vcombine.low %v226_v22, %v230_v23  ;;  %v210_v38 = vld [vmem:[#allocation5 + $0xc8] sm:$0xff] }
  0xc1   :  { %v269_v41 = vld [vmem:[#allocation5 + $0x2a0] sm:$0xff]  ;;  %2198 = vmatpush2.bf16.msra.mxu0 %v5531_v44 }
  0xc2   :  { %v393_v42 = vld [vmem:[#allocation5 + $0x680] sm:$0xff]  ;;  %v5524_v46 = vcombine.high %v265_v40, %v269_v41  ;;  %2240 = vmatprep.subr.bf16.mxu1 %v5660_v39  ;;  %v5523_v52 = vcombine.low %v265_v40, %v269_v41  ;;  %v5478_v39 = vcombine.high %v218_v29, %v222_v31  ;;  %v214_v40 = vld [vmem:[#allocation5 + $0xe8] sm:$0xff] }
  0xc3   :  { %v397_v43 = vld [vmem:[#allocation5 + $0x6a0] sm:$0xff]  ;;  %2241 = vmatpush2.bf16.msra.mxu1 %v5659_v45  ;;  %v202_v45 = vld [vmem:[#allocation5 + $0x88] sm:$0xff] }
  0xc4   :  { %v5652_v47 = vcombine.high %v393_v42, %v397_v43  ;;  %v257_v48 = vld [vmem:[#allocation5 + $0x240] sm:$0xff]  ;;  %2199 = vmatprep.subr.bf16.mxu0 %v5524_v46  ;;  %v5651_v53 = vcombine.low %v393_v42, %v397_v43  ;;  %v5477_v42 = vcombine.low %v218_v29, %v222_v31  ;;  %v5470_v46 = vcombine.high %v210_v38, %v214_v40 }
  0xc5   :  { %v261_v49 = vld [vmem:[#allocation5 + $0x260] sm:$0xff]  ;;  %2200 = vmatpush2.bf16.msra.mxu0 %v5523_v52 }
  0xc6   :  { %v385_v50 = vld [vmem:[#allocation5 + $0x640] sm:$0xff]  ;;  %v5516_v54 = vcombine.high %v257_v48, %v261_v49  ;;  %2242 = vmatprep.subr.bf16.mxu1 %v5652_v47  ;;  %v5515_v62 = vcombine.low %v257_v48, %v261_v49  ;;  %v206_v47 = vld [vmem:[#allocation5 + $0xa8] sm:$0xff]  ;;  %v5469_v49 = vcombine.low %v210_v38, %v214_v40 }
  0xc7   :  { %v389_v51 = vld [vmem:[#allocation5 + $0x660] sm:$0xff]  ;;  %2243 = vmatpush2.bf16.msra.mxu1 %v5651_v53  ;;  %v194_v53 = vld [vmem:[#allocation5 + $0x48] sm:$0xff] }
  0xc8   :  { %v5644_v55 = vcombine.high %v385_v50, %v389_v51  ;;  %v249_v57 = vld [vmem:[#allocation5 + $0x200] sm:$0xff]  ;;  %2201 = vmatprep.subr.bf16.mxu0 %v5516_v54  ;;  %v5643_v63 = vcombine.low %v385_v50, %v389_v51  ;;  %v5462_v54 = vcombine.high %v202_v45, %v206_v47 }
  0xc9   :  { %v253_v58 = vld [vmem:[#allocation5 + $0x220] sm:$0xff]  ;;  %2202 = vmatpush2.bf16.msra.mxu0 %v5515_v62 }
  0xca   :  { %v377_v60 = vld [vmem:[#allocation5 + $0x600] sm:$0xff]  ;;  %v5508_v0 = vcombine.high %v249_v57, %v253_v58  ;;  %2244 = vmatprep.subr.bf16.mxu1 %v5644_v55  ;;  %v5507_v6 = vcombine.low %v249_v57, %v253_v58  ;;  %v198_v55 = vld [vmem:[#allocation5 + $0x68] sm:$0xff]  ;;  %v5461_v58 = vcombine.low %v202_v45, %v206_v47 }
  0xcb   :  { %v381_v61 = vld [vmem:[#allocation5 + $0x620] sm:$0xff]  ;;  %2245 = vmatpush2.bf16.msra.mxu1 %v5643_v63  ;;  %v186_v63 = vld [vmem:[#allocation5 + $0x8] sm:$0xff] }
  0xcc   :  { %v5636_v1 = vcombine.high %v377_v60, %v381_v61  ;;  %v497_v2 = vld [vmem:[#allocation5 + $0x9c0] sm:$0xff]  ;;  %2203 = vmatprep.subr.bf16.mxu0 %v5508_v0  ;;  %v5635_v7 = vcombine.low %v377_v60, %v381_v61  ;;  %v5454_v0 = vcombine.high %v194_v53, %v198_v55  ;;  %v266_v47 = vld [vmem:[#allocation5 + $0x288] sm:$0xff] }
  0xcd   :  { %v501_v3 = vld [vmem:[#allocation5 + $0x9e0] sm:$0xff]  ;;  %2204 = vmatpush2.bf16.msra.mxu0 %v5507_v6  ;;  %v310_v6 = vld [vmem:[#allocation5 + $0x3e8] sm:$0xff] }
  0xce   :  { %v5756_v8 = vcombine.high %v497_v2, %v501_v3  ;;  %2246 = vmatprep.subr.bf16.mxu1 %v5636_v1  ;;  %v489_v10 = vld [vmem:[#allocation5 + $0x980] sm:$0xff]  ;;  %v5755_v16 = vcombine.low %v497_v2, %v501_v3  ;;  %v190_v1 = vld [vmem:[#allocation5 + $0x28] sm:$0xff]  ;;  %v5453_v3 = vcombine.low %v194_v53, %v198_v55  ;;  %v5565_v22 = vcombine.low %v306_v5, %v310_v6 }
  0xcf   :  { %v493_v11 = vld [vmem:[#allocation5 + $0x9a0] sm:$0xff]  ;;  %2247 = vmatpush2.bf16.msra.mxu1 %v5635_v7  ;;  %v370_v7 = vld [vmem:[#allocation5 + $0x5c8] sm:$0xff] }
  0xd0   :  { %v7097_v15 = vld [vmem:[#allocation2 + $0x8] ss:$20 sps:$4 sm:$0xff]   ;;  %2259 = vmatprep.subr.bf16.mxu0 %v5756_v8  ;;  %v5748_v18 = vcombine.high %v489_v10, %v493_v11  ;;  %2302 = vmatprep.subr.bf16.mxu1 %v5502_v9  ;;  %v5747_v24 = vcombine.low %v489_v10, %v493_v11  ;;  %v5446_v8 = vcombine.high %v186_v63, %v190_v1  ;;  %v374_v9 = vld [vmem:[#allocation5 + $0x5e8] sm:$0xff] }
  0xd1   :  { %v481_v20 = vld [vmem:[#allocation5 + $0x940] sm:$0xff]  ;;  %2206 = vmatmul.mubr.bf16.vlgmr.msra.gmra.mxu0 %v7095_v12  ;;  %v5445_v11 = vcombine.low %v186_v63, %v190_v1  ;;  %v5630_v14 = vcombine.high %v370_v7, %v374_v9  ;;  %v258_v55 = vld [vmem:[#allocation5 + $0x248] sm:$0xff] }
  0xd2   :  { %v485_v21 = vld [vmem:[#allocation5 + $0x960] sm:$0xff]  ;;  %2249 = vmatmul.mubr.bf16.vlgmr.msra.gmra.mxu1 %v7097_v15  ;;  %2260 = vmatpush1.bf16.msra.mxu0 %v5755_v16  ;;  %v298_v16 = vld [vmem:[#allocation5 + $0x388] sm:$0xff] }
  0xd3   :  { %2303 = vmatpush1.bf16.msra.mxu1 %v5501_v17  ;;  %2261 = vmatprep.subr.bf16.mxu0 %v5748_v18  ;;  %v5740_v26 = vcombine.high %v481_v20, %v485_v21  ;;  %v473_v27 = vld [vmem:[#allocation5 + $0x900] sm:$0xff]  ;;  %v5739_v33 = vcombine.low %v481_v20, %v485_v21  ;;  %v302_v17 = vld [vmem:[#allocation5 + $0x3a8] sm:$0xff]  ;;  %v5629_v21 = vcombine.low %v370_v7, %v374_v9 }
  0xd4   :  { %v477_v28 = vld [vmem:[#allocation5 + $0x920] sm:$0xff]  ;;  %2304 = vmatprep.subr.bf16.mxu1 %v5494_v19  ;;  %2291 = vmatprep.mubr.bf16.mxu0 %v6986_v32  ;;  %v362_v18 = vld [vmem:[#allocation5 + $0x588] sm:$0xff]  ;;  %v5566_v19 = vcombine.high %v306_v5, %v310_v6 }
  0xd5   :  { %2334 = vmatprep.mubr.bf16.mxu1 %v7089_v56  ;;  %v5732_v35 = vcombine.high %v473_v27, %v477_v28  ;;  %v465_v36 = vld [vmem:[#allocation5 + $0x8c0] sm:$0xff]  ;;  %v5731_v41 = vcombine.low %v473_v27, %v477_v28  ;;  %v366_v20 = vld [vmem:[#allocation5 + $0x5a8] sm:$0xff]  ;;  %v5558_v27 = vcombine.high %v298_v16, %v302_v17 }
  0xd6   :  { %2262 = vmatpush1.bf16.msra.mxu0 %v5747_v24  ;;  %v469_v37 = vld [vmem:[#allocation5 + $0x8e0] sm:$0xff]  ;;  %v5622_v23 = vcombine.high %v362_v18, %v366_v20  ;;  %v290_v24 = vld [vmem:[#allocation5 + $0x348] sm:$0xff]  ;;  %v5621_v29 = vcombine.low %v362_v18, %v366_v20 }
  0xd7   :  { %2305 = vmatpush1.bf16.msra.mxu1 %v5493_v25  ;;  %2263 = vmatprep.subr.bf16.mxu0 %v5740_v26  ;;  %v5724_v43 = vcombine.high %v465_v36, %v469_v37  ;;  %v457_v44 = vld [vmem:[#allocation5 + $0x880] sm:$0xff]  ;;  %v5723_v48 = vcombine.low %v465_v36, %v469_v37  ;;  %v294_v25 = vld [vmem:[#allocation5 + $0x368] sm:$0xff] }
  0xd8   :  { %2306 = vmatprep.subr.bf16.mxu1 %v5486_v30  ;;  %v461_v56 = vld [vmem:[#allocation5 + $0x8a0] sm:$0xff]  ;;  %v354_v26 = vld [vmem:[#allocation5 + $0x548] sm:$0xff]  ;;  %v5557_v30 = vcombine.low %v298_v16, %v302_v17  ;;  %v5550_v36 = vcombine.high %v290_v24, %v294_v25 }
  0xd9   :  { %v5716_v50 = vcombine.high %v457_v44, %v461_v56  ;;  %v449_v51 = vld [vmem:[#allocation5 + $0x840] sm:$0xff]  ;;  %v5715_v57 = vcombine.low %v457_v44, %v461_v56  ;;  %v358_v28 = vld [vmem:[#allocation5 + $0x568] sm:$0xff] }
  0xda   :  { %2264 = vmatpush1.bf16.msra.mxu0 %v5739_v33  ;;  %v453_v52 = vld [vmem:[#allocation5 + $0x860] sm:$0xff]  ;;  %v5614_v31 = vcombine.high %v354_v26, %v358_v28  ;;  %v282_v33 = vld [vmem:[#allocation5 + $0x308] sm:$0xff]  ;;  %v5613_v38 = vcombine.low %v354_v26, %v358_v28 }
  0xdb   :  { %2307 = vmatpush1.bf16.msra.mxu1 %v5485_v34  ;;  %2265 = vmatprep.subr.bf16.mxu0 %v5732_v35  ;;  %v5708_v60 = vcombine.high %v449_v51, %v453_v52  ;;  %v441_v61 = vld [vmem:[#allocation5 + $0x800] sm:$0xff]  ;;  %v5707_v2 = vcombine.low %v449_v51, %v453_v52  ;;  %v286_v34 = vld [vmem:[#allocation5 + $0x328] sm:$0xff] }
  0xdc   :  { %2308 = vmatprep.subr.bf16.mxu1 %v5478_v39  ;;  %v445_v62 = vld [vmem:[#allocation5 + $0x820] sm:$0xff]  ;;  %v346_v35 = vld [vmem:[#allocation5 + $0x508] sm:$0xff]  ;;  %v5549_v39 = vcombine.low %v290_v24, %v294_v25  ;;  %v5541_v45 = vcombine.low %v282_v33, %v286_v34 }
  0xdd   :  { %v5700_v4 = vcombine.high %v441_v61, %v445_v62  ;;  %v5699_v10 = vcombine.low %v441_v61, %v445_v62  ;;  %v350_v37 = vld [vmem:[#allocation5 + $0x528] sm:$0xff] }
  0xde   :  { %2266 = vmatpush1.bf16.msra.mxu0 %v5731_v41  ;;  %v5606_v40 = vcombine.high %v346_v35, %v350_v37  ;;  %v274_v41 = vld [vmem:[#allocation5 + $0x2c8] sm:$0xff]  ;;  %v5605_v56 = vcombine.low %v346_v35, %v350_v37 }
  0xdf   :  { %2309 = vmatpush1.bf16.msra.mxu1 %v5477_v42  ;;  %2267 = vmatprep.subr.bf16.mxu0 %v5724_v43  ;;  %v278_v42 = vld [vmem:[#allocation5 + $0x2e8] sm:$0xff] }
  0xe0   :  { %2310 = vmatprep.subr.bf16.mxu1 %v5470_v46  ;;  %v338_v43 = vld [vmem:[#allocation5 + $0x4c8] sm:$0xff]  ;;  %v5533_v53 = vcombine.low %v274_v41, %v278_v42 }
  0xe1   :  { %v342_v44 = vld [vmem:[#allocation5 + $0x4e8] sm:$0xff] }
  0xe2   :  { %2268 = vmatpush1.bf16.msra.mxu0 %v5723_v48  ;;  %v5598_v46 = vcombine.high %v338_v43, %v342_v44  ;;  %v270_v48 = vld [vmem:[#allocation5 + $0x2a8] sm:$0xff]  ;;  %v5597_v52 = vcombine.low %v338_v43, %v342_v44 }
  0xe3   :  { %2311 = vmatpush1.bf16.msra.mxu1 %v5469_v49  ;;  %2269 = vmatprep.subr.bf16.mxu0 %v5716_v50  ;;  %v330_v49 = vld [vmem:[#allocation5 + $0x488] sm:$0xff]  ;;  %v5534_v50 = vcombine.high %v274_v41, %v278_v42  ;;  %v5525_v63 = vcombine.low %v266_v47, %v270_v48 }
  0xe4   :  { %2312 = vmatprep.subr.bf16.mxu1 %v5462_v54  ;;  %v334_v51 = vld [vmem:[#allocation5 + $0x4a8] sm:$0xff] }
  0xe5   :  { %v5590_v54 = vcombine.high %v330_v49, %v334_v51  ;;  %v326_v61 = vld [vmem:[#allocation5 + $0x468] sm:$0xff]  ;;  %v5589_v62 = vcombine.low %v330_v49, %v334_v51 }
  0xe6   :  { %2270 = vmatpush1.bf16.msra.mxu0 %v5715_v57  ;;  %v262_v57 = vld [vmem:[#allocation5 + $0x268] sm:$0xff] }
  0xe7   :  { %2313 = vmatpush1.bf16.msra.mxu1 %v5461_v58  ;;  %2271 = vmatprep.subr.bf16.mxu0 %v5708_v60  ;;  %v322_v58 = vld [vmem:[#allocation5 + $0x448] sm:$0xff]  ;;  %v5526_v60 = vcombine.high %v266_v47, %v270_v48  ;;  %v5517_v7 = vcombine.low %v258_v55, %v262_v57 }
  0xe8   :  { %2314 = vmatprep.subr.bf16.mxu1 %v5454_v0  ;;  %v5582_v0 = vcombine.high %v322_v58, %v326_v61  ;;  %v250_v1 = vld [vmem:[#allocation5 + $0x208] sm:$0xff]  ;;  %v5581_v6 = vcombine.low %v322_v58, %v326_v61 }
  0xe9   :  { %v318_v5 = vld [vmem:[#allocation5 + $0x428] sm:$0xff] }
  0xea   :  { %2272 = vmatpush1.bf16.msra.mxu0 %v5707_v2  ;;  %v254_v2 = vld [vmem:[#allocation5 + $0x228] sm:$0xff] }
  0xeb   :  { %2315 = vmatpush1.bf16.msra.mxu1 %v5453_v3  ;;  %2273 = vmatprep.subr.bf16.mxu0 %v5700_v4  ;;  %v314_v3 = vld [vmem:[#allocation5 + $0x408] sm:$0xff]  ;;  %v5518_v4 = vcombine.high %v258_v55, %v262_v57  ;;  %v5509_v18 = vcombine.low %v250_v1, %v254_v2 }
  0xec   :  { %2316 = vmatprep.subr.bf16.mxu1 %v5446_v8  ;;  %v5574_v8 = vcombine.high %v314_v3, %v318_v5  ;;  %v434_v9 = vld [vmem:[#allocation5 + $0x7c8] sm:$0xff]  ;;  %v5573_v17 = vcombine.low %v314_v3, %v318_v5 }
  0xed   :  { %v502_v16 = vld [vmem:[#allocation5 + $0x9e8] sm:$0xff] }
  0xee   :  { %2274 = vmatpush1.bf16.msra.mxu0 %v5699_v10  ;;  %v438_v10 = vld [vmem:[#allocation5 + $0x7e8] sm:$0xff] }
  0xef   :  { %2317 = vmatpush1.bf16.msra.mxu1 %v5445_v11  ;;  %2345 = vmatprep.subr.bf16.mxu0 %v5630_v14  ;;  %v498_v11 = vld [vmem:[#allocation5 + $0x9c8] sm:$0xff]  ;;  %v5510_v14 = vcombine.high %v250_v1, %v254_v2  ;;  %v5693_v25 = vcombine.low %v434_v9, %v438_v10 }
  0xf0   :  { %2318 = vmatprep.subr.bf16.mxu1 %v5566_v19  ;;  %v5694_v19 = vcombine.high %v434_v9, %v438_v10  ;;  %v426_v20 = vld [vmem:[#allocation5 + $0x788] sm:$0xff]  ;;  %v5757_v26 = vcombine.low %v498_v11, %v502_v16 }
  0xf1   :  { %2292 = vmatmul.mubr.bf16.vlgmr.msra.gmra.mxu0 %v7103_v13  ;;  %v494_v24 = vld [vmem:[#allocation5 + $0x9a8] sm:$0xff] }
  0xf2   :  { %2346 = vmatpush1.bf16.msra.mxu0 %v5629_v21  ;;  %2377 = vmatprep.mubr.bf16.mxu0 %v7091_v59  ;;  %v5542_v59 = vcombine.high %v282_v33, %v286_v34  ;;  %v430_v21 = vld [vmem:[#allocation5 + $0x7a8] sm:$0xff] }
  0xf3   :  { %2319 = vmatpush2.bf16.msra.mxu1 %v5565_v22  ;;  %2347 = vmatprep.subr.bf16.mxu0 %v5622_v23  ;;  %v490_v22 = vld [vmem:[#allocation5 + $0x988] sm:$0xff]  ;;  %v5758_v23 = vcombine.high %v498_v11, %v502_v16  ;;  %v5685_v34 = vcombine.low %v426_v20, %v430_v21  ;;  %v247_v16 = vld [vmem:[#allocation5 + $0x1f0] sm:$0xff] }
  0xf4   :  { %2320 = vmatprep.subr.bf16.mxu1 %v5558_v27  ;;  %v5686_v27 = vcombine.high %v426_v20, %v430_v21  ;;  %v418_v28 = vld [vmem:[#allocation5 + $0x748] sm:$0xff]  ;;  %v5749_v35 = vcombine.low %v490_v22, %v494_v24 }
  0xf5   :  { %v486_v33 = vld [vmem:[#allocation5 + $0x968] sm:$0xff] }
  0xf6   :  { %2348 = vmatpush1.bf16.msra.mxu0 %v5621_v29  ;;  %v422_v29 = vld [vmem:[#allocation5 + $0x768] sm:$0xff] }
  0xf7   :  { %2321 = vmatpush2.bf16.msra.mxu1 %v5557_v30  ;;  %2349 = vmatprep.subr.bf16.mxu0 %v5614_v31  ;;  %v5750_v30 = vcombine.high %v490_v22, %v494_v24  ;;  %v482_v31 = vld [vmem:[#allocation5 + $0x948] sm:$0xff]  ;;  %v5677_v42 = vcombine.low %v418_v28, %v422_v29  ;;  %v239_v24 = vld [vmem:[#allocation5 + $0x1b0] sm:$0xff] }
  0xf8   :  { %2322 = vmatprep.subr.bf16.mxu1 %v5550_v36  ;;  %v5678_v36 = vcombine.high %v418_v28, %v422_v29  ;;  %v410_v37 = vld [vmem:[#allocation5 + $0x708] sm:$0xff]  ;;  %v5741_v43 = vcombine.low %v482_v31, %v486_v33 }
  0xf9   :  { %v478_v41 = vld [vmem:[#allocation5 + $0x928] sm:$0xff] }
  0xfa   :  { %2350 = vmatpush1.bf16.msra.mxu0 %v5613_v38  ;;  %v414_v38 = vld [vmem:[#allocation5 + $0x728] sm:$0xff] }
  0xfb   :  { %2323 = vmatpush2.bf16.msra.mxu1 %v5549_v39  ;;  %2351 = vmatprep.subr.bf16.mxu0 %v5606_v40  ;;  %v474_v39 = vld [vmem:[#allocation5 + $0x908] sm:$0xff]  ;;  %v5742_v40 = vcombine.high %v482_v31, %v486_v33  ;;  %v5669_v47 = vcombine.low %v410_v37, %v414_v38  ;;  %v227_v31 = vld [vmem:[#allocation5 + $0x150] sm:$0xff] }
  0xfc   :  { %2324 = vmatprep.subr.bf16.mxu1 %v5542_v59  ;;  %v402_v59 = vld [vmem:[#allocation5 + $0x6c8] sm:$0xff]  ;;  %v5733_v48 = vcombine.low %v474_v39, %v478_v41  ;;  %v231_v33 = vld [vmem:[#allocation5 + $0x170] sm:$0xff] }
  0xfd   :  { %v406_v44 = vld [vmem:[#allocation5 + $0x6e8] sm:$0xff] }
  0xfe   :  { %2352 = vmatpush1.bf16.msra.mxu0 %v5605_v56  ;;  %v466_v56 = vld [vmem:[#allocation5 + $0x8c8] sm:$0xff]  ;;  %v5662_v49 = vcombine.high %v402_v59, %v406_v44  ;;  %v5661_v55 = vcombine.low %v402_v59, %v406_v44  ;;  %v7111_v59 = vld [vmem:[#allocation2 + $0x4] ss:$20 sps:$4 sm:$0xff]   ;;  %v7114_v44 = vld [vmem:[#allocation2 + $0xc] ss:$20 sps:$4 sm:$0xff]  }
  0xff   :  { %2325 = vmatpush2.bf16.msra.mxu1 %v5541_v45  ;;  %2353 = vmatprep.subr.bf16.mxu0 %v5598_v46  ;;  %v5734_v45 = vcombine.high %v474_v39, %v478_v41  ;;  %v470_v46 = vld [vmem:[#allocation5 + $0x8e8] sm:$0xff]  ;;  %v5488_v39 = vcombine.high %v227_v31, %v231_v33  ;;  %v223_v41 = vld [vmem:[#allocation5 + $0x130] sm:$0xff] }
 0x100   :  { %2326 = vmatprep.subr.bf16.mxu1 %v5534_v50  ;;  %v394_v50 = vld [vmem:[#allocation5 + $0x688] sm:$0xff]  ;;  %v5725_v57 = vcombine.low %v466_v56, %v470_v46 }
 0x101   :  { %v398_v51 = vld [vmem:[#allocation5 + $0x6a8] sm:$0xff] }
 0x102   :  { %2354 = vmatpush1.bf16.msra.mxu0 %v5597_v52  ;;  %v458_v52 = vld [vmem:[#allocation5 + $0x888] sm:$0xff]  ;;  %v5654_v58 = vcombine.high %v394_v50, %v398_v51  ;;  %v5653_v1 = vcombine.low %v394_v50, %v398_v51 }
 0x103   :  { %2327 = vmatpush2.bf16.msra.mxu1 %v5533_v53  ;;  %2355 = vmatprep.subr.bf16.mxu0 %v5590_v54  ;;  %v5726_v53 = vcombine.high %v466_v56, %v470_v46  ;;  %v462_v54 = vld [vmem:[#allocation5 + $0x8a8] sm:$0xff]  ;;  %v215_v46 = vld [vmem:[#allocation5 + $0xf0] sm:$0xff] }
 0x104   :  { %2328 = vmatprep.subr.bf16.mxu1 %v5526_v60  ;;  %v386_v60 = vld [vmem:[#allocation5 + $0x648] sm:$0xff]  ;;  %v5717_v2 = vcombine.low %v458_v52, %v462_v54 }
 0x105   :  { %v390_v61 = vld [vmem:[#allocation5 + $0x668] sm:$0xff] }
 0x106   :  { %2356 = vmatpush1.bf16.msra.mxu0 %v5589_v62  ;;  %v450_v62 = vld [vmem:[#allocation5 + $0x848] sm:$0xff]  ;;  %v5646_v3 = vcombine.high %v386_v60, %v390_v61  ;;  %v5645_v9 = vcombine.low %v386_v60, %v390_v61 }
 0x107   :  { %2329 = vmatpush2.bf16.msra.mxu1 %v5525_v63  ;;  %2357 = vmatprep.subr.bf16.mxu0 %v5582_v0  ;;  %v5718_v63 = vcombine.high %v458_v52, %v462_v54  ;;  %v454_v0 = vld [vmem:[#allocation5 + $0x868] sm:$0xff]  ;;  %v207_v54 = vld [vmem:[#allocation5 + $0xb0] sm:$0xff] }
 0x108   :  { %2330 = vmatprep.subr.bf16.mxu1 %v5518_v4  ;;  %v378_v4 = vld [vmem:[#allocation5 + $0x608] sm:$0xff]  ;;  %v5709_v10 = vcombine.low %v450_v62, %v454_v0 }
 0x109   :  { %v382_v5 = vld [vmem:[#allocation5 + $0x628] sm:$0xff] }
 0x10a   :  { %2358 = vmatpush1.bf16.msra.mxu0 %v5581_v6  ;;  %v442_v6 = vld [vmem:[#allocation5 + $0x808] sm:$0xff]  ;;  %v5638_v11 = vcombine.high %v378_v4, %v382_v5  ;;  %v5637_v20 = vcombine.low %v378_v4, %v382_v5 }
 0x10b   :  { %2331 = vmatpush2.bf16.msra.mxu1 %v5517_v7  ;;  %2359 = vmatprep.subr.bf16.mxu0 %v5574_v8  ;;  %v5710_v7 = vcombine.high %v450_v62, %v454_v0  ;;  %v446_v8 = vld [vmem:[#allocation5 + $0x828] sm:$0xff]  ;;  %v199_v0 = vld [vmem:[#allocation5 + $0x70] sm:$0xff] }
 0x10c   :  { %2332 = vmatprep.subr.bf16.mxu1 %v5510_v14  ;;  %v243_v14 = vld [vmem:[#allocation5 + $0x1d0] sm:$0xff]  ;;  %v5701_v21 = vcombine.low %v442_v6, %v446_v8 }
 0x10d   :  { %v5504_v22 = vcombine.high %v243_v14, %v247_v16  ;;  %v5503_v28 = vcombine.low %v243_v14, %v247_v16 }
 0x10e   :  { %2360 = vmatpush1.bf16.msra.mxu0 %v5573_v17  ;;  %v371_v17 = vld [vmem:[#allocation5 + $0x5d0] sm:$0xff] }
 0x10f   :  { %2333 = vmatpush2.bf16.msra.mxu1 %v5509_v18  ;;  %2361 = vmatprep.subr.bf16.mxu0 %v5694_v19  ;;  %v5702_v18 = vcombine.high %v442_v6, %v446_v8  ;;  %v375_v19 = vld [vmem:[#allocation5 + $0x5f0] sm:$0xff] }
 0x110   :  { %2388 = vmatprep.subr.bf16.mxu1 %v5758_v23  ;;  %v235_v23 = vld [vmem:[#allocation5 + $0x190] sm:$0xff]  ;;  %v5631_v29 = vcombine.low %v371_v17, %v375_v19 }
 0x111   :  { %v191_v8 = vld [vmem:[#allocation5 + $0x30] sm:$0xff] }
 0x112   :  { %2335 = vmatmul.mubr.bf16.vlgmr.msra.gmra.mxu1 %v7095_v12  ;;  %2362 = vmatpush2.bf16.msra.mxu0 %v5693_v25  ;;  %v5670_v12 = vcombine.high %v410_v37, %v414_v38  ;;  %v363_v25 = vld [vmem:[#allocation5 + $0x590] sm:$0xff]  ;;  %v5495_v37 = vcombine.low %v235_v23, %v239_v24 }
 0x113   :  { %2389 = vmatpush1.bf16.msra.mxu1 %v5757_v26  ;;  %2363 = vmatprep.subr.bf16.mxu0 %v5686_v27  ;;  %v5632_v26 = vcombine.high %v371_v17, %v375_v19  ;;  %v367_v27 = vld [vmem:[#allocation5 + $0x5b0] sm:$0xff] }
 0x114   :  { %2390 = vmatprep.subr.bf16.mxu1 %v5750_v30  ;;  %2420 = vmatprep.mubr.bf16.mxu1 %v6986_v32  ;;  %v5496_v30 = vcombine.high %v235_v23, %v239_v24  ;;  %v5623_v38 = vcombine.low %v363_v25, %v367_v27  ;;  %v311_v19 = vld [vmem:[#allocation5 + $0x3f0] sm:$0xff] }
 0x116   :  { %2364 = vmatpush2.bf16.msra.mxu0 %v5685_v34  ;;  %v355_v34 = vld [vmem:[#allocation5 + $0x550] sm:$0xff] }
 0x117   :  { %2391 = vmatpush1.bf16.msra.mxu1 %v5749_v35  ;;  %2365 = vmatprep.subr.bf16.mxu0 %v5678_v36  ;;  %v5624_v35 = vcombine.high %v363_v25, %v367_v27  ;;  %v359_v36 = vld [vmem:[#allocation5 + $0x570] sm:$0xff] }
 0x118   :  { %2392 = vmatprep.subr.bf16.mxu1 %v5742_v40  ;;  %v219_v40 = vld [vmem:[#allocation5 + $0x110] sm:$0xff] }
 0x119   :  { %v5480_v56 = vcombine.high %v219_v40, %v223_v41  ;;  %v5479_v50 = vcombine.low %v219_v40, %v223_v41  ;;  %v303_v27 = vld [vmem:[#allocation5 + $0x3b0] sm:$0xff] }
 0x11a   :  { %2366 = vmatpush2.bf16.msra.mxu0 %v5677_v42  ;;  %v347_v42 = vld [vmem:[#allocation5 + $0x510] sm:$0xff] }
 0x11b   :  { %2393 = vmatpush1.bf16.msra.mxu1 %v5741_v43  ;;  %2367 = vmatprep.subr.bf16.mxu0 %v5670_v12  ;;  %v5616_v43 = vcombine.high %v355_v34, %v359_v36  ;;  %v351_v12 = vld [vmem:[#allocation5 + $0x530] sm:$0xff] }
 0x11c   :  { %2394 = vmatprep.subr.bf16.mxu1 %v5734_v45  ;;  %v211_v45 = vld [vmem:[#allocation5 + $0xd0] sm:$0xff]  ;;  %v5607_v51 = vcombine.low %v347_v42, %v351_v12 }
 0x11d   :  { %v5472_v52 = vcombine.high %v211_v45, %v215_v46  ;;  %v5471_v60 = vcombine.low %v211_v45, %v215_v46 }
 0x11e   :  { %2368 = vmatpush2.bf16.msra.mxu0 %v5669_v47  ;;  %v339_v47 = vld [vmem:[#allocation5 + $0x4d0] sm:$0xff] }
 0x11f   :  { %2395 = vmatpush1.bf16.msra.mxu1 %v5733_v48  ;;  %2369 = vmatprep.subr.bf16.mxu0 %v5662_v49  ;;  %v5608_v48 = vcombine.high %v347_v42, %v351_v12  ;;  %v343_v49 = vld [vmem:[#allocation5 + $0x4f0] sm:$0xff] }
 0x120   :  { %2396 = vmatprep.subr.bf16.mxu1 %v5726_v53  ;;  %v203_v53 = vld [vmem:[#allocation5 + $0x90] sm:$0xff]  ;;  %v5599_v61 = vcombine.low %v339_v47, %v343_v49 }
 0x121   :  { %v5464_v62 = vcombine.high %v203_v53, %v207_v54  ;;  %v5463_v4 = vcombine.low %v203_v53, %v207_v54  ;;  %v283_v12 = vld [vmem:[#allocation5 + $0x310] sm:$0xff] }
 0x122   :  { %2370 = vmatpush2.bf16.msra.mxu0 %v5661_v55  ;;  %v331_v55 = vld [vmem:[#allocation5 + $0x490] sm:$0xff] }
 0x123   :  { %2397 = vmatpush1.bf16.msra.mxu1 %v5725_v57  ;;  %2371 = vmatprep.subr.bf16.mxu0 %v5654_v58  ;;  %v5600_v57 = vcombine.high %v339_v47, %v343_v49  ;;  %v335_v58 = vld [vmem:[#allocation5 + $0x4b0] sm:$0xff] }
 0x124   :  { %2398 = vmatprep.subr.bf16.mxu1 %v5718_v63  ;;  %v195_v63 = vld [vmem:[#allocation5 + $0x50] sm:$0xff]  ;;  %v5591_v5 = vcombine.low %v331_v55, %v335_v58 }
 0x125   :  { %v5456_v6 = vcombine.high %v195_v63, %v199_v0  ;;  %v5455_v14 = vcombine.low %v195_v63, %v199_v0  ;;  %v275_v49 = vld [vmem:[#allocation5 + $0x2d0] sm:$0xff] }
 0x126   :  { %2372 = vmatpush2.bf16.msra.mxu0 %v5653_v1  ;;  %v323_v1 = vld [vmem:[#allocation5 + $0x450] sm:$0xff] }
 0x127   :  { %2399 = vmatpush1.bf16.msra.mxu1 %v5717_v2  ;;  %2373 = vmatprep.subr.bf16.mxu0 %v5646_v3  ;;  %v5592_v2 = vcombine.high %v331_v55, %v335_v58  ;;  %v327_v3 = vld [vmem:[#allocation5 + $0x470] sm:$0xff] }
 0x128   :  { %2400 = vmatprep.subr.bf16.mxu1 %v5710_v7  ;;  %v187_v7 = vld [vmem:[#allocation5 + $0x10] sm:$0xff]  ;;  %v5583_v16 = vcombine.low %v323_v1, %v327_v3 }
 0x129   :  { %v5448_v17 = vcombine.high %v187_v7, %v191_v8  ;;  %v5447_v23 = vcombine.low %v187_v7, %v191_v8  ;;  %v271_v58 = vld [vmem:[#allocation5 + $0x2b0] sm:$0xff] }
 0x12a   :  { %2374 = vmatpush2.bf16.msra.mxu0 %v5645_v9  ;;  %v315_v9 = vld [vmem:[#allocation5 + $0x410] sm:$0xff] }
 0x12b   :  { %2401 = vmatpush1.bf16.msra.mxu1 %v5709_v10  ;;  %2375 = vmatprep.subr.bf16.mxu0 %v5638_v11  ;;  %v5584_v10 = vcombine.high %v323_v1, %v327_v3  ;;  %v319_v11 = vld [vmem:[#allocation5 + $0x430] sm:$0xff] }
 0x12c   :  { %2402 = vmatprep.subr.bf16.mxu1 %v5702_v18  ;;  %v307_v18 = vld [vmem:[#allocation5 + $0x3d0] sm:$0xff]  ;;  %v5575_v24 = vcombine.low %v315_v9, %v319_v11 }
 0x12d   :  { %v5568_v25 = vcombine.high %v307_v18, %v311_v19  ;;  %v263_v3 = vld [vmem:[#allocation5 + $0x270] sm:$0xff] }
 0x12e   :  { %2376 = vmatpush2.bf16.msra.mxu0 %v5637_v20  ;;  %v435_v20 = vld [vmem:[#allocation5 + $0x7d0] sm:$0xff] }
 0x12f   :  { %2403 = vmatpush1.bf16.msra.mxu1 %v5701_v21  ;;  %2431 = vmatprep.subr.bf16.mxu0 %v5504_v22  ;;  %v5576_v21 = vcombine.high %v315_v9, %v319_v11  ;;  %v439_v22 = vld [vmem:[#allocation5 + $0x7f0] sm:$0xff] }
 0x130   :  { %2474 = vmatprep.subr.bf16.mxu1 %v5632_v26  ;;  %v299_v26 = vld [vmem:[#allocation5 + $0x390] sm:$0xff] }
 0x131   :  { %2378 = vmatmul.mubr.bf16.vlgmr.msra.gmra.mxu0 %v7097_v15  ;;  %v5487_v15 = vcombine.low %v227_v31, %v231_v33  ;;  %v5567_v31 = vcombine.low %v307_v18, %v311_v19  ;;  %v5695_v33 = vcombine.low %v435_v20, %v439_v22  ;;  %v5559_v40 = vcombine.low %v299_v26, %v303_v27  ;;  %v255_v11 = vld [vmem:[#allocation5 + $0x230] sm:$0xff] }
 0x132   :  { %2421 = vmatmul.mubr.bf16.vlgmr.msra.gmra.mxu1 %v7103_v13  ;;  %2432 = vmatpush1.bf16.msra.mxu0 %v5503_v28  ;;  %v5615_v13 = vcombine.low %v355_v34, %v359_v36  ;;  %v427_v28 = vld [vmem:[#allocation5 + $0x790] sm:$0xff]  ;;  %v5560_v34 = vcombine.high %v299_v26, %v303_v27 }
 0x133   :  { %2475 = vmatpush1.bf16.msra.mxu1 %v5631_v29  ;;  %2433 = vmatprep.subr.bf16.mxu0 %v5496_v30  ;;  %v5696_v29 = vcombine.high %v435_v20, %v439_v22  ;;  %v431_v30 = vld [vmem:[#allocation5 + $0x7b0] sm:$0xff] }
 0x134   :  { %2476 = vmatprep.subr.bf16.mxu1 %v5624_v35  ;;  %2463 = vmatprep.mubr.bf16.mxu0 %v7111_v59  ;;  %v5688_v35 = vcombine.high %v427_v28, %v431_v30  ;;  %v291_v36 = vld [vmem:[#allocation5 + $0x350] sm:$0xff]  ;;  %v5687_v41 = vcombine.low %v427_v28, %v431_v30 }
 0x135   :  { %2506 = vmatprep.mubr.bf16.mxu1 %v7114_v44  ;;  %v503_v22 = vld [vmem:[#allocation5 + $0x9f0] sm:$0xff] }
 0x136   :  { %2434 = vmatpush1.bf16.msra.mxu0 %v5495_v37  ;;  %v295_v37 = vld [vmem:[#allocation5 + $0x370] sm:$0xff] }
 0x137   :  { %2477 = vmatpush1.bf16.msra.mxu1 %v5623_v38  ;;  %2435 = vmatprep.subr.bf16.mxu0 %v5488_v39  ;;  %v419_v38 = vld [vmem:[#allocation5 + $0x750] sm:$0xff]  ;;  %v5552_v42 = vcombine.high %v291_v36, %v295_v37  ;;  %v5551_v45 = vcombine.low %v291_v36, %v295_v37 }
 0x138   :  { %2478 = vmatprep.subr.bf16.mxu1 %v5616_v43  ;;  %v423_v39 = vld [vmem:[#allocation5 + $0x770] sm:$0xff] }
 0x139   :  { %v5680_v43 = vcombine.high %v419_v38, %v423_v39  ;;  %v5679_v46 = vcombine.low %v419_v38, %v423_v39  ;;  %v495_v30 = vld [vmem:[#allocation5 + $0x9b0] sm:$0xff] }
 0x13a   :  { %2436 = vmatpush1.bf16.msra.mxu0 %v5487_v15  ;;  %v287_v15 = vld [vmem:[#allocation5 + $0x330] sm:$0xff] }
 0x13b   :  { %2479 = vmatpush1.bf16.msra.mxu1 %v5615_v13  ;;  %2437 = vmatprep.subr.bf16.mxu0 %v5480_v56  ;;  %v411_v13 = vld [vmem:[#allocation5 + $0x710] sm:$0xff]  ;;  %v5544_v47 = vcombine.high %v283_v12, %v287_v15  ;;  %v5543_v53 = vcombine.low %v283_v12, %v287_v15 }
 0x13c   :  { %2480 = vmatprep.subr.bf16.mxu1 %v5608_v48  ;;  %v415_v56 = vld [vmem:[#allocation5 + $0x730] sm:$0xff] }
 0x13d   :  { %v5672_v48 = vcombine.high %v411_v13, %v415_v56  ;;  %v5671_v54 = vcombine.low %v411_v13, %v415_v56  ;;  %v483_v39 = vld [vmem:[#allocation5 + $0x950] sm:$0xff] }
 0x13e   :  { %2438 = vmatpush1.bf16.msra.mxu0 %v5479_v50  ;;  %v279_v50 = vld [vmem:[#allocation5 + $0x2f0] sm:$0xff] }
 0x13f   :  { %2481 = vmatpush1.bf16.msra.mxu1 %v5607_v51  ;;  %2439 = vmatprep.subr.bf16.mxu0 %v5472_v52  ;;  %v403_v51 = vld [vmem:[#allocation5 + $0x6d0] sm:$0xff]  ;;  %v5536_v55 = vcombine.high %v275_v49, %v279_v50  ;;  %v5535_v63 = vcombine.low %v275_v49, %v279_v50  ;;  %v224_v49 = vld [vmem:[#allocation5 + $0x138] sm:$0xff] }
 0x140   :  { %2482 = vmatprep.subr.bf16.mxu1 %v5600_v57  ;;  %v407_v52 = vld [vmem:[#allocation5 + $0x6f0] sm:$0xff] }
 0x141   :  { %v267_v57 = vld [vmem:[#allocation5 + $0x290] sm:$0xff]  ;;  %v5663_v0 = vcombine.low %v403_v51, %v407_v52 }
 0x142   :  { %2440 = vmatpush1.bf16.msra.mxu0 %v5471_v60  ;;  %v395_v60 = vld [vmem:[#allocation5 + $0x690] sm:$0xff]  ;;  %v5528_v1 = vcombine.high %v267_v57, %v271_v58  ;;  %v5527_v7 = vcombine.low %v267_v57, %v271_v58  ;;  %v212_v57 = vld [vmem:[#allocation5 + $0xd8] sm:$0xff] }
 0x143   :  { %2483 = vmatpush1.bf16.msra.mxu1 %v5599_v61  ;;  %2441 = vmatprep.subr.bf16.mxu0 %v5464_v62  ;;  %v5664_v61 = vcombine.high %v403_v51, %v407_v52  ;;  %v399_v62 = vld [vmem:[#allocation5 + $0x6b0] sm:$0xff]  ;;  %v216_v58 = vld [vmem:[#allocation5 + $0xf8] sm:$0xff] }
 0x144   :  { %2484 = vmatprep.subr.bf16.mxu1 %v5592_v2  ;;  %v259_v2 = vld [vmem:[#allocation5 + $0x250] sm:$0xff]  ;;  %v5655_v8 = vcombine.low %v395_v60, %v399_v62 }
 0x145   :  { %v5520_v9 = vcombine.high %v259_v2, %v263_v3  ;;  %v5519_v18 = vcombine.low %v259_v2, %v263_v3  ;;  %v7120_v12 = vld [vmem:[#allocation2 + $0x8] ss:$20 sps:$4 sm:$0xff]   ;;  %v208_v2 = vld [vmem:[#allocation5 + $0xb8] sm:$0xff] }
 0x146   :  { %2442 = vmatpush1.bf16.msra.mxu0 %v5463_v4  ;;  %v387_v4 = vld [vmem:[#allocation5 + $0x650] sm:$0xff] }
 0x147   :  { %2485 = vmatpush1.bf16.msra.mxu1 %v5591_v5  ;;  %2443 = vmatprep.subr.bf16.mxu0 %v5456_v6  ;;  %v5656_v5 = vcombine.high %v395_v60, %v399_v62  ;;  %v391_v6 = vld [vmem:[#allocation5 + $0x670] sm:$0xff] }
 0x148   :  { %2486 = vmatprep.subr.bf16.mxu1 %v5584_v10  ;;  %v251_v10 = vld [vmem:[#allocation5 + $0x210] sm:$0xff]  ;;  %v5647_v19 = vcombine.low %v387_v4, %v391_v6 }
 0x149   :  { %v5512_v20 = vcombine.high %v251_v10, %v255_v11  ;;  %v5511_v26 = vcombine.low %v251_v10, %v255_v11  ;;  %v507_v10 = vlaneseq  ;;  %v200_v11 = vld [vmem:[#allocation5 + $0x78] sm:$0xff] }
 0x14a   :  { %2444 = vmatpush1.bf16.msra.mxu0 %v5455_v14  ;;  %v379_v14 = vld [vmem:[#allocation5 + $0x610] sm:$0xff] }
 0x14b   :  { %2487 = vmatpush1.bf16.msra.mxu1 %v5583_v16  ;;  %2445 = vmatprep.subr.bf16.mxu0 %v5448_v17  ;;  %v5648_v16 = vcombine.high %v387_v4, %v391_v6  ;;  %v383_v17 = vld [vmem:[#allocation5 + $0x630] sm:$0xff]  ;;  %v5473_v4 = vcombine.low %v212_v57, %v216_v58 }
 0x14c   :  { %2488 = vmatprep.subr.bf16.mxu1 %v5576_v21  ;;  %v499_v21 = vld [vmem:[#allocation5 + $0x9d0] sm:$0xff]  ;;  %v5639_v27 = vcombine.low %v379_v14, %v383_v17 }
 0x14d   :  { %v5760_v28 = vcombine.high %v499_v21, %v503_v22 }
 0x14e   :  { %2446 = vmatpush1.bf16.msra.mxu0 %v5447_v23  ;;  %v244_v23 = vld [vmem:[#allocation5 + $0x1d8] sm:$0xff] }
 0x14f   :  { %2489 = vmatpush1.bf16.msra.mxu1 %v5575_v24  ;;  %2447 = vmatprep.subr.bf16.mxu0 %v5568_v25  ;;  %v5640_v24 = vcombine.high %v379_v14, %v383_v17  ;;  %v248_v25 = vld [vmem:[#allocation5 + $0x1f8] sm:$0xff] }
 0x150   :  { %2490 = vmatprep.subr.bf16.mxu1 %v5696_v29  ;;  %v491_v29 = vld [vmem:[#allocation5 + $0x990] sm:$0xff]  ;;  %v5505_v36 = vcombine.low %v244_v23, %v248_v25 }
 0x151   :  { %v5752_v37 = vcombine.high %v491_v29, %v495_v30  ;;  %v5751_v15 = vcombine.low %v491_v29, %v495_v30  ;;  %v372_v29 = vld [vmem:[#allocation5 + $0x5d8] sm:$0xff] }
 0x152   :  { %2448 = vmatpush2.bf16.msra.mxu0 %v5567_v31  ;;  %v236_v31 = vld [vmem:[#allocation5 + $0x198] sm:$0xff] }
 0x153   :  { %2491 = vmatpush2.bf16.msra.mxu1 %v5695_v33  ;;  %2449 = vmatprep.subr.bf16.mxu0 %v5560_v34  ;;  %v5506_v33 = vcombine.high %v244_v23, %v248_v25  ;;  %v240_v34 = vld [vmem:[#allocation5 + $0x1b8] sm:$0xff]  ;;  %v7125_v23 = vshrl.u32 %v507_v10, 7 }
 0x154   :  { %2492 = vmatprep.subr.bf16.mxu1 %v5688_v35  ;;  %v5759_v35 = vcombine.low %v499_v21, %v503_v22  ;;  %v5498_v38 = vcombine.high %v236_v31, %v240_v34  ;;  %v5497_v13 = vcombine.low %v236_v31, %v240_v34  ;;  %v192_v22 = vld [vmem:[#allocation5 + $0x38] sm:$0xff] }
 0x155   :  { %v7128_v31 = vsub.s32 0, %v7125_v23  ;;  %v340_v10 = vld [vmem:[#allocation5 + $0x4d8] sm:$0xff] }
 0x156   :  { %2450 = vmatpush2.bf16.msra.mxu0 %v5559_v40  ;;  %v487_v40 = vld [vmem:[#allocation5 + $0x970] sm:$0xff] }
 0x157   :  { %2493 = vmatpush2.bf16.msra.mxu1 %v5687_v41  ;;  %2451 = vmatprep.subr.bf16.mxu0 %v5552_v42  ;;  %v7117_v41 = vld [vmem:[#allocation2] ss:$20 sps:$4 sm:$0xff]   ;;  %v5744_v56 = vcombine.high %v483_v39, %v487_v40  ;;  %v5743_v50 = vcombine.low %v483_v39, %v487_v40 }
 0x158   :  { %2494 = vmatprep.subr.bf16.mxu1 %v5680_v43  ;;  %v228_v42 = vld [vmem:[#allocation5 + $0x158] sm:$0xff] }
 0x159   :  { %v232_v43 = vld [vmem:[#allocation5 + $0x178] sm:$0xff] }
 0x15a   :  { %2452 = vmatpush2.bf16.msra.mxu0 %v5551_v45  ;;  %v5490_v45 = vcombine.high %v228_v42, %v232_v43  ;;  %v5489_v51 = vcombine.low %v228_v42, %v232_v43  ;;  %v364_v39 = vld [vmem:[#allocation5 + $0x598] sm:$0xff] }
 0x15b   :  { %2495 = vmatpush2.bf16.msra.mxu1 %v5679_v46  ;;  %2453 = vmatprep.subr.bf16.mxu0 %v5544_v47  ;;  %v475_v46 = vld [vmem:[#allocation5 + $0x910] sm:$0xff]  ;;  %v368_v40 = vld [vmem:[#allocation5 + $0x5b8] sm:$0xff] }
 0x15c   :  { %2496 = vmatprep.subr.bf16.mxu1 %v5672_v48  ;;  %v479_v47 = vld [vmem:[#allocation5 + $0x930] sm:$0xff]  ;;  %v220_v48 = vld [vmem:[#allocation5 + $0x118] sm:$0xff] }
 0x15d   :  { %v5736_v52 = vcombine.high %v475_v46, %v479_v47  ;;  %v5735_v60 = vcombine.low %v475_v46, %v479_v47  ;;  %v300_v42 = vld [vmem:[#allocation5 + $0x398] sm:$0xff] }
 0x15e   :  { %2454 = vmatpush2.bf16.msra.mxu0 %v5543_v53  ;;  %v5482_v53 = vcombine.high %v220_v48, %v224_v49  ;;  %v304_v43 = vld [vmem:[#allocation5 + $0x3b8] sm:$0xff] }
 0x15f   :  { %2497 = vmatpush2.bf16.msra.mxu1 %v5671_v54  ;;  %2455 = vmatprep.subr.bf16.mxu0 %v5536_v55  ;;  %v467_v54 = vld [vmem:[#allocation5 + $0x8d0] sm:$0xff]  ;;  %v5562_v46 = vcombine.high %v300_v42, %v304_v43  ;;  %v356_v47 = vld [vmem:[#allocation5 + $0x558] sm:$0xff] }
 0x160   :  { %2498 = vmatprep.subr.bf16.mxu1 %v5664_v61  ;;  %v471_v55 = vld [vmem:[#allocation5 + $0x8f0] sm:$0xff]  ;;  %v5481_v61 = vcombine.low %v220_v48, %v224_v49  ;;  %v360_v48 = vld [vmem:[#allocation5 + $0x578] sm:$0xff] }
 0x161   :  { %v5728_v62 = vcombine.high %v467_v54, %v471_v55  ;;  %v5727_v3 = vcombine.low %v467_v54, %v471_v55  ;;  %v5625_v55 = vcombine.low %v364_v39, %v368_v40 }
 0x162   :  { %2456 = vmatpush2.bf16.msra.mxu0 %v5535_v63  ;;  %v459_v63 = vld [vmem:[#allocation5 + $0x890] sm:$0xff] }
 0x163   :  { %2499 = vmatpush2.bf16.msra.mxu1 %v5663_v0  ;;  %2457 = vmatprep.subr.bf16.mxu0 %v5528_v1  ;;  %v463_v0 = vld [vmem:[#allocation5 + $0x8b0] sm:$0xff]  ;;  %v204_v1 = vld [vmem:[#allocation5 + $0x98] sm:$0xff] }
 0x164   :  { %2500 = vmatprep.subr.bf16.mxu1 %v5656_v5  ;;  %v5720_v5 = vcombine.high %v459_v63, %v463_v0  ;;  %v5466_v6 = vcombine.high %v204_v1, %v208_v2  ;;  %v5719_v14 = vcombine.low %v459_v63, %v463_v0  ;;  %v348_v63 = vld [vmem:[#allocation5 + $0x518] sm:$0xff] }
 0x165   :  { %v352_v0 = vld [vmem:[#allocation5 + $0x538] sm:$0xff] }
 0x166   :  { %2458 = vmatpush2.bf16.msra.mxu0 %v5527_v7  ;;  %v451_v7 = vld [vmem:[#allocation5 + $0x850] sm:$0xff] }
 0x167   :  { %2501 = vmatpush2.bf16.msra.mxu1 %v5655_v8  ;;  %2459 = vmatprep.subr.bf16.mxu0 %v5520_v9  ;;  %v455_v8 = vld [vmem:[#allocation5 + $0x870] sm:$0xff]  ;;  %v196_v9 = vld [vmem:[#allocation5 + $0x58] sm:$0xff] }
 0x168   :  { %2502 = vmatprep.subr.bf16.mxu1 %v5648_v16  ;;  %v5465_v16 = vcombine.low %v204_v1, %v208_v2  ;;  %v5712_v17 = vcombine.high %v451_v7, %v455_v8  ;;  %v5458_v21 = vcombine.high %v196_v9, %v200_v11  ;;  %v5457_v25 = vcombine.low %v196_v9, %v200_v11  ;;  %v284_v2 = vld [vmem:[#allocation5 + $0x318] sm:$0xff] }
 0x169   :  { %v344_v11 = vld [vmem:[#allocation5 + $0x4f8] sm:$0xff] }
 0x16a   :  { %2460 = vmatpush2.bf16.msra.mxu0 %v5519_v18  ;;  %v443_v18 = vld [vmem:[#allocation5 + $0x810] sm:$0xff] }
 0x16b   :  { %2503 = vmatpush2.bf16.msra.mxu1 %v5647_v19  ;;  %2461 = vmatprep.subr.bf16.mxu0 %v5512_v20  ;;  %v447_v19 = vld [vmem:[#allocation5 + $0x830] sm:$0xff]  ;;  %v188_v20 = vld [vmem:[#allocation5 + $0x18] sm:$0xff] }
 0x16c   :  { %2504 = vmatprep.subr.bf16.mxu1 %v5640_v24  ;;  %v5711_v24 = vcombine.low %v451_v7, %v455_v8  ;;  %v5450_v30 = vcombine.high %v188_v20, %v192_v22  ;;  %v5703_v34 = vcombine.low %v443_v18, %v447_v19  ;;  %v5610_v7 = vcombine.high %v348_v63, %v352_v0 }
 0x16e   :  { %2462 = vmatpush2.bf16.msra.mxu0 %v5511_v26  ;;  %v5704_v26 = vcombine.high %v443_v18, %v447_v19  ;;  %v5602_v19 = vcombine.high %v340_v10, %v344_v11 }
 0x16f   :  { %2505 = vmatpush2.bf16.msra.mxu1 %v5639_v27  ;;  %2517 = vmatprep.subr.bf16.mxu0 %v5760_v28  ;;  %v308_v27 = vld [vmem:[#allocation5 + $0x3d8] sm:$0xff] }
 0x170   :  { %2560 = vmatprep.subr.bf16.mxu1 %v5506_v33  ;;  %v312_v28 = vld [vmem:[#allocation5 + $0x3f8] sm:$0xff] }
 0x171   :  { %2464 = vmatmul.mubr.bf16.vlgmr.msra.gmra.mxu0 %v7117_v41  ;;  %v376_v33 = vld [vmem:[#allocation5 + $0x5f8] sm:$0xff] }
 0x172   :  { %2507 = vmatmul.mubr.bf16.vlgmr.msra.gmra.mxu1 %v7120_v12  ;;  %2518 = vmatpush1.bf16.msra.mxu0 %v5759_v35  ;;  %v5449_v35 = vcombine.low %v188_v20, %v192_v22  ;;  %v336_v22 = vld [vmem:[#allocation5 + $0x4b8] sm:$0xff] }
 0x173   :  { %2561 = vmatpush1.bf16.msra.mxu1 %v5505_v36  ;;  %2519 = vmatprep.subr.bf16.mxu0 %v5752_v37  ;;  %v7130_v36 = vld [vmem:[#allocation7] sm:$0xff]  ;;  %v5634_v37 = vcombine.high %v372_v29, %v376_v33 }
 0x174   :  { %2562 = vmatprep.subr.bf16.mxu1 %v5498_v38  ;;  %2549 = vmatprep.mubr.bf16.mxu0 %v6986_v32  ;;  %v5570_v38 = vcombine.high %v308_v27, %v312_v28 }
 0x175   :  { %2592 = vmatprep.mubr.bf16.mxu1 %v7111_v59  ;;  %v5474_v59 = vcombine.high %v212_v57, %v216_v58  ;;  %v5561_v58 = vcombine.low %v300_v42, %v304_v43  ;;  %v316_v42 = vld [vmem:[#allocation5 + $0x418] sm:$0xff] }
 0x176   :  { %2520 = vmatpush1.bf16.msra.mxu0 %v5751_v15  ;;  %v510_v15 = vrot.slane %v7130_v36, %v7128_v31  ;;  %v320_v43 = vld [vmem:[#allocation5 + $0x438] sm:$0xff] }
 0x177   :  { %2563 = vmatpush1.bf16.msra.mxu1 %v5497_v13  ;;  %2521 = vmatprep.subr.bf16.mxu0 %v5744_v56  ;;  %v5633_v13 = vcombine.low %v372_v29, %v376_v33  ;;  %v5569_v56 = vcombine.low %v308_v27, %v312_v28  ;;  %v328_v33 = vld [vmem:[#allocation5 + $0x478] sm:$0xff] }
 0x178   :  { %2564 = vmatprep.subr.bf16.mxu1 %v5490_v45  ;;  %v5626_v45 = vcombine.high %v364_v39, %v368_v40 }
 0x17a   :  { %2522 = vmatpush1.bf16.msra.mxu0 %v5743_v50  ;;  %v7134_v50 = vld [vmem:[#allocation2 + $0x10] ss:$20 sps:$4 sm:$0xff]  }
 0x17b   :  { %2565 = vmatpush1.bf16.msra.mxu1 %v5489_v51  ;;  %2523 = vmatprep.subr.bf16.mxu0 %v5736_v52  ;;  %v292_v51 = vld [vmem:[#allocation5 + $0x358] sm:$0xff] }
 0x17c   :  { %2566 = vmatprep.subr.bf16.mxu1 %v5482_v53  ;;  %v296_v52 = vld [vmem:[#allocation5 + $0x378] sm:$0xff] }
 0x17e   :  { %2524 = vmatpush1.bf16.msra.mxu0 %v5735_v60  ;;  %v5618_v60 = vcombine.high %v356_v47, %v360_v48 }
 0x17f   :  { %2567 = vmatpush1.bf16.msra.mxu1 %v5481_v61  ;;  %2525 = vmatprep.subr.bf16.mxu0 %v5728_v62 }
 0x180   :  { %2568 = vmatprep.subr.bf16.mxu1 %v5474_v59  ;;  %v5554_v59 = vcombine.high %v292_v51, %v296_v52 }
 0x182   :  { %2526 = vmatpush1.bf16.msra.mxu0 %v5727_v3  ;;  %v288_v3 = vld [vmem:[#allocation5 + $0x338] sm:$0xff] }
 0x183   :  { %2569 = vmatpush1.bf16.msra.mxu1 %v5473_v4  ;;  %2527 = vmatprep.subr.bf16.mxu0 %v5720_v5  ;;  %v5546_v9 = vcombine.high %v284_v2, %v288_v3  ;;  %v5545_v18 = vcombine.low %v284_v2, %v288_v3 }
 0x184   :  { %2570 = vmatprep.subr.bf16.mxu1 %v5466_v6  ;;  %v5553_v6 = vcombine.low %v292_v51, %v296_v52  ;;  %v500_v51 = vld [vmem:[#allocation5 + $0x9d8] sm:$0xff] }
 0x185   :  { %v504_v52 = vld [vmem:[#allocation5 + $0x9f8] sm:$0xff] }
 0x186   :  { %2528 = vmatpush1.bf16.msra.mxu0 %v5719_v14  ;;  %v276_v14 = vld [vmem:[#allocation5 + $0x2d8] sm:$0xff]  ;;  %v5761_v3 = vcombine.low %v500_v51, %v504_v52 }
 0x187   :  { %2571 = vmatpush1.bf16.msra.mxu1 %v5465_v16  ;;  %2529 = vmatprep.subr.bf16.mxu0 %v5712_v17  ;;  %v280_v16 = vld [vmem:[#allocation5 + $0x2f8] sm:$0xff]  ;;  %v5609_v17 = vcombine.low %v348_v63, %v352_v0 }
 0x188   :  { %2572 = vmatprep.subr.bf16.mxu1 %v5458_v21  ;;  %v5538_v20 = vcombine.high %v276_v14, %v280_v16  ;;  %v332_v21 = vld [vmem:[#allocation5 + $0x498] sm:$0xff]  ;;  %v5537_v27 = vcombine.low %v276_v14, %v280_v16 }
 0x189   :  { %v5594_v28 = vcombine.high %v332_v21, %v336_v22  ;;  %v492_v63 = vld [vmem:[#allocation5 + $0x998] sm:$0xff] }
 0x18a   :  { %2530 = vmatpush1.bf16.msra.mxu0 %v5711_v24  ;;  %v268_v24 = vld [vmem:[#allocation5 + $0x298] sm:$0xff] }
 0x18b   :  { %2573 = vmatpush1.bf16.msra.mxu1 %v5457_v25  ;;  %2531 = vmatprep.subr.bf16.mxu0 %v5704_v26  ;;  %v272_v25 = vld [vmem:[#allocation5 + $0x2b8] sm:$0xff]  ;;  %v5601_v26 = vcombine.low %v340_v10, %v344_v11 }
 0x18c   :  { %2574 = vmatprep.subr.bf16.mxu1 %v5450_v30  ;;  %v5530_v29 = vcombine.high %v268_v24, %v272_v25  ;;  %v324_v30 = vld [vmem:[#allocation5 + $0x458] sm:$0xff] }
 0x18d   :  { %v5586_v39 = vcombine.high %v324_v30, %v328_v33  ;;  %v496_v0 = vld [vmem:[#allocation5 + $0x9b8] sm:$0xff] }
 0x18e   :  { %2532 = vmatpush1.bf16.msra.mxu0 %v5703_v34  ;;  %v260_v34 = vld [vmem:[#allocation5 + $0x258] sm:$0xff] }
 0x18f   :  { %2575 = vmatpush1.bf16.msra.mxu1 %v5449_v35  ;;  %2603 = vmatprep.subr.bf16.mxu0 %v5634_v37  ;;  %v264_v35 = vld [vmem:[#allocation5 + $0x278] sm:$0xff]  ;;  %v5593_v37 = vcombine.low %v332_v21, %v336_v22 }
 0x190   :  { %2576 = vmatprep.subr.bf16.mxu1 %v5570_v38  ;;  %v5529_v38 = vcombine.low %v268_v24, %v272_v25  ;;  %v5522_v40 = vcombine.high %v260_v34, %v264_v35  ;;  %v488_v10 = vld [vmem:[#allocation5 + $0x978] sm:$0xff] }
 0x191   :  { %v2207_v49 = vpop.f32.mrf.mxu0  ;;  %2550 = vmatmul.mubr.bf16.vlgmr.msra.gmra.mxu0 %v7134_v50  ;;  %v416_v21 = vld [vmem:[#allocation5 + $0x738] sm:$0xff] }
 0x192   :  { %v2208_v53 = vadd.f32 %v2207_v49, %v510_v15  ;;  %v2250_v54 = vpop.f32.mrf.mxu1  ;;  %2604 = vmatpush1.bf16.msra.mxu0 %v5633_v13  ;;  %2635 = vmatprep.mubr.bf16.mxu0 %v7114_v44  ;;  %v5617_v44 = vcombine.low %v356_v47, %v360_v48  ;;  %v256_v13 = vld [vmem:[#allocation5 + $0x238] sm:$0xff] }
 0x193   :  { %2577 = vmatpush2.bf16.msra.mxu1 %v5569_v56  ;;  %v7138_v57 = vpop.f32.mrf.mxu0  ;;  %2605 = vmatprep.subr.bf16.mxu0 %v5626_v45  ;;  %v5585_v56 = vcombine.low %v324_v30, %v328_v33  ;;  %v5521_v45 = vcombine.low %v260_v34, %v264_v35  ;;  %v436_v48 = vld [vmem:[#allocation5 + $0x7d8] sm:$0xff] }
 0x194   :  { %v7140_v61 = vadd.f32 %v2250_v54, %v2208_v53  ;;  %v7142_v62 = vpop.f32.mrf.mxu1  ;;  %2578 = vmatprep.subr.bf16.mxu1 %v5562_v46  ;;  %v5578_v46 = vcombine.high %v316_v42, %v320_v43  ;;  %v440_v49 = vld [vmem:[#allocation5 + $0x7f8] sm:$0xff]  ;;  %v5577_v53 = vcombine.low %v316_v42, %v320_v43 }
 0x195   :  { %v2211_v1 = vpop.f32.mrf.mxu0  ;;  %v476_v24 = vld [vmem:[#allocation5 + $0x918] sm:$0xff] }
 0x196   :  { %v2212_v4 = vadd.f32 %v2211_v1, %v510_v15  ;;  %2606 = vmatpush1.bf16.msra.mxu0 %v5625_v55  ;;  %v2254_v5 = vpop.f32.mrf.mxu1  ;;  %v252_v15 = vld [vmem:[#allocation5 + $0x218] sm:$0xff]  ;;  %v5698_v55 = vcombine.high %v436_v48, %v440_v49  ;;  %v5697_v1 = vcombine.low %v436_v48, %v440_v49 }
 0x197   :  { %2579 = vmatpush2.bf16.msra.mxu1 %v5561_v58  ;;  %2607 = vmatprep.subr.bf16.mxu0 %v5618_v60  ;;  %v5514_v47 = vcombine.high %v252_v15, %v256_v13  ;;  %v5513_v54 = vcombine.low %v252_v15, %v256_v13  ;;  %v5762_v58 = vcombine.high %v500_v51, %v504_v52  ;;  %v428_v60 = vld [vmem:[#allocation5 + $0x798] sm:$0xff]  ;;  %v7146_v2 = vpop.f32.mrf.mxu0  ;;  %v7157_v15 = vsub.s32 1, %v7125_v23 }
 0x198   :  { %v7144_v8 = vadd.f32 %v2254_v5, %v2212_v4  ;;  %2580 = vmatprep.subr.bf16.mxu1 %v5554_v59  ;;  %v432_v59 = vld [vmem:[#allocation5 + $0x7b8] sm:$0xff] }
 0x199   :  { %v5690_v4 = vcombine.high %v428_v60, %v432_v59  ;;  %v420_v5 = vld [vmem:[#allocation5 + $0x758] sm:$0xff]  ;;  %v5689_v14 = vcombine.low %v428_v60, %v432_v59  ;;  %v514_v52 = vrot.slane %v7130_v36, %v7157_v15 }
 0x19a   :  { %2608 = vmatpush1.bf16.msra.mxu0 %v5617_v44  ;;  %v5754_v44 = vcombine.high %v492_v63, %v496_v0  ;;  %v480_v25 = vld [vmem:[#allocation5 + $0x938] sm:$0xff] }
 0x19b   :  { %2581 = vmatpush2.bf16.msra.mxu1 %v5553_v6  ;;  %2609 = vmatprep.subr.bf16.mxu0 %v5610_v7  ;;  %v424_v6 = vld [vmem:[#allocation5 + $0x778] sm:$0xff]  ;;  %v5738_v30 = vcombine.high %v476_v24, %v480_v25 }
 0x19c   :  { %2582 = vmatprep.subr.bf16.mxu1 %v5546_v9  ;;  %v484_v9 = vld [vmem:[#allocation5 + $0x958] sm:$0xff] }
 0x19d   :  { %v404_v33 = vld [vmem:[#allocation5 + $0x6d8] sm:$0xff] }
 0x19e   :  { %2610 = vmatpush1.bf16.msra.mxu0 %v5609_v17  ;;  %v5753_v17 = vcombine.low %v492_v63, %v496_v0  ;;  %v408_v34 = vld [vmem:[#allocation5 + $0x6f8] sm:$0xff] }
 0x19f   :  { %2583 = vmatpush2.bf16.msra.mxu1 %v5545_v18  ;;  %2611 = vmatprep.subr.bf16.mxu0 %v5602_v19  ;;  %v5682_v18 = vcombine.high %v420_v5, %v424_v6  ;;  %v5746_v19 = vcombine.high %v484_v9, %v488_v10  ;;  %v468_v35 = vld [vmem:[#allocation5 + $0x8d8] sm:$0xff] }
 0x1a0   :  { %2584 = vmatprep.subr.bf16.mxu1 %v5538_v20  ;;  %v412_v20 = vld [vmem:[#allocation5 + $0x718] sm:$0xff] }
 0x1a1   :  { %v396_v42 = vld [vmem:[#allocation5 + $0x698] sm:$0xff] }
 0x1a2   :  { %2612 = vmatpush1.bf16.msra.mxu0 %v5601_v26  ;;  %v5745_v26 = vcombine.low %v484_v9, %v488_v10  ;;  %v400_v43 = vld [vmem:[#allocation5 + $0x6b8] sm:$0xff] }
 0x1a3   :  { %2585 = vmatpush2.bf16.msra.mxu1 %v5537_v27  ;;  %2613 = vmatprep.subr.bf16.mxu0 %v5594_v28  ;;  %v5674_v27 = vcombine.high %v412_v20, %v416_v21  ;;  %v460_v13 = vld [vmem:[#allocation5 + $0x898] sm:$0xff] }
 0x1a4   :  { %2586 = vmatprep.subr.bf16.mxu1 %v5530_v29  ;;  %v388_v49 = vld [vmem:[#allocation5 + $0x658] sm:$0xff] }
 0x1a5   :  { %v392_v51 = vld [vmem:[#allocation5 + $0x678] sm:$0xff] }
 0x1a6   :  { %2614 = vmatpush1.bf16.msra.mxu0 %v5593_v37  ;;  %v472_v37 = vld [vmem:[#allocation5 + $0x8f8] sm:$0xff]  ;;  %v5650_v59 = vcombine.high %v388_v49, %v392_v51 }
 0x1a7   :  { %2587 = vmatpush2.bf16.msra.mxu1 %v5529_v38  ;;  %2615 = vmatprep.subr.bf16.mxu0 %v5586_v39  ;;  %v5673_v38 = vcombine.low %v412_v20, %v416_v21  ;;  %v5666_v39 = vcombine.high %v404_v33, %v408_v34  ;;  %v380_v0 = vld [vmem:[#allocation5 + $0x618] sm:$0xff] }
 0x1a8   :  { %2588 = vmatprep.subr.bf16.mxu1 %v5522_v40  ;;  %v5730_v40 = vcombine.high %v468_v35, %v472_v37  ;;  %v6203_v20 = vld [vmem:[#allocation8 + $0xe4] ss:$16 sps:$4 sm:$0xff]  }
 0x1a9   :  { %v6206_v21 = vld [vmem:[#allocation8 + $0x2e4] ss:$16 sps:$4 sm:$0xff]  }
 0x1aa   :  { %2616 = vmatpush1.bf16.msra.mxu0 %v5585_v56  ;;  %v464_v56 = vld [vmem:[#allocation5 + $0x8b8] sm:$0xff] }
 0x1ab   :  { %2589 = vmatpush2.bf16.msra.mxu1 %v5521_v45  ;;  %2617 = vmatprep.subr.bf16.mxu0 %v5578_v46  ;;  %v5665_v45 = vcombine.low %v404_v33, %v408_v34  ;;  %v5729_v46 = vcombine.low %v468_v35, %v472_v37  ;;  %v5722_v48 = vcombine.high %v460_v13, %v464_v56  ;;  %v6216_v33 = vld [vmem:[#allocation8 + $0x2a0] ss:$16 sps:$4 sm:$0xff]   ;;  %v6221_v34 = vld [vmem:[#allocation8 + $0x84] ss:$16 sps:$4 sm:$0xff]  }
 0x1ac   :  { %2590 = vmatprep.subr.bf16.mxu1 %v5514_v47  ;;  %v5658_v47 = vcombine.high %v396_v42, %v400_v43  ;;  %v5721_v60 = vcombine.low %v460_v13, %v464_v56  ;;  %v6222_v35 = vld [vmem:[#allocation8 + $0x280] ss:$16 sps:$4 sm:$0xff]   ;;  %v6227_v37 = vld [vmem:[#allocation8 + $0x64] ss:$16 sps:$4 sm:$0xff]  }
 0x1ad   :  { %v6234_v13 = vld [vmem:[#allocation8 + $0x240] ss:$16 sps:$4 sm:$0xff]   ;;  %v6239_v56 = vld [vmem:[#allocation8 + $0x24] ss:$16 sps:$4 sm:$0xff]  }
 0x1ae   :  { %2618 = vmatpush1.bf16.msra.mxu0 %v5577_v53  ;;  %v452_v53 = vld [vmem:[#allocation5 + $0x858] sm:$0xff] }
 0x1af   :  { %2591 = vmatpush2.bf16.msra.mxu1 %v5513_v54  ;;  %2619 = vmatprep.subr.bf16.mxu0 %v5698_v55  ;;  %v456_v54 = vld [vmem:[#allocation5 + $0x878] sm:$0xff]  ;;  %v5657_v55 = vcombine.low %v396_v42, %v400_v43 }
 0x1b0   :  { %2646 = vmatprep.subr.bf16.mxu1 %v5762_v58  ;;  %v2214_v58 = vadd.f32 %v7146_v2, %v514_v52  ;;  %v5714_v63 = vcombine.high %v452_v53, %v456_v54  ;;  %v5713_v2 = vcombine.low %v452_v53, %v456_v54  ;;  %v6236_v42 = vld [vmem:[#allocation8 + $0x244] ss:$16 sps:$4 sm:$0xff]   ;;  %v6231_v43 = vld [vmem:[#allocation8 + $0x40] ss:$16 sps:$4 sm:$0xff]   ;;  %v521_v53 = vsub.s32 3, %v7125_v23 }
 0x1b1   :  { %v2293_v7 = vpop.f32.mrf.mxu0  ;;  %v6243_v54 = vld [vmem:[#allocation8] ss:$16 sps:$4 sm:$0xff]  }
 0x1b2   :  { %v2294_v11 = vadd.f32 %v2293_v7, %v7140_v61  ;;  %2593 = vmatmul.mubr.bf16.vlgmr.msra.gmra.mxu1 %v7117_v41  ;;  %2620 = vmatpush2.bf16.msra.mxu0 %v5697_v1  ;;  %v5681_v41 = vcombine.low %v420_v5, %v424_v6  ;;  %v384_v1 = vld [vmem:[#allocation5 + $0x638] sm:$0xff]  ;;  %v2256_v5 = vpop.f32.mrf.mxu1  ;;  %v5649_v7 = vcombine.low %v388_v49, %v392_v51 }
 0x1b3   :  { %2647 = vmatpush1.bf16.msra.mxu1 %v5761_v3  ;;  %v7150_v16 = vpop.f32.mrf.mxu0  ;;  %2621 = vmatprep.subr.bf16.mxu0 %v5690_v4  ;;  %v2210_v3 = vadd.f32 %v7138_v57, %v514_v52  ;;  %v444_v4 = vld [vmem:[#allocation5 + $0x818] sm:$0xff]  ;;  %v2257_v9 = vadd.f32 %v2256_v5, %v2214_v58  ;;  %v5642_v10 = vcombine.high %v380_v0, %v384_v1 }
 0x1b4   :  { %2648 = vmatprep.subr.bf16.mxu1 %v5754_v44  ;;  %2678 = vmatprep.mubr.bf16.mxu1 %v6986_v32  ;;  %v2689_v28 = vmax.f32 %v2294_v11, 0.0  ;;  %v448_v44 = vld [vmem:[#allocation5 + $0x838] sm:$0xff] }
 0x1b5   :  { %v2297_v22 = vpop.f32.mrf.mxu0  ;;  %v5706_v11 = vcombine.high %v444_v4, %v448_v44  ;;  %v6245_v49 = vld [vmem:[#allocation8 + $0x4] ss:$16 sps:$4 sm:$0xff]  }
 0x1b6   :  { %v2298_v61 = vadd.f32 %v2297_v22, %v7144_v8  ;;  %2622 = vmatpush2.bf16.msra.mxu0 %v5689_v14  ;;  %v5737_v8 = vcombine.low %v476_v24, %v480_v25  ;;  %v2253_v14 = vadd.f32 %v7142_v62, %v2210_v3  ;;  %v6201_v24 = vld [vmem:[#allocation8 + $0xe0] ss:$16 sps:$4 sm:$0xff]   ;;  %v6209_v62 = vld [vmem:[#allocation8 + $0xc4] ss:$16 sps:$4 sm:$0xff]  }
 0x1b7   :  { %2649 = vmatpush1.bf16.msra.mxu1 %v5753_v17  ;;  %2623 = vmatprep.subr.bf16.mxu0 %v5682_v18  ;;  %v2299_v6 = vpop.f32.mrf.mxu0  ;;  %v5641_v18 = vcombine.low %v380_v0, %v384_v1  ;;  %v6248_v52 = vld [vmem:[#allocation8 + $0x204] ss:$16 sps:$4 sm:$0xff]   ;;  %v6249_v0 = vld [vmem:[#allocation8 + $0x1e0] ss:$16 sps:$4 sm:$0xff]  }
 0x1b8   :  { %v2697_v29 = vmax.f32 %v2298_v61, 0.0  ;;  %2650 = vmatprep.subr.bf16.mxu1 %v5746_v19  ;;  %v2300_v17 = vadd.f32 %v2299_v6, %v2257_v9  ;;  %v2296_v57 = vadd.f32 %v7150_v16, %v2253_v14  ;;  %v5705_v19 = vcombine.low %v444_v4, %v448_v44  ;;  %v6204_v61 = vld [vmem:[#allocation8 + $0x2e0] ss:$16 sps:$4 sm:$0xff]   ;;  %v6251_v58 = vld [vmem:[#allocation8 + $0x1e4] ss:$16 sps:$4 sm:$0xff]  }
 0x1b9   :  { %v6207_v16 = vld [vmem:[#allocation8 + $0xc0] ss:$16 sps:$4 sm:$0xff]   ;;  %v6257_v3 = vld [vmem:[#allocation8 + $0x1c4] ss:$16 sps:$4 sm:$0xff]  }
 0x1ba   :  { %v7154_v32 = vpack.c.bf16 %v2697_v29, %v2689_v28  ;;  %2624 = vmatpush2.bf16.msra.mxu0 %v5681_v41  ;;  %v2698_v22 = vmax.f32 %v2300_v17, 0.0  ;;  %v2690_v25 = vmax.f32 %v2296_v57, 0.0  ;;  %v6212_v41 = vld [vmem:[#allocation8 + $0x2c4] ss:$16 sps:$4 sm:$0xff]   ;;  %v6252_v1 = vld [vmem:[#allocation8 + $0x3e0] ss:$16 sps:$4 sm:$0xff]  }
 0x1bb   :  { %2651 = vmatpush1.bf16.msra.mxu1 %v5745_v26  ;;  %2625 = vmatprep.subr.bf16.mxu0 %v5674_v27  ;;  %v6210_v27 = vld [vmem:[#allocation8 + $0x2c0] ss:$16 sps:$4 sm:$0xff]   ;;  %v6215_v28 = vld [vmem:[#allocation8 + $0xa4] ss:$16 sps:$4 sm:$0xff]  }
 0x1bc   :  { %2652 = vmatprep.subr.bf16.mxu1 %v5738_v30  ;;  %v7165_v26 = vpack.c.bf16 %v2698_v22, %v2690_v25  ;;  %v6218_v29 = vld [vmem:[#allocation8 + $0x2a4] ss:$16 sps:$4 sm:$0xff]   ;;  %v6213_v30 = vld [vmem:[#allocation8 + $0xa0] ss:$16 sps:$4 sm:$0xff]  }
 0x1bd   :  { %v6260_v44 = vld [vmem:[#allocation8 + $0x3c4] ss:$16 sps:$4 sm:$0xff]   ;;  %v6255_v9 = vld [vmem:[#allocation8 + $0x1c0] ss:$16 sps:$4 sm:$0xff]  }
 0x1be   :  { %2626 = vmatpush2.bf16.msra.mxu0 %v5673_v38  ;;  %v6230_v38 = vld [vmem:[#allocation8 + $0x264] ss:$16 sps:$4 sm:$0xff]  }
 0x1bf   :  { %2653 = vmatpush1.bf16.msra.mxu1 %v5737_v8  ;;  %2627 = vmatprep.subr.bf16.mxu0 %v5666_v39  ;;  %v6225_v8 = vld [vmem:[#allocation8 + $0x60] ss:$16 sps:$4 sm:$0xff]   ;;  %v6269_v25 = vld [vmem:[#allocation8 + $0x184] ss:$16 sps:$4 sm:$0xff]  }
 0x1c0   :  { %2654 = vmatprep.subr.bf16.mxu1 %v5730_v40  ;;  %v6228_v39 = vld [vmem:[#allocation8 + $0x260] ss:$16 sps:$4 sm:$0xff]   ;;  %v6233_v40 = vld [vmem:[#allocation8 + $0x44] ss:$16 sps:$4 sm:$0xff]  }
 0x1c2   :  { %2628 = vmatpush2.bf16.msra.mxu0 %v5665_v45 }
 0x1c3   :  { %2655 = vmatpush1.bf16.msra.mxu1 %v5729_v46  ;;  %2629 = vmatprep.subr.bf16.mxu0 %v5658_v47  ;;  %v6242_v46 = vld [vmem:[#allocation8 + $0x224] ss:$16 sps:$4 sm:$0xff]   ;;  %v6237_v47 = vld [vmem:[#allocation8 + $0x20] ss:$16 sps:$4 sm:$0xff]  }
 0x1c4   :  { %2656 = vmatprep.subr.bf16.mxu1 %v5722_v48  ;;  %v6240_v48 = vld [vmem:[#allocation8 + $0x220] ss:$16 sps:$4 sm:$0xff]  }
 0x1c6   :  { %2630 = vmatpush2.bf16.msra.mxu0 %v5657_v55  ;;  %v6246_v55 = vld [vmem:[#allocation8 + $0x200] ss:$16 sps:$4 sm:$0xff]  }
 0x1c7   :  { %2657 = vmatpush1.bf16.msra.mxu1 %v5721_v60  ;;  %2631 = vmatprep.subr.bf16.mxu0 %v5650_v59  ;;  %v6254_v59 = vld [vmem:[#allocation8 + $0x3e4] ss:$16 sps:$4 sm:$0xff]  }
 0x1c8   :  { %2658 = vmatprep.subr.bf16.mxu1 %v5714_v63  ;;  %v522_v63 = vrot.slane %v7130_v36, %v521_v53 }
 0x1ca   :  { %2632 = vmatpush2.bf16.msra.mxu0 %v5649_v7 }
 0x1cb   :  { %2659 = vmatpush1.bf16.msra.mxu1 %v5713_v2  ;;  %2633 = vmatprep.subr.bf16.mxu0 %v5642_v10  ;;  %v6258_v10 = vld [vmem:[#allocation8 + $0x3c0] ss:$16 sps:$4 sm:$0xff]  }
 0x1cc   :  { %2660 = vmatprep.subr.bf16.mxu1 %v5706_v11  ;;  %v6263_v11 = vld [vmem:[#allocation8 + $0x1a4] ss:$16 sps:$4 sm:$0xff]  }
 0x1ce   :  { %2634 = vmatpush2.bf16.msra.mxu0 %v5641_v18  ;;  %v6266_v18 = vld [vmem:[#allocation8 + $0x3a4] ss:$16 sps:$4 sm:$0xff]  }
 0x1cf   :  { %2661 = vmatpush1.bf16.msra.mxu1 %v5705_v19  ;;  %4271 = vmatprep.subr.bf16.mxu0 %v6203_v20 }
 0x1d0   :  { %4314 = vmatprep.subr.bf16.mxu1 %v6206_v21  ;;  %v6261_v21 = vld [vmem:[#allocation8 + $0x1a0] ss:$16 sps:$4 sm:$0xff]  }
 0x1d1   :  { %2636 = vmatmul.mubr.bf16.vlgmr.msra.gmra.mxu0 %v7120_v12  ;;  %v6224_v12 = vld [vmem:[#allocation8 + $0x284] ss:$16 sps:$4 sm:$0xff]  }
 0x1d2   :  { %2679 = vmatmul.mubr.bf16.vlgmr.msra.gmra.mxu1 %v7134_v50  ;;  %4272 = vmatpush1.bf16.msra.mxu0 %v6201_v24  ;;  %v6219_v50 = vld [vmem:[#allocation8 + $0x80] ss:$16 sps:$4 sm:$0xff]   ;;  %v7170_v45 = vpop.f32.mrf.mxu1 }
 0x1d3   :  { %4303 = vmatprep.mubr.bf16.mxu0 %v7165_v26  ;;  %4315 = vmatpush1.bf16.msra.mxu1 %v6204_v61  ;;  %v6264_v24 = vld [vmem:[#allocation8 + $0x3a0] ss:$16 sps:$4 sm:$0xff]  }
 0x1d4   :  { %4273 = vmatprep.subr.bf16.mxu0 %v6209_v62  ;;  %4316 = vmatprep.subr.bf16.mxu1 %v6212_v41  ;;  %v2338_v51 = vpop.f32.mrf.mxu1  ;;  %v6272_v41 = vld [vmem:[#allocation8 + $0x384] ss:$16 sps:$4 sm:$0xff]  }
 0x1d5   :  { %v2339_v6 = vadd.f32 %v2338_v51, %v522_v63  ;;  %v6288_v51 = vld [vmem:[#allocation8 + $0x320] ss:$16 sps:$4 sm:$0xff]  }
 0x1d6   :  { %4274 = vmatpush1.bf16.msra.mxu0 %v6207_v16  ;;  %v7173_v60 = vpop.f32.mrf.mxu1 }
 0x1d7   :  { %4317 = vmatpush1.bf16.msra.mxu1 %v6210_v27  ;;  %4275 = vmatprep.subr.bf16.mxu0 %v6215_v28  ;;  %v517_v27 = vsub.s32 2, %v7125_v23 }
 0x1d8   :  { %4318 = vmatprep.subr.bf16.mxu1 %v6218_v29  ;;  %v2342_v4 = vpop.f32.mrf.mxu1  ;;  %v6267_v29 = vld [vmem:[#allocation8 + $0x180] ss:$16 sps:$4 sm:$0xff]  }
 0x1d9   :  { %v2343_v19 = vadd.f32 %v2342_v4, %v522_v63  ;;  %v6302_v4 = vld [vmem:[#allocation8 + $0x4c4] ss:$16 sps:$4 sm:$0xff]  }
 0x1da   :  { %4276 = vmatpush1.bf16.msra.mxu0 %v6213_v30  ;;  %v6270_v30 = vld [vmem:[#allocation8 + $0x380] ss:$16 sps:$4 sm:$0xff]  }
 0x1db   :  { %4319 = vmatpush1.bf16.msra.mxu1 %v6216_v33  ;;  %4277 = vmatprep.subr.bf16.mxu0 %v6221_v34  ;;  %v6275_v33 = vld [vmem:[#allocation8 + $0x164] ss:$16 sps:$4 sm:$0xff]  }
 0x1dc   :  { %4320 = vmatprep.subr.bf16.mxu1 %v6224_v12 }
 0x1de   :  { %4278 = vmatpush1.bf16.msra.mxu0 %v6219_v50  ;;  %v6278_v50 = vld [vmem:[#allocation8 + $0x364] ss:$16 sps:$4 sm:$0xff]  }
 0x1df   :  { %4321 = vmatpush1.bf16.msra.mxu1 %v6222_v35  ;;  %4279 = vmatprep.subr.bf16.mxu0 %v6227_v37  ;;  %v518_v35 = vrot.slane %v7130_v36, %v517_v27  ;;  %v6287_v36 = vld [vmem:[#allocation8 + $0x124] ss:$16 sps:$4 sm:$0xff]  }
 0x1e0   :  { %4322 = vmatprep.subr.bf16.mxu1 %v6230_v38  ;;  %v6273_v38 = vld [vmem:[#allocation8 + $0x160] ss:$16 sps:$4 sm:$0xff]  }
 0x1e2   :  { %4280 = vmatpush1.bf16.msra.mxu0 %v6225_v8  ;;  %v6276_v8 = vld [vmem:[#allocation8 + $0x360] ss:$16 sps:$4 sm:$0xff]  }
 0x1e3   :  { %4323 = vmatpush1.bf16.msra.mxu1 %v6228_v39  ;;  %4281 = vmatprep.subr.bf16.mxu0 %v6233_v40  ;;  %v6281_v39 = vld [vmem:[#allocation8 + $0x144] ss:$16 sps:$4 sm:$0xff]  }
 0x1e4   :  { %4324 = vmatprep.subr.bf16.mxu1 %v6236_v42  ;;  %v6284_v40 = vld [vmem:[#allocation8 + $0x344] ss:$16 sps:$4 sm:$0xff]   ;;  %v2341_v42 = vadd.f32 %v7173_v60, %v518_v35  ;;  %v6291_v60 = vld [vmem:[#allocation8 + $0x100] ss:$16 sps:$4 sm:$0xff]  }
 0x1e6   :  { %4282 = vmatpush1.bf16.msra.mxu0 %v6231_v43  ;;  %v6279_v43 = vld [vmem:[#allocation8 + $0x140] ss:$16 sps:$4 sm:$0xff]  }
 0x1e7   :  { %4325 = vmatpush1.bf16.msra.mxu1 %v6234_v13  ;;  %4283 = vmatprep.subr.bf16.mxu0 %v6239_v56  ;;  %v6282_v13 = vld [vmem:[#allocation8 + $0x340] ss:$16 sps:$4 sm:$0xff]   ;;  %v2337_v56 = vadd.f32 %v7170_v45, %v518_v35 }
 0x1e8   :  { %4326 = vmatprep.subr.bf16.mxu1 %v6242_v46  ;;  %v6294_v45 = vld [vmem:[#allocation8 + $0x300] ss:$16 sps:$4 sm:$0xff]  }
 0x1e9   :  { %v6390_v35 = vld [vmem:[#allocation8 + $0x600] ss:$16 sps:$4 sm:$0xff]  }
 0x1ea   :  { %4284 = vmatpush1.bf16.msra.mxu0 %v6237_v47  ;;  %v6290_v47 = vld [vmem:[#allocation8 + $0x324] ss:$16 sps:$4 sm:$0xff]  }
 0x1eb   :  { %4327 = vmatpush1.bf16.msra.mxu1 %v6240_v48  ;;  %4285 = vmatprep.subr.bf16.mxu0 %v6245_v49  ;;  %v6285_v49 = vld [vmem:[#allocation8 + $0x120] ss:$16 sps:$4 sm:$0xff]  }
 0x1ec   :  { %4328 = vmatprep.subr.bf16.mxu1 %v6248_v52  ;;  %v6293_v52 = vld [vmem:[#allocation8 + $0x104] ss:$16 sps:$4 sm:$0xff]  }
 0x1ee   :  { %4286 = vmatpush1.bf16.msra.mxu0 %v6243_v54 }
 0x1ef   :  { %4329 = vmatpush1.bf16.msra.mxu1 %v6246_v55  ;;  %4287 = vmatprep.subr.bf16.mxu0 %v6251_v58  ;;  %v6296_v55 = vld [vmem:[#allocation8 + $0x304] ss:$16 sps:$4 sm:$0xff]  }
 0x1f0   :  { %4330 = vmatprep.subr.bf16.mxu1 %v6254_v59  ;;  %v6299_v59 = vld [vmem:[#allocation8 + $0x4e4] ss:$16 sps:$4 sm:$0xff]  }
 0x1f1   :  { %v7178_v5 = vpop.f32.mrf.mxu0 }
 0x1f2   :  { %v7180_v7 = vpop.f32.mrf.mxu1  ;;  %4288 = vmatpush2.bf16.msra.mxu0 %v6249_v0  ;;  %v2380_v48 = vadd.f32 %v7178_v5, %v2337_v56  ;;  %v6350_v0 = vld [vmem:[#allocation8 + $0x6e4] ss:$16 sps:$4 sm:$0xff]  }
 0x1f3   :  { %4331 = vmatpush2.bf16.msra.mxu1 %v6252_v1  ;;  %v2381_v2 = vpop.f32.mrf.mxu0  ;;  %4289 = vmatprep.subr.bf16.mxu0 %v6257_v3  ;;  %v6297_v3 = vld [vmem:[#allocation8 + $0x4e0] ss:$16 sps:$4 sm:$0xff]   ;;  %v6410_v56 = vld [vmem:[#allocation8 + $0x7a4] ss:$16 sps:$4 sm:$0xff]  }
 0x1f4   :  { %v2382_v14 = vadd.f32 %v2381_v2, %v2339_v6  ;;  %v2424_v17 = vpop.f32.mrf.mxu1  ;;  %4332 = vmatprep.subr.bf16.mxu1 %v6260_v44  ;;  %v2423_v58 = vadd.f32 %v7180_v7, %v2380_v48  ;;  %v6348_v44 = vld [vmem:[#allocation8 + $0x6e0] ss:$16 sps:$4 sm:$0xff]   ;;  %v6356_v6 = vld [vmem:[#allocation8 + $0x6c4] ss:$16 sps:$4 sm:$0xff]  }
 0x1f5   :  { %v2383_v57 = vpop.f32.mrf.mxu0  ;;  %v6300_v7 = vld [vmem:[#allocation8 + $0x4c0] ss:$16 sps:$4 sm:$0xff]  }
 0x1f6   :  { %v2426_v20 = vpop.f32.mrf.mxu1  ;;  %4290 = vmatpush2.bf16.msra.mxu0 %v6255_v9  ;;  %v2425_v61 = vadd.f32 %v2424_v17, %v2382_v14  ;;  %v2384_v46 = vadd.f32 %v2383_v57, %v2341_v42  ;;  %v2691_v1 = vmax.f32 %v2423_v58, 0.0  ;;  %v6305_v9 = vld [vmem:[#allocation8 + $0x4a4] ss:$16 sps:$4 sm:$0xff]   ;;  %v6354_v2 = vld [vmem:[#allocation8 + $0x6c0] ss:$16 sps:$4 sm:$0xff]  }
 0x1f7   :  { %4333 = vmatpush2.bf16.msra.mxu1 %v6258_v10  ;;  %v2385_v22 = vpop.f32.mrf.mxu0  ;;  %4291 = vmatprep.subr.bf16.mxu0 %v6263_v11  ;;  %v6362_v10 = vld [vmem:[#allocation8 + $0x6a4] ss:$16 sps:$4 sm:$0xff]   ;;  %v6303_v11 = vld [vmem:[#allocation8 + $0x4a0] ss:$16 sps:$4 sm:$0xff]  }
 0x1f8   :  { %v2386_v62 = vadd.f32 %v2385_v22, %v2343_v19  ;;  %4334 = vmatprep.subr.bf16.mxu1 %v6266_v18  ;;  %v2428_v16 = vpop.f32.mrf.mxu1  ;;  %v2692_v34 = vmax.f32 %v2425_v61, 0.0  ;;  %v2427_v54 = vadd.f32 %v2426_v20, %v2384_v46  ;;  %v6308_v14 = vld [vmem:[#allocation8 + $0x484] ss:$16 sps:$4 sm:$0xff]   ;;  %v6360_v17 = vld [vmem:[#allocation8 + $0x6a0] ss:$16 sps:$4 sm:$0xff]  }
 0x1f9   :  { %v6368_v18 = vld [vmem:[#allocation8 + $0x684] ss:$16 sps:$4 sm:$0xff]   ;;  %v6306_v57 = vld [vmem:[#allocation8 + $0x480] ss:$16 sps:$4 sm:$0xff]  }
 0x1fa   :  { %v2429_v28 = vadd.f32 %v2428_v16, %v2386_v62  ;;  %4292 = vmatpush2.bf16.msra.mxu0 %v6261_v21  ;;  %v2699_v63 = vmax.f32 %v2427_v54, 0.0  ;;  %v6311_v19 = vld [vmem:[#allocation8 + $0x464] ss:$16 sps:$4 sm:$0xff]   ;;  %v6366_v20 = vld [vmem:[#allocation8 + $0x680] ss:$16 sps:$4 sm:$0xff]  }
 0x1fb   :  { %4335 = vmatpush2.bf16.msra.mxu1 %v6264_v24  ;;  %4293 = vmatprep.subr.bf16.mxu0 %v6269_v25  ;;  %v6374_v21 = vld [vmem:[#allocation8 + $0x664] ss:$16 sps:$4 sm:$0xff]   ;;  %v6309_v22 = vld [vmem:[#allocation8 + $0x460] ss:$16 sps:$4 sm:$0xff]  }
 0x1fc   :  { %v2700_v12 = vmax.f32 %v2429_v28, 0.0  ;;  %4336 = vmatprep.subr.bf16.mxu1 %v6272_v41  ;;  %v7193_v5 = vpack.c.bf16 %v2699_v63, %v2691_v1  ;;  %v6314_v24 = vld [vmem:[#allocation8 + $0x444] ss:$16 sps:$4 sm:$0xff]   ;;  %v6372_v25 = vld [vmem:[#allocation8 + $0x660] ss:$16 sps:$4 sm:$0xff]  }
 0x1fd   :  { %v6380_v61 = vld [vmem:[#allocation8 + $0x644] ss:$16 sps:$4 sm:$0xff]   ;;  %v6312_v62 = vld [vmem:[#allocation8 + $0x440] ss:$16 sps:$4 sm:$0xff]  }
 0x1fe   :  { %v7186_v37 = vpack.c.bf16 %v2700_v12, %v2692_v34  ;;  %4294 = vmatpush2.bf16.msra.mxu0 %v6267_v29  ;;  %v6317_v41 = vld [vmem:[#allocation8 + $0x424] ss:$16 sps:$4 sm:$0xff]   ;;  %v6378_v16 = vld [vmem:[#allocation8 + $0x640] ss:$16 sps:$4 sm:$0xff]  }
 0x1ff   :  { %4337 = vmatpush2.bf16.msra.mxu1 %v6270_v30  ;;  %4295 = vmatprep.subr.bf16.mxu0 %v6275_v33  ;;  %v6386_v28 = vld [vmem:[#allocation8 + $0x624] ss:$16 sps:$4 sm:$0xff]   ;;  %v6315_v29 = vld [vmem:[#allocation8 + $0x420] ss:$16 sps:$4 sm:$0xff]  }
 0x200   :  { %4346 = vmatprep.mubr.bf16.mxu1 %v7186_v37  ;;  %4338 = vmatprep.subr.bf16.mxu1 %v6278_v50  ;;  %v6320_v30 = vld [vmem:[#allocation8 + $0x404] ss:$16 sps:$4 sm:$0xff]   ;;  %v6384_v33 = vld [vmem:[#allocation8 + $0x620] ss:$16 sps:$4 sm:$0xff]  }
 0x201   :  { %v6392_v34 = vld [vmem:[#allocation8 + $0x604] ss:$16 sps:$4 sm:$0xff]   ;;  %v6318_v12 = vld [vmem:[#allocation8 + $0x400] ss:$16 sps:$4 sm:$0xff]  }
 0x202   :  { %4296 = vmatpush2.bf16.msra.mxu0 %v6273_v38  ;;  %v6323_v50 = vld [vmem:[#allocation8 + $0x5e4] ss:$16 sps:$4 sm:$0xff]   ;;  %v6327_v46 = vld [vmem:[#allocation8 + $0x5a0] ss:$16 sps:$4 sm:$0xff]  }
 0x203   :  { %4339 = vmatpush2.bf16.msra.mxu1 %v6276_v8  ;;  %4297 = vmatprep.subr.bf16.mxu0 %v6281_v39  ;;  %v6398_v38 = vld [vmem:[#allocation8 + $0x7e4] ss:$16 sps:$4 sm:$0xff]   ;;  %v6321_v8 = vld [vmem:[#allocation8 + $0x5e0] ss:$16 sps:$4 sm:$0xff]  }
 0x204   :  { %4340 = vmatprep.subr.bf16.mxu1 %v6284_v40  ;;  %v6326_v39 = vld [vmem:[#allocation8 + $0x5c4] ss:$16 sps:$4 sm:$0xff]   ;;  %v6396_v40 = vld [vmem:[#allocation8 + $0x7e0] ss:$16 sps:$4 sm:$0xff]  }
 0x205   :  { %v6404_v42 = vld [vmem:[#allocation8 + $0x7c4] ss:$16 sps:$4 sm:$0xff]   ;;  %v6408_v48 = vld [vmem:[#allocation8 + $0x7a0] ss:$16 sps:$4 sm:$0xff]  }
 0x206   :  { %4298 = vmatpush2.bf16.msra.mxu0 %v6279_v43  ;;  %v6324_v43 = vld [vmem:[#allocation8 + $0x5c0] ss:$16 sps:$4 sm:$0xff]   ;;  %v6341_v1 = vld [vmem:[#allocation8 + $0x524] ss:$16 sps:$4 sm:$0xff]  }
 0x207   :  { %4341 = vmatpush2.bf16.msra.mxu1 %v6282_v13  ;;  %4299 = vmatprep.subr.bf16.mxu0 %v6287_v36  ;;  %v6329_v13 = vld [vmem:[#allocation8 + $0x5a4] ss:$16 sps:$4 sm:$0xff]   ;;  %v6402_v36 = vld [vmem:[#allocation8 + $0x7c0] ss:$16 sps:$4 sm:$0xff]  }
 0x208   :  { %4342 = vmatprep.subr.bf16.mxu1 %v6290_v47  ;;  %v6332_v47 = vld [vmem:[#allocation8 + $0x584] ss:$16 sps:$4 sm:$0xff]   ;;  %v6414_v54 = vld [vmem:[#allocation8 + $0x780] ss:$16 sps:$4 sm:$0xff]  }
 0x209   :  { %v6333_v58 = vld [vmem:[#allocation8 + $0x560] ss:$16 sps:$4 sm:$0xff]  }
 0x20a   :  { %4300 = vmatpush2.bf16.msra.mxu0 %v6285_v49  ;;  %v6416_v49 = vld [vmem:[#allocation8 + $0x784] ss:$16 sps:$4 sm:$0xff]   ;;  %v6336_v63 = vld [vmem:[#allocation8 + $0x540] ss:$16 sps:$4 sm:$0xff]  }
 0x20b   :  { %4343 = vmatpush2.bf16.msra.mxu1 %v6288_v51  ;;  %4301 = vmatprep.subr.bf16.mxu0 %v6293_v52  ;;  %v6330_v51 = vld [vmem:[#allocation8 + $0x580] ss:$16 sps:$4 sm:$0xff]   ;;  %v6335_v52 = vld [vmem:[#allocation8 + $0x564] ss:$16 sps:$4 sm:$0xff]  }
 0x20c   :  { %4344 = vmatprep.subr.bf16.mxu1 %v6296_v55  ;;  %v6422_v55 = vld [vmem:[#allocation8 + $0x764] ss:$16 sps:$4 sm:$0xff]  }
 0x20e   :  { %4302 = vmatpush2.bf16.msra.mxu0 %v6291_v60  ;;  %v6338_v60 = vld [vmem:[#allocation8 + $0x544] ss:$16 sps:$4 sm:$0xff]  }
 0x20f   :  { %4345 = vmatpush2.bf16.msra.mxu1 %v6294_v45  ;;  %4357 = vmatprep.subr.bf16.mxu0 %v6299_v59  ;;  %v6420_v45 = vld [vmem:[#allocation8 + $0x760] ss:$16 sps:$4 sm:$0xff]   ;;  %v6428_v59 = vld [vmem:[#allocation8 + $0x744] ss:$16 sps:$4 sm:$0xff]  }
 0x210   :  { %4400 = vmatprep.subr.bf16.mxu1 %v6350_v0 }
 0x211   :  { %4304 = vmatmul.mubr.bf16.vlgmr.msra.gmra.mxu0 %v7154_v32 }
 0x212   :  { %4347 = vmatmul.mubr.bf16.vlgmr.msra.gmra.mxu1 %v7193_v5  ;;  %4358 = vmatpush1.bf16.msra.mxu0 %v6297_v3  ;;  %v6426_v3 = vld [vmem:[#allocation8 + $0x740] ss:$16 sps:$4 sm:$0xff]  }
 0x213   :  { %4359 = vmatprep.subr.bf16.mxu0 %v6302_v4  ;;  %4401 = vmatpush1.bf16.msra.mxu1 %v6348_v44  ;;  %v6434_v4 = vld [vmem:[#allocation8 + $0x724] ss:$16 sps:$4 sm:$0xff]   ;;  %v6339_v44 = vld [vmem:[#allocation8 + $0x520] ss:$16 sps:$4 sm:$0xff]  }
 0x214   :  { %4402 = vmatprep.subr.bf16.mxu1 %v6356_v6 }
 0x216   :  { %4360 = vmatpush1.bf16.msra.mxu0 %v6300_v7  ;;  %v6344_v7 = vld [vmem:[#allocation8 + $0x504] ss:$16 sps:$4 sm:$0xff]  }
 0x217   :  { %4361 = vmatprep.subr.bf16.mxu0 %v6305_v9  ;;  %4403 = vmatpush1.bf16.msra.mxu1 %v6354_v2  ;;  %v6432_v9 = vld [vmem:[#allocation8 + $0x720] ss:$16 sps:$4 sm:$0xff]   ;;  %v529_v2 = vsub.s32 5, %v7125_v23 }
 0x218   :  { %4404 = vmatprep.subr.bf16.mxu1 %v6362_v10  ;;  %v6440_v10 = vld [vmem:[#allocation8 + $0x704] ss:$16 sps:$4 sm:$0xff]  }
 0x21a   :  { %4362 = vmatpush1.bf16.msra.mxu0 %v6303_v11  ;;  %v525_v11 = vsub.s32 4, %v7125_v23 }
 0x21b   :  { %4363 = vmatprep.subr.bf16.mxu0 %v6308_v14  ;;  %4405 = vmatpush1.bf16.msra.mxu1 %v6360_v17  ;;  %v6342_v17 = vld [vmem:[#allocation8 + $0x500] ss:$16 sps:$4 sm:$0xff]  }
 0x21c   :  { %4406 = vmatprep.subr.bf16.mxu1 %v6368_v18 }
 0x21e   :  { %4364 = vmatpush1.bf16.msra.mxu0 %v6306_v57  ;;  %v6347_v57 = vld [vmem:[#allocation8 + $0xec] ss:$16 sps:$4 sm:$0xff]  }
 0x21f   :  { %4365 = vmatprep.subr.bf16.mxu0 %v6311_v19  ;;  %4407 = vmatpush1.bf16.msra.mxu1 %v6366_v20  ;;  %v6438_v19 = vld [vmem:[#allocation8 + $0x700] ss:$16 sps:$4 sm:$0xff]   ;;  %v7199_v20 = vld [vmem:[#allocation7] sm:$0xff] }
 0x220   :  { %4408 = vmatprep.subr.bf16.mxu1 %v6374_v21  ;;  %v530_v21 = vrot.slane %v7199_v20, %v529_v2  ;;  %v6399_v2 = vld [vmem:[#allocation8 + $0x1c8] ss:$16 sps:$4 sm:$0xff]  }
 0x222   :  { %4366 = vmatpush1.bf16.msra.mxu0 %v6309_v22  ;;  %v6446_v22 = vld [vmem:[#allocation8 + $0x2ec] ss:$16 sps:$4 sm:$0xff]  }
 0x223   :  { %4367 = vmatprep.subr.bf16.mxu0 %v6314_v24  ;;  %4409 = vmatpush1.bf16.msra.mxu1 %v6372_v25  ;;  %v526_v24 = vrot.slane %v7199_v20, %v525_v11 }
 0x224   :  { %4410 = vmatprep.subr.bf16.mxu1 %v6380_v61 }
 0x226   :  { %4368 = vmatpush1.bf16.msra.mxu0 %v6312_v62 }
 0x227   :  { %4369 = vmatprep.subr.bf16.mxu0 %v6317_v41  ;;  %4411 = vmatpush1.bf16.msra.mxu1 %v6378_v16 }
 0x228   :  { %4412 = vmatprep.subr.bf16.mxu1 %v6386_v28 }
 0x22a   :  { %4370 = vmatpush1.bf16.msra.mxu0 %v6315_v29 }
 0x22b   :  { %4371 = vmatprep.subr.bf16.mxu0 %v6320_v30  ;;  %4413 = vmatpush1.bf16.msra.mxu1 %v6384_v33 }
 0x22c   :  { %4414 = vmatprep.subr.bf16.mxu1 %v6392_v34 }
 0x22e   :  { %4372 = vmatpush1.bf16.msra.mxu0 %v6318_v12 }
 0x22f   :  { %4373 = vmatprep.subr.bf16.mxu0 %v6323_v50  ;;  %4415 = vmatpush1.bf16.msra.mxu1 %v6390_v35 }
 0x230   :  { %4416 = vmatprep.subr.bf16.mxu1 %v6398_v38 }
 0x231   :  { %v2465_v0 = vpop.f32.mrf.mxu0 }
 0x232   :  { %4374 = vmatpush2.bf16.msra.mxu0 %v6321_v8  ;;  %v2508_v14 = vpop.f32.mrf.mxu1  ;;  %v2466_v16 = vadd.f32 %v2465_v0, %v526_v24  ;;  %v6377_v0 = vld [vmem:[#allocation8 + $0x4c] ss:$16 sps:$4 sm:$0xff]  }
 0x233   :  { %4375 = vmatprep.subr.bf16.mxu0 %v6326_v39  ;;  %4417 = vmatpush2.bf16.msra.mxu1 %v6396_v40  ;;  %v2467_v6 = vpop.f32.mrf.mxu0 }
 0x234   :  { %4418 = vmatprep.subr.bf16.mxu1 %v6404_v42  ;;  %v2510_v25 = vpop.f32.mrf.mxu1  ;;  %v2468_v62 = vadd.f32 %v2467_v6, %v530_v21  ;;  %v2509_v50 = vadd.f32 %v2508_v14, %v2466_v16  ;;  %v6395_v6 = vld [vmem:[#allocation8 + $0x1ec] ss:$16 sps:$4 sm:$0xff]   ;;  %v6405_v14 = vld [vmem:[#allocation8 + $0x1a8] ss:$16 sps:$4 sm:$0xff]  }
 0x235   :  { %v2469_v18 = vpop.f32.mrf.mxu0 }
 0x236   :  { %4376 = vmatpush2.bf16.msra.mxu0 %v6324_v43  ;;  %v2470_v41 = vadd.f32 %v2469_v18, %v526_v24  ;;  %v2512_v28 = vpop.f32.mrf.mxu1  ;;  %v2511_v34 = vadd.f32 %v2510_v25, %v2468_v62  ;;  %v6417_v25 = vld [vmem:[#allocation8 + $0x168] ss:$16 sps:$4 sm:$0xff]  }
 0x237   :  { %4377 = vmatprep.subr.bf16.mxu0 %v6329_v13  ;;  %4419 = vmatpush2.bf16.msra.mxu1 %v6402_v36  ;;  %v2471_v61 = vpop.f32.mrf.mxu0 }
 0x238   :  { %4420 = vmatprep.subr.bf16.mxu1 %v6410_v56  ;;  %v2472_v30 = vadd.f32 %v2471_v61, %v530_v21  ;;  %v2513_v12 = vadd.f32 %v2512_v28, %v2470_v41  ;;  %v2514_v35 = vpop.f32.mrf.mxu1  ;;  %v537_v21 = vsub.s32 7, %v7125_v23  ;;  %v6425_v61 = vld [vmem:[#allocation8 + $0x14c] ss:$16 sps:$4 sm:$0xff]   ;;  %v6423_v28 = vld [vmem:[#allocation8 + $0x148] ss:$16 sps:$4 sm:$0xff]  }
 0x23a   :  { %4378 = vmatpush2.bf16.msra.mxu0 %v6327_v46  ;;  %v2515_v8 = vadd.f32 %v2514_v35, %v2472_v30  ;;  %v538_v62 = vrot.slane %v7199_v20, %v537_v21  ;;  %v6431_v30 = vld [vmem:[#allocation8 + $0x12c] ss:$16 sps:$4 sm:$0xff]  }
 0x23b   :  { %4379 = vmatprep.subr.bf16.mxu0 %v6332_v47  ;;  %4421 = vmatpush2.bf16.msra.mxu1 %v6408_v48  ;;  %v6473_v21 = vld [vmem:[#allocation8 + $0x44c] ss:$16 sps:$4 sm:$0xff]  }
 0x23c   :  { %4422 = vmatprep.subr.bf16.mxu1 %v6416_v49  ;;  %v6345_v49 = vld [vmem:[#allocation8 + $0xe8] ss:$16 sps:$4 sm:$0xff]  }
 0x23e   :  { %4380 = vmatpush2.bf16.msra.mxu0 %v6330_v51 }
 0x23f   :  { %4381 = vmatprep.subr.bf16.mxu0 %v6335_v52  ;;  %4423 = vmatpush2.bf16.msra.mxu1 %v6414_v54  ;;  %v6353_v52 = vld [vmem:[#allocation8 + $0xcc] ss:$16 sps:$4 sm:$0xff]   ;;  %v6351_v54 = vld [vmem:[#allocation8 + $0xc8] ss:$16 sps:$4 sm:$0xff]  }
 0x240   :  { %4424 = vmatprep.subr.bf16.mxu1 %v6422_v55  ;;  %v6359_v55 = vld [vmem:[#allocation8 + $0xac] ss:$16 sps:$4 sm:$0xff]  }
 0x242   :  { %4382 = vmatpush2.bf16.msra.mxu0 %v6333_v58  ;;  %v6357_v58 = vld [vmem:[#allocation8 + $0xa8] ss:$16 sps:$4 sm:$0xff]  }
 0x243   :  { %4383 = vmatprep.subr.bf16.mxu0 %v6338_v60  ;;  %4425 = vmatpush2.bf16.msra.mxu1 %v6420_v45  ;;  %v6365_v60 = vld [vmem:[#allocation8 + $0x8c] ss:$16 sps:$4 sm:$0xff]   ;;  %v6363_v45 = vld [vmem:[#allocation8 + $0x88] ss:$16 sps:$4 sm:$0xff]  }
 0x244   :  { %4426 = vmatprep.subr.bf16.mxu1 %v6428_v59  ;;  %v6371_v59 = vld [vmem:[#allocation8 + $0x6c] ss:$16 sps:$4 sm:$0xff]  }
 0x246   :  { %4384 = vmatpush2.bf16.msra.mxu0 %v6336_v63  ;;  %v6369_v63 = vld [vmem:[#allocation8 + $0x68] ss:$16 sps:$4 sm:$0xff]  }
 0x247   :  { %4385 = vmatprep.subr.bf16.mxu0 %v6341_v1  ;;  %4427 = vmatpush2.bf16.msra.mxu1 %v6426_v3  ;;  %v6375_v1 = vld [vmem:[#allocation8 + $0x48] ss:$16 sps:$4 sm:$0xff]   ;;  %v6383_v3 = vld [vmem:[#allocation8 + $0x2c] ss:$16 sps:$4 sm:$0xff]  }
 0x248   :  { %4428 = vmatprep.subr.bf16.mxu1 %v6434_v4  ;;  %v6389_v4 = vld [vmem:[#allocation8 + $0xc] ss:$16 sps:$4 sm:$0xff]  }
 0x24a   :  { %4386 = vmatpush2.bf16.msra.mxu0 %v6339_v44  ;;  %v6387_v44 = vld [vmem:[#allocation8 + $0x8] ss:$16 sps:$4 sm:$0xff]  }
 0x24b   :  { %4387 = vmatprep.subr.bf16.mxu0 %v6344_v7  ;;  %4429 = vmatpush2.bf16.msra.mxu1 %v6432_v9  ;;  %v6393_v7 = vld [vmem:[#allocation8 + $0x1e8] ss:$16 sps:$4 sm:$0xff]   ;;  %v6401_v9 = vld [vmem:[#allocation8 + $0x1cc] ss:$16 sps:$4 sm:$0xff]  }
 0x24c   :  { %4430 = vmatprep.subr.bf16.mxu1 %v6440_v10  ;;  %v6407_v10 = vld [vmem:[#allocation8 + $0x1ac] ss:$16 sps:$4 sm:$0xff]  }
 0x24e   :  { %4388 = vmatpush2.bf16.msra.mxu0 %v6342_v17  ;;  %v6413_v17 = vld [vmem:[#allocation8 + $0x18c] ss:$16 sps:$4 sm:$0xff]  }
 0x24f   :  { %4443 = vmatprep.subr.bf16.mxu0 %v6347_v57  ;;  %4431 = vmatpush2.bf16.msra.mxu1 %v6438_v19  ;;  %v6411_v57 = vld [vmem:[#allocation8 + $0x188] ss:$16 sps:$4 sm:$0xff]   ;;  %v6419_v19 = vld [vmem:[#allocation8 + $0x16c] ss:$16 sps:$4 sm:$0xff]  }
 0x250   :  { %4486 = vmatprep.subr.bf16.mxu1 %v6446_v22  ;;  %v533_v22 = vsub.s32 6, %v7125_v23 }
 0x251   :  { %v2551_v29 = vpop.f32.mrf.mxu0 }
 0x252   :  { %v2552_v42 = vadd.f32 %v2551_v29, %v2509_v50  ;;  %v534_v41 = vrot.slane %v7199_v20, %v533_v22  ;;  %v6468_v22 = vld [vmem:[#allocation8 + $0x268] ss:$16 sps:$4 sm:$0xff]  }
 0x253   :  { %v2553_v33 = vpop.f32.mrf.mxu0 }
 0x254   :  { %v2554_v39 = vadd.f32 %v2553_v33, %v2511_v34  ;;  %v2693_v47 = vmax.f32 %v2552_v42, 0.0  ;;  %v6437_v42 = vld [vmem:[#allocation8 + $0x10c] ss:$16 sps:$4 sm:$0xff]  }
 0x255   :  { %v2555_v38 = vpop.f32.mrf.mxu0 }
 0x256   :  { %v2556_v40 = vadd.f32 %v2555_v38, %v2513_v12  ;;  %v2694_v56 = vmax.f32 %v2554_v39, 0.0  ;;  %v6429_v39 = vld [vmem:[#allocation8 + $0x128] ss:$16 sps:$4 sm:$0xff]  }
 0x257   :  { %v2557_v43 = vpop.f32.mrf.mxu0 }
 0x258   :  { %v2558_v13 = vadd.f32 %v2557_v43, %v2515_v8  ;;  %v2701_v36 = vmax.f32 %v2556_v40, 0.0 }
 0x25a   :  { %v2702_v46 = vmax.f32 %v2558_v13, 0.0  ;;  %v7205_v51 = vpack.c.bf16 %v2701_v36, %v2693_v47 }
 0x25c   :  { %v7203_v48 = vpack.c.bf16 %v2702_v46, %v2694_v56 }
 0x25e   :  { %4389 = vmatprep.mubr.bf16.mxu0 %v7203_v48 }
 0x25f   :  { %4390 = vmatmul.mubr.bf16.vlgmr.msra.gmra.mxu0 %v7205_v51 }
 0x260   :  { %4444 = vmatpush1.bf16.msra.mxu0 %v6345_v49  ;;  %4475 = vmatprep.mubr.bf16.mxu0 %v7165_v26  ;;  %v6381_v26 = vld [vmem:[#allocation8 + $0x28] ss:$16 sps:$4 sm:$0xff]  }
 0x261   :  { %4445 = vmatprep.subr.bf16.mxu0 %v6353_v52  ;;  %v6435_v52 = vld [vmem:[#allocation8 + $0x108] ss:$16 sps:$4 sm:$0xff]  }
 0x264   :  { %4446 = vmatpush1.bf16.msra.mxu0 %v6351_v54 }
 0x265   :  { %4447 = vmatprep.subr.bf16.mxu0 %v6359_v55  ;;  %v6443_v55 = vld [vmem:[#allocation8 + $0x4ec] ss:$16 sps:$4 sm:$0xff]  }
 0x268   :  { %4448 = vmatpush1.bf16.msra.mxu0 %v6357_v58 }
 0x269   :  { %4449 = vmatprep.subr.bf16.mxu0 %v6365_v60 }
 0x26c   :  { %4450 = vmatpush1.bf16.msra.mxu0 %v6363_v45 }
 0x26d   :  { %4451 = vmatprep.subr.bf16.mxu0 %v6371_v59 }
 0x270   :  { %4452 = vmatpush1.bf16.msra.mxu0 %v6369_v63 }
 0x271   :  { %4453 = vmatprep.subr.bf16.mxu0 %v6377_v0  ;;  %v6441_v0 = vld [vmem:[#allocation8 + $0x4e8] ss:$16 sps:$4 sm:$0xff]  }
 0x272   :  { %v2594_v11 = vpop.f32.mrf.mxu1 }
 0x273   :  { %v2595_v50 = vadd.f32 %v2594_v11, %v534_v41  ;;  %v6461_v11 = vld [vmem:[#allocation8 + $0x48c] ss:$16 sps:$4 sm:$0xff]  }
 0x274   :  { %4454 = vmatpush1.bf16.msra.mxu0 %v6375_v1  ;;  %v2596_v18 = vpop.f32.mrf.mxu1  ;;  %v6449_v1 = vld [vmem:[#allocation8 + $0x4cc] ss:$16 sps:$4 sm:$0xff]  }
 0x275   :  { %4455 = vmatprep.subr.bf16.mxu0 %v6383_v3  ;;  %v2597_v33 = vadd.f32 %v2596_v18, %v538_v62  ;;  %v6467_v18 = vld [vmem:[#allocation8 + $0x46c] ss:$16 sps:$4 sm:$0xff]  }
 0x276   :  { %v2598_v24 = vpop.f32.mrf.mxu1 }
 0x277   :  { %v2599_v35 = vadd.f32 %v2598_v24, %v534_v41  ;;  %v6471_v24 = vld [vmem:[#allocation8 + $0x448] ss:$16 sps:$4 sm:$0xff]  }
 0x278   :  { %4456 = vmatpush1.bf16.msra.mxu0 %v6381_v26  ;;  %v2600_v16 = vpop.f32.mrf.mxu1  ;;  %v6477_v41 = vld [vmem:[#allocation8 + $0x428] ss:$16 sps:$4 sm:$0xff]  }
 0x279   :  { %4457 = vmatprep.subr.bf16.mxu0 %v6389_v4  ;;  %v2601_v43 = vadd.f32 %v2600_v16, %v538_v62  ;;  %v6444_v4 = vld [vmem:[#allocation8 + $0x2e8] ss:$16 sps:$4 sm:$0xff]   ;;  %v6482_v16 = vld [vmem:[#allocation8 + $0x22c] ss:$16 sps:$4 sm:$0xff]  }
 0x27a   :  { %v6474_v62 = vld [vmem:[#allocation8 + $0x248] ss:$16 sps:$4 sm:$0xff]  }
 0x27c   :  { %4458 = vmatpush1.bf16.msra.mxu0 %v6387_v44 }
 0x27d   :  { %4459 = vmatprep.subr.bf16.mxu0 %v6395_v6  ;;  %v6447_v6 = vld [vmem:[#allocation8 + $0x4c8] ss:$16 sps:$4 sm:$0xff]  }
 0x280   :  { %4460 = vmatpush2.bf16.msra.mxu0 %v6393_v7  ;;  %v6452_v7 = vld [vmem:[#allocation8 + $0x2cc] ss:$16 sps:$4 sm:$0xff]  }
 0x281   :  { %4461 = vmatprep.subr.bf16.mxu0 %v6401_v9  ;;  %v6455_v9 = vld [vmem:[#allocation8 + $0x4ac] ss:$16 sps:$4 sm:$0xff]  }
 0x284   :  { %4462 = vmatpush2.bf16.msra.mxu0 %v6399_v2  ;;  %v6450_v2 = vld [vmem:[#allocation8 + $0x2c8] ss:$16 sps:$4 sm:$0xff]  }
 0x285   :  { %4463 = vmatprep.subr.bf16.mxu0 %v6407_v10  ;;  %v6458_v10 = vld [vmem:[#allocation8 + $0x2ac] ss:$16 sps:$4 sm:$0xff]  }
 0x288   :  { %4464 = vmatpush2.bf16.msra.mxu0 %v6405_v14  ;;  %v6459_v14 = vld [vmem:[#allocation8 + $0x488] ss:$16 sps:$4 sm:$0xff]  }
 0x289   :  { %4465 = vmatprep.subr.bf16.mxu0 %v6413_v17  ;;  %v6464_v17 = vld [vmem:[#allocation8 + $0x28c] ss:$16 sps:$4 sm:$0xff]  }
 0x28c   :  { %4466 = vmatpush2.bf16.msra.mxu0 %v6411_v57  ;;  %v6462_v57 = vld [vmem:[#allocation8 + $0x288] ss:$16 sps:$4 sm:$0xff]  }
 0x28d   :  { %4467 = vmatprep.subr.bf16.mxu0 %v6419_v19  ;;  %v6470_v19 = vld [vmem:[#allocation8 + $0x26c] ss:$16 sps:$4 sm:$0xff]  }
 0x290   :  { %4468 = vmatpush2.bf16.msra.mxu0 %v6417_v25  ;;  %v6476_v25 = vld [vmem:[#allocation8 + $0x24c] ss:$16 sps:$4 sm:$0xff]  }
 0x291   :  { %v2637_v29 = vpop.f32.mrf.mxu0  ;;  %4469 = vmatprep.subr.bf16.mxu0 %v6425_v61  ;;  %v6479_v61 = vld [vmem:[#allocation8 + $0x42c] ss:$16 sps:$4 sm:$0xff]  }
 0x292   :  { %v2680_v34 = vpop.f32.mrf.mxu1  ;;  %v2638_v20 = vadd.f32 %v2637_v29, %v2595_v50  ;;  %v6480_v29 = vld [vmem:[#allocation8 + $0x228] ss:$16 sps:$4 sm:$0xff]  }
 0x293   :  { %v2639_v12 = vpop.f32.mrf.mxu0  ;;  %v6489_v50 = vld [vmem:[#allocation8 + $0x5e8] ss:$16 sps:$4 sm:$0xff]  }
 0x294   :  { %v2640_v38 = vadd.f32 %v2639_v12, %v2597_v33  ;;  %v2682_v8 = vpop.f32.mrf.mxu1  ;;  %4470 = vmatpush2.bf16.msra.mxu0 %v6423_v28  ;;  %v2681_v58 = vadd.f32 %v2680_v34, %v2638_v20  ;;  %v6485_v28 = vld [vmem:[#allocation8 + $0x40c] ss:$16 sps:$4 sm:$0xff]   ;;  %v6486_v12 = vld [vmem:[#allocation8 + $0x208] ss:$16 sps:$4 sm:$0xff]  }
 0x295   :  { %v2641_v40 = vpop.f32.mrf.mxu0  ;;  %4471 = vmatprep.subr.bf16.mxu0 %v6431_v30  ;;  %v6483_v30 = vld [vmem:[#allocation8 + $0x408] ss:$16 sps:$4 sm:$0xff]   ;;  %v6488_v33 = vld [vmem:[#allocation8 + $0x20c] ss:$16 sps:$4 sm:$0xff]  }
 0x296   :  { %v2642_v13 = vadd.f32 %v2641_v40, %v2599_v35  ;;  %v2684_v36 = vpop.f32.mrf.mxu1  ;;  %v2683_v46 = vadd.f32 %v2682_v8, %v2640_v38  ;;  %v2695_v3 = vmax.f32 %v2681_v58, 0.0  ;;  %v6491_v34 = vld [vmem:[#allocation8 + $0x5ec] ss:$16 sps:$4 sm:$0xff]   ;;  %v6492_v8 = vld [vmem:[#allocation8 + $0x3e8] ss:$16 sps:$4 sm:$0xff]  }
 0x297   :  { %v2643_v56 = vpop.f32.mrf.mxu0  ;;  %v6494_v35 = vld [vmem:[#allocation8 + $0x3ec] ss:$16 sps:$4 sm:$0xff]   ;;  %v6501_v20 = vld [vmem:[#allocation8 + $0x5a8] ss:$16 sps:$4 sm:$0xff]  }
 0x298   :  { %v2685_v47 = vadd.f32 %v2684_v36, %v2642_v13  ;;  %v2644_v49 = vadd.f32 %v2643_v56, %v2601_v43  ;;  %4472 = vmatpush2.bf16.msra.mxu0 %v6429_v39  ;;  %v2686_v54 = vpop.f32.mrf.mxu1  ;;  %v2696_v45 = vmax.f32 %v2683_v46, 0.0  ;;  %v6497_v38 = vld [vmem:[#allocation8 + $0x5cc] ss:$16 sps:$4 sm:$0xff]   ;;  %v6495_v39 = vld [vmem:[#allocation8 + $0x5c8] ss:$16 sps:$4 sm:$0xff]  }
 0x299   :  { %4473 = vmatprep.subr.bf16.mxu0 %v6437_v42  ;;  %v6500_v40 = vld [vmem:[#allocation8 + $0x3cc] ss:$16 sps:$4 sm:$0xff]   ;;  %v6498_v43 = vld [vmem:[#allocation8 + $0x3c8] ss:$16 sps:$4 sm:$0xff]  }
 0x29a   :  { %v2687_v60 = vadd.f32 %v2686_v54, %v2644_v49  ;;  %v2703_v59 = vmax.f32 %v2685_v47, 0.0  ;;  %v6503_v42 = vld [vmem:[#allocation8 + $0x5ac] ss:$16 sps:$4 sm:$0xff]   ;;  %v6504_v56 = vld [vmem:[#allocation8 + $0x3a8] ss:$16 sps:$4 sm:$0xff]  }
 0x29b   :  { %v6506_v13 = vld [vmem:[#allocation8 + $0x3ac] ss:$16 sps:$4 sm:$0xff]   ;;  %v6507_v46 = vld [vmem:[#allocation8 + $0x588] ss:$16 sps:$4 sm:$0xff]  }
 0x29c   :  { %v2704_v63 = vmax.f32 %v2687_v60, 0.0  ;;  %4474 = vmatpush2.bf16.msra.mxu0 %v6435_v52  ;;  %v7217_v44 = vpack.c.bf16 %v2703_v59, %v2695_v3  ;;  %v6509_v36 = vld [vmem:[#allocation8 + $0x58c] ss:$16 sps:$4 sm:$0xff]   ;;  %v6510_v52 = vld [vmem:[#allocation8 + $0x388] ss:$16 sps:$4 sm:$0xff]  }
 0x29d   :  { %4529 = vmatprep.subr.bf16.mxu0 %v6443_v55  ;;  %v6512_v47 = vld [vmem:[#allocation8 + $0x38c] ss:$16 sps:$4 sm:$0xff]   ;;  %v6513_v54 = vld [vmem:[#allocation8 + $0x568] ss:$16 sps:$4 sm:$0xff]  }
 0x29e   :  { %v7214_v26 = vpack.c.bf16 %v2704_v63, %v2696_v45  ;;  %v6515_v49 = vld [vmem:[#allocation8 + $0x56c] ss:$16 sps:$4 sm:$0xff]   ;;  %v6516_v60 = vld [vmem:[#allocation8 + $0x368] ss:$16 sps:$4 sm:$0xff]  }
 0x29f   :  { %4476 = vmatmul.mubr.bf16.vlgmr.msra.gmra.mxu0 %v7154_v32  ;;  %v6453_v32 = vld [vmem:[#allocation8 + $0x4a8] ss:$16 sps:$4 sm:$0xff]   ;;  %v6518_v55 = vld [vmem:[#allocation8 + $0x36c] ss:$16 sps:$4 sm:$0xff]  }
 0x2a0   :  { %4530 = vmatpush1.bf16.msra.mxu0 %v6441_v0  ;;  %4561 = vmatprep.mubr.bf16.mxu0 %v7203_v48  ;;  %v6456_v48 = vld [vmem:[#allocation8 + $0x2a8] ss:$16 sps:$4 sm:$0xff]   ;;  %v6521_v58 = vld [vmem:[#allocation8 + $0x54c] ss:$16 sps:$4 sm:$0xff]  }
 0x2a1   :  { %4432 = vmatprep.mubr.bf16.mxu1 %v7214_v26  ;;  %4531 = vmatprep.subr.bf16.mxu0 %v6449_v1  ;;  %v6519_v45 = vld [vmem:[#allocation8 + $0x548] ss:$16 sps:$4 sm:$0xff]   ;;  %v6524_v59 = vld [vmem:[#allocation8 + $0x34c] ss:$16 sps:$4 sm:$0xff]  }
 0x2a2   :  { %4433 = vmatmul.mubr.bf16.vlgmr.msra.gmra.mxu1 %v7217_v44  ;;  %v6527_v63 = vld [vmem:[#allocation8 + $0x52c] ss:$16 sps:$4 sm:$0xff]   ;;  %v6522_v0 = vld [vmem:[#allocation8 + $0x348] ss:$16 sps:$4 sm:$0xff]  }
 0x2a3   :  { %4487 = vmatpush1.bf16.msra.mxu1 %v6444_v4  ;;  %4518 = vmatprep.mubr.bf16.mxu1 %v7186_v37  ;;  %v6465_v37 = vld [vmem:[#allocation8 + $0x468] ss:$16 sps:$4 sm:$0xff]   ;;  %v6530_v3 = vld [vmem:[#allocation8 + $0x32c] ss:$16 sps:$4 sm:$0xff]  }
 0x2a4   :  { %4532 = vmatpush1.bf16.msra.mxu0 %v6447_v6  ;;  %4488 = vmatprep.subr.bf16.mxu1 %v6452_v7  ;;  %v6525_v1 = vld [vmem:[#allocation8 + $0x528] ss:$16 sps:$4 sm:$0xff]   ;;  %v6533_v4 = vld [vmem:[#allocation8 + $0x50c] ss:$16 sps:$4 sm:$0xff]  }
 0x2a5   :  { %4533 = vmatprep.subr.bf16.mxu0 %v6455_v9  ;;  %v6528_v6 = vld [vmem:[#allocation8 + $0x328] ss:$16 sps:$4 sm:$0xff]   ;;  %v6536_v9 = vld [vmem:[#allocation8 + $0x30c] ss:$16 sps:$4 sm:$0xff]  }
 0x2a6   :  { %v6531_v7 = vld [vmem:[#allocation8 + $0x508] ss:$16 sps:$4 sm:$0xff]  }
 0x2a7   :  { %4489 = vmatpush1.bf16.msra.mxu1 %v6450_v2  ;;  %v6587_v2 = vld [vmem:[#allocation11 + $0x74] ss:$8 sps:$4 sm:$0xff]  }
 0x2a8   :  { %4534 = vmatpush1.bf16.msra.mxu0 %v6453_v32  ;;  %4490 = vmatprep.subr.bf16.mxu1 %v6458_v10  ;;  %v6534_v32 = vld [vmem:[#allocation8 + $0x308] ss:$16 sps:$4 sm:$0xff]   ;;  %v6539_v10 = vld [vmem:[#allocation8 + $0x6ec] ss:$16 sps:$4 sm:$0xff]  }
 0x2a9   :  { %4535 = vmatprep.subr.bf16.mxu0 %v6461_v11  ;;  %v6585_v11 = vld [vmem:[#allocation11 + $0x70] ss:$8 sps:$4 sm:$0xff]  }
 0x2ab   :  { %4491 = vmatpush1.bf16.msra.mxu1 %v6456_v48  ;;  %v6590_v48 = vld [vmem:[#allocation11 + $0x64] ss:$8 sps:$4 sm:$0xff]  }
 0x2ac   :  { %4536 = vmatpush1.bf16.msra.mxu0 %v6459_v14  ;;  %4492 = vmatprep.subr.bf16.mxu1 %v6464_v17  ;;  %v6537_v14 = vld [vmem:[#allocation8 + $0x6e8] ss:$16 sps:$4 sm:$0xff]   ;;  %v6542_v17 = vld [vmem:[#allocation8 + $0x6cc] ss:$16 sps:$4 sm:$0xff]  }
 0x2ad   :  { %4537 = vmatprep.subr.bf16.mxu0 %v6467_v18  ;;  %v6588_v18 = vld [vmem:[#allocation11 + $0x60] ss:$8 sps:$4 sm:$0xff]  }
 0x2af   :  { %4493 = vmatpush1.bf16.msra.mxu1 %v6462_v57  ;;  %v6593_v57 = vld [vmem:[#allocation11 + $0x54] ss:$8 sps:$4 sm:$0xff]  }
 0x2b0   :  { %4538 = vmatpush1.bf16.msra.mxu0 %v6465_v37  ;;  %4494 = vmatprep.subr.bf16.mxu1 %v6470_v19  ;;  %v6540_v37 = vld [vmem:[#allocation8 + $0x6c8] ss:$16 sps:$4 sm:$0xff]   ;;  %v6545_v19 = vld [vmem:[#allocation8 + $0x6ac] ss:$16 sps:$4 sm:$0xff]  }
 0x2b1   :  { %4539 = vmatprep.subr.bf16.mxu0 %v6473_v21  ;;  %v6591_v21 = vld [vmem:[#allocation11 + $0x50] ss:$8 sps:$4 sm:$0xff]  }
 0x2b3   :  { %4495 = vmatpush1.bf16.msra.mxu1 %v6468_v22  ;;  %v6596_v22 = vld [vmem:[#allocation11 + $0x44] ss:$8 sps:$4 sm:$0xff]  }
 0x2b4   :  { %4540 = vmatpush1.bf16.msra.mxu0 %v6471_v24  ;;  %4496 = vmatprep.subr.bf16.mxu1 %v6476_v25  ;;  %v6548_v24 = vld [vmem:[#allocation8 + $0x68c] ss:$16 sps:$4 sm:$0xff]  }
 0x2b5   :  { %4541 = vmatprep.subr.bf16.mxu0 %v6479_v61  ;;  %v6594_v25 = vld [vmem:[#allocation11 + $0x40] ss:$8 sps:$4 sm:$0xff]   ;;  %v6599_v61 = vld [vmem:[#allocation11 + $0x34] ss:$8 sps:$4 sm:$0xff]  }
 0x2b7   :  { %4497 = vmatpush1.bf16.msra.mxu1 %v6474_v62  ;;  %v6551_v62 = vld [vmem:[#allocation8 + $0x66c] ss:$16 sps:$4 sm:$0xff]  }
 0x2b8   :  { %4542 = vmatpush1.bf16.msra.mxu0 %v6477_v41  ;;  %4498 = vmatprep.subr.bf16.mxu1 %v6482_v16  ;;  %v6602_v41 = vld [vmem:[#allocation11 + $0x24] ss:$8 sps:$4 sm:$0xff]  }
 0x2b9   :  { %4543 = vmatprep.subr.bf16.mxu0 %v6485_v28  ;;  %v6549_v16 = vld [vmem:[#allocation8 + $0x668] ss:$16 sps:$4 sm:$0xff]   ;;  %v6554_v28 = vld [vmem:[#allocation8 + $0x64c] ss:$16 sps:$4 sm:$0xff]  }
 0x2bb   :  { %4499 = vmatpush1.bf16.msra.mxu1 %v6480_v29  ;;  %v6600_v29 = vld [vmem:[#allocation11 + $0x20] ss:$8 sps:$4 sm:$0xff]  }
 0x2bc   :  { %4544 = vmatpush1.bf16.msra.mxu0 %v6483_v30  ;;  %4500 = vmatprep.subr.bf16.mxu1 %v6488_v33  ;;  %v6605_v30 = vld [vmem:[#allocation11 + $0x14] ss:$8 sps:$4 sm:$0xff]  }
 0x2bd   :  { %4545 = vmatprep.subr.bf16.mxu0 %v6491_v34  ;;  %v6552_v33 = vld [vmem:[#allocation8 + $0x648] ss:$16 sps:$4 sm:$0xff]   ;;  %v6557_v34 = vld [vmem:[#allocation8 + $0x62c] ss:$16 sps:$4 sm:$0xff]  }
 0x2bf   :  { %4501 = vmatpush1.bf16.msra.mxu1 %v6486_v12  ;;  %v6603_v12 = vld [vmem:[#allocation11 + $0x10] ss:$8 sps:$4 sm:$0xff]  }
 0x2c0   :  { %4546 = vmatpush2.bf16.msra.mxu0 %v6489_v50  ;;  %4502 = vmatprep.subr.bf16.mxu1 %v6494_v35  ;;  %v6608_v50 = vld [vmem:[#allocation11 + $0x4] ss:$8 sps:$4 sm:$0xff]  }
 0x2c1   :  { %4547 = vmatprep.subr.bf16.mxu0 %v6497_v38  ;;  %v6555_v35 = vld [vmem:[#allocation8 + $0x628] ss:$16 sps:$4 sm:$0xff]   ;;  %v6560_v38 = vld [vmem:[#allocation8 + $0x60c] ss:$16 sps:$4 sm:$0xff]  }
 0x2c3   :  { %4503 = vmatpush2.bf16.msra.mxu1 %v6492_v8  ;;  %v6606_v8 = vld [vmem:[#allocation11] ss:$8 sps:$4 sm:$0xff]  }
 0x2c4   :  { %4548 = vmatpush2.bf16.msra.mxu0 %v6495_v39  ;;  %4504 = vmatprep.subr.bf16.mxu1 %v6500_v40  ;;  %v6611_v39 = vld [vmem:[#allocation11 + $0xf4] ss:$8 sps:$4 sm:$0xff]  }
 0x2c5   :  { %4549 = vmatprep.subr.bf16.mxu0 %v6503_v42  ;;  %v6558_v40 = vld [vmem:[#allocation8 + $0x608] ss:$16 sps:$4 sm:$0xff]   ;;  %v6563_v42 = vld [vmem:[#allocation8 + $0x7ec] ss:$16 sps:$4 sm:$0xff]  }
 0x2c7   :  { %4505 = vmatpush2.bf16.msra.mxu1 %v6498_v43  ;;  %v6609_v43 = vld [vmem:[#allocation11 + $0xf0] ss:$8 sps:$4 sm:$0xff]  }
 0x2c8   :  { %4550 = vmatpush2.bf16.msra.mxu0 %v6501_v20  ;;  %4506 = vmatprep.subr.bf16.mxu1 %v6506_v13  ;;  %v6614_v20 = vld [vmem:[#allocation11 + $0xe4] ss:$8 sps:$4 sm:$0xff]  }
 0x2c9   :  { %4551 = vmatprep.subr.bf16.mxu0 %v6509_v36  ;;  %v6561_v13 = vld [vmem:[#allocation8 + $0x7e8] ss:$16 sps:$4 sm:$0xff]   ;;  %v6566_v36 = vld [vmem:[#allocation8 + $0x7cc] ss:$16 sps:$4 sm:$0xff]  }
 0x2cb   :  { %4507 = vmatpush2.bf16.msra.mxu1 %v6504_v56  ;;  %v6612_v56 = vld [vmem:[#allocation11 + $0xe0] ss:$8 sps:$4 sm:$0xff]  }
 0x2cc   :  { %4552 = vmatpush2.bf16.msra.mxu0 %v6507_v46  ;;  %4508 = vmatprep.subr.bf16.mxu1 %v6512_v47  ;;  %v6617_v46 = vld [vmem:[#allocation11 + $0xd4] ss:$8 sps:$4 sm:$0xff]  }
 0x2cd   :  { %4553 = vmatprep.subr.bf16.mxu0 %v6515_v49  ;;  %v6564_v47 = vld [vmem:[#allocation8 + $0x7c8] ss:$16 sps:$4 sm:$0xff]   ;;  %v6569_v49 = vld [vmem:[#allocation8 + $0x7ac] ss:$16 sps:$4 sm:$0xff]  }
 0x2cf   :  { %4509 = vmatpush2.bf16.msra.mxu1 %v6510_v52  ;;  %v6615_v52 = vld [vmem:[#allocation11 + $0xd0] ss:$8 sps:$4 sm:$0xff]  }
 0x2d0   :  { %4554 = vmatpush2.bf16.msra.mxu0 %v6513_v54  ;;  %4510 = vmatprep.subr.bf16.mxu1 %v6518_v55  ;;  %v6620_v54 = vld [vmem:[#allocation11 + $0xc4] ss:$8 sps:$4 sm:$0xff]  }
 0x2d1   :  { %4555 = vmatprep.subr.bf16.mxu0 %v6521_v58  ;;  %v6567_v55 = vld [vmem:[#allocation8 + $0x7a8] ss:$16 sps:$4 sm:$0xff]   ;;  %v6572_v58 = vld [vmem:[#allocation8 + $0x78c] ss:$16 sps:$4 sm:$0xff]  }
 0x2d3   :  { %4511 = vmatpush2.bf16.msra.mxu1 %v6516_v60  ;;  %v6618_v60 = vld [vmem:[#allocation11 + $0xc0] ss:$8 sps:$4 sm:$0xff]  }
 0x2d4   :  { %4556 = vmatpush2.bf16.msra.mxu0 %v6519_v45  ;;  %4512 = vmatprep.subr.bf16.mxu1 %v6524_v59  ;;  %v6623_v45 = vld [vmem:[#allocation11 + $0xb4] ss:$8 sps:$4 sm:$0xff]  }
 0x2d5   :  { %4557 = vmatprep.subr.bf16.mxu0 %v6527_v63  ;;  %v6570_v59 = vld [vmem:[#allocation8 + $0x788] ss:$16 sps:$4 sm:$0xff]   ;;  %v6575_v63 = vld [vmem:[#allocation8 + $0x76c] ss:$16 sps:$4 sm:$0xff]  }
 0x2d7   :  { %4513 = vmatpush2.bf16.msra.mxu1 %v6522_v0  ;;  %v6621_v0 = vld [vmem:[#allocation11 + $0xb0] ss:$8 sps:$4 sm:$0xff]  }
 0x2d8   :  { %4558 = vmatpush2.bf16.msra.mxu0 %v6525_v1  ;;  %4514 = vmatprep.subr.bf16.mxu1 %v6530_v3  ;;  %v6626_v1 = vld [vmem:[#allocation11 + $0xa4] ss:$8 sps:$4 sm:$0xff]  }
 0x2d9   :  { %4559 = vmatprep.subr.bf16.mxu0 %v6533_v4  ;;  %v6573_v3 = vld [vmem:[#allocation8 + $0x768] ss:$16 sps:$4 sm:$0xff]   ;;  %v6578_v4 = vld [vmem:[#allocation8 + $0x74c] ss:$16 sps:$4 sm:$0xff]  }
 0x2db   :  { %4515 = vmatpush2.bf16.msra.mxu1 %v6528_v6  ;;  %v6624_v6 = vld [vmem:[#allocation11 + $0xa0] ss:$8 sps:$4 sm:$0xff]  }
 0x2dc   :  { %4560 = vmatpush2.bf16.msra.mxu0 %v6531_v7  ;;  %4516 = vmatprep.subr.bf16.mxu1 %v6536_v9  ;;  %v6629_v7 = vld [vmem:[#allocation11 + $0x94] ss:$8 sps:$4 sm:$0xff]  }
 0x2dd   :  { %5023 = vmatprep.subr.bf16.mxu0 %v6587_v2  ;;  %v6576_v9 = vld [vmem:[#allocation8 + $0x748] ss:$16 sps:$4 sm:$0xff]   ;;  %v6581_v2 = vld [vmem:[#allocation8 + $0x72c] ss:$16 sps:$4 sm:$0xff]  }
 0x2df   :  { %4517 = vmatpush2.bf16.msra.mxu1 %v6534_v32  ;;  %4562 = vmatmul.mubr.bf16.vlgmr.msra.gmra.mxu0 %v7205_v51  ;;  %v6543_v51 = vld [vmem:[#allocation8 + $0x6a8] ss:$16 sps:$4 sm:$0xff]   ;;  %v6627_v32 = vld [vmem:[#allocation11 + $0x90] ss:$8 sps:$4 sm:$0xff]  }
 0x2e0   :  { %4572 = vmatprep.subr.bf16.mxu1 %v6539_v10  ;;  %5024 = vmatpush1.bf16.msra.mxu0 %v6585_v11  ;;  %v6632_v10 = vld [vmem:[#allocation11 + $0x84] ss:$8 sps:$4 sm:$0xff]  }
 0x2e1   :  { %5025 = vmatprep.subr.bf16.mxu0 %v6590_v48  ;;  %v6579_v11 = vld [vmem:[#allocation8 + $0x728] ss:$16 sps:$4 sm:$0xff]   ;;  %v6584_v48 = vld [vmem:[#allocation8 + $0x70c] ss:$16 sps:$4 sm:$0xff]  }
 0x2e2   :  { %4519 = vmatmul.mubr.bf16.vlgmr.msra.gmra.mxu1 %v7193_v5  ;;  %v6546_v5 = vld [vmem:[#allocation8 + $0x688] ss:$16 sps:$4 sm:$0xff]  }
 0x2e3   :  { %4573 = vmatpush1.bf16.msra.mxu1 %v6537_v14  ;;  %4604 = vmatprep.mubr.bf16.mxu1 %v7214_v26  ;;  %v6597_v26 = vld [vmem:[#allocation11 + $0x30] ss:$8 sps:$4 sm:$0xff]   ;;  %v6630_v14 = vld [vmem:[#allocation11 + $0x80] ss:$8 sps:$4 sm:$0xff]  }
 0x2e4   :  { %4574 = vmatprep.subr.bf16.mxu1 %v6542_v17  ;;  %5026 = vmatpush1.bf16.msra.mxu0 %v6588_v18  ;;  %v6582_v17 = vld [vmem:[#allocation8 + $0x708] ss:$16 sps:$4 sm:$0xff]   ;;  %v6633_v18 = vld [vmem:[#allocation11 + $0x170] ss:$8 sps:$4 sm:$0xff]  }
 0x2e5   :  { %5027 = vmatprep.subr.bf16.mxu0 %v6593_v57  ;;  %v6635_v57 = vld [vmem:[#allocation11 + $0x174] ss:$8 sps:$4 sm:$0xff]  }
 0x2e7   :  { %4575 = vmatpush1.bf16.msra.mxu1 %v6540_v37  ;;  %v6638_v37 = vld [vmem:[#allocation11 + $0x164] ss:$8 sps:$4 sm:$0xff]  }
 0x2e8   :  { %4576 = vmatprep.subr.bf16.mxu1 %v6545_v19  ;;  %5028 = vmatpush1.bf16.msra.mxu0 %v6591_v21  ;;  %v6636_v19 = vld [vmem:[#allocation11 + $0x160] ss:$8 sps:$4 sm:$0xff]   ;;  %v6641_v21 = vld [vmem:[#allocation11 + $0x154] ss:$8 sps:$4 sm:$0xff]  }
 0x2e9   :  { %5029 = vmatprep.subr.bf16.mxu0 %v6596_v22  ;;  %v6639_v22 = vld [vmem:[#allocation11 + $0x150] ss:$8 sps:$4 sm:$0xff]  }
 0x2eb   :  { %4577 = vmatpush1.bf16.msra.mxu1 %v6543_v51  ;;  %v6644_v51 = vld [vmem:[#allocation11 + $0x144] ss:$8 sps:$4 sm:$0xff]  }
 0x2ec   :  { %4578 = vmatprep.subr.bf16.mxu1 %v6548_v24  ;;  %5030 = vmatpush1.bf16.msra.mxu0 %v6594_v25  ;;  %v6642_v24 = vld [vmem:[#allocation11 + $0x140] ss:$8 sps:$4 sm:$0xff]   ;;  %v6647_v25 = vld [vmem:[#allocation11 + $0x134] ss:$8 sps:$4 sm:$0xff]  }
 0x2ed   :  { %5031 = vmatprep.subr.bf16.mxu0 %v6599_v61  ;;  %v6645_v61 = vld [vmem:[#allocation11 + $0x130] ss:$8 sps:$4 sm:$0xff]  }
 0x2ef   :  { %4579 = vmatpush1.bf16.msra.mxu1 %v6546_v5  ;;  %v6648_v5 = vld [vmem:[#allocation11 + $0x120] ss:$8 sps:$4 sm:$0xff]  }
 0x2f0   :  { %4580 = vmatprep.subr.bf16.mxu1 %v6551_v62  ;;  %5032 = vmatpush1.bf16.msra.mxu0 %v6597_v26  ;;  %v6653_v62 = vld [vmem:[#allocation11 + $0x114] ss:$8 sps:$4 sm:$0xff]   ;;  %v6651_v26 = vld [vmem:[#allocation11 + $0x110] ss:$8 sps:$4 sm:$0xff]  }
 0x2f1   :  { %5033 = vmatprep.subr.bf16.mxu0 %v6602_v41  ;;  %v6656_v41 = vld [vmem:[#allocation11 + $0x104] ss:$8 sps:$4 sm:$0xff]  }
 0x2f3   :  { %4581 = vmatpush1.bf16.msra.mxu1 %v6549_v16  ;;  %v6654_v16 = vld [vmem:[#allocation11 + $0x100] ss:$8 sps:$4 sm:$0xff]  }
 0x2f4   :  { %4582 = vmatprep.subr.bf16.mxu1 %v6554_v28  ;;  %5034 = vmatpush1.bf16.msra.mxu0 %v6600_v29  ;;  %v6659_v28 = vld [vmem:[#allocation11 + $0x1f4] ss:$8 sps:$4 sm:$0xff]   ;;  %v6657_v29 = vld [vmem:[#allocation11 + $0x1f0] ss:$8 sps:$4 sm:$0xff]  }
 0x2f5   :  { %5035 = vmatprep.subr.bf16.mxu0 %v6605_v30  ;;  %v6662_v30 = vld [vmem:[#allocation11 + $0x1e4] ss:$8 sps:$4 sm:$0xff]  }
 0x2f7   :  { %4583 = vmatpush1.bf16.msra.mxu1 %v6552_v33  ;;  %v4305_v33 = vpop.f32.mrf.mxu0 }
 0x2f8   :  { %4584 = vmatprep.subr.bf16.mxu1 %v6557_v34  ;;  %5036 = vmatpush1.bf16.msra.mxu0 %v6603_v12  ;;  %v6660_v34 = vld [vmem:[#allocation11 + $0x1e0] ss:$8 sps:$4 sm:$0xff]   ;;  %v6665_v12 = vld [vmem:[#allocation11 + $0x1d4] ss:$8 sps:$4 sm:$0xff]  }
 0x2f9   :  { %5037 = vmatprep.subr.bf16.mxu0 %v6608_v50  ;;  %v4307_v50 = vpop.f32.mrf.mxu0 }
 0x2fb   :  { %4585 = vmatpush1.bf16.msra.mxu1 %v6555_v35  ;;  %v6663_v35 = vld [vmem:[#allocation11 + $0x1d0] ss:$8 sps:$4 sm:$0xff]  }
 0x2fc   :  { %4586 = vmatprep.subr.bf16.mxu1 %v6560_v38  ;;  %5038 = vmatpush1.bf16.msra.mxu0 %v6606_v8  ;;  %v6668_v38 = vld [vmem:[#allocation11 + $0x1c4] ss:$8 sps:$4 sm:$0xff]   ;;  %v4309_v8 = vpop.f32.mrf.mxu0 }
 0x2fd   :  { %5039 = vmatprep.subr.bf16.mxu0 %v6611_v39  ;;  %v4348_v39 = vpop.f32.mrf.mxu1 }
 0x2ff   :  { %4587 = vmatpush1.bf16.msra.mxu1 %v6558_v40  ;;  %v6666_v40 = vld [vmem:[#allocation11 + $0x1c0] ss:$8 sps:$4 sm:$0xff]  }
 0x300   :  { %4588 = vmatprep.subr.bf16.mxu1 %v6563_v42  ;;  %5040 = vmatpush2.bf16.msra.mxu0 %v6609_v43  ;;  %v6671_v42 = vld [vmem:[#allocation11 + $0x1b4] ss:$8 sps:$4 sm:$0xff]   ;;  %v4311_v43 = vpop.f32.mrf.mxu0 }
 0x301   :  { %5041 = vmatprep.subr.bf16.mxu0 %v6614_v20  ;;  %v4350_v20 = vpop.f32.mrf.mxu1 }
 0x303   :  { %4589 = vmatpush2.bf16.msra.mxu1 %v6561_v13 }
 0x304   :  { %4590 = vmatprep.subr.bf16.mxu1 %v6566_v36  ;;  %5042 = vmatpush2.bf16.msra.mxu0 %v6612_v56  ;;  %v6669_v36 = vld [vmem:[#allocation11 + $0x1b0] ss:$8 sps:$4 sm:$0xff]   ;;  %v7227_v56 = vld [vmem:[#allocation10] sm:$0xf] }
 0x305   :  { %5043 = vmatprep.subr.bf16.mxu0 %v6617_v46  ;;  %v2978_v46 = vrot.slane %v7227_v56, %v7157_v15 }
 0x307   :  { %4591 = vmatpush2.bf16.msra.mxu1 %v6564_v47  ;;  %v2974_v47 = vrot.slane %v7227_v56, %v7128_v31 }
 0x308   :  { %4592 = vmatprep.subr.bf16.mxu1 %v6569_v49  ;;  %5044 = vmatpush2.bf16.msra.mxu0 %v6615_v52  ;;  %v4352_v49 = vpop.f32.mrf.mxu1 }
 0x309   :  { %5045 = vmatprep.subr.bf16.mxu0 %v6620_v54  ;;  %v4308_v54 = vadd.f32 %v4307_v50, %v2978_v46  ;;  %v6689_v50 = vld [vmem:[#allocation14 + $0x58] sm:$0xff]  }
 0x30b   :  { %4593 = vmatpush2.bf16.msra.mxu1 %v6567_v55  ;;  %v4310_v55 = vadd.f32 %v4309_v8, %v2974_v47 }
 0x30c   :  { %4594 = vmatprep.subr.bf16.mxu1 %v6572_v58  ;;  %5046 = vmatpush2.bf16.msra.mxu0 %v6618_v60  ;;  %v4306_v58 = vadd.f32 %v4305_v33, %v2974_v47  ;;  %v4354_v60 = vpop.f32.mrf.mxu1  ;;  %v6686_v33 = vld [vmem:[#allocation14 + $0x28] sm:$0xff]  }
 0x30d   :  { %5047 = vmatprep.subr.bf16.mxu0 %v6623_v45 }
 0x30f   :  { %4595 = vmatpush2.bf16.msra.mxu1 %v6570_v59  ;;  %v4312_v59 = vadd.f32 %v4311_v43, %v2978_v46 }
 0x310   :  { %4596 = vmatprep.subr.bf16.mxu1 %v6575_v63  ;;  %5048 = vmatpush2.bf16.msra.mxu0 %v6621_v0  ;;  %v6674_v0 = vld [vmem:[#allocation11 + $0x1a4] ss:$8 sps:$4 sm:$0xff]  }
 0x311   :  { %5049 = vmatprep.subr.bf16.mxu0 %v6626_v1  ;;  %v4351_v1 = vadd.f32 %v4350_v20, %v4308_v54 }
 0x313   :  { %4597 = vmatpush2.bf16.msra.mxu1 %v6573_v3  ;;  %v4353_v3 = vadd.f32 %v4352_v49, %v4310_v55 }
 0x314   :  { %4598 = vmatprep.subr.bf16.mxu1 %v6578_v4  ;;  %5050 = vmatpush2.bf16.msra.mxu0 %v6624_v6  ;;  %v6672_v4 = vld [vmem:[#allocation11 + $0x1a0] ss:$8 sps:$4 sm:$0xff]   ;;  %v4349_v6 = vadd.f32 %v4348_v39, %v4306_v58 }
 0x315   :  { %5051 = vmatprep.subr.bf16.mxu0 %v6629_v7 }
 0x317   :  { %4599 = vmatpush2.bf16.msra.mxu1 %v6576_v9 }
 0x318   :  { %4600 = vmatprep.subr.bf16.mxu1 %v6581_v2  ;;  %5052 = vmatpush2.bf16.msra.mxu0 %v6627_v32  ;;  %v4355_v2 = vadd.f32 %v4354_v60, %v4312_v59 }
 0x319   :  { %5053 = vmatprep.subr.bf16.mxu0 %v6632_v10 }
 0x31b   :  { %4601 = vmatpush2.bf16.msra.mxu1 %v6579_v11 }
 0x31c   :  { %4602 = vmatprep.subr.bf16.mxu1 %v6584_v48  ;;  %5054 = vmatpush2.bf16.msra.mxu0 %v6630_v14  ;;  %v6677_v14 = vld [vmem:[#allocation11 + $0x194] ss:$8 sps:$4 sm:$0xff]  }
 0x31f   :  { %4603 = vmatpush2.bf16.msra.mxu1 %v6582_v17  ;;  %v4391_v13 = vpop.f32.mrf.mxu0 }
 0x320   :  { %5066 = vmatprep.subr.bf16.mxu1 %v6635_v57  ;;  %v4392_v11 = vadd.f32 %v4391_v13, %v4349_v6  ;;  %v2986_v13 = vrot.slane %v7227_v56, %v521_v53 }
 0x321   :  { %v4393_v52 = vpop.f32.mrf.mxu0 }
 0x322   :  { %4605 = vmatmul.mubr.bf16.vlgmr.msra.gmra.mxu1 %v7217_v44  ;;  %v6650_v44 = vld [vmem:[#allocation11 + $0x124] ss:$8 sps:$4 sm:$0xff]   ;;  %v4394_v32 = vadd.f32 %v4393_v52, %v4351_v1 }
 0x323   :  { %5067 = vmatpush1.bf16.msra.mxu1 %v6633_v18  ;;  %v4395_v45 = vpop.f32.mrf.mxu0 }
 0x324   :  { %5068 = vmatprep.subr.bf16.mxu1 %v6638_v37  ;;  %v4396_v10 = vadd.f32 %v4395_v45, %v4353_v3  ;;  %v6675_v37 = vld [vmem:[#allocation11 + $0x190] ss:$8 sps:$4 sm:$0xff]  }
 0x325   :  { %v4397_v7 = vpop.f32.mrf.mxu0 }
 0x326   :  { %v4398_v17 = vadd.f32 %v4397_v7, %v4355_v2 }
 0x327   :  { %5069 = vmatpush1.bf16.msra.mxu1 %v6636_v19 }
 0x328   :  { %5070 = vmatprep.subr.bf16.mxu1 %v6641_v21 }
 0x32b   :  { %5071 = vmatpush1.bf16.msra.mxu1 %v6639_v22 }
 0x32c   :  { %5072 = vmatprep.subr.bf16.mxu1 %v6644_v51 }
 0x32f   :  { %5073 = vmatpush1.bf16.msra.mxu1 %v6642_v24  ;;  %v6680_v24 = vld [vmem:[#allocation11 + $0x184] ss:$8 sps:$4 sm:$0xff]  }
 0x330   :  { %5074 = vmatprep.subr.bf16.mxu1 %v6647_v25 }
 0x333   :  { %5075 = vmatpush1.bf16.msra.mxu1 %v6645_v61 }
 0x334   :  { %5076 = vmatprep.subr.bf16.mxu1 %v6650_v44  ;;  %v6678_v44 = vld [vmem:[#allocation11 + $0x180] ss:$8 sps:$4 sm:$0xff]  }
 0x337   :  { %5077 = vmatpush1.bf16.msra.mxu1 %v6648_v5 }
 0x338   :  { %5078 = vmatprep.subr.bf16.mxu1 %v6653_v62 }
 0x33b   :  { %5079 = vmatpush1.bf16.msra.mxu1 %v6651_v26 }
 0x33c   :  { %5080 = vmatprep.subr.bf16.mxu1 %v6656_v41  ;;  %v6681_v41 = vld [vmem:[#allocation14 + $0x78] sm:$0xff]  }
 0x33d   :  { %6118 = vmatprep.subr.bf16.mxu0 %v6681_v41 }
 0x33f   :  { %5081 = vmatpush1.bf16.msra.mxu1 %v6654_v16  ;;  %v6682_v16 = vld [vmem:[#allocation14 + $0x38] sm:$0xff]  }
 0x340   :  { %5082 = vmatprep.subr.bf16.mxu1 %v6659_v28  ;;  %v6683_v28 = vld [vmem:[#allocation14 + $0x70] sm:$0xff]  }
 0x343   :  { %5083 = vmatpush2.bf16.msra.mxu1 %v6657_v29  ;;  %v6684_v29 = vld [vmem:[#allocation14 + $0x30] sm:$0xff]  }
 0x344   :  { %5084 = vmatprep.subr.bf16.mxu1 %v6662_v30  ;;  %v6685_v30 = vld [vmem:[#allocation14 + $0x68] sm:$0xff]  }
 0x347   :  { %5085 = vmatpush2.bf16.msra.mxu1 %v6660_v34  ;;  %v6687_v34 = vld [vmem:[#allocation14 + $0x60] sm:$0xff]  }
 0x348   :  { %5086 = vmatprep.subr.bf16.mxu1 %v6665_v12  ;;  %v6688_v12 = vld [vmem:[#allocation14 + $0x20] sm:$0xff]  }
 0x34b   :  { %5087 = vmatpush2.bf16.msra.mxu1 %v6663_v35  ;;  %v6690_v35 = vld [vmem:[#allocation14 + $0x18] sm:$0xff]  }
 0x34c   :  { %5088 = vmatprep.subr.bf16.mxu1 %v6668_v38 }
 0x34f   :  { %5089 = vmatpush2.bf16.msra.mxu1 %v6666_v40 }
 0x350   :  { %5090 = vmatprep.subr.bf16.mxu1 %v6671_v42 }
 0x353   :  { %5091 = vmatpush2.bf16.msra.mxu1 %v6669_v36  ;;  %v2982_v36 = vrot.slane %v7227_v56, %v517_v27 }
 0x354   :  { %5092 = vmatprep.subr.bf16.mxu1 %v6674_v0 }
 0x357   :  { %5093 = vmatpush2.bf16.msra.mxu1 %v6672_v4 }
 0x358   :  { %5094 = vmatprep.subr.bf16.mxu1 %v6677_v14 }
 0x35b   :  { %5095 = vmatpush2.bf16.msra.mxu1 %v6675_v37  ;;  %v6691_v37 = vld [vmem:[#allocation14 + $0x50] sm:$0xff]  }
 0x35c   :  { %5096 = vmatprep.subr.bf16.mxu1 %v6680_v24  ;;  %v6696_v24 = vld [vmem:[#allocation14] sm:$0xff]  }
 0x35f   :  { %5097 = vmatpush2.bf16.msra.mxu1 %v6678_v44  ;;  %v4477_v38 = vpop.f32.mrf.mxu0  ;;  %v6698_v44 = vld [vmem:[#allocation17 + $0x30] sm:$0xff]  }
 0x360   :  { %v4478_v54 = vadd.f32 %v4477_v38, %v2982_v36 }
 0x361   :  { %v4479_v8 = vpop.f32.mrf.mxu0 }
 0x362   :  { %v4434_v63 = vpop.f32.mrf.mxu1  ;;  %v4480_v49 = vadd.f32 %v4479_v8, %v2986_v13 }
 0x363   :  { %v4435_v19 = vadd.f32 %v4434_v63, %v4392_v11  ;;  %v4481_v39 = vpop.f32.mrf.mxu0 }
 0x364   :  { %v4436_v9 = vpop.f32.mrf.mxu1  ;;  %v4482_v52 = vadd.f32 %v4481_v39, %v2982_v36 }
 0x365   :  { %v4437_v18 = vadd.f32 %v4436_v9, %v4394_v32  ;;  %v4615_v5 = vmax.f32 %v4435_v19, 0.0  ;;  %v4483_v42 = vpop.f32.mrf.mxu0  ;;  %v6692_v19 = vld [vmem:[#allocation14 + $0x10] sm:$0xff]  }
 0x366   :  { %v4438_v48 = vpop.f32.mrf.mxu1  ;;  %v4484_v58 = vadd.f32 %v4483_v42, %v2986_v13 }
 0x367   :  { %v4439_v57 = vadd.f32 %v4438_v48, %v4396_v10  ;;  %v4616_v25 = vmax.f32 %v4437_v18, 0.0 }
 0x368   :  { %v4440_v21 = vpop.f32.mrf.mxu1 }
 0x369   :  { %v4441_v22 = vadd.f32 %v4440_v21, %v4398_v17  ;;  %v4619_v51 = vmax.f32 %v4439_v57, 0.0  ;;  %v6693_v21 = vld [vmem:[#allocation14 + $0x48] sm:$0xff]  }
 0x36b   :  { %v4620_v61 = vmax.f32 %v4441_v22, 0.0  ;;  %v4623_v26 = vpack.c.bf16 %v4619_v51, %v4615_v5  ;;  %v6694_v22 = vld [vmem:[#allocation14 + $0x8] sm:$0xff]   ;;  %v6695_v51 = vld [vmem:[#allocation14 + $0x40] sm:$0xff]  }
 0x36c   :  { %v6699_v5 = vld [vmem:[#allocation17 + $0x28] sm:$0xff]  }
 0x36d   :  { %v4624_v62 = vpack.c.bf16 %v4620_v61, %v4616_v25  ;;  %v6697_v25 = vld [vmem:[#allocation17 + $0x38] sm:$0xff]   ;;  %v6987_v61 = vmov 0.0  }
 0x36e   :  { %6149 = vmatprep.subr.bf16.mxu1 %v6987_v61 }
 0x36f   :  { %5055 = vmatprep.mubr.bf16.mxu0 %v4624_v62  ;;  %v6700_v62 = vld [vmem:[#allocation17 + $0x20] sm:$0xff]  }
 0x370   :  { %5056 = vmatmul.mubr.bf16.vlgmr.msra.gmra.mxu0 %v4623_v26 }
 0x371   :  { %6119 = vmatpush3.bf16.msra.mxu0 %v6682_v16  ;;  %v4691_v16 = vld [vmem:[#allocation13] sm:$0x3] }
 0x372   :  { %6120 = vmatprep.subr.bf16.mxu0 %v6683_v28 }
 0x375   :  { %6121 = vmatpush3.bf16.msra.mxu0 %v6684_v29  ;;  %v4700_v29 = vrot.slane %v4691_v16, %v7157_v15 }
 0x376   :  { %6122 = vmatprep.subr.bf16.mxu0 %v6685_v30  ;;  %v4696_v30 = vrot.slane %v4691_v16, %v7128_v31  ;;  %v6701_v31 = vld [vmem:[#allocation17 + $0x18] sm:$0xff]  }
 0x379   :  { %6123 = vmatpush3.bf16.msra.mxu0 %v6686_v33 }
 0x37a   :  { %6124 = vmatprep.subr.bf16.mxu0 %v6687_v34 }
 0x37d   :  { %6125 = vmatpush3.bf16.msra.mxu0 %v6688_v12 }
 0x37e   :  { %6126 = vmatprep.subr.bf16.mxu0 %v6689_v50 }
 0x381   :  { %6127 = vmatpush3.bf16.msra.mxu0 %v6690_v35 }
 0x382   :  { %6128 = vmatprep.subr.bf16.mxu0 %v6691_v37 }
 0x385   :  { %6129 = vmatpush3.bf16.msra.mxu0 %v6692_v19 }
 0x386   :  { %6130 = vmatprep.subr.bf16.mxu0 %v6693_v21 }
 0x389   :  { %6131 = vmatpush3.bf16.msra.mxu0 %v6694_v22 }
 0x38a   :  { %6132 = vmatprep.subr.bf16.mxu0 %v6695_v51 }
 0x38d   :  { %6133 = vmatpush3.bf16.msra.mxu0 %v6696_v24 }
 0x39f   :  { %v4563_v20 = vpop.f32.mrf.mxu0 }
 0x3a1   :  { %v4565_v47 = vpop.f32.mrf.mxu0 }
 0x3a2   :  { %v4520_v40 = vpop.f32.mrf.mxu1 }
 0x3a3   :  { %v4521_v59 = vadd.f32 %v4520_v40, %v4478_v54  ;;  %v4567_v63 = vpop.f32.mrf.mxu0  ;;  %v6702_v54 = vld [vmem:[#allocation17 + $0x10] sm:$0xff]  }
 0x3a4   :  { %v4522_v43 = vpop.f32.mrf.mxu1 }
 0x3a5   :  { %v4523_v60 = vadd.f32 %v4522_v43, %v4480_v49  ;;  %v4569_v6 = vpop.f32.mrf.mxu0  ;;  %v4564_v23 = vadd.f32 %v4563_v20, %v4521_v59 }
 0x3a6   :  { %v4524_v46 = vpop.f32.mrf.mxu1 }
 0x3a7   :  { %v4525_v45 = vadd.f32 %v4524_v46, %v4482_v52  ;;  %v4566_v4 = vadd.f32 %v4565_v47, %v4523_v60 }
 0x3a8   :  { %v4526_v55 = vpop.f32.mrf.mxu1 }
 0x3a9   :  { %v4527_v1 = vadd.f32 %v4526_v55, %v4484_v58  ;;  %v4568_v53 = vadd.f32 %v4567_v63, %v4525_v45  ;;  %v6703_v55 = vld [vmem:[#allocation17 + $0x8] sm:$0xff]   ;;  %v6704_v58 = vld [vmem:[#allocation17] sm:$0xff]   ;;  %v6083_v63 = vld [vmem:[#allocation16] ss:$0 sm:$0xff] }
 0x3ab   :  { %v4570_v9 = vadd.f32 %v4569_v6, %v4527_v1 }
 0x3e2   :  { %v4606_v0 = vpop.f32.mrf.mxu1 }
 0x3e3   :  { %v4607_v2 = vadd.f32 %v4606_v0, %v4564_v23 }
 0x3e4   :  { %v4608_v3 = vpop.f32.mrf.mxu1 }
 0x3e5   :  { %v4609_v27 = vadd.f32 %v4608_v3, %v4566_v4  ;;  %v4617_v17 = vmax.f32 %v4607_v2, 0.0 }
 0x3e6   :  { %v4610_v7 = vpop.f32.mrf.mxu1 }
 0x3e7   :  { %v4611_v56 = vadd.f32 %v4610_v7, %v4568_v53  ;;  %v4618_v48 = vmax.f32 %v4609_v27, 0.0 }
 0x3e8   :  { %v4612_v32 = vpop.f32.mrf.mxu1 }
 0x3e9   :  { %v4613_v10 = vadd.f32 %v4612_v32, %v4570_v9  ;;  %v4621_v11 = vmax.f32 %v4611_v56, 0.0  ;;  %v6100_v56 = vld [vmem:[#allocation19] ss:$0 sm:$0xff] }
 0x3eb   :  { %v4622_v14 = vmax.f32 %v4613_v10, 0.0  ;;  %v4625_v57 = vpack.c.bf16 %v4621_v11, %v4617_v17 }
 0x3ed   :  { %v4626_v18 = vpack.c.bf16 %v4622_v14, %v4618_v48 }
 0x3ef   :  { %5098 = vmatprep.mubr.bf16.mxu1 %v4626_v18 }
 0x3f0   :  { %5099 = vmatmul.mubr.bf16.vlgmr.msra.gmra.mxu1 %v4625_v57 }
 0x3f1   :  { %6150 = vmatpush3.bf16.msra.mxu1 %v6697_v25  ;;  %6165 = vmatprep.mubr.msk.bf16.mxu1 %vm6988_vm0, %v6987_v61 }
 0x3f2   :  { %6151 = vmatprep.subr.bf16.mxu1 %v6987_v61 }
 0x3f5   :  { %6152 = vmatpush3.bf16.msra.mxu1 %v6698_v44 }
 0x3f6   :  { %6153 = vmatprep.subr.bf16.mxu1 %v6987_v61 }
 0x3f9   :  { %6154 = vmatpush3.bf16.msra.mxu1 %v6699_v5 }
 0x3fa   :  { %6155 = vmatprep.subr.bf16.mxu1 %v6987_v61 }
 0x3fd   :  { %6156 = vmatpush3.bf16.msra.mxu1 %v6700_v62 }
 0x3fe   :  { %6157 = vmatprep.subr.bf16.mxu1 %v6987_v61 }
 0x401   :  { %6158 = vmatpush3.bf16.msra.mxu1 %v6701_v31 }
 0x402   :  { %6159 = vmatprep.subr.bf16.mxu1 %v6987_v61 }
 0x405   :  { %6160 = vmatpush3.bf16.msra.mxu1 %v6702_v54 }
 0x406   :  { %6161 = vmatprep.subr.bf16.mxu1 %v6987_v61 }
 0x409   :  { %6162 = vmatpush3.bf16.msra.mxu1 %v6703_v55 }
 0x40a   :  { %6163 = vmatprep.subr.bf16.mxu1 %v6987_v61 }
 0x40d   :  { %6164 = vmatpush3.bf16.msra.mxu1 %v6704_v58 }
 0x430   :  { %v5057_v26 = vpop.f32.mrf.mxu0 }
 0x431   :  { %v5058_v38 = vadd.f32 %v5057_v26, %v4696_v30 }
 0x432   :  { %v5059_v41 = vpop.f32.mrf.mxu0 }
 0x433   :  { %v5060_v50 = vadd.f32 %v5059_v41, %v4700_v29 }
 0x434   :  { %v5061_v28 = vpop.f32.mrf.mxu0 }
 0x435   :  { %v5062_v35 = vadd.f32 %v5061_v28, %v4696_v30 }
 0x436   :  { %v5063_v34 = vpop.f32.mrf.mxu0 }
 0x437   :  { %v5064_v39 = vadd.f32 %v5063_v34, %v4700_v29 }
 0x4b0   :  { %v5100_v33 = vpop.f32.mrf.mxu1 }
 0x4b1   :  { %v5101_v43 = vadd.f32 %v5100_v33, %v5058_v38 }
 0x4b2   :  { %v5102_v12 = vpop.f32.mrf.mxu1 }
 0x4b3   :  { %v5103_v40 = vadd.f32 %v5102_v12, %v5060_v50  ;;  %v5109_v49 = vmax.f32 %v5101_v43, 0.0 }
 0x4b4   :  { %v5104_v8 = vpop.f32.mrf.mxu1 }
 0x4b5   :  { %v5105_v42 = vadd.f32 %v5104_v8, %v5062_v35  ;;  %v5110_v46 = vmax.f32 %v5103_v40, 0.0 }
 0x4b6   :  { %v5106_v20 = vpop.f32.mrf.mxu1 }
 0x4b7   :  { %v5107_v13 = vadd.f32 %v5106_v20, %v5064_v39  ;;  %v5111_v36 = vmax.f32 %v5105_v42, 0.0 }
 0x4b9   :  { %v5112_v47 = vmax.f32 %v5107_v13, 0.0  ;;  %v5113_v52 = vpack.c.bf16 %v5111_v36, %v5109_v49 }
 0x4bb   :  { %v5114_v15 = vpack.c.bf16 %v5112_v47, %v5110_v46 }
 0x4bd   :  { %5282 = vmatprep.mubr.bf16.mxu0 %v5114_v15 }
 0x4be   :  { %5283 = vmatmul.mubr.bf16.vlgmr.msra.gmra.mxu0 %v5113_v52 }
 0x57e   :  { %v6134_v60 = vpop.f32.mrf.mxu0 }
 0x580   :  { %v6135_v45 = vpop.f32.mrf.mxu0 }
 0x581   :  { %v6136_v59 = vadd.f32 %v6135_v45, %v6134_v60 }
 0x582   :  { %v6137_v0 = vpop.f32.mrf.mxu0 }
 0x583   :  { %v5285_v3 = vadd.f32 %v6136_v59, %v6083_v63 }
 0x584   :  { %v6138_v1 = vpop.f32.mrf.mxu0 }
 0x585   :  { %v6139_v4 = vadd.f32 %v6138_v1, %v6137_v0  ;;  %v5291_v6 = vmax.f32 %v5285_v3, 0.0 }
 0x587   :  { %v5288_v53 = vadd.f32 %v6139_v4, %v6083_v63 }
 0x589   :  { %v5292_v23 = vmax.f32 %v5288_v53, 0.0 }
 0x58b   :  { %v5293_v7 = vpack.c.bf16 %v5292_v23, %v5291_v6 }
 0x58d   :  { %6166 = vmatmul.mubr.bf16.vlgmr.msra.gmra.mxu1 %v5293_v7 }
 0x64d   :  { %v5399_v27 = vpop.f32.mrf.mxu1 }
 0x64e   :  { %v5400_v32 = vadd.f32 %v6100_v56, %v5399_v27 }
 0x64f   :  { %v6167_v9 = vpop.f32.mrf.mxu1 }
 0x651   :  { %v5402_v2 = vpop.f32.mrf.mxu1 }
 0x652   :  { %v5403_v10 = vadd.f32 %v6100_v56, %v5402_v2 }
 0x653   :  { %v6168_v11 = vpop.f32.mrf.mxu1 }
 0x654   :  { %v6116_v48 = vpack.c.bf16 %v5403_v10, %v5400_v32 }
 0x656   :  { %6117 = vst [vmem:[#allocation20] sm:$0xff] %v6116_v48  }
 0x657   :  { %6942 = shalt.err (!%p6939_p3)
}
 0x658   :  { %5427 = dma.vmem_to_hbm [thread:$0]  %s5422_s10, 128, %s7258_s11, [#allocation4], %s6975_s20, %s6975_s20, %s6976_s21  }
 0x659   :  { %6963 = dma.done.wait [#allocation4], 128  }
 0x65a   :  { %6964 = vsyncadd [#allocation4], 4294967168 }
 0x65b   :  { %5431 = vsyncpa [#allocation3], 1 }
 0x65c   :  { %5432 = vsyncpa [#allocation6], 1 }
 0x65d   :  { %5433 = vsyncpa [#allocation9], 1 }
 0x65e   :  { %5434 = vsyncpa [#allocation12], 1 }
 0x65f   :  { %5435 = vsyncpa [#allocation15], 1 }
 0x660   :  { %5436 = vsyncpa [#allocation18], 1 }
 0x661   :  { %5437 = vsyncpa [#allocation4], 1 }

// kernel: tpu_custom_call.1
= control target key start
LH: loop header
LB: loop body
LE: loop exit
PB: predicated region body
PF: predicated region fallthrough
CT: control target
= control target key end

     0   :  { %16 = vsyncpa [#allocation3], 0  ;;  %s7247_s0 = inlined_call_operand.hbm [shape: bf16[16,640], index: 0, kind: input, shape index: {}]   ;;  %s7248_s1 = inlined_call_operand.hbm [shape: bf16[640,1024], index: 1, kind: input, shape index: {}]   ;;  %s7249_s2 = inlined_call_operand.hbm [shape: f32[1,1024], index: 2, kind: input, shape index: {}]   ;;  %s7250_s3 = inlined_call_operand.hbm [shape: bf16[1024,512], index: 3, kind: input, shape index: {}]   ;;  %s7251_s4 = inlined_call_operand.hbm [shape: f32[1,512], index: 4, kind: input, shape index: {}]   ;;  %s7252_s5 = inlined_call_operand.hbm [shape: bf16[512,256], index: 5, kind: input, shape index: {}]   ;;  %s7253_s6 = inlined_call_operand.hbm [shape: f32[1,256], index: 6, kind: input, shape index: {}]   ;;  %s7254_s7 = inlined_call_operand.hbm [shape: bf16[256,128], index: 7, kind: input, shape index: {}]   ;;  %s7255_s8 = inlined_call_operand.hbm [shape: f32[1,128], index: 8, kind: input, shape index: {}]   ;;  %s7256_s9 = inlined_call_operand.hbm [shape: bf16[128,128], index: 9, kind: input, shape index: {}]   ;;  %s7257_s10 = inlined_call_operand.hbm [shape: f32[1,128], index: 10, kind: input, shape index: {}]   ;;  %s7258_s11 = inlined_call_operand.hbm [shape: bf16[16,128], index: 11, kind: output, shape index: {}]  }
   0x1   :  { %17 = vsyncpa [#allocation6], 0 }
   0x2   :  { %18 = vsyncpa [#allocation9], 0 }
   0x3   :  { %19 = vsyncpa [#allocation12], 0 }
   0x4   :  { %20 = vsyncpa [#allocation15], 0 }
   0x5   :  { %21 = vsyncpa [#allocation18], 0 }
   0x6   :  { %22 = vsyncpa [#allocation4], 0  ;;  %s6965_s17 = smov [#allocation5]  }
   0x7   :  { %s40_s18 = sshll.u32 %s6965_s17, 4  ;;  %s41_s18 = int_to_ptr.vmem [resolvable:$true] %s40_s18 }
   0x8   :  { %s6719_s19 = scalar_lea.vmem %s41_s18, 40960  ;;  %p6724_p1 = scmp.lt.s32.totalorder %s41_s18, %s41_s18 }
   0x9   :  { %p6720_p0 = scmp.ne.s32.totalorder %s41_s18, %s6719_s19  ;;  %p6725_p2 = scmp.lt.s32.totalorder %s6719_s19, %s6719_s19 }
   0xb   :  { %p6726_p3 = por %p6725_p2, %p6724_p1 }
   0xd   :  { %p6727_p4 = pnand %p6726_p3, %p6720_p0 }
   0xf   :  { %6730 = shalt.err (!%p6727_p4)
}
  0x10   :  { %s6966_s20 = smov 512   ;;  %s6967_s21 = smov 32  }
  0x11   :  { %46 = dma.hbm_to_vmem [thread:$0]  %s7248_s1, 40960, %s41_s18, [#allocation6], %s6966_s20, %s6966_s20, %s6967_s21  }
  0x12   :  { %s6968_s24 = smov [#allocation8]  }
  0x13   :  { %s62_s25 = sshll.u32 %s6968_s24, 4  ;;  %s63_s25 = int_to_ptr.vmem [resolvable:$true] %s62_s25 }
  0x14   :  { %s6739_s26 = scalar_lea.vmem %s63_s25, 32768  ;;  %p6744_p6 = scmp.lt.s32.totalorder %s63_s25, %s63_s25 }
  0x15   :  { %p6740_p5 = scmp.ne.s32.totalorder %s63_s25, %s6739_s26  ;;  %p6745_p7 = scmp.lt.s32.totalorder %s6739_s26, %s6739_s26 }
  0x17   :  { %p6746_p8 = por %p6745_p7, %p6744_p6 }
  0x19   :  { %p6747_p9 = pnand %p6746_p8, %p6740_p5 }
  0x1b   :  { %6750 = shalt.err (!%p6747_p9)
}
  0x1c   :  { %s6969_s27 = smov 256   ;;  %s6970_s28 = smov 16  }
  0x1d   :  { %68 = dma.hbm_to_vmem [thread:$0]  %s7250_s3, 32768, %s63_s25, [#allocation9], %s6969_s27, %s6969_s27, %s6970_s28  }
  0x1e   :  { %s6971_s12 = smov [#allocation11]  }
  0x1f   :  { %s84_s13 = sshll.u32 %s6971_s12, 4  ;;  %s85_s13 = int_to_ptr.vmem [resolvable:$true] %s84_s13 }
  0x20   :  { %s6759_s1 = scalar_lea.vmem %s85_s13, 8192  ;;  %p6764_p11 = scmp.lt.s32.totalorder %s85_s13, %s85_s13 }
  0x21   :  { %p6760_p10 = scmp.ne.s32.totalorder %s85_s13, %s6759_s1  ;;  %p6765_p12 = scmp.lt.s32.totalorder %s6759_s1, %s6759_s1 }
  0x23   :  { %p6766_p13 = por %p6765_p12, %p6764_p11 }
  0x25   :  { %p6767_p0 = pnand %p6766_p13, %p6760_p10 }
  0x27   :  { %6770 = shalt.err (!%p6767_p0)
}
  0x28   :  { %s6972_s14 = smov 128   ;;  %s6973_s15 = smov 8  }
  0x29   :  { %90 = dma.hbm_to_vmem [thread:$0]  %s7252_s5, 8192, %s85_s13, [#allocation12], %s6972_s14, %s6972_s14, %s6973_s15  }
  0x2a   :  { %s6974_s18 = smov [#allocation14]  }
  0x2b   :  { %s106_s19 = sshll.u32 %s6974_s18, 4  ;;  %s107_s19 = int_to_ptr.vmem [resolvable:$true] %s106_s19 }
  0x2c   :  { %s6779_s3 = scalar_lea.vmem %s107_s19, 2048  ;;  %p6784_p2 = scmp.lt.s32.totalorder %s107_s19, %s107_s19 }
  0x2d   :  { %p6780_p1 = scmp.ne.s32.totalorder %s107_s19, %s6779_s3  ;;  %p6785_p3 = scmp.lt.s32.totalorder %s6779_s3, %s6779_s3 }
  0x2f   :  { %p6786_p4 = por %p6785_p3, %p6784_p2 }
  0x31   :  { %p6787_p5 = pnand %p6786_p4, %p6780_p1 }
  0x33   :  { %6790 = shalt.err (!%p6787_p5)
}
  0x34   :  { %s6975_s20 = smov 64   ;;  %s6976_s21 = smov 4  }
  0x35   :  { %112 = dma.hbm_to_vmem [thread:$0]  %s7254_s7, 2048, %s107_s19, [#allocation15], %s6975_s20, %s6975_s20, %s6976_s21  }
  0x36   :  { %s6977_s5 = smov [#allocation17]   ;;  %s6978_s25 = smov [#allocation2]  }
  0x37   :  { %s128_s24 = sshll.u32 %s6977_s5, 4  ;;  %s28_s26 = sshll.u32 %s6978_s25, 4  ;;  %s129_s24 = int_to_ptr.vmem [resolvable:$true] %s128_s24  ;;  %s29_s26 = int_to_ptr.vmem [resolvable:$true] %s28_s26 }
  0x38   :  { %s6799_s27 = scalar_lea.vmem %s129_s24, 1024  ;;  %p6804_p7 = scmp.lt.s32.totalorder %s129_s24, %s129_s24 }
  0x39   :  { %p6800_p6 = scmp.ne.s32.totalorder %s129_s24, %s6799_s27  ;;  %p6805_p8 = scmp.lt.s32.totalorder %s6799_s27, %s6799_s27 }
  0x3b   :  { %p6806_p9 = por %p6805_p8, %p6804_p7 }
  0x3d   :  { %p6807_p10 = pnand %p6806_p9, %p6800_p6 }
  0x3f   :  { %6810 = shalt.err (!%p6807_p10)
}
  0x40   :  { %134 = dma.hbm_to_vmem [thread:$0]  %s7256_s9, 1024, %s129_s24, [#allocation18], %s6975_s20, %s6975_s20, %s6976_s21  }
  0x41   :  { %s6819_s7 = scalar_lea.vmem %s29_s26, 640  ;;  %p6824_p12 = scmp.lt.s32.totalorder %s29_s26, %s29_s26 }
  0x42   :  { %p6820_p11 = scmp.ne.s32.totalorder %s29_s26, %s6819_s7  ;;  %p6825_p13 = scmp.lt.s32.totalorder %s6819_s7, %s6819_s7 }
  0x44   :  { %p6826_p0 = por %p6825_p13, %p6824_p12 }
  0x46   :  { %p6827_p1 = pnand %p6826_p0, %p6820_p11 }
  0x48   :  { %6830 = shalt.err (!%p6827_p1)
}
  0x49   :  { %s6979_s30 = smov 320   ;;  %s6980_s12 = smov 20  }
  0x4a   :  { %34 = dma.hbm_to_vmem [thread:$0]  %s7247_s0, 640, %s29_s26, [#allocation3], %s6979_s30, %s6979_s30, %s6980_s12  }
  0x4b   :  { %s6981_s14 = smov [#allocation7]   ;;  %s6982_s16 = smov [#allocation10]  }
  0x4c   :  { %s53_s15 = sshll.u32 %s6981_s14, 4  ;;  %s75_s17 = sshll.u32 %s6982_s16, 4  ;;  %s54_s15 = int_to_ptr.vmem [resolvable:$true] %s53_s15  ;;  %s76_s17 = int_to_ptr.vmem [resolvable:$true] %s75_s17 }
  0x4d   :  { %s6839_s9 = scalar_lea.vmem %s54_s15, 128  ;;  %p6844_p3 = scmp.lt.s32.totalorder %s54_s15, %s54_s15 }
  0x4e   :  { %p6840_p2 = scmp.ne.s32.totalorder %s54_s15, %s6839_s9  ;;  %p6845_p4 = scmp.lt.s32.totalorder %s6839_s9, %s6839_s9 }
  0x50   :  { %p6846_p5 = por %p6845_p4, %p6844_p3 }
  0x52   :  { %p6847_p6 = pnand %p6846_p5, %p6840_p2 }
  0x54   :  { %6850 = shalt.err (!%p6847_p6)
}
  0x55   :  { %56 = dma.hbm_to_vmem [thread:$0]  %s7249_s2, 128, %s54_s15, [#allocation6]  }
  0x56   :  { %s6859_s3 = scalar_lea.vmem %s76_s17, 64  ;;  %p6864_p8 = scmp.lt.s32.totalorder %s76_s17, %s76_s17 }
  0x57   :  { %p6860_p7 = scmp.ne.s32.totalorder %s76_s17, %s6859_s3  ;;  %p6865_p9 = scmp.lt.s32.totalorder %s6859_s3, %s6859_s3 }
  0x59   :  { %p6866_p10 = por %p6865_p9, %p6864_p8 }
  0x5b   :  { %p6867_p11 = pnand %p6866_p10, %p6860_p7 }
  0x5d   :  { %6870 = shalt.err (!%p6867_p11)
}
  0x5e   :  { %78 = dma.hbm_to_vmem [thread:$0]  %s7251_s4, 64, %s76_s17, [#allocation9]  }
  0x5f   :  { %s6983_s23 = smov [#allocation13]   ;;  %s6984_s24 = smov [#allocation16]  }
  0x60   :  { %s97_s5 = sshll.u32 %s6983_s23, 4  ;;  %s119_s25 = sshll.u32 %s6984_s24, 4  ;;  %s98_s5 = int_to_ptr.vmem [resolvable:$true] %s97_s5  ;;  %s120_s25 = int_to_ptr.vmem [resolvable:$true] %s119_s25 }
  0x61   :  { %s6879_s26 = scalar_lea.vmem %s98_s5, 32  ;;  %p6884_p13 = scmp.lt.s32.totalorder %s98_s5, %s98_s5 }
  0x62   :  { %p6880_p12 = scmp.ne.s32.totalorder %s98_s5, %s6879_s26  ;;  %p6885_p0 = scmp.lt.s32.totalorder %s6879_s26, %s6879_s26 }
  0x64   :  { %p6886_p1 = por %p6885_p0, %p6884_p13 }
  0x66   :  { %p6887_p2 = pnand %p6886_p1, %p6880_p12 }
  0x68   :  { %6890 = shalt.err (!%p6887_p2)
}
  0x69   :  { %100 = dma.hbm_to_vmem [thread:$0]  %s7253_s6, 32, %s98_s5, [#allocation12]  }
  0x6a   :  { %s6899_s28 = scalar_lea.vmem %s120_s25, 16  ;;  %s6903_s4 = scalar_lea.vmem %s120_s25, 32 }
  0x6b   :  { %p6900_p3 = scmp.ne.s32.totalorder %s120_s25, %s6899_s28  ;;  %p6904_p4 = scmp.lt.s32.totalorder %s120_s25, %s120_s25 }
  0x6c   :  { %p6905_p5 = scmp.lt.s32.totalorder %s6903_s4, %s6899_s28 }
  0x6e   :  { %p6906_p6 = por %p6905_p5, %p6904_p4 }
  0x70   :  { %p6907_p7 = pnand %p6906_p6, %p6900_p3 }
  0x72   :  { %6910 = shalt.err (!%p6907_p7)
}
  0x73   :  { %122 = dma.hbm_to_vmem [thread:$0]  %s7255_s8, 16, %s120_s25, [#allocation15]  }
  0x74   :  { %s6985_s30 = smov [#allocation19]  }
  0x75   :  { %s141_s12 = sshll.u32 %s6985_s30, 4  ;;  %s142_s12 = int_to_ptr.vmem [resolvable:$true] %s141_s12 }
  0x76   :  { %s6919_s13 = scalar_lea.vmem %s142_s12, 16  ;;  %s6923_s1 = scalar_lea.vmem %s142_s12, 32 }
  0x77   :  { %p6920_p8 = scmp.ne.s32.totalorder %s142_s12, %s6919_s13  ;;  %p6924_p9 = scmp.lt.s32.totalorder %s142_s12, %s142_s12 }
  0x78   :  { %p6925_p10 = scmp.lt.s32.totalorder %s6923_s1, %s6919_s13 }
  0x7a   :  { %p6926_p11 = por %p6925_p10, %p6924_p9 }
  0x7c   :  { %p6927_p12 = pnand %p6926_p11, %p6920_p8 }
  0x7e   :  { %6930 = shalt.err (!%p6927_p12)
}
  0x7f   :  { %144 = dma.hbm_to_vmem [thread:$0]  %s7257_s10, 16, %s142_s12, [#allocation18]  }
  0x80   :  { %6951 = dma.done.wait [#allocation3], 640  }
  0x81   :  { %6952 = vsyncadd [#allocation3], 4294966656 }
  0x82   :  { %6953 = dma.done.wait [#allocation6], 41088  }
  0x83   :  { %6954 = vsyncadd [#allocation6], 4294926208 }
  0x84   :  { %6955 = dma.done.wait [#allocation9], 32832  }
  0x85   :  { %6956 = vsyncadd [#allocation9], 4294934464 }
  0x86   :  { %6957 = dma.done.wait [#allocation12], 8224  }
  0x87   :  { %6958 = vsyncadd [#allocation12], 4294959072 }
  0x88   :  { %6959 = dma.done.wait [#allocation15], 2064  }
  0x89   :  { %6960 = vsyncadd [#allocation15], 4294965232 }
  0x8a   :  { %6961 = dma.done.wait [#allocation18], 1040  }
  0x8b   :  { %6962 = vsyncadd [#allocation18], 4294966256  ;;  %v241_v0 = vld [vmem:[#allocation5 + $0x1c0] sm:$0xff]  ;;  %v7089_v56 = vld [vmem:[#allocation2 + $0x4] ss:$20 sps:$4 sm:$0xff]   ;;  %vm6988_vm0 = vmmov 0  }
  0x8c   :  { %v245_v1 = vld [vmem:[#allocation5 + $0x1e0] sm:$0xff]  ;;  %2205 = vmatprep.mubr.bf16.mxu0 %v7089_v56  ;;  %s6989_s8 = smov [#allocation20]  }
  0x8d   :  { %v369_v2 = vld [vmem:[#allocation5 + $0x5c0] sm:$0xff]  ;;  %v5500_v3 = vcombine.high %v241_v0, %v245_v1  ;;  %v5499_v5 = vcombine.low %v241_v0, %v245_v1  ;;  %s5421_s10 = sshll.u32 %s6989_s8, 4  ;;  %s5422_s10 = int_to_ptr.vmem [resolvable:$true] %s5421_s10 }
  0x8e   :  { %v373_v4 = vld [vmem:[#allocation5 + $0x5e0] sm:$0xff]  ;;  %s6931_s15 = scalar_lea.vmem %s5422_s10, 128  ;;  %p6936_p0 = scmp.lt.s32.totalorder %s5422_s10, %s5422_s10 }
  0x8f   :  { %v233_v6 = vld [vmem:[#allocation5 + $0x180] sm:$0xff]  ;;  %v5628_v8 = vcombine.high %v369_v2, %v373_v4  ;;  %v5627_v9 = vcombine.low %v369_v2, %v373_v4  ;;  %2173 = vmatprep.subr.bf16.mxu0 %v5500_v3  ;;  %p6932_p13 = scmp.ne.s32.totalorder %s5422_s10, %s6931_s15  ;;  %p6937_p1 = scmp.lt.s32.totalorder %s6931_s15, %s6931_s15 }
  0x90   :  { %v237_v7 = vld [vmem:[#allocation5 + $0x1a0] sm:$0xff]  ;;  %2174 = vmatpush1.bf16.msra.mxu0 %v5499_v5 }
  0x91   :  { %v5492_v10 = vcombine.high %v233_v6, %v237_v7  ;;  %v361_v11 = vld [vmem:[#allocation5 + $0x580] sm:$0xff]  ;;  %2216 = vmatprep.subr.bf16.mxu1 %v5628_v8  ;;  %v5491_v18 = vcombine.low %v233_v6, %v237_v7  ;;  %p6938_p2 = por %p6937_p1, %p6936_p0 }
  0x92   :  { %v365_v12 = vld [vmem:[#allocation5 + $0x5a0] sm:$0xff]  ;;  %2217 = vmatpush1.bf16.msra.mxu1 %v5627_v9 }
  0x93   :  { %v225_v13 = vld [vmem:[#allocation5 + $0x140] sm:$0xff]  ;;  %v5620_v14 = vcombine.high %v361_v11, %v365_v12  ;;  %2175 = vmatprep.subr.bf16.mxu0 %v5492_v10  ;;  %v5619_v19 = vcombine.low %v361_v11, %v365_v12  ;;  %p6939_p3 = pnand %p6938_p2, %p6932_p13 }
  0x94   :  { %v229_v15 = vld [vmem:[#allocation5 + $0x160] sm:$0xff]  ;;  %2176 = vmatpush1.bf16.msra.mxu0 %v5491_v18 }
  0x95   :  { %v353_v16 = vld [vmem:[#allocation5 + $0x540] sm:$0xff]  ;;  %v5484_v20 = vcombine.high %v225_v13, %v229_v15  ;;  %2218 = vmatprep.subr.bf16.mxu1 %v5620_v14  ;;  %v5483_v26 = vcombine.low %v225_v13, %v229_v15 }
  0x96   :  { %v357_v17 = vld [vmem:[#allocation5 + $0x560] sm:$0xff]  ;;  %2219 = vmatpush1.bf16.msra.mxu1 %v5619_v19 }
  0x97   :  { %v5612_v21 = vcombine.high %v353_v16, %v357_v17  ;;  %v217_v22 = vld [vmem:[#allocation5 + $0x100] sm:$0xff]  ;;  %2177 = vmatprep.subr.bf16.mxu0 %v5484_v20  ;;  %v5611_v27 = vcombine.low %v353_v16, %v357_v17 }
  0x98   :  { %v221_v23 = vld [vmem:[#allocation5 + $0x120] sm:$0xff]  ;;  %2178 = vmatpush1.bf16.msra.mxu0 %v5483_v26 }
  0x99   :  { %v345_v24 = vld [vmem:[#allocation5 + $0x500] sm:$0xff]  ;;  %v5476_v28 = vcombine.high %v217_v22, %v221_v23  ;;  %2220 = vmatprep.subr.bf16.mxu1 %v5612_v21  ;;  %v5475_v34 = vcombine.low %v217_v22, %v221_v23 }
  0x9a   :  { %v349_v25 = vld [vmem:[#allocation5 + $0x520] sm:$0xff]  ;;  %2221 = vmatpush1.bf16.msra.mxu1 %v5611_v27 }
  0x9b   :  { %v5604_v29 = vcombine.high %v345_v24, %v349_v25  ;;  %v209_v30 = vld [vmem:[#allocation5 + $0xc0] sm:$0xff]  ;;  %2179 = vmatprep.subr.bf16.mxu0 %v5476_v28  ;;  %v5603_v35 = vcombine.low %v345_v24, %v349_v25 }
  0x9c   :  { %v213_v31 = vld [vmem:[#allocation5 + $0xe0] sm:$0xff]  ;;  %2180 = vmatpush1.bf16.msra.mxu0 %v5475_v34 }
  0x9d   :  { %v337_v32 = vld [vmem:[#allocation5 + $0x4c0] sm:$0xff]  ;;  %v5468_v36 = vcombine.high %v209_v30, %v213_v31  ;;  %2222 = vmatprep.subr.bf16.mxu1 %v5604_v29  ;;  %v5467_v42 = vcombine.low %v209_v30, %v213_v31 }
  0x9e   :  { %v341_v33 = vld [vmem:[#allocation5 + $0x4e0] sm:$0xff]  ;;  %2223 = vmatpush1.bf16.msra.mxu1 %v5603_v35 }
  0x9f   :  { %v5596_v37 = vcombine.high %v337_v32, %v341_v33  ;;  %v201_v38 = vld [vmem:[#allocation5 + $0x80] sm:$0xff]  ;;  %2181 = vmatprep.subr.bf16.mxu0 %v5468_v36  ;;  %v5595_v43 = vcombine.low %v337_v32, %v341_v33 }
  0xa0   :  { %v205_v39 = vld [vmem:[#allocation5 + $0xa0] sm:$0xff]  ;;  %2182 = vmatpush1.bf16.msra.mxu0 %v5467_v42 }
  0xa1   :  { %v329_v40 = vld [vmem:[#allocation5 + $0x480] sm:$0xff]  ;;  %v5460_v44 = vcombine.high %v201_v38, %v205_v39  ;;  %2224 = vmatprep.subr.bf16.mxu1 %v5596_v37  ;;  %v5459_v50 = vcombine.low %v201_v38, %v205_v39 }
  0xa2   :  { %v333_v41 = vld [vmem:[#allocation5 + $0x4a0] sm:$0xff]  ;;  %2225 = vmatpush1.bf16.msra.mxu1 %v5595_v43 }
  0xa3   :  { %v5588_v45 = vcombine.high %v329_v40, %v333_v41  ;;  %v193_v46 = vld [vmem:[#allocation5 + $0x40] sm:$0xff]  ;;  %2183 = vmatprep.subr.bf16.mxu0 %v5460_v44  ;;  %v5587_v52 = vcombine.low %v329_v40, %v333_v41 }
  0xa4   :  { %v197_v47 = vld [vmem:[#allocation5 + $0x60] sm:$0xff]  ;;  %2184 = vmatpush1.bf16.msra.mxu0 %v5459_v50 }
  0xa5   :  { %v321_v48 = vld [vmem:[#allocation5 + $0x440] sm:$0xff]  ;;  %v5452_v53 = vcombine.high %v193_v46, %v197_v47  ;;  %2226 = vmatprep.subr.bf16.mxu1 %v5588_v45  ;;  %v5451_v60 = vcombine.low %v193_v46, %v197_v47 }
  0xa6   :  { %v325_v49 = vld [vmem:[#allocation5 + $0x460] sm:$0xff]  ;;  %2227 = vmatpush1.bf16.msra.mxu1 %v5587_v52 }
  0xa7   :  { %v185_v51 = vld [vmem:[#allocation5] sm:$0xff]  ;;  %v5580_v55 = vcombine.high %v321_v48, %v325_v49  ;;  %2185 = vmatprep.subr.bf16.mxu0 %v5452_v53  ;;  %v5579_v61 = vcombine.low %v321_v48, %v325_v49 }
  0xa8   :  { %v189_v54 = vld [vmem:[#allocation5 + $0x20] sm:$0xff]  ;;  %2186 = vmatpush1.bf16.msra.mxu0 %v5451_v60 }
  0xa9   :  { %v313_v57 = vld [vmem:[#allocation5 + $0x400] sm:$0xff]  ;;  %v5444_v62 = vcombine.high %v185_v51, %v189_v54  ;;  %2228 = vmatprep.subr.bf16.mxu1 %v5580_v55  ;;  %v5443_v4 = vcombine.low %v185_v51, %v189_v54 }
  0xaa   :  { %v317_v58 = vld [vmem:[#allocation5 + $0x420] sm:$0xff]  ;;  %2229 = vmatpush1.bf16.msra.mxu1 %v5579_v61 }
  0xab   :  { %v7091_v59 = vld [vmem:[#allocation2 + $0xc] ss:$20 sps:$4 sm:$0xff]   ;;  %v5572_v63 = vcombine.high %v313_v57, %v317_v58  ;;  %2187 = vmatprep.subr.bf16.mxu0 %v5444_v62  ;;  %v5571_v5 = vcombine.low %v313_v57, %v317_v58 }
  0xac   :  { %v305_v0 = vld [vmem:[#allocation5 + $0x3c0] sm:$0xff]  ;;  %2248 = vmatprep.mubr.bf16.mxu1 %v7091_v59  ;;  %2188 = vmatpush1.bf16.msra.mxu0 %v5443_v4  ;;  %v242_v4 = vld [vmem:[#allocation5 + $0x1c8] sm:$0xff] }
  0xad   :  { %v309_v1 = vld [vmem:[#allocation5 + $0x3e0] sm:$0xff]  ;;  %2230 = vmatprep.subr.bf16.mxu1 %v5572_v63 }
  0xae   :  { %v433_v2 = vld [vmem:[#allocation5 + $0x7c0] sm:$0xff]  ;;  %v5564_v6 = vcombine.high %v305_v0, %v309_v1  ;;  %v5563_v12 = vcombine.low %v305_v0, %v309_v1  ;;  %2231 = vmatpush1.bf16.msra.mxu1 %v5571_v5  ;;  %v246_v5 = vld [vmem:[#allocation5 + $0x1e8] sm:$0xff] }
  0xaf   :  { %v437_v3 = vld [vmem:[#allocation5 + $0x7e0] sm:$0xff] }
  0xb0   :  { %v5692_v7 = vcombine.high %v433_v2, %v437_v3  ;;  %v297_v8 = vld [vmem:[#allocation5 + $0x380] sm:$0xff]  ;;  %2189 = vmatprep.subr.bf16.mxu0 %v5564_v6  ;;  %v5691_v13 = vcombine.low %v433_v2, %v437_v3 }
  0xb1   :  { %v301_v9 = vld [vmem:[#allocation5 + $0x3a0] sm:$0xff]  ;;  %2190 = vmatpush2.bf16.msra.mxu0 %v5563_v12  ;;  %v7095_v12 = vld [vmem:[#allocation2] ss:$20 sps:$4 sm:$0xff]  }
  0xb2   :  { %v425_v10 = vld [vmem:[#allocation5 + $0x780] sm:$0xff]  ;;  %v5556_v14 = vcombine.high %v297_v8, %v301_v9  ;;  %2232 = vmatprep.subr.bf16.mxu1 %v5692_v7  ;;  %v5555_v20 = vcombine.low %v297_v8, %v301_v9  ;;  %v5502_v9 = vcombine.high %v242_v4, %v246_v5 }
  0xb3   :  { %v429_v11 = vld [vmem:[#allocation5 + $0x7a0] sm:$0xff]  ;;  %2233 = vmatpush2.bf16.msra.mxu1 %v5691_v13  ;;  %v234_v13 = vld [vmem:[#allocation5 + $0x188] sm:$0xff] }
  0xb4   :  { %v5684_v15 = vcombine.high %v425_v10, %v429_v11  ;;  %v289_v16 = vld [vmem:[#allocation5 + $0x340] sm:$0xff]  ;;  %2191 = vmatprep.subr.bf16.mxu0 %v5556_v14  ;;  %v5683_v21 = vcombine.low %v425_v10, %v429_v11  ;;  %v238_v14 = vld [vmem:[#allocation5 + $0x1a8] sm:$0xff] }
  0xb5   :  { %v293_v17 = vld [vmem:[#allocation5 + $0x360] sm:$0xff]  ;;  %2192 = vmatpush2.bf16.msra.mxu0 %v5555_v20 }
  0xb6   :  { %v417_v18 = vld [vmem:[#allocation5 + $0x740] sm:$0xff]  ;;  %v5548_v22 = vcombine.high %v289_v16, %v293_v17  ;;  %2234 = vmatprep.subr.bf16.mxu1 %v5684_v15  ;;  %v5547_v28 = vcombine.low %v289_v16, %v293_v17  ;;  %v5501_v17 = vcombine.low %v242_v4, %v246_v5  ;;  %v306_v5 = vld [vmem:[#allocation5 + $0x3c8] sm:$0xff] }
  0xb7   :  { %v421_v19 = vld [vmem:[#allocation5 + $0x760] sm:$0xff]  ;;  %2235 = vmatpush2.bf16.msra.mxu1 %v5683_v21 }
  0xb8   :  { %v5676_v23 = vcombine.high %v417_v18, %v421_v19  ;;  %v281_v24 = vld [vmem:[#allocation5 + $0x300] sm:$0xff]  ;;  %2193 = vmatprep.subr.bf16.mxu0 %v5548_v22  ;;  %v5675_v29 = vcombine.low %v417_v18, %v421_v19  ;;  %v5494_v19 = vcombine.high %v234_v13, %v238_v14  ;;  %v226_v22 = vld [vmem:[#allocation5 + $0x148] sm:$0xff] }
  0xb9   :  { %v285_v25 = vld [vmem:[#allocation5 + $0x320] sm:$0xff]  ;;  %2194 = vmatpush2.bf16.msra.mxu0 %v5547_v28 }
  0xba   :  { %v409_v26 = vld [vmem:[#allocation5 + $0x700] sm:$0xff]  ;;  %v5540_v30 = vcombine.high %v281_v24, %v285_v25  ;;  %2236 = vmatprep.subr.bf16.mxu1 %v5676_v23  ;;  %v5539_v36 = vcombine.low %v281_v24, %v285_v25  ;;  %v230_v23 = vld [vmem:[#allocation5 + $0x168] sm:$0xff]  ;;  %v5493_v25 = vcombine.low %v234_v13, %v238_v14 }
  0xbb   :  { %v413_v27 = vld [vmem:[#allocation5 + $0x720] sm:$0xff]  ;;  %2237 = vmatpush2.bf16.msra.mxu1 %v5675_v29  ;;  %v218_v29 = vld [vmem:[#allocation5 + $0x108] sm:$0xff] }
  0xbc   :  { %v5668_v31 = vcombine.high %v409_v26, %v413_v27  ;;  %v273_v32 = vld [vmem:[#allocation5 + $0x2c0] sm:$0xff]  ;;  %2195 = vmatprep.subr.bf16.mxu0 %v5540_v30  ;;  %v5667_v37 = vcombine.low %v409_v26, %v413_v27  ;;  %v5486_v30 = vcombine.high %v226_v22, %v230_v23  ;;  %v7103_v13 = vld [vmem:[#allocation2 + $0x10] ss:$20 sps:$4 sm:$0xff]  }
  0xbd   :  { %v277_v33 = vld [vmem:[#allocation5 + $0x2e0] sm:$0xff]  ;;  %2196 = vmatpush2.bf16.msra.mxu0 %v5539_v36 }
  0xbe   :  { %v401_v34 = vld [vmem:[#allocation5 + $0x6c0] sm:$0xff]  ;;  %v5532_v38 = vcombine.high %v273_v32, %v277_v33  ;;  %2238 = vmatprep.subr.bf16.mxu1 %v5668_v31  ;;  %v5531_v44 = vcombine.low %v273_v32, %v277_v33  ;;  %v222_v31 = vld [vmem:[#allocation5 + $0x128] sm:$0xff]  ;;  %v6986_v32 = vmov 0  }
  0xbf   :  { %v405_v35 = vld [vmem:[#allocation5 + $0x6e0] sm:$0xff]  ;;  %2239 = vmatpush2.bf16.msra.mxu1 %v5667_v37 }
  0xc0   :  { %v5660_v39 = vcombine.high %v401_v34, %v405_v35  ;;  %v265_v40 = vld [vmem:[#allocation5 + $0x280] sm:$0xff]  ;;  %2197 = vmatprep.subr.bf16.mxu0 %v5532_v38  ;;  %v5659_v45 = vcombine.low %v401_v34, %v405_v35  ;;  %v5485_v34 = vcombine.low %v226_v22, %v230_v23  ;;  %v210_v38 = vld [vmem:[#allocation5 + $0xc8] sm:$0xff] }
  0xc1   :  { %v269_v41 = vld [vmem:[#allocation5 + $0x2a0] sm:$0xff]  ;;  %2198 = vmatpush2.bf16.msra.mxu0 %v5531_v44 }
  0xc2   :  { %v393_v42 = vld [vmem:[#allocation5 + $0x680] sm:$0xff]  ;;  %v5524_v46 = vcombine.high %v265_v40, %v269_v41  ;;  %2240 = vmatprep.subr.bf16.mxu1 %v5660_v39  ;;  %v5523_v52 = vcombine.low %v265_v40, %v269_v41  ;;  %v5478_v39 = vcombine.high %v218_v29, %v222_v31  ;;  %v214_v40 = vld [vmem:[#allocation5 + $0xe8] sm:$0xff] }
  0xc3   :  { %v397_v43 = vld [vmem:[#allocation5 + $0x6a0] sm:$0xff]  ;;  %2241 = vmatpush2.bf16.msra.mxu1 %v5659_v45  ;;  %v202_v45 = vld [vmem:[#allocation5 + $0x88] sm:$0xff] }
  0xc4   :  { %v5652_v47 = vcombine.high %v393_v42, %v397_v43  ;;  %v257_v48 = vld [vmem:[#allocation5 + $0x240] sm:$0xff]  ;;  %2199 = vmatprep.subr.bf16.mxu0 %v5524_v46  ;;  %v5651_v53 = vcombine.low %v393_v42, %v397_v43  ;;  %v5477_v42 = vcombine.low %v218_v29, %v222_v31  ;;  %v5470_v46 = vcombine.high %v210_v38, %v214_v40 }
  0xc5   :  { %v261_v49 = vld [vmem:[#allocation5 + $0x260] sm:$0xff]  ;;  %2200 = vmatpush2.bf16.msra.mxu0 %v5523_v52 }
  0xc6   :  { %v385_v50 = vld [vmem:[#allocation5 + $0x640] sm:$0xff]  ;;  %v5516_v54 = vcombine.high %v257_v48, %v261_v49  ;;  %2242 = vmatprep.subr.bf16.mxu1 %v5652_v47  ;;  %v5515_v62 = vcombine.low %v257_v48, %v261_v49  ;;  %v206_v47 = vld [vmem:[#allocation5 + $0xa8] sm:$0xff]  ;;  %v5469_v49 = vcombine.low %v210_v38, %v214_v40 }
  0xc7   :  { %v389_v51 = vld [vmem:[#allocation5 + $0x660] sm:$0xff]  ;;  %2243 = vmatpush2.bf16.msra.mxu1 %v5651_v53  ;;  %v194_v53 = vld [vmem:[#allocation5 + $0x48] sm:$0xff] }
  0xc8   :  { %v5644_v55 = vcombine.high %v385_v50, %v389_v51  ;;  %v249_v57 = vld [vmem:[#allocation5 + $0x200] sm:$0xff]  ;;  %2201 = vmatprep.subr.bf16.mxu0 %v5516_v54  ;;  %v5643_v63 = vcombine.low %v385_v50, %v389_v51  ;;  %v5462_v54 = vcombine.high %v202_v45, %v206_v47 }
  0xc9   :  { %v253_v58 = vld [vmem:[#allocation5 + $0x220] sm:$0xff]  ;;  %2202 = vmatpush2.bf16.msra.mxu0 %v5515_v62 }
  0xca   :  { %v377_v60 = vld [vmem:[#allocation5 + $0x600] sm:$0xff]  ;;  %v5508_v0 = vcombine.high %v249_v57, %v253_v58  ;;  %2244 = vmatprep.subr.bf16.mxu1 %v5644_v55  ;;  %v5507_v6 = vcombine.low %v249_v57, %v253_v58  ;;  %v198_v55 = vld [vmem:[#allocation5 + $0x68] sm:$0xff]  ;;  %v5461_v58 = vcombine.low %v202_v45, %v206_v47 }
  0xcb   :  { %v381_v61 = vld [vmem:[#allocation5 + $0x620] sm:$0xff]  ;;  %2245 = vmatpush2.bf16.msra.mxu1 %v5643_v63  ;;  %v186_v63 = vld [vmem:[#allocation5 + $0x8] sm:$0xff] }
  0xcc   :  { %v5636_v1 = vcombine.high %v377_v60, %v381_v61  ;;  %v497_v2 = vld [vmem:[#allocation5 + $0x9c0] sm:$0xff]  ;;  %2203 = vmatprep.subr.bf16.mxu0 %v5508_v0  ;;  %v5635_v7 = vcombine.low %v377_v60, %v381_v61  ;;  %v5454_v0 = vcombine.high %v194_v53, %v198_v55  ;;  %v266_v47 = vld [vmem:[#allocation5 + $0x288] sm:$0xff] }
  0xcd   :  { %v501_v3 = vld [vmem:[#allocation5 + $0x9e0] sm:$0xff]  ;;  %2204 = vmatpush2.bf16.msra.mxu0 %v5507_v6  ;;  %v310_v6 = vld [vmem:[#allocation5 + $0x3e8] sm:$0xff] }
  0xce   :  { %v5756_v8 = vcombine.high %v497_v2, %v501_v3  ;;  %2246 = vmatprep.subr.bf16.mxu1 %v5636_v1  ;;  %v489_v10 = vld [vmem:[#allocation5 + $0x980] sm:$0xff]  ;;  %v5755_v16 = vcombine.low %v497_v2, %v501_v3  ;;  %v190_v1 = vld [vmem:[#allocation5 + $0x28] sm:$0xff]  ;;  %v5453_v3 = vcombine.low %v194_v53, %v198_v55  ;;  %v5565_v22 = vcombine.low %v306_v5, %v310_v6 }
  0xcf   :  { %v493_v11 = vld [vmem:[#allocation5 + $0x9a0] sm:$0xff]  ;;  %2247 = vmatpush2.bf16.msra.mxu1 %v5635_v7  ;;  %v370_v7 = vld [vmem:[#allocation5 + $0x5c8] sm:$0xff] }
  0xd0   :  { %v7097_v15 = vld [vmem:[#allocation2 + $0x8] ss:$20 sps:$4 sm:$0xff]   ;;  %2259 = vmatprep.subr.bf16.mxu0 %v5756_v8  ;;  %v5748_v18 = vcombine.high %v489_v10, %v493_v11  ;;  %2302 = vmatprep.subr.bf16.mxu1 %v5502_v9  ;;  %v5747_v24 = vcombine.low %v489_v10, %v493_v11  ;;  %v5446_v8 = vcombine.high %v186_v63, %v190_v1  ;;  %v374_v9 = vld [vmem:[#allocation5 + $0x5e8] sm:$0xff] }
  0xd1   :  { %v481_v20 = vld [vmem:[#allocation5 + $0x940] sm:$0xff]  ;;  %2206 = vmatmul.mubr.bf16.vlgmr.msra.gmra.mxu0 %v7095_v12  ;;  %v5445_v11 = vcombine.low %v186_v63, %v190_v1  ;;  %v5630_v14 = vcombine.high %v370_v7, %v374_v9  ;;  %v258_v55 = vld [vmem:[#allocation5 + $0x248] sm:$0xff] }
  0xd2   :  { %v485_v21 = vld [vmem:[#allocation5 + $0x960] sm:$0xff]  ;;  %2249 = vmatmul.mubr.bf16.vlgmr.msra.gmra.mxu1 %v7097_v15  ;;  %2260 = vmatpush1.bf16.msra.mxu0 %v5755_v16  ;;  %v298_v16 = vld [vmem:[#allocation5 + $0x388] sm:$0xff] }
  0xd3   :  { %2303 = vmatpush1.bf16.msra.mxu1 %v5501_v17  ;;  %2261 = vmatprep.subr.bf16.mxu0 %v5748_v18  ;;  %v5740_v26 = vcombine.high %v481_v20, %v485_v21  ;;  %v473_v27 = vld [vmem:[#allocation5 + $0x900] sm:$0xff]  ;;  %v5739_v33 = vcombine.low %v481_v20, %v485_v21  ;;  %v302_v17 = vld [vmem:[#allocation5 + $0x3a8] sm:$0xff]  ;;  %v5629_v21 = vcombine.low %v370_v7, %v374_v9 }
  0xd4   :  { %v477_v28 = vld [vmem:[#allocation5 + $0x920] sm:$0xff]  ;;  %2304 = vmatprep.subr.bf16.mxu1 %v5494_v19  ;;  %2291 = vmatprep.mubr.bf16.mxu0 %v6986_v32  ;;  %v362_v18 = vld [vmem:[#allocation5 + $0x588] sm:$0xff]  ;;  %v5566_v19 = vcombine.high %v306_v5, %v310_v6 }
  0xd5   :  { %2334 = vmatprep.mubr.bf16.mxu1 %v7089_v56  ;;  %v5732_v35 = vcombine.high %v473_v27, %v477_v28  ;;  %v465_v36 = vld [vmem:[#allocation5 + $0x8c0] sm:$0xff]  ;;  %v5731_v41 = vcombine.low %v473_v27, %v477_v28  ;;  %v366_v20 = vld [vmem:[#allocation5 + $0x5a8] sm:$0xff]  ;;  %v5558_v27 = vcombine.high %v298_v16, %v302_v17 }
  0xd6   :  { %2262 = vmatpush1.bf16.msra.mxu0 %v5747_v24  ;;  %v469_v37 = vld [vmem:[#allocation5 + $0x8e0] sm:$0xff]  ;;  %v5622_v23 = vcombine.high %v362_v18, %v366_v20  ;;  %v290_v24 = vld [vmem:[#allocation5 + $0x348] sm:$0xff]  ;;  %v5621_v29 = vcombine.low %v362_v18, %v366_v20 }
  0xd7   :  { %2305 = vmatpush1.bf16.msra.mxu1 %v5493_v25  ;;  %2263 = vmatprep.subr.bf16.mxu0 %v5740_v26  ;;  %v5724_v43 = vcombine.high %v465_v36, %v469_v37  ;;  %v457_v44 = vld [vmem:[#allocation5 + $0x880] sm:$0xff]  ;;  %v5723_v48 = vcombine.low %v465_v36, %v469_v37  ;;  %v294_v25 = vld [vmem:[#allocation5 + $0x368] sm:$0xff] }
  0xd8   :  { %2306 = vmatprep.subr.bf16.mxu1 %v5486_v30  ;;  %v461_v56 = vld [vmem:[#allocation5 + $0x8a0] sm:$0xff]  ;;  %v354_v26 = vld [vmem:[#allocation5 + $0x548] sm:$0xff]  ;;  %v5557_v30 = vcombine.low %v298_v16, %v302_v17  ;;  %v5550_v36 = vcombine.high %v290_v24, %v294_v25 }
  0xd9   :  { %v5716_v50 = vcombine.high %v457_v44, %v461_v56  ;;  %v449_v51 = vld [vmem:[#allocation5 + $0x840] sm:$0xff]  ;;  %v5715_v57 = vcombine.low %v457_v44, %v461_v56  ;;  %v358_v28 = vld [vmem:[#allocation5 + $0x568] sm:$0xff] }
  0xda   :  { %2264 = vmatpush1.bf16.msra.mxu0 %v5739_v33  ;;  %v453_v52 = vld [vmem:[#allocation5 + $0x860] sm:$0xff]  ;;  %v5614_v31 = vcombine.high %v354_v26, %v358_v28  ;;  %v282_v33 = vld [vmem:[#allocation5 + $0x308] sm:$0xff]  ;;  %v5613_v38 = vcombine.low %v354_v26, %v358_v28 }
  0xdb   :  { %2307 = vmatpush1.bf16.msra.mxu1 %v5485_v34  ;;  %2265 = vmatprep.subr.bf16.mxu0 %v5732_v35  ;;  %v5708_v60 = vcombine.high %v449_v51, %v453_v52  ;;  %v441_v61 = vld [vmem:[#allocation5 + $0x800] sm:$0xff]  ;;  %v5707_v2 = vcombine.low %v449_v51, %v453_v52  ;;  %v286_v34 = vld [vmem:[#allocation5 + $0x328] sm:$0xff] }
  0xdc   :  { %2308 = vmatprep.subr.bf16.mxu1 %v5478_v39  ;;  %v445_v62 = vld [vmem:[#allocation5 + $0x820] sm:$0xff]  ;;  %v346_v35 = vld [vmem:[#allocation5 + $0x508] sm:$0xff]  ;;  %v5549_v39 = vcombine.low %v290_v24, %v294_v25  ;;  %v5541_v45 = vcombine.low %v282_v33, %v286_v34 }
  0xdd   :  { %v5700_v4 = vcombine.high %v441_v61, %v445_v62  ;;  %v5699_v10 = vcombine.low %v441_v61, %v445_v62  ;;  %v350_v37 = vld [vmem:[#allocation5 + $0x528] sm:$0xff] }
  0xde   :  { %2266 = vmatpush1.bf16.msra.mxu0 %v5731_v41  ;;  %v5606_v40 = vcombine.high %v346_v35, %v350_v37  ;;  %v274_v41 = vld [vmem:[#allocation5 + $0x2c8] sm:$0xff]  ;;  %v5605_v56 = vcombine.low %v346_v35, %v350_v37 }
  0xdf   :  { %2309 = vmatpush1.bf16.msra.mxu1 %v5477_v42  ;;  %2267 = vmatprep.subr.bf16.mxu0 %v5724_v43  ;;  %v278_v42 = vld [vmem:[#allocation5 + $0x2e8] sm:$0xff] }
  0xe0   :  { %2310 = vmatprep.subr.bf16.mxu1 %v5470_v46  ;;  %v338_v43 = vld [vmem:[#allocation5 + $0x4c8] sm:$0xff]  ;;  %v5533_v53 = vcombine.low %v274_v41, %v278_v42 }
  0xe1   :  { %v342_v44 = vld [vmem:[#allocation5 + $0x4e8] sm:$0xff] }
  0xe2   :  { %2268 = vmatpush1.bf16.msra.mxu0 %v5723_v48  ;;  %v5598_v46 = vcombine.high %v338_v43, %v342_v44  ;;  %v270_v48 = vld [vmem:[#allocation5 + $0x2a8] sm:$0xff]  ;;  %v5597_v52 = vcombine.low %v338_v43, %v342_v44 }
  0xe3   :  { %2311 = vmatpush1.bf16.msra.mxu1 %v5469_v49  ;;  %2269 = vmatprep.subr.bf16.mxu0 %v5716_v50  ;;  %v330_v49 = vld [vmem:[#allocation5 + $0x488] sm:$0xff]  ;;  %v5534_v50 = vcombine.high %v274_v41, %v278_v42  ;;  %v5525_v63 = vcombine.low %v266_v47, %v270_v48 }
  0xe4   :  { %2312 = vmatprep.subr.bf16.mxu1 %v5462_v54  ;;  %v334_v51 = vld [vmem:[#allocation5 + $0x4a8] sm:$0xff] }
  0xe5   :  { %v5590_v54 = vcombine.high %v330_v49, %v334_v51  ;;  %v326_v61 = vld [vmem:[#allocation5 + $0x468] sm:$0xff]  ;;  %v5589_v62 = vcombine.low %v330_v49, %v334_v51 }
  0xe6   :  { %2270 = vmatpush1.bf16.msra.mxu0 %v5715_v57  ;;  %v262_v57 = vld [vmem:[#allocation5 + $0x268] sm:$0xff] }
  0xe7   :  { %2313 = vmatpush1.bf16.msra.mxu1 %v5461_v58  ;;  %2271 = vmatprep.subr.bf16.mxu0 %v5708_v60  ;;  %v322_v58 = vld [vmem:[#allocation5 + $0x448] sm:$0xff]  ;;  %v5526_v60 = vcombine.high %v266_v47, %v270_v48  ;;  %v5517_v7 = vcombine.low %v258_v55, %v262_v57 }
  0xe8   :  { %2314 = vmatprep.subr.bf16.mxu1 %v5454_v0  ;;  %v5582_v0 = vcombine.high %v322_v58, %v326_v61  ;;  %v250_v1 = vld [vmem:[#allocation5 + $0x208] sm:$0xff]  ;;  %v5581_v6 = vcombine.low %v322_v58, %v326_v61 }
  0xe9   :  { %v318_v5 = vld [vmem:[#allocation5 + $0x428] sm:$0xff] }
  0xea   :  { %2272 = vmatpush1.bf16.msra.mxu0 %v5707_v2  ;;  %v254_v2 = vld [vmem:[#allocation5 + $0x228] sm:$0xff] }
  0xeb   :  { %2315 = vmatpush1.bf16.msra.mxu1 %v5453_v3  ;;  %2273 = vmatprep.subr.bf16.mxu0 %v5700_v4  ;;  %v314_v3 = vld [vmem:[#allocation5 + $0x408] sm:$0xff]  ;;  %v5518_v4 = vcombine.high %v258_v55, %v262_v57  ;;  %v5509_v18 = vcombine.low %v250_v1, %v254_v2 }
  0xec   :  { %2316 = vmatprep.subr.bf16.mxu1 %v5446_v8  ;;  %v5574_v8 = vcombine.high %v314_v3, %v318_v5  ;;  %v434_v9 = vld [vmem:[#allocation5 + $0x7c8] sm:$0xff]  ;;  %v5573_v17 = vcombine.low %v314_v3, %v318_v5 }
  0xed   :  { %v502_v16 = vld [vmem:[#allocation5 + $0x9e8] sm:$0xff] }
  0xee   :  { %2274 = vmatpush1.bf16.msra.mxu0 %v5699_v10  ;;  %v438_v10 = vld [vmem:[#allocation5 + $0x7e8] sm:$0xff] }
  0xef   :  { %2317 = vmatpush1.bf16.msra.mxu1 %v5445_v11  ;;  %2345 = vmatprep.subr.bf16.mxu0 %v5630_v14  ;;  %v498_v11 = vld [vmem:[#allocation5 + $0x9c8] sm:$0xff]  ;;  %v5510_v14 = vcombine.high %v250_v1, %v254_v2  ;;  %v5693_v25 = vcombine.low %v434_v9, %v438_v10 }
  0xf0   :  { %2318 = vmatprep.subr.bf16.mxu1 %v5566_v19  ;;  %v5694_v19 = vcombine.high %v434_v9, %v438_v10  ;;  %v426_v20 = vld [vmem:[#allocation5 + $0x788] sm:$0xff]  ;;  %v5757_v26 = vcombine.low %v498_v11, %v502_v16 }
  0xf1   :  { %2292 = vmatmul.mubr.bf16.vlgmr.msra.gmra.mxu0 %v7103_v13  ;;  %v494_v24 = vld [vmem:[#allocation5 + $0x9a8] sm:$0xff] }
  0xf2   :  { %2346 = vmatpush1.bf16.msra.mxu0 %v5629_v21  ;;  %2377 = vmatprep.mubr.bf16.mxu0 %v7091_v59  ;;  %v5542_v59 = vcombine.high %v282_v33, %v286_v34  ;;  %v430_v21 = vld [vmem:[#allocation5 + $0x7a8] sm:$0xff] }
  0xf3   :  { %2319 = vmatpush2.bf16.msra.mxu1 %v5565_v22  ;;  %2347 = vmatprep.subr.bf16.mxu0 %v5622_v23  ;;  %v490_v22 = vld [vmem:[#allocation5 + $0x988] sm:$0xff]  ;;  %v5758_v23 = vcombine.high %v498_v11, %v502_v16  ;;  %v5685_v34 = vcombine.low %v426_v20, %v430_v21  ;;  %v247_v16 = vld [vmem:[#allocation5 + $0x1f0] sm:$0xff] }
  0xf4   :  { %2320 = vmatprep.subr.bf16.mxu1 %v5558_v27  ;;  %v5686_v27 = vcombine.high %v426_v20, %v430_v21  ;;  %v418_v28 = vld [vmem:[#allocation5 + $0x748] sm:$0xff]  ;;  %v5749_v35 = vcombine.low %v490_v22, %v494_v24 }
  0xf5   :  { %v486_v33 = vld [vmem:[#allocation5 + $0x968] sm:$0xff] }
  0xf6   :  { %2348 = vmatpush1.bf16.msra.mxu0 %v5621_v29  ;;  %v422_v29 = vld [vmem:[#allocation5 + $0x768] sm:$0xff] }
  0xf7   :  { %2321 = vmatpush2.bf16.msra.mxu1 %v5557_v30  ;;  %2349 = vmatprep.subr.bf16.mxu0 %v5614_v31  ;;  %v5750_v30 = vcombine.high %v490_v22, %v494_v24  ;;  %v482_v31 = vld [vmem:[#allocation5 + $0x948] sm:$0xff]  ;;  %v5677_v42 = vcombine.low %v418_v28, %v422_v29  ;;  %v239_v24 = vld [vmem:[#allocation5 + $0x1b0] sm:$0xff] }
  0xf8   :  { %2322 = vmatprep.subr.bf16.mxu1 %v5550_v36  ;;  %v5678_v36 = vcombine.high %v418_v28, %v422_v29  ;;  %v410_v37 = vld [vmem:[#allocation5 + $0x708] sm:$0xff]  ;;  %v5741_v43 = vcombine.low %v482_v31, %v486_v33 }
  0xf9   :  { %v478_v41 = vld [vmem:[#allocation5 + $0x928] sm:$0xff] }
  0xfa   :  { %2350 = vmatpush1.bf16.msra.mxu0 %v5613_v38  ;;  %v414_v38 = vld [vmem:[#allocation5 + $0x728] sm:$0xff] }
  0xfb   :  { %2323 = vmatpush2.bf16.msra.mxu1 %v5549_v39  ;;  %2351 = vmatprep.subr.bf16.mxu0 %v5606_v40  ;;  %v474_v39 = vld [vmem:[#allocation5 + $0x908] sm:$0xff]  ;;  %v5742_v40 = vcombine.high %v482_v31, %v486_v33  ;;  %v5669_v47 = vcombine.low %v410_v37, %v414_v38  ;;  %v227_v31 = vld [vmem:[#allocation5 + $0x150] sm:$0xff] }
  0xfc   :  { %2324 = vmatprep.subr.bf16.mxu1 %v5542_v59  ;;  %v402_v59 = vld [vmem:[#allocation5 + $0x6c8] sm:$0xff]  ;;  %v5733_v48 = vcombine.low %v474_v39, %v478_v41  ;;  %v231_v33 = vld [vmem:[#allocation5 + $0x170] sm:$0xff] }
  0xfd   :  { %v406_v44 = vld [vmem:[#allocation5 + $0x6e8] sm:$0xff] }
  0xfe   :  { %2352 = vmatpush1.bf16.msra.mxu0 %v5605_v56  ;;  %v466_v56 = vld [vmem:[#allocation5 + $0x8c8] sm:$0xff]  ;;  %v5662_v49 = vcombine.high %v402_v59, %v406_v44  ;;  %v5661_v55 = vcombine.low %v402_v59, %v406_v44  ;;  %v7111_v59 = vld [vmem:[#allocation2 + $0x4] ss:$20 sps:$4 sm:$0xff]   ;;  %v7114_v44 = vld [vmem:[#allocation2 + $0xc] ss:$20 sps:$4 sm:$0xff]  }
  0xff   :  { %2325 = vmatpush2.bf16.msra.mxu1 %v5541_v45  ;;  %2353 = vmatprep.subr.bf16.mxu0 %v5598_v46  ;;  %v5734_v45 = vcombine.high %v474_v39, %v478_v41  ;;  %v470_v46 = vld [vmem:[#allocation5 + $0x8e8] sm:$0xff]  ;;  %v5488_v39 = vcombine.high %v227_v31, %v231_v33  ;;  %v223_v41 = vld [vmem:[#allocation5 + $0x130] sm:$0xff] }
 0x100   :  { %2326 = vmatprep.subr.bf16.mxu1 %v5534_v50  ;;  %v394_v50 = vld [vmem:[#allocation5 + $0x688] sm:$0xff]  ;;  %v5725_v57 = vcombine.low %v466_v56, %v470_v46 }
 0x101   :  { %v398_v51 = vld [vmem:[#allocation5 + $0x6a8] sm:$0xff] }
 0x102   :  { %2354 = vmatpush1.bf16.msra.mxu0 %v5597_v52  ;;  %v458_v52 = vld [vmem:[#allocation5 + $0x888] sm:$0xff]  ;;  %v5654_v58 = vcombine.high %v394_v50, %v398_v51  ;;  %v5653_v1 = vcombine.low %v394_v50, %v398_v51 }
 0x103   :  { %2327 = vmatpush2.bf16.msra.mxu1 %v5533_v53  ;;  %2355 = vmatprep.subr.bf16.mxu0 %v5590_v54  ;;  %v5726_v53 = vcombine.high %v466_v56, %v470_v46  ;;  %v462_v54 = vld [vmem:[#allocation5 + $0x8a8] sm:$0xff]  ;;  %v215_v46 = vld [vmem:[#allocation5 + $0xf0] sm:$0xff] }
 0x104   :  { %2328 = vmatprep.subr.bf16.mxu1 %v5526_v60  ;;  %v386_v60 = vld [vmem:[#allocation5 + $0x648] sm:$0xff]  ;;  %v5717_v2 = vcombine.low %v458_v52, %v462_v54 }
 0x105   :  { %v390_v61 = vld [vmem:[#allocation5 + $0x668] sm:$0xff] }
 0x106   :  { %2356 = vmatpush1.bf16.msra.mxu0 %v5589_v62  ;;  %v450_v62 = vld [vmem:[#allocation5 + $0x848] sm:$0xff]  ;;  %v5646_v3 = vcombine.high %v386_v60, %v390_v61  ;;  %v5645_v9 = vcombine.low %v386_v60, %v390_v61 }
 0x107   :  { %2329 = vmatpush2.bf16.msra.mxu1 %v5525_v63  ;;  %2357 = vmatprep.subr.bf16.mxu0 %v5582_v0  ;;  %v5718_v63 = vcombine.high %v458_v52, %v462_v54  ;;  %v454_v0 = vld [vmem:[#allocation5 + $0x868] sm:$0xff]  ;;  %v207_v54 = vld [vmem:[#allocation5 + $0xb0] sm:$0xff] }
 0x108   :  { %2330 = vmatprep.subr.bf16.mxu1 %v5518_v4  ;;  %v378_v4 = vld [vmem:[#allocation5 + $0x608] sm:$0xff]  ;;  %v5709_v10 = vcombine.low %v450_v62, %v454_v0 }
 0x109   :  { %v382_v5 = vld [vmem:[#allocation5 + $0x628] sm:$0xff] }
 0x10a   :  { %2358 = vmatpush1.bf16.msra.mxu0 %v5581_v6  ;;  %v442_v6 = vld [vmem:[#allocation5 + $0x808] sm:$0xff]  ;;  %v5638_v11 = vcombine.high %v378_v4, %v382_v5  ;;  %v5637_v20 = vcombine.low %v378_v4, %v382_v5 }
 0x10b   :  { %2331 = vmatpush2.bf16.msra.mxu1 %v5517_v7  ;;  %2359 = vmatprep.subr.bf16.mxu0 %v5574_v8  ;;  %v5710_v7 = vcombine.high %v450_v62, %v454_v0  ;;  %v446_v8 = vld [vmem:[#allocation5 + $0x828] sm:$0xff]  ;;  %v199_v0 = vld [vmem:[#allocation5 + $0x70] sm:$0xff] }
 0x10c   :  { %2332 = vmatprep.subr.bf16.mxu1 %v5510_v14  ;;  %v243_v14 = vld [vmem:[#allocation5 + $0x1d0] sm:$0xff]  ;;  %v5701_v21 = vcombine.low %v442_v6, %v446_v8 }
 0x10d   :  { %v5504_v22 = vcombine.high %v243_v14, %v247_v16  ;;  %v5503_v28 = vcombine.low %v243_v14, %v247_v16 }
 0x10e   :  { %2360 = vmatpush1.bf16.msra.mxu0 %v5573_v17  ;;  %v371_v17 = vld [vmem:[#allocation5 + $0x5d0] sm:$0xff] }
 0x10f   :  { %2333 = vmatpush2.bf16.msra.mxu1 %v5509_v18  ;;  %2361 = vmatprep.subr.bf16.mxu0 %v5694_v19  ;;  %v5702_v18 = vcombine.high %v442_v6, %v446_v8  ;;  %v375_v19 = vld [vmem:[#allocation5 + $0x5f0] sm:$0xff] }
 0x110   :  { %2388 = vmatprep.subr.bf16.mxu1 %v5758_v23  ;;  %v235_v23 = vld [vmem:[#allocation5 + $0x190] sm:$0xff]  ;;  %v5631_v29 = vcombine.low %v371_v17, %v375_v19 }
 0x111   :  { %v191_v8 = vld [vmem:[#allocation5 + $0x30] sm:$0xff] }
 0x112   :  { %2335 = vmatmul.mubr.bf16.vlgmr.msra.gmra.mxu1 %v7095_v12  ;;  %2362 = vmatpush2.bf16.msra.mxu0 %v5693_v25  ;;  %v5670_v12 = vcombine.high %v410_v37, %v414_v38  ;;  %v363_v25 = vld [vmem:[#allocation5 + $0x590] sm:$0xff]  ;;  %v5495_v37 = vcombine.low %v235_v23, %v239_v24 }
 0x113   :  { %2389 = vmatpush1.bf16.msra.mxu1 %v5757_v26  ;;  %2363 = vmatprep.subr.bf16.mxu0 %v5686_v27  ;;  %v5632_v26 = vcombine.high %v371_v17, %v375_v19  ;;  %v367_v27 = vld [vmem:[#allocation5 + $0x5b0] sm:$0xff] }
 0x114   :  { %2390 = vmatprep.subr.bf16.mxu1 %v5750_v30  ;;  %2420 = vmatprep.mubr.bf16.mxu1 %v6986_v32  ;;  %v5496_v30 = vcombine.high %v235_v23, %v239_v24  ;;  %v5623_v38 = vcombine.low %v363_v25, %v367_v27  ;;  %v311_v19 = vld [vmem:[#allocation5 + $0x3f0] sm:$0xff] }
 0x116   :  { %2364 = vmatpush2.bf16.msra.mxu0 %v5685_v34  ;;  %v355_v34 = vld [vmem:[#allocation5 + $0x550] sm:$0xff] }
 0x117   :  { %2391 = vmatpush1.bf16.msra.mxu1 %v5749_v35  ;;  %2365 = vmatprep.subr.bf16.mxu0 %v5678_v36  ;;  %v5624_v35 = vcombine.high %v363_v25, %v367_v27  ;;  %v359_v36 = vld [vmem:[#allocation5 + $0x570] sm:$0xff] }
 0x118   :  { %2392 = vmatprep.subr.bf16.mxu1 %v5742_v40  ;;  %v219_v40 = vld [vmem:[#allocation5 + $0x110] sm:$0xff] }
 0x119   :  { %v5480_v56 = vcombine.high %v219_v40, %v223_v41  ;;  %v5479_v50 = vcombine.low %v219_v40, %v223_v41  ;;  %v303_v27 = vld [vmem:[#allocation5 + $0x3b0] sm:$0xff] }
 0x11a   :  { %2366 = vmatpush2.bf16.msra.mxu0 %v5677_v42  ;;  %v347_v42 = vld [vmem:[#allocation5 + $0x510] sm:$0xff] }
 0x11b   :  { %2393 = vmatpush1.bf16.msra.mxu1 %v5741_v43  ;;  %2367 = vmatprep.subr.bf16.mxu0 %v5670_v12  ;;  %v5616_v43 = vcombine.high %v355_v34, %v359_v36  ;;  %v351_v12 = vld [vmem:[#allocation5 + $0x530] sm:$0xff] }
 0x11c   :  { %2394 = vmatprep.subr.bf16.mxu1 %v5734_v45  ;;  %v211_v45 = vld [vmem:[#allocation5 + $0xd0] sm:$0xff]  ;;  %v5607_v51 = vcombine.low %v347_v42, %v351_v12 }
 0x11d   :  { %v5472_v52 = vcombine.high %v211_v45, %v215_v46  ;;  %v5471_v60 = vcombine.low %v211_v45, %v215_v46 }
 0x11e   :  { %2368 = vmatpush2.bf16.msra.mxu0 %v5669_v47  ;;  %v339_v47 = vld [vmem:[#allocation5 + $0x4d0] sm:$0xff] }
 0x11f   :  { %2395 = vmatpush1.bf16.msra.mxu1 %v5733_v48  ;;  %2369 = vmatprep.subr.bf16.mxu0 %v5662_v49  ;;  %v5608_v48 = vcombine.high %v347_v42, %v351_v12  ;;  %v343_v49 = vld [vmem:[#allocation5 + $0x4f0] sm:$0xff] }
 0x120   :  { %2396 = vmatprep.subr.bf16.mxu1 %v5726_v53  ;;  %v203_v53 = vld [vmem:[#allocation5 + $0x90] sm:$0xff]  ;;  %v5599_v61 = vcombine.low %v339_v47, %v343_v49 }
 0x121   :  { %v5464_v62 = vcombine.high %v203_v53, %v207_v54  ;;  %v5463_v4 = vcombine.low %v203_v53, %v207_v54  ;;  %v283_v12 = vld [vmem:[#allocation5 + $0x310] sm:$0xff] }
 0x122   :  { %2370 = vmatpush2.bf16.msra.mxu0 %v5661_v55  ;;  %v331_v55 = vld [vmem:[#allocation5 + $0x490] sm:$0xff] }
 0x123   :  { %2397 = vmatpush1.bf16.msra.mxu1 %v5725_v57  ;;  %2371 = vmatprep.subr.bf16.mxu0 %v5654_v58  ;;  %v5600_v57 = vcombine.high %v339_v47, %v343_v49  ;;  %v335_v58 = vld [vmem:[#allocation5 + $0x4b0] sm:$0xff] }
 0x124   :  { %2398 = vmatprep.subr.bf16.mxu1 %v5718_v63  ;;  %v195_v63 = vld [vmem:[#allocation5 + $0x50] sm:$0xff]  ;;  %v5591_v5 = vcombine.low %v331_v55, %v335_v58 }
 0x125   :  { %v5456_v6 = vcombine.high %v195_v63, %v199_v0  ;;  %v5455_v14 = vcombine.low %v195_v63, %v199_v0  ;;  %v275_v49 = vld [vmem:[#allocation5 + $0x2d0] sm:$0xff] }
 0x126   :  { %2372 = vmatpush2.bf16.msra.mxu0 %v5653_v1  ;;  %v323_v1 = vld [vmem:[#allocation5 + $0x450] sm:$0xff] }
 0x127   :  { %2399 = vmatpush1.bf16.msra.mxu1 %v5717_v2  ;;  %2373 = vmatprep.subr.bf16.mxu0 %v5646_v3  ;;  %v5592_v2 = vcombine.high %v331_v55, %v335_v58  ;;  %v327_v3 = vld [vmem:[#allocation5 + $0x470] sm:$0xff] }
 0x128   :  { %2400 = vmatprep.subr.bf16.mxu1 %v5710_v7  ;;  %v187_v7 = vld [vmem:[#allocation5 + $0x10] sm:$0xff]  ;;  %v5583_v16 = vcombine.low %v323_v1, %v327_v3 }
 0x129   :  { %v5448_v17 = vcombine.high %v187_v7, %v191_v8  ;;  %v5447_v23 = vcombine.low %v187_v7, %v191_v8  ;;  %v271_v58 = vld [vmem:[#allocation5 + $0x2b0] sm:$0xff] }
 0x12a   :  { %2374 = vmatpush2.bf16.msra.mxu0 %v5645_v9  ;;  %v315_v9 = vld [vmem:[#allocation5 + $0x410] sm:$0xff] }
 0x12b   :  { %2401 = vmatpush1.bf16.msra.mxu1 %v5709_v10  ;;  %2375 = vmatprep.subr.bf16.mxu0 %v5638_v11  ;;  %v5584_v10 = vcombine.high %v323_v1, %v327_v3  ;;  %v319_v11 = vld [vmem:[#allocation5 + $0x430] sm:$0xff] }
 0x12c   :  { %2402 = vmatprep.subr.bf16.mxu1 %v5702_v18  ;;  %v307_v18 = vld [vmem:[#allocation5 + $0x3d0] sm:$0xff]  ;;  %v5575_v24 = vcombine.low %v315_v9, %v319_v11 }
 0x12d   :  { %v5568_v25 = vcombine.high %v307_v18, %v311_v19  ;;  %v263_v3 = vld [vmem:[#allocation5 + $0x270] sm:$0xff] }
 0x12e   :  { %2376 = vmatpush2.bf16.msra.mxu0 %v5637_v20  ;;  %v435_v20 = vld [vmem:[#allocation5 + $0x7d0] sm:$0xff] }
 0x12f   :  { %2403 = vmatpush1.bf16.msra.mxu1 %v5701_v21  ;;  %2431 = vmatprep.subr.bf16.mxu0 %v5504_v22  ;;  %v5576_v21 = vcombine.high %v315_v9, %v319_v11  ;;  %v439_v22 = vld [vmem:[#allocation5 + $0x7f0] sm:$0xff] }
 0x130   :  { %2474 = vmatprep.subr.bf16.mxu1 %v5632_v26  ;;  %v299_v26 = vld [vmem:[#allocation5 + $0x390] sm:$0xff] }
 0x131   :  { %2378 = vmatmul.mubr.bf16.vlgmr.msra.gmra.mxu0 %v7097_v15  ;;  %v5487_v15 = vcombine.low %v227_v31, %v231_v33  ;;  %v5567_v31 = vcombine.low %v307_v18, %v311_v19  ;;  %v5695_v33 = vcombine.low %v435_v20, %v439_v22  ;;  %v5559_v40 = vcombine.low %v299_v26, %v303_v27  ;;  %v255_v11 = vld [vmem:[#allocation5 + $0x230] sm:$0xff] }
 0x132   :  { %2421 = vmatmul.mubr.bf16.vlgmr.msra.gmra.mxu1 %v7103_v13  ;;  %2432 = vmatpush1.bf16.msra.mxu0 %v5503_v28  ;;  %v5615_v13 = vcombine.low %v355_v34, %v359_v36  ;;  %v427_v28 = vld [vmem:[#allocation5 + $0x790] sm:$0xff]  ;;  %v5560_v34 = vcombine.high %v299_v26, %v303_v27 }
 0x133   :  { %2475 = vmatpush1.bf16.msra.mxu1 %v5631_v29  ;;  %2433 = vmatprep.subr.bf16.mxu0 %v5496_v30  ;;  %v5696_v29 = vcombine.high %v435_v20, %v439_v22  ;;  %v431_v30 = vld [vmem:[#allocation5 + $0x7b0] sm:$0xff] }
 0x134   :  { %2476 = vmatprep.subr.bf16.mxu1 %v5624_v35  ;;  %2463 = vmatprep.mubr.bf16.mxu0 %v7111_v59  ;;  %v5688_v35 = vcombine.high %v427_v28, %v431_v30  ;;  %v291_v36 = vld [vmem:[#allocation5 + $0x350] sm:$0xff]  ;;  %v5687_v41 = vcombine.low %v427_v28, %v431_v30 }
 0x135   :  { %2506 = vmatprep.mubr.bf16.mxu1 %v7114_v44  ;;  %v503_v22 = vld [vmem:[#allocation5 + $0x9f0] sm:$0xff] }
 0x136   :  { %2434 = vmatpush1.bf16.msra.mxu0 %v5495_v37  ;;  %v295_v37 = vld [vmem:[#allocation5 + $0x370] sm:$0xff] }
 0x137   :  { %2477 = vmatpush1.bf16.msra.mxu1 %v5623_v38  ;;  %2435 = vmatprep.subr.bf16.mxu0 %v5488_v39  ;;  %v419_v38 = vld [vmem:[#allocation5 + $0x750] sm:$0xff]  ;;  %v5552_v42 = vcombine.high %v291_v36, %v295_v37  ;;  %v5551_v45 = vcombine.low %v291_v36, %v295_v37 }
 0x138   :  { %2478 = vmatprep.subr.bf16.mxu1 %v5616_v43  ;;  %v423_v39 = vld [vmem:[#allocation5 + $0x770] sm:$0xff] }
 0x139   :  { %v5680_v43 = vcombine.high %v419_v38, %v423_v39  ;;  %v5679_v46 = vcombine.low %v419_v38, %v423_v39  ;;  %v495_v30 = vld [vmem:[#allocation5 + $0x9b0] sm:$0xff] }
 0x13a   :  { %2436 = vmatpush1.bf16.msra.mxu0 %v5487_v15  ;;  %v287_v15 = vld [vmem:[#allocation5 + $0x330] sm:$0xff] }
 0x13b   :  { %2479 = vmatpush1.bf16.msra.mxu1 %v5615_v13  ;;  %2437 = vmatprep.subr.bf16.mxu0 %v5480_v56  ;;  %v411_v13 = vld [vmem:[#allocation5 + $0x710] sm:$0xff]  ;;  %v5544_v47 = vcombine.high %v283_v12, %v287_v15  ;;  %v5543_v53 = vcombine.low %v283_v12, %v287_v15 }
 0x13c   :  { %2480 = vmatprep.subr.bf16.mxu1 %v5608_v48  ;;  %v415_v56 = vld [vmem:[#allocation5 + $0x730] sm:$0xff] }
 0x13d   :  { %v5672_v48 = vcombine.high %v411_v13, %v415_v56  ;;  %v5671_v54 = vcombine.low %v411_v13, %v415_v56  ;;  %v483_v39 = vld [vmem:[#allocation5 + $0x950] sm:$0xff] }
 0x13e   :  { %2438 = vmatpush1.bf16.msra.mxu0 %v5479_v50  ;;  %v279_v50 = vld [vmem:[#allocation5 + $0x2f0] sm:$0xff] }
 0x13f   :  { %2481 = vmatpush1.bf16.msra.mxu1 %v5607_v51  ;;  %2439 = vmatprep.subr.bf16.mxu0 %v5472_v52  ;;  %v403_v51 = vld [vmem:[#allocation5 + $0x6d0] sm:$0xff]  ;;  %v5536_v55 = vcombine.high %v275_v49, %v279_v50  ;;  %v5535_v63 = vcombine.low %v275_v49, %v279_v50  ;;  %v224_v49 = vld [vmem:[#allocation5 + $0x138] sm:$0xff] }
 0x140   :  { %2482 = vmatprep.subr.bf16.mxu1 %v5600_v57  ;;  %v407_v52 = vld [vmem:[#allocation5 + $0x6f0] sm:$0xff] }
 0x141   :  { %v267_v57 = vld [vmem:[#allocation5 + $0x290] sm:$0xff]  ;;  %v5663_v0 = vcombine.low %v403_v51, %v407_v52 }
 0x142   :  { %2440 = vmatpush1.bf16.msra.mxu0 %v5471_v60  ;;  %v395_v60 = vld [vmem:[#allocation5 + $0x690] sm:$0xff]  ;;  %v5528_v1 = vcombine.high %v267_v57, %v271_v58  ;;  %v5527_v7 = vcombine.low %v267_v57, %v271_v58  ;;  %v212_v57 = vld [vmem:[#allocation5 + $0xd8] sm:$0xff] }
 0x143   :  { %2483 = vmatpush1.bf16.msra.mxu1 %v5599_v61  ;;  %2441 = vmatprep.subr.bf16.mxu0 %v5464_v62  ;;  %v5664_v61 = vcombine.high %v403_v51, %v407_v52  ;;  %v399_v62 = vld [vmem:[#allocation5 + $0x6b0] sm:$0xff]  ;;  %v216_v58 = vld [vmem:[#allocation5 + $0xf8] sm:$0xff] }
 0x144   :  { %2484 = vmatprep.subr.bf16.mxu1 %v5592_v2  ;;  %v259_v2 = vld [vmem:[#allocation5 + $0x250] sm:$0xff]  ;;  %v5655_v8 = vcombine.low %v395_v60, %v399_v62 }
 0x145   :  { %v5520_v9 = vcombine.high %v259_v2, %v263_v3  ;;  %v5519_v18 = vcombine.low %v259_v2, %v263_v3  ;;  %v7120_v12 = vld [vmem:[#allocation2 + $0x8] ss:$20 sps:$4 sm:$0xff]   ;;  %v208_v2 = vld [vmem:[#allocation5 + $0xb8] sm:$0xff] }
 0x146   :  { %2442 = vmatpush1.bf16.msra.mxu0 %v5463_v4  ;;  %v387_v4 = vld [vmem:[#allocation5 + $0x650] sm:$0xff] }
 0x147   :  { %2485 = vmatpush1.bf16.msra.mxu1 %v5591_v5  ;;  %2443 = vmatprep.subr.bf16.mxu0 %v5456_v6  ;;  %v5656_v5 = vcombine.high %v395_v60, %v399_v62  ;;  %v391_v6 = vld [vmem:[#allocation5 + $0x670] sm:$0xff] }
 0x148   :  { %2486 = vmatprep.subr.bf16.mxu1 %v5584_v10  ;;  %v251_v10 = vld [vmem:[#allocation5 + $0x210] sm:$0xff]  ;;  %v5647_v19 = vcombine.low %v387_v4, %v391_v6 }
 0x149   :  { %v5512_v20 = vcombine.high %v251_v10, %v255_v11  ;;  %v5511_v26 = vcombine.low %v251_v10, %v255_v11  ;;  %v507_v10 = vlaneseq  ;;  %v200_v11 = vld [vmem:[#allocation5 + $0x78] sm:$0xff] }
 0x14a   :  { %2444 = vmatpush1.bf16.msra.mxu0 %v5455_v14  ;;  %v379_v14 = vld [vmem:[#allocation5 + $0x610] sm:$0xff] }
 0x14b   :  { %2487 = vmatpush1.bf16.msra.mxu1 %v5583_v16  ;;  %2445 = vmatprep.subr.bf16.mxu0 %v5448_v17  ;;  %v5648_v16 = vcombine.high %v387_v4, %v391_v6  ;;  %v383_v17 = vld [vmem:[#allocation5 + $0x630] sm:$0xff]  ;;  %v5473_v4 = vcombine.low %v212_v57, %v216_v58 }
 0x14c   :  { %2488 = vmatprep.subr.bf16.mxu1 %v5576_v21  ;;  %v499_v21 = vld [vmem:[#allocation5 + $0x9d0] sm:$0xff]  ;;  %v5639_v27 = vcombine.low %v379_v14, %v383_v17 }
 0x14d   :  { %v5760_v28 = vcombine.high %v499_v21, %v503_v22 }
 0x14e   :  { %2446 = vmatpush1.bf16.msra.mxu0 %v5447_v23  ;;  %v244_v23 = vld [vmem:[#allocation5 + $0x1d8] sm:$0xff] }
 0x14f   :  { %2489 = vmatpush1.bf16.msra.mxu1 %v5575_v24  ;;  %2447 = vmatprep.subr.bf16.mxu0 %v5568_v25  ;;  %v5640_v24 = vcombine.high %v379_v14, %v383_v17  ;;  %v248_v25 = vld [vmem:[#allocation5 + $0x1f8] sm:$0xff] }
 0x150   :  { %2490 = vmatprep.subr.bf16.mxu1 %v5696_v29  ;;  %v491_v29 = vld [vmem:[#allocation5 + $0x990] sm:$0xff]  ;;  %v5505_v36 = vcombine.low %v244_v23, %v248_v25 }
 0x151   :  { %v5752_v37 = vcombine.high %v491_v29, %v495_v30  ;;  %v5751_v15 = vcombine.low %v491_v29, %v495_v30  ;;  %v372_v29 = vld [vmem:[#allocation5 + $0x5d8] sm:$0xff] }
 0x152   :  { %2448 = vmatpush2.bf16.msra.mxu0 %v5567_v31  ;;  %v236_v31 = vld [vmem:[#allocation5 + $0x198] sm:$0xff] }
 0x153   :  { %2491 = vmatpush2.bf16.msra.mxu1 %v5695_v33  ;;  %2449 = vmatprep.subr.bf16.mxu0 %v5560_v34  ;;  %v5506_v33 = vcombine.high %v244_v23, %v248_v25  ;;  %v240_v34 = vld [vmem:[#allocation5 + $0x1b8] sm:$0xff]  ;;  %v7125_v23 = vshrl.u32 %v507_v10, 7 }
 0x154   :  { %2492 = vmatprep.subr.bf16.mxu1 %v5688_v35  ;;  %v5759_v35 = vcombine.low %v499_v21, %v503_v22  ;;  %v5498_v38 = vcombine.high %v236_v31, %v240_v34  ;;  %v5497_v13 = vcombine.low %v236_v31, %v240_v34  ;;  %v192_v22 = vld [vmem:[#allocation5 + $0x38] sm:$0xff] }
 0x155   :  { %v7128_v31 = vsub.s32 0, %v7125_v23  ;;  %v340_v10 = vld [vmem:[#allocation5 + $0x4d8] sm:$0xff] }
 0x156   :  { %2450 = vmatpush2.bf16.msra.mxu0 %v5559_v40  ;;  %v487_v40 = vld [vmem:[#allocation5 + $0x970] sm:$0xff] }
 0x157   :  { %2493 = vmatpush2.bf16.msra.mxu1 %v5687_v41  ;;  %2451 = vmatprep.subr.bf16.mxu0 %v5552_v42  ;;  %v7117_v41 = vld [vmem:[#allocation2] ss:$20 sps:$4 sm:$0xff]   ;;  %v5744_v56 = vcombine.high %v483_v39, %v487_v40  ;;  %v5743_v50 = vcombine.low %v483_v39, %v487_v40 }
 0x158   :  { %2494 = vmatprep.subr.bf16.mxu1 %v5680_v43  ;;  %v228_v42 = vld [vmem:[#allocation5 + $0x158] sm:$0xff] }
 0x159   :  { %v232_v43 = vld [vmem:[#allocation5 + $0x178] sm:$0xff] }
 0x15a   :  { %2452 = vmatpush2.bf16.msra.mxu0 %v5551_v45  ;;  %v5490_v45 = vcombine.high %v228_v42, %v232_v43  ;;  %v5489_v51 = vcombine.low %v228_v42, %v232_v43  ;;  %v364_v39 = vld [vmem:[#allocation5 + $0x598] sm:$0xff] }
 0x15b   :  { %2495 = vmatpush2.bf16.msra.mxu1 %v5679_v46  ;;  %2453 = vmatprep.subr.bf16.mxu0 %v5544_v47  ;;  %v475_v46 = vld [vmem:[#allocation5 + $0x910] sm:$0xff]  ;;  %v368_v40 = vld [vmem:[#allocation5 + $0x5b8] sm:$0xff] }
 0x15c   :  { %2496 = vmatprep.subr.bf16.mxu1 %v5672_v48  ;;  %v479_v47 = vld [vmem:[#allocation5 + $0x930] sm:$0xff]  ;;  %v220_v48 = vld [vmem:[#allocation5 + $0x118] sm:$0xff] }
 0x15d   :  { %v5736_v52 = vcombine.high %v475_v46, %v479_v47  ;;  %v5735_v60 = vcombine.low %v475_v46, %v479_v47  ;;  %v300_v42 = vld [vmem:[#allocation5 + $0x398] sm:$0xff] }
 0x15e   :  { %2454 = vmatpush2.bf16.msra.mxu0 %v5543_v53  ;;  %v5482_v53 = vcombine.high %v220_v48, %v224_v49  ;;  %v304_v43 = vld [vmem:[#allocation5 + $0x3b8] sm:$0xff] }
 0x15f   :  { %2497 = vmatpush2.bf16.msra.mxu1 %v5671_v54  ;;  %2455 = vmatprep.subr.bf16.mxu0 %v5536_v55  ;;  %v467_v54 = vld [vmem:[#allocation5 + $0x8d0] sm:$0xff]  ;;  %v5562_v46 = vcombine.high %v300_v42, %v304_v43  ;;  %v356_v47 = vld [vmem:[#allocation5 + $0x558] sm:$0xff] }
 0x160   :  { %2498 = vmatprep.subr.bf16.mxu1 %v5664_v61  ;;  %v471_v55 = vld [vmem:[#allocation5 + $0x8f0] sm:$0xff]  ;;  %v5481_v61 = vcombine.low %v220_v48, %v224_v49  ;;  %v360_v48 = vld [vmem:[#allocation5 + $0x578] sm:$0xff] }
 0x161   :  { %v5728_v62 = vcombine.high %v467_v54, %v471_v55  ;;  %v5727_v3 = vcombine.low %v467_v54, %v471_v55  ;;  %v5625_v55 = vcombine.low %v364_v39, %v368_v40 }
 0x162   :  { %2456 = vmatpush2.bf16.msra.mxu0 %v5535_v63  ;;  %v459_v63 = vld [vmem:[#allocation5 + $0x890] sm:$0xff] }
 0x163   :  { %2499 = vmatpush2.bf16.msra.mxu1 %v5663_v0  ;;  %2457 = vmatprep.subr.bf16.mxu0 %v5528_v1  ;;  %v463_v0 = vld [vmem:[#allocation5 + $0x8b0] sm:$0xff]  ;;  %v204_v1 = vld [vmem:[#allocation5 + $0x98] sm:$0xff] }
 0x164   :  { %2500 = vmatprep.subr.bf16.mxu1 %v5656_v5  ;;  %v5720_v5 = vcombine.high %v459_v63, %v463_v0  ;;  %v5466_v6 = vcombine.high %v204_v1, %v208_v2  ;;  %v5719_v14 = vcombine.low %v459_v63, %v463_v0  ;;  %v348_v63 = vld [vmem:[#allocation5 + $0x518] sm:$0xff] }
 0x165   :  { %v352_v0 = vld [vmem:[#allocation5 + $0x538] sm:$0xff] }
 0x166   :  { %2458 = vmatpush2.bf16.msra.mxu0 %v5527_v7  ;;  %v451_v7 = vld [vmem:[#allocation5 + $0x850] sm:$0xff] }
 0x167   :  { %2501 = vmatpush2.bf16.msra.mxu1 %v5655_v8  ;;  %2459 = vmatprep.subr.bf16.mxu0 %v5520_v9  ;;  %v455_v8 = vld [vmem:[#allocation5 + $0x870] sm:$0xff]  ;;  %v196_v9 = vld [vmem:[#allocation5 + $0x58] sm:$0xff] }
 0x168   :  { %2502 = vmatprep.subr.bf16.mxu1 %v5648_v16  ;;  %v5465_v16 = vcombine.low %v204_v1, %v208_v2  ;;  %v5712_v17 = vcombine.high %v451_v7, %v455_v8  ;;  %v5458_v21 = vcombine.high %v196_v9, %v200_v11  ;;  %v5457_v25 = vcombine.low %v196_v9, %v200_v11  ;;  %v284_v2 = vld [vmem:[#allocation5 + $0x318] sm:$0xff] }
 0x169   :  { %v344_v11 = vld [vmem:[#allocation5 + $0x4f8] sm:$0xff] }
 0x16a   :  { %2460 = vmatpush2.bf16.msra.mxu0 %v5519_v18  ;;  %v443_v18 = vld [vmem:[#allocation5 + $0x810] sm:$0xff] }
 0x16b   :  { %2503 = vmatpush2.bf16.msra.mxu1 %v5647_v19  ;;  %2461 = vmatprep.subr.bf16.mxu0 %v5512_v20  ;;  %v447_v19 = vld [vmem:[#allocation5 + $0x830] sm:$0xff]  ;;  %v188_v20 = vld [vmem:[#allocation5 + $0x18] sm:$0xff] }
 0x16c   :  { %2504 = vmatprep.subr.bf16.mxu1 %v5640_v24  ;;  %v5711_v24 = vcombine.low %v451_v7, %v455_v8  ;;  %v5450_v30 = vcombine.high %v188_v20, %v192_v22  ;;  %v5703_v34 = vcombine.low %v443_v18, %v447_v19  ;;  %v5610_v7 = vcombine.high %v348_v63, %v352_v0 }
 0x16e   :  { %2462 = vmatpush2.bf16.msra.mxu0 %v5511_v26  ;;  %v5704_v26 = vcombine.high %v443_v18, %v447_v19  ;;  %v5602_v19 = vcombine.high %v340_v10, %v344_v11 }
 0x16f   :  { %2505 = vmatpush2.bf16.msra.mxu1 %v5639_v27  ;;  %2517 = vmatprep.subr.bf16.mxu0 %v5760_v28  ;;  %v308_v27 = vld [vmem:[#allocation5 + $0x3d8] sm:$0xff] }
 0x170   :  { %2560 = vmatprep.subr.bf16.mxu1 %v5506_v33  ;;  %v312_v28 = vld [vmem:[#allocation5 + $0x3f8] sm:$0xff] }
 0x171   :  { %2464 = vmatmul.mubr.bf16.vlgmr.msra.gmra.mxu0 %v7117_v41  ;;  %v376_v33 = vld [vmem:[#allocation5 + $0x5f8] sm:$0xff] }
 0x172   :  { %2507 = vmatmul.mubr.bf16.vlgmr.msra.gmra.mxu1 %v7120_v12  ;;  %2518 = vmatpush1.bf16.msra.mxu0 %v5759_v35  ;;  %v5449_v35 = vcombine.low %v188_v20, %v192_v22  ;;  %v336_v22 = vld [vmem:[#allocation5 + $0x4b8] sm:$0xff] }
 0x173   :  { %2561 = vmatpush1.bf16.msra.mxu1 %v5505_v36  ;;  %2519 = vmatprep.subr.bf16.mxu0 %v5752_v37  ;;  %v7130_v36 = vld [vmem:[#allocation7] sm:$0xff]  ;;  %v5634_v37 = vcombine.high %v372_v29, %v376_v33 }
 0x174   :  { %2562 = vmatprep.subr.bf16.mxu1 %v5498_v38  ;;  %2549 = vmatprep.mubr.bf16.mxu0 %v6986_v32  ;;  %v5570_v38 = vcombine.high %v308_v27, %v312_v28 }
 0x175   :  { %2592 = vmatprep.mubr.bf16.mxu1 %v7111_v59  ;;  %v5474_v59 = vcombine.high %v212_v57, %v216_v58  ;;  %v5561_v58 = vcombine.low %v300_v42, %v304_v43  ;;  %v316_v42 = vld [vmem:[#allocation5 + $0x418] sm:$0xff] }
 0x176   :  { %2520 = vmatpush1.bf16.msra.mxu0 %v5751_v15  ;;  %v510_v15 = vrot.slane %v7130_v36, %v7128_v31  ;;  %v320_v43 = vld [vmem:[#allocation5 + $0x438] sm:$0xff] }
 0x177   :  { %2563 = vmatpush1.bf16.msra.mxu1 %v5497_v13  ;;  %2521 = vmatprep.subr.bf16.mxu0 %v5744_v56  ;;  %v5633_v13 = vcombine.low %v372_v29, %v376_v33  ;;  %v5569_v56 = vcombine.low %v308_v27, %v312_v28  ;;  %v328_v33 = vld [vmem:[#allocation5 + $0x478] sm:$0xff] }
 0x178   :  { %2564 = vmatprep.subr.bf16.mxu1 %v5490_v45  ;;  %v5626_v45 = vcombine.high %v364_v39, %v368_v40 }
 0x17a   :  { %2522 = vmatpush1.bf16.msra.mxu0 %v5743_v50  ;;  %v7134_v50 = vld [vmem:[#allocation2 + $0x10] ss:$20 sps:$4 sm:$0xff]  }
 0x17b   :  { %2565 = vmatpush1.bf16.msra.mxu1 %v5489_v51  ;;  %2523 = vmatprep.subr.bf16.mxu0 %v5736_v52  ;;  %v292_v51 = vld [vmem:[#allocation5 + $0x358] sm:$0xff] }
 0x17c   :  { %2566 = vmatprep.subr.bf16.mxu1 %v5482_v53  ;;  %v296_v52 = vld [vmem:[#allocation5 + $0x378] sm:$0xff] }
 0x17e   :  { %2524 = vmatpush1.bf16.msra.mxu0 %v5735_v60  ;;  %v5618_v60 = vcombine.high %v356_v47, %v360_v48 }
 0x17f   :  { %2567 = vmatpush1.bf16.msra.mxu1 %v5481_v61  ;;  %2525 = vmatprep.subr.bf16.mxu0 %v5728_v62 }
 0x180   :  { %2568 = vmatprep.subr.bf16.mxu1 %v5474_v59  ;;  %v5554_v59 = vcombine.high %v292_v51, %v296_v52 }
 0x182   :  { %2526 = vmatpush1.bf16.msra.mxu0 %v5727_v3  ;;  %v288_v3 = vld [vmem:[#allocation5 + $0x338] sm:$0xff] }
 0x183   :  { %2569 = vmatpush1.bf16.msra.mxu1 %v5473_v4  ;;  %2527 = vmatprep.subr.bf16.mxu0 %v5720_v5  ;;  %v5546_v9 = vcombine.high %v284_v2, %v288_v3  ;;  %v5545_v18 = vcombine.low %v284_v2, %v288_v3 }
 0x184   :  { %2570 = vmatprep.subr.bf16.mxu1 %v5466_v6  ;;  %v5553_v6 = vcombine.low %v292_v51, %v296_v52  ;;  %v500_v51 = vld [vmem:[#allocation5 + $0x9d8] sm:$0xff] }
 0x185   :  { %v504_v52 = vld [vmem:[#allocation5 + $0x9f8] sm:$0xff] }
 0x186   :  { %2528 = vmatpush1.bf16.msra.mxu0 %v5719_v14  ;;  %v276_v14 = vld [vmem:[#allocation5 + $0x2d8] sm:$0xff]  ;;  %v5761_v3 = vcombine.low %v500_v51, %v504_v52 }
 0x187   :  { %2571 = vmatpush1.bf16.msra.mxu1 %v5465_v16  ;;  %2529 = vmatprep.subr.bf16.mxu0 %v5712_v17  ;;  %v280_v16 = vld [vmem:[#allocation5 + $0x2f8] sm:$0xff]  ;;  %v5609_v17 = vcombine.low %v348_v63, %v352_v0 }
 0x188   :  { %2572 = vmatprep.subr.bf16.mxu1 %v5458_v21  ;;  %v5538_v20 = vcombine.high %v276_v14, %v280_v16  ;;  %v332_v21 = vld [vmem:[#allocation5 + $0x498] sm:$0xff]  ;;  %v5537_v27 = vcombine.low %v276_v14, %v280_v16 }
 0x189   :  { %v5594_v28 = vcombine.high %v332_v21, %v336_v22  ;;  %v492_v63 = vld [vmem:[#allocation5 + $0x998] sm:$0xff] }
 0x18a   :  { %2530 = vmatpush1.bf16.msra.mxu0 %v5711_v24  ;;  %v268_v24 = vld [vmem:[#allocation5 + $0x298] sm:$0xff] }
 0x18b   :  { %2573 = vmatpush1.bf16.msra.mxu1 %v5457_v25  ;;  %2531 = vmatprep.subr.bf16.mxu0 %v5704_v26  ;;  %v272_v25 = vld [vmem:[#allocation5 + $0x2b8] sm:$0xff]  ;;  %v5601_v26 = vcombine.low %v340_v10, %v344_v11 }
 0x18c   :  { %2574 = vmatprep.subr.bf16.mxu1 %v5450_v30  ;;  %v5530_v29 = vcombine.high %v268_v24, %v272_v25  ;;  %v324_v30 = vld [vmem:[#allocation5 + $0x458] sm:$0xff] }
 0x18d   :  { %v5586_v39 = vcombine.high %v324_v30, %v328_v33  ;;  %v496_v0 = vld [vmem:[#allocation5 + $0x9b8] sm:$0xff] }
 0x18e   :  { %2532 = vmatpush1.bf16.msra.mxu0 %v5703_v34  ;;  %v260_v34 = vld [vmem:[#allocation5 + $0x258] sm:$0xff] }
 0x18f   :  { %2575 = vmatpush1.bf16.msra.mxu1 %v5449_v35  ;;  %2603 = vmatprep.subr.bf16.mxu0 %v5634_v37  ;;  %v264_v35 = vld [vmem:[#allocation5 + $0x278] sm:$0xff]  ;;  %v5593_v37 = vcombine.low %v332_v21, %v336_v22 }
 0x190   :  { %2576 = vmatprep.subr.bf16.mxu1 %v5570_v38  ;;  %v5529_v38 = vcombine.low %v268_v24, %v272_v25  ;;  %v5522_v40 = vcombine.high %v260_v34, %v264_v35  ;;  %v488_v10 = vld [vmem:[#allocation5 + $0x978] sm:$0xff] }
 0x191   :  { %v2207_v49 = vpop.f32.mrf.mxu0  ;;  %2550 = vmatmul.mubr.bf16.vlgmr.msra.gmra.mxu0 %v7134_v50  ;;  %v416_v21 = vld [vmem:[#allocation5 + $0x738] sm:$0xff] }
 0x192   :  { %v2208_v53 = vadd.f32 %v2207_v49, %v510_v15  ;;  %v2250_v54 = vpop.f32.mrf.mxu1  ;;  %2604 = vmatpush1.bf16.msra.mxu0 %v5633_v13  ;;  %2635 = vmatprep.mubr.bf16.mxu0 %v7114_v44  ;;  %v5617_v44 = vcombine.low %v356_v47, %v360_v48  ;;  %v256_v13 = vld [vmem:[#allocation5 + $0x238] sm:$0xff] }
 0x193   :  { %2577 = vmatpush2.bf16.msra.mxu1 %v5569_v56  ;;  %v7138_v57 = vpop.f32.mrf.mxu0  ;;  %2605 = vmatprep.subr.bf16.mxu0 %v5626_v45  ;;  %v5585_v56 = vcombine.low %v324_v30, %v328_v33  ;;  %v5521_v45 = vcombine.low %v260_v34, %v264_v35  ;;  %v436_v48 = vld [vmem:[#allocation5 + $0x7d8] sm:$0xff] }
 0x194   :  { %v7140_v61 = vadd.f32 %v2250_v54, %v2208_v53  ;;  %v7142_v62 = vpop.f32.mrf.mxu1  ;;  %2578 = vmatprep.subr.bf16.mxu1 %v5562_v46  ;;  %v5578_v46 = vcombine.high %v316_v42, %v320_v43  ;;  %v440_v49 = vld [vmem:[#allocation5 + $0x7f8] sm:$0xff]  ;;  %v5577_v53 = vcombine.low %v316_v42, %v320_v43 }
 0x195   :  { %v2211_v1 = vpop.f32.mrf.mxu0  ;;  %v476_v24 = vld [vmem:[#allocation5 + $0x918] sm:$0xff] }
 0x196   :  { %v2212_v4 = vadd.f32 %v2211_v1, %v510_v15  ;;  %2606 = vmatpush1.bf16.msra.mxu0 %v5625_v55  ;;  %v2254_v5 = vpop.f32.mrf.mxu1  ;;  %v252_v15 = vld [vmem:[#allocation5 + $0x218] sm:$0xff]  ;;  %v5698_v55 = vcombine.high %v436_v48, %v440_v49  ;;  %v5697_v1 = vcombine.low %v436_v48, %v440_v49 }
 0x197   :  { %2579 = vmatpush2.bf16.msra.mxu1 %v5561_v58  ;;  %2607 = vmatprep.subr.bf16.mxu0 %v5618_v60  ;;  %v5514_v47 = vcombine.high %v252_v15, %v256_v13  ;;  %v5513_v54 = vcombine.low %v252_v15, %v256_v13  ;;  %v5762_v58 = vcombine.high %v500_v51, %v504_v52  ;;  %v428_v60 = vld [vmem:[#allocation5 + $0x798] sm:$0xff]  ;;  %v7146_v2 = vpop.f32.mrf.mxu0  ;;  %v7157_v15 = vsub.s32 1, %v7125_v23 }
 0x198   :  { %v7144_v8 = vadd.f32 %v2254_v5, %v2212_v4  ;;  %2580 = vmatprep.subr.bf16.mxu1 %v5554_v59  ;;  %v432_v59 = vld [vmem:[#allocation5 + $0x7b8] sm:$0xff] }
 0x199   :  { %v5690_v4 = vcombine.high %v428_v60, %v432_v59  ;;  %v420_v5 = vld [vmem:[#allocation5 + $0x758] sm:$0xff]  ;;  %v5689_v14 = vcombine.low %v428_v60, %v432_v59  ;;  %v514_v52 = vrot.slane %v7130_v36, %v7157_v15 }
 0x19a   :  { %2608 = vmatpush1.bf16.msra.mxu0 %v5617_v44  ;;  %v5754_v44 = vcombine.high %v492_v63, %v496_v0  ;;  %v480_v25 = vld [vmem:[#allocation5 + $0x938] sm:$0xff] }
 0x19b   :  { %2581 = vmatpush2.bf16.msra.mxu1 %v5553_v6  ;;  %2609 = vmatprep.subr.bf16.mxu0 %v5610_v7  ;;  %v424_v6 = vld [vmem:[#allocation5 + $0x778] sm:$0xff]  ;;  %v5738_v30 = vcombine.high %v476_v24, %v480_v25 }
 0x19c   :  { %2582 = vmatprep.subr.bf16.mxu1 %v5546_v9  ;;  %v484_v9 = vld [vmem:[#allocation5 + $0x958] sm:$0xff] }
 0x19d   :  { %v404_v33 = vld [vmem:[#allocation5 + $0x6d8] sm:$0xff] }
 0x19e   :  { %2610 = vmatpush1.bf16.msra.mxu0 %v5609_v17  ;;  %v5753_v17 = vcombine.low %v492_v63, %v496_v0  ;;  %v408_v34 = vld [vmem:[#allocation5 + $0x6f8] sm:$0xff] }
 0x19f   :  { %2583 = vmatpush2.bf16.msra.mxu1 %v5545_v18  ;;  %2611 = vmatprep.subr.bf16.mxu0 %v5602_v19  ;;  %v5682_v18 = vcombine.high %v420_v5, %v424_v6  ;;  %v5746_v19 = vcombine.high %v484_v9, %v488_v10  ;;  %v468_v35 = vld [vmem:[#allocation5 + $0x8d8] sm:$0xff] }
 0x1a0   :  { %2584 = vmatprep.subr.bf16.mxu1 %v5538_v20  ;;  %v412_v20 = vld [vmem:[#allocation5 + $0x718] sm:$0xff] }
 0x1a1   :  { %v396_v42 = vld [vmem:[#allocation5 + $0x698] sm:$0xff] }
 0x1a2   :  { %2612 = vmatpush1.bf16.msra.mxu0 %v5601_v26  ;;  %v5745_v26 = vcombine.low %v484_v9, %v488_v10  ;;  %v400_v43 = vld [vmem:[#allocation5 + $0x6b8] sm:$0xff] }
 0x1a3   :  { %2585 = vmatpush2.bf16.msra.mxu1 %v5537_v27  ;;  %2613 = vmatprep.subr.bf16.mxu0 %v5594_v28  ;;  %v5674_v27 = vcombine.high %v412_v20, %v416_v21  ;;  %v460_v13 = vld [vmem:[#allocation5 + $0x898] sm:$0xff] }
 0x1a4   :  { %2586 = vmatprep.subr.bf16.mxu1 %v5530_v29  ;;  %v388_v49 = vld [vmem:[#allocation5 + $0x658] sm:$0xff] }
 0x1a5   :  { %v392_v51 = vld [vmem:[#allocation5 + $0x678] sm:$0xff] }
 0x1a6   :  { %2614 = vmatpush1.bf16.msra.mxu0 %v5593_v37  ;;  %v472_v37 = vld [vmem:[#allocation5 + $0x8f8] sm:$0xff]  ;;  %v5650_v59 = vcombine.high %v388_v49, %v392_v51 }
 0x1a7   :  { %2587 = vmatpush2.bf16.msra.mxu1 %v5529_v38  ;;  %2615 = vmatprep.subr.bf16.mxu0 %v5586_v39  ;;  %v5673_v38 = vcombine.low %v412_v20, %v416_v21  ;;  %v5666_v39 = vcombine.high %v404_v33, %v408_v34  ;;  %v380_v0 = vld [vmem:[#allocation5 + $0x618] sm:$0xff] }
 0x1a8   :  { %2588 = vmatprep.subr.bf16.mxu1 %v5522_v40  ;;  %v5730_v40 = vcombine.high %v468_v35, %v472_v37  ;;  %v6203_v20 = vld [vmem:[#allocation8 + $0xe4] ss:$16 sps:$4 sm:$0xff]  }
 0x1a9   :  { %v6206_v21 = vld [vmem:[#allocation8 + $0x2e4] ss:$16 sps:$4 sm:$0xff]  }
 0x1aa   :  { %2616 = vmatpush1.bf16.msra.mxu0 %v5585_v56  ;;  %v464_v56 = vld [vmem:[#allocation5 + $0x8b8] sm:$0xff] }
 0x1ab   :  { %2589 = vmatpush2.bf16.msra.mxu1 %v5521_v45  ;;  %2617 = vmatprep.subr.bf16.mxu0 %v5578_v46  ;;  %v5665_v45 = vcombine.low %v404_v33, %v408_v34  ;;  %v5729_v46 = vcombine.low %v468_v35, %v472_v37  ;;  %v5722_v48 = vcombine.high %v460_v13, %v464_v56  ;;  %v6216_v33 = vld [vmem:[#allocation8 + $0x2a0] ss:$16 sps:$4 sm:$0xff]   ;;  %v6221_v34 = vld [vmem:[#allocation8 + $0x84] ss:$16 sps:$4 sm:$0xff]  }
 0x1ac   :  { %2590 = vmatprep.subr.bf16.mxu1 %v5514_v47  ;;  %v5658_v47 = vcombine.high %v396_v42, %v400_v43  ;;  %v5721_v60 = vcombine.low %v460_v13, %v464_v56  ;;  %v6222_v35 = vld [vmem:[#allocation8 + $0x280] ss:$16 sps:$4 sm:$0xff]   ;;  %v6227_v37 = vld [vmem:[#allocation8 + $0x64] ss:$16 sps:$4 sm:$0xff]  }
 0x1ad   :  { %v6234_v13 = vld [vmem:[#allocation8 + $0x240] ss:$16 sps:$4 sm:$0xff]   ;;  %v6239_v56 = vld [vmem:[#allocation8 + $0x24] ss:$16 sps:$4 sm:$0xff]  }
 0x1ae   :  { %2618 = vmatpush1.bf16.msra.mxu0 %v5577_v53  ;;  %v452_v53 = vld [vmem:[#allocation5 + $0x858] sm:$0xff] }
 0x1af   :  { %2591 = vmatpush2.bf16.msra.mxu1 %v5513_v54  ;;  %2619 = vmatprep.subr.bf16.mxu0 %v5698_v55  ;;  %v456_v54 = vld [vmem:[#allocation5 + $0x878] sm:$0xff]  ;;  %v5657_v55 = vcombine.low %v396_v42, %v400_v43 }
 0x1b0   :  { %2646 = vmatprep.subr.bf16.mxu1 %v5762_v58  ;;  %v2214_v58 = vadd.f32 %v7146_v2, %v514_v52  ;;  %v5714_v63 = vcombine.high %v452_v53, %v456_v54  ;;  %v5713_v2 = vcombine.low %v452_v53, %v456_v54  ;;  %v6236_v42 = vld [vmem:[#allocation8 + $0x244] ss:$16 sps:$4 sm:$0xff]   ;;  %v6231_v43 = vld [vmem:[#allocation8 + $0x40] ss:$16 sps:$4 sm:$0xff]   ;;  %v521_v53 = vsub.s32 3, %v7125_v23 }
 0x1b1   :  { %v2293_v7 = vpop.f32.mrf.mxu0  ;;  %v6243_v54 = vld [vmem:[#allocation8] ss:$16 sps:$4 sm:$0xff]  }
 0x1b2   :  { %v2294_v11 = vadd.f32 %v2293_v7, %v7140_v61  ;;  %2593 = vmatmul.mubr.bf16.vlgmr.msra.gmra.mxu1 %v7117_v41  ;;  %2620 = vmatpush2.bf16.msra.mxu0 %v5697_v1  ;;  %v5681_v41 = vcombine.low %v420_v5, %v424_v6  ;;  %v384_v1 = vld [vmem:[#allocation5 + $0x638] sm:$0xff]  ;;  %v2256_v5 = vpop.f32.mrf.mxu1  ;;  %v5649_v7 = vcombine.low %v388_v49, %v392_v51 }
 0x1b3   :  { %2647 = vmatpush1.bf16.msra.mxu1 %v5761_v3  ;;  %v7150_v16 = vpop.f32.mrf.mxu0  ;;  %2621 = vmatprep.subr.bf16.mxu0 %v5690_v4  ;;  %v2210_v3 = vadd.f32 %v7138_v57, %v514_v52  ;;  %v444_v4 = vld [vmem:[#allocation5 + $0x818] sm:$0xff]  ;;  %v2257_v9 = vadd.f32 %v2256_v5, %v2214_v58  ;;  %v5642_v10 = vcombine.high %v380_v0, %v384_v1 }
 0x1b4   :  { %2648 = vmatprep.subr.bf16.mxu1 %v5754_v44  ;;  %2678 = vmatprep.mubr.bf16.mxu1 %v6986_v32  ;;  %v2689_v28 = vmax.f32 %v2294_v11, 0.0  ;;  %v448_v44 = vld [vmem:[#allocation5 + $0x838] sm:$0xff] }
 0x1b5   :  { %v2297_v22 = vpop.f32.mrf.mxu0  ;;  %v5706_v11 = vcombine.high %v444_v4, %v448_v44  ;;  %v6245_v49 = vld [vmem:[#allocation8 + $0x4] ss:$16 sps:$4 sm:$0xff]  }
 0x1b6   :  { %v2298_v61 = vadd.f32 %v2297_v22, %v7144_v8  ;;  %2622 = vmatpush2.bf16.msra.mxu0 %v5689_v14  ;;  %v5737_v8 = vcombine.low %v476_v24, %v480_v25  ;;  %v2253_v14 = vadd.f32 %v7142_v62, %v2210_v3  ;;  %v6201_v24 = vld [vmem:[#allocation8 + $0xe0] ss:$16 sps:$4 sm:$0xff]   ;;  %v6209_v62 = vld [vmem:[#allocation8 + $0xc4] ss:$16 sps:$4 sm:$0xff]  }
 0x1b7   :  { %2649 = vmatpush1.bf16.msra.mxu1 %v5753_v17  ;;  %2623 = vmatprep.subr.bf16.mxu0 %v5682_v18  ;;  %v2299_v6 = vpop.f32.mrf.mxu0  ;;  %v5641_v18 = vcombine.low %v380_v0, %v384_v1  ;;  %v6248_v52 = vld [vmem:[#allocation8 + $0x204] ss:$16 sps:$4 sm:$0xff]   ;;  %v6249_v0 = vld [vmem:[#allocation8 + $0x1e0] ss:$16 sps:$4 sm:$0xff]  }
 0x1b8   :  { %v2697_v29 = vmax.f32 %v2298_v61, 0.0  ;;  %2650 = vmatprep.subr.bf16.mxu1 %v5746_v19  ;;  %v2300_v17 = vadd.f32 %v2299_v6, %v2257_v9  ;;  %v2296_v57 = vadd.f32 %v7150_v16, %v2253_v14  ;;  %v5705_v19 = vcombine.low %v444_v4, %v448_v44  ;;  %v6204_v61 = vld [vmem:[#allocation8 + $0x2e0] ss:$16 sps:$4 sm:$0xff]   ;;  %v6251_v58 = vld [vmem:[#allocation8 + $0x1e4] ss:$16 sps:$4 sm:$0xff]  }
 0x1b9   :  { %v6207_v16 = vld [vmem:[#allocation8 + $0xc0] ss:$16 sps:$4 sm:$0xff]   ;;  %v6257_v3 = vld [vmem:[#allocation8 + $0x1c4] ss:$16 sps:$4 sm:$0xff]  }
 0x1ba   :  { %v7154_v32 = vpack.c.bf16 %v2697_v29, %v2689_v28  ;;  %2624 = vmatpush2.bf16.msra.mxu0 %v5681_v41  ;;  %v2698_v22 = vmax.f32 %v2300_v17, 0.0  ;;  %v2690_v25 = vmax.f32 %v2296_v57, 0.0  ;;  %v6212_v41 = vld [vmem:[#allocation8 + $0x2c4] ss:$16 sps:$4 sm:$0xff]   ;;  %v6252_v1 = vld [vmem:[#allocation8 + $0x3e0] ss:$16 sps:$4 sm:$0xff]  }
 0x1bb   :  { %2651 = vmatpush1.bf16.msra.mxu1 %v5745_v26  ;;  %2625 = vmatprep.subr.bf16.mxu0 %v5674_v27  ;;  %v6210_v27 = vld [vmem:[#allocation8 + $0x2c0] ss:$16 sps:$4 sm:$0xff]   ;;  %v6215_v28 = vld [vmem:[#allocation8 + $0xa4] ss:$16 sps:$4 sm:$0xff]  }
 0x1bc   :  { %2652 = vmatprep.subr.bf16.mxu1 %v5738_v30  ;;  %v7165_v26 = vpack.c.bf16 %v2698_v22, %v2690_v25  ;;  %v6218_v29 = vld [vmem:[#allocation8 + $0x2a4] ss:$16 sps:$4 sm:$0xff]   ;;  %v6213_v30 = vld [vmem:[#allocation8 + $0xa0] ss:$16 sps:$4 sm:$0xff]  }
 0x1bd   :  { %v6260_v44 = vld [vmem:[#allocation8 + $0x3c4] ss:$16 sps:$4 sm:$0xff]   ;;  %v6255_v9 = vld [vmem:[#allocation8 + $0x1c0] ss:$16 sps:$4 sm:$0xff]  }
 0x1be   :  { %2626 = vmatpush2.bf16.msra.mxu0 %v5673_v38  ;;  %v6230_v38 = vld [vmem:[#allocation8 + $0x264] ss:$16 sps:$4 sm:$0xff]  }
 0x1bf   :  { %2653 = vmatpush1.bf16.msra.mxu1 %v5737_v8  ;;  %2627 = vmatprep.subr.bf16.mxu0 %v5666_v39  ;;  %v6225_v8 = vld [vmem:[#allocation8 + $0x60] ss:$16 sps:$4 sm:$0xff]   ;;  %v6269_v25 = vld [vmem:[#allocation8 + $0x184] ss:$16 sps:$4 sm:$0xff]  }
 0x1c0   :  { %2654 = vmatprep.subr.bf16.mxu1 %v5730_v40  ;;  %v6228_v39 = vld [vmem:[#allocation8 + $0x260] ss:$16 sps:$4 sm:$0xff]   ;;  %v6233_v40 = vld [vmem:[#allocation8 + $0x44] ss:$16 sps:$4 sm:$0xff]  }
 0x1c2   :  { %2628 = vmatpush2.bf16.msra.mxu0 %v5665_v45 }
 0x1c3   :  { %2655 = vmatpush1.bf16.msra.mxu1 %v5729_v46  ;;  %2629 = vmatprep.subr.bf16.mxu0 %v5658_v47  ;;  %v6242_v46 = vld [vmem:[#allocation8 + $0x224] ss:$16 sps:$4 sm:$0xff]   ;;  %v6237_v47 = vld [vmem:[#allocation8 + $0x20] ss:$16 sps:$4 sm:$0xff]  }
 0x1c4   :  { %2656 = vmatprep.subr.bf16.mxu1 %v5722_v48  ;;  %v6240_v48 = vld [vmem:[#allocation8 + $0x220] ss:$16 sps:$4 sm:$0xff]  }
 0x1c6   :  { %2630 = vmatpush2.bf16.msra.mxu0 %v5657_v55  ;;  %v6246_v55 = vld [vmem:[#allocation8 + $0x200] ss:$16 sps:$4 sm:$0xff]  }
 0x1c7   :  { %2657 = vmatpush1.bf16.msra.mxu1 %v5721_v60  ;;  %2631 = vmatprep.subr.bf16.mxu0 %v5650_v59  ;;  %v6254_v59 = vld [vmem:[#allocation8 + $0x3e4] ss:$16 sps:$4 sm:$0xff]  }
 0x1c8   :  { %2658 = vmatprep.subr.bf16.mxu1 %v5714_v63  ;;  %v522_v63 = vrot.slane %v7130_v36, %v521_v53 }
 0x1ca   :  { %2632 = vmatpush2.bf16.msra.mxu0 %v5649_v7 }
 0x1cb   :  { %2659 = vmatpush1.bf16.msra.mxu1 %v5713_v2  ;;  %2633 = vmatprep.subr.bf16.mxu0 %v5642_v10  ;;  %v6258_v10 = vld [vmem:[#allocation8 + $0x3c0] ss:$16 sps:$4 sm:$0xff]  }
 0x1cc   :  { %2660 = vmatprep.subr.bf16.mxu1 %v5706_v11  ;;  %v6263_v11 = vld [vmem:[#allocation8 + $0x1a4] ss:$16 sps:$4 sm:$0xff]  }
 0x1ce   :  { %2634 = vmatpush2.bf16.msra.mxu0 %v5641_v18  ;;  %v6266_v18 = vld [vmem:[#allocation8 + $0x3a4] ss:$16 sps:$4 sm:$0xff]  }
 0x1cf   :  { %2661 = vmatpush1.bf16.msra.mxu1 %v5705_v19  ;;  %4271 = vmatprep.subr.bf16.mxu0 %v6203_v20 }
 0x1d0   :  { %4314 = vmatprep.subr.bf16.mxu1 %v6206_v21  ;;  %v6261_v21 = vld [vmem:[#allocation8 + $0x1a0] ss:$16 sps:$4 sm:$0xff]  }
 0x1d1   :  { %2636 = vmatmul.mubr.bf16.vlgmr.msra.gmra.mxu0 %v7120_v12  ;;  %v6224_v12 = vld [vmem:[#allocation8 + $0x284] ss:$16 sps:$4 sm:$0xff]  }
 0x1d2   :  { %2679 = vmatmul.mubr.bf16.vlgmr.msra.gmra.mxu1 %v7134_v50  ;;  %4272 = vmatpush1.bf16.msra.mxu0 %v6201_v24  ;;  %v6219_v50 = vld [vmem:[#allocation8 + $0x80] ss:$16 sps:$4 sm:$0xff]   ;;  %v7170_v45 = vpop.f32.mrf.mxu1 }
 0x1d3   :  { %4303 = vmatprep.mubr.bf16.mxu0 %v7165_v26  ;;  %4315 = vmatpush1.bf16.msra.mxu1 %v6204_v61  ;;  %v6264_v24 = vld [vmem:[#allocation8 + $0x3a0] ss:$16 sps:$4 sm:$0xff]  }
 0x1d4   :  { %4273 = vmatprep.subr.bf16.mxu0 %v6209_v62  ;;  %4316 = vmatprep.subr.bf16.mxu1 %v6212_v41  ;;  %v2338_v51 = vpop.f32.mrf.mxu1  ;;  %v6272_v41 = vld [vmem:[#allocation8 + $0x384] ss:$16 sps:$4 sm:$0xff]  }
 0x1d5   :  { %v2339_v6 = vadd.f32 %v2338_v51, %v522_v63  ;;  %v6288_v51 = vld [vmem:[#allocation8 + $0x320] ss:$16 sps:$4 sm:$0xff]  }
 0x1d6   :  { %4274 = vmatpush1.bf16.msra.mxu0 %v6207_v16  ;;  %v7173_v60 = vpop.f32.mrf.mxu1 }
 0x1d7   :  { %4317 = vmatpush1.bf16.msra.mxu1 %v6210_v27  ;;  %4275 = vmatprep.subr.bf16.mxu0 %v6215_v28  ;;  %v517_v27 = vsub.s32 2, %v7125_v23 }
 0x1d8   :  { %4318 = vmatprep.subr.bf16.mxu1 %v6218_v29  ;;  %v2342_v4 = vpop.f32.mrf.mxu1  ;;  %v6267_v29 = vld [vmem:[#allocation8 + $0x180] ss:$16 sps:$4 sm:$0xff]  }
 0x1d9   :  { %v2343_v19 = vadd.f32 %v2342_v4, %v522_v63  ;;  %v6302_v4 = vld [vmem:[#allocation8 + $0x4c4] ss:$16 sps:$4 sm:$0xff]  }
 0x1da   :  { %4276 = vmatpush1.bf16.msra.mxu0 %v6213_v30  ;;  %v6270_v30 = vld [vmem:[#allocation8 + $0x380] ss:$16 sps:$4 sm:$0xff]  }
 0x1db   :  { %4319 = vmatpush1.bf16.msra.mxu1 %v6216_v33  ;;  %4277 = vmatprep.subr.bf16.mxu0 %v6221_v34  ;;  %v6275_v33 = vld [vmem:[#allocation8 + $0x164] ss:$16 sps:$4 sm:$0xff]  }
 0x1dc   :  { %4320 = vmatprep.subr.bf16.mxu1 %v6224_v12 }
 0x1de   :  { %4278 = vmatpush1.bf16.msra.mxu0 %v6219_v50  ;;  %v6278_v50 = vld [vmem:[#allocation8 + $0x364] ss:$16 sps:$4 sm:$0xff]  }
 0x1df   :  { %4321 = vmatpush1.bf16.msra.mxu1 %v6222_v35  ;;  %4279 = vmatprep.subr.bf16.mxu0 %v6227_v37  ;;  %v518_v35 = vrot.slane %v7130_v36, %v517_v27  ;;  %v6287_v36 = vld [vmem:[#allocation8 + $0x124] ss:$16 sps:$4 sm:$0xff]  }
 0x1e0   :  { %4322 = vmatprep.subr.bf16.mxu1 %v6230_v38  ;;  %v6273_v38 = vld [vmem:[#allocation8 + $0x160] ss:$16 sps:$4 sm:$0xff]  }
 0x1e2   :  { %4280 = vmatpush1.bf16.msra.mxu0 %v6225_v8  ;;  %v6276_v8 = vld [vmem:[#allocation8 + $0x360] ss:$16 sps:$4 sm:$0xff]  }
 0x1e3   :  { %4323 = vmatpush1.bf16.msra.mxu1 %v6228_v39  ;;  %4281 = vmatprep.subr.bf16.mxu0 %v6233_v40  ;;  %v6281_v39 = vld [vmem:[#allocation8 + $0x144] ss:$16 sps:$4 sm:$0xff]  }
 0x1e4   :  { %4324 = vmatprep.subr.bf16.mxu1 %v6236_v42  ;;  %v6284_v40 = vld [vmem:[#allocation8 + $0x344] ss:$16 sps:$4 sm:$0xff]   ;;  %v2341_v42 = vadd.f32 %v7173_v60, %v518_v35  ;;  %v6291_v60 = vld [vmem:[#allocation8 + $0x100] ss:$16 sps:$4 sm:$0xff]  }
 0x1e6   :  { %4282 = vmatpush1.bf16.msra.mxu0 %v6231_v43  ;;  %v6279_v43 = vld [vmem:[#allocation8 + $0x140] ss:$16 sps:$4 sm:$0xff]  }
 0x1e7   :  { %4325 = vmatpush1.bf16.msra.mxu1 %v6234_v13  ;;  %4283 = vmatprep.subr.bf16.mxu0 %v6239_v56  ;;  %v6282_v13 = vld [vmem:[#allocation8 + $0x340] ss:$16 sps:$4 sm:$0xff]   ;;  %v2337_v56 = vadd.f32 %v7170_v45, %v518_v35 }
 0x1e8   :  { %4326 = vmatprep.subr.bf16.mxu1 %v6242_v46  ;;  %v6294_v45 = vld [vmem:[#allocation8 + $0x300] ss:$16 sps:$4 sm:$0xff]  }
 0x1e9   :  { %v6390_v35 = vld [vmem:[#allocation8 + $0x600] ss:$16 sps:$4 sm:$0xff]  }
 0x1ea   :  { %4284 = vmatpush1.bf16.msra.mxu0 %v6237_v47  ;;  %v6290_v47 = vld [vmem:[#allocation8 + $0x324] ss:$16 sps:$4 sm:$0xff]  }
 0x1eb   :  { %4327 = vmatpush1.bf16.msra.mxu1 %v6240_v48  ;;  %4285 = vmatprep.subr.bf16.mxu0 %v6245_v49  ;;  %v6285_v49 = vld [vmem:[#allocation8 + $0x120] ss:$16 sps:$4 sm:$0xff]  }
 0x1ec   :  { %4328 = vmatprep.subr.bf16.mxu1 %v6248_v52  ;;  %v6293_v52 = vld [vmem:[#allocation8 + $0x104] ss:$16 sps:$4 sm:$0xff]  }
 0x1ee   :  { %4286 = vmatpush1.bf16.msra.mxu0 %v6243_v54 }
 0x1ef   :  { %4329 = vmatpush1.bf16.msra.mxu1 %v6246_v55  ;;  %4287 = vmatprep.subr.bf16.mxu0 %v6251_v58  ;;  %v6296_v55 = vld [vmem:[#allocation8 + $0x304] ss:$16 sps:$4 sm:$0xff]  }
 0x1f0   :  { %4330 = vmatprep.subr.bf16.mxu1 %v6254_v59  ;;  %v6299_v59 = vld [vmem:[#allocation8 + $0x4e4] ss:$16 sps:$4 sm:$0xff]  }
 0x1f1   :  { %v7178_v5 = vpop.f32.mrf.mxu0 }
 0x1f2   :  { %v7180_v7 = vpop.f32.mrf.mxu1  ;;  %4288 = vmatpush2.bf16.msra.mxu0 %v6249_v0  ;;  %v2380_v48 = vadd.f32 %v7178_v5, %v2337_v56  ;;  %v6350_v0 = vld [vmem:[#allocation8 + $0x6e4] ss:$16 sps:$4 sm:$0xff]  }
 0x1f3   :  { %4331 = vmatpush2.bf16.msra.mxu1 %v6252_v1  ;;  %v2381_v2 = vpop.f32.mrf.mxu0  ;;  %4289 = vmatprep.subr.bf16.mxu0 %v6257_v3  ;;  %v6297_v3 = vld [vmem:[#allocation8 + $0x4e0] ss:$16 sps:$4 sm:$0xff]   ;;  %v6410_v56 = vld [vmem:[#allocation8 + $0x7a4] ss:$16 sps:$4 sm:$0xff]  }
 0x1f4   :  { %v2382_v14 = vadd.f32 %v2381_v2, %v2339_v6  ;;  %v2424_v17 = vpop.f32.mrf.mxu1  ;;  %4332 = vmatprep.subr.bf16.mxu1 %v6260_v44  ;;  %v2423_v58 = vadd.f32 %v7180_v7, %v2380_v48  ;;  %v6348_v44 = vld [vmem:[#allocation8 + $0x6e0] ss:$16 sps:$4 sm:$0xff]   ;;  %v6356_v6 = vld [vmem:[#allocation8 + $0x6c4] ss:$16 sps:$4 sm:$0xff]  }
 0x1f5   :  { %v2383_v57 = vpop.f32.mrf.mxu0  ;;  %v6300_v7 = vld [vmem:[#allocation8 + $0x4c0] ss:$16 sps:$4 sm:$0xff]  }
 0x1f6   :  { %v2426_v20 = vpop.f32.mrf.mxu1  ;;  %4290 = vmatpush2.bf16.msra.mxu0 %v6255_v9  ;;  %v2425_v61 = vadd.f32 %v2424_v17, %v2382_v14  ;;  %v2384_v46 = vadd.f32 %v2383_v57, %v2341_v42  ;;  %v2691_v1 = vmax.f32 %v2423_v58, 0.0  ;;  %v6305_v9 = vld [vmem:[#allocation8 + $0x4a4] ss:$16 sps:$4 sm:$0xff]   ;;  %v6354_v2 = vld [vmem:[#allocation8 + $0x6c0] ss:$16 sps:$4 sm:$0xff]  }
 0x1f7   :  { %4333 = vmatpush2.bf16.msra.mxu1 %v6258_v10  ;;  %v2385_v22 = vpop.f32.mrf.mxu0  ;;  %4291 = vmatprep.subr.bf16.mxu0 %v6263_v11  ;;  %v6362_v10 = vld [vmem:[#allocation8 + $0x6a4] ss:$16 sps:$4 sm:$0xff]   ;;  %v6303_v11 = vld [vmem:[#allocation8 + $0x4a0] ss:$16 sps:$4 sm:$0xff]  }
 0x1f8   :  { %v2386_v62 = vadd.f32 %v2385_v22, %v2343_v19  ;;  %4334 = vmatprep.subr.bf16.mxu1 %v6266_v18  ;;  %v2428_v16 = vpop.f32.mrf.mxu1  ;;  %v2692_v34 = vmax.f32 %v2425_v61, 0.0  ;;  %v2427_v54 = vadd.f32 %v2426_v20, %v2384_v46  ;;  %v6308_v14 = vld [vmem:[#allocation8 + $0x484] ss:$16 sps:$4 sm:$0xff]   ;;  %v6360_v17 = vld [vmem:[#allocation8 + $0x6a0] ss:$16 sps:$4 sm:$0xff]  }
 0x1f9   :  { %v6368_v18 = vld [vmem:[#allocation8 + $0x684] ss:$16 sps:$4 sm:$0xff]   ;;  %v6306_v57 = vld [vmem:[#allocation8 + $0x480] ss:$16 sps:$4 sm:$0xff]  }
 0x1fa   :  { %v2429_v28 = vadd.f32 %v2428_v16, %v2386_v62  ;;  %4292 = vmatpush2.bf16.msra.mxu0 %v6261_v21  ;;  %v2699_v63 = vmax.f32 %v2427_v54, 0.0  ;;  %v6311_v19 = vld [vmem:[#allocation8 + $0x464] ss:$16 sps:$4 sm:$0xff]   ;;  %v6366_v20 = vld [vmem:[#allocation8 + $0x680] ss:$16 sps:$4 sm:$0xff]  }
 0x1fb   :  { %4335 = vmatpush2.bf16.msra.mxu1 %v6264_v24  ;;  %4293 = vmatprep.subr.bf16.mxu0 %v6269_v25  ;;  %v6374_v21 = vld [vmem:[#allocation8 + $0x664] ss:$16 sps:$4 sm:$0xff]   ;;  %v6309_v22 = vld [vmem:[#allocation8 + $0x460] ss:$16 sps:$4 sm:$0xff]  }
 0x1fc   :  { %v2700_v12 = vmax.f32 %v2429_v28, 0.0  ;;  %4336 = vmatprep.subr.bf16.mxu1 %v6272_v41  ;;  %v7193_v5 = vpack.c.bf16 %v2699_v63, %v2691_v1  ;;  %v6314_v24 = vld [vmem:[#allocation8 + $0x444] ss:$16 sps:$4 sm:$0xff]   ;;  %v6372_v25 = vld [vmem:[#allocation8 + $0x660] ss:$16 sps:$4 sm:$0xff]  }
 0x1fd   :  { %v6380_v61 = vld [vmem:[#allocation8 + $0x644] ss:$16 sps:$4 sm:$0xff]   ;;  %v6312_v62 = vld [vmem:[#allocation8 + $0x440] ss:$16 sps:$4 sm:$0xff]  }
 0x1fe   :  { %v7186_v37 = vpack.c.bf16 %v2700_v12, %v2692_v34  ;;  %4294 = vmatpush2.bf16.msra.mxu0 %v6267_v29  ;;  %v6317_v41 = vld [vmem:[#allocation8 + $0x424] ss:$16 sps:$4 sm:$0xff]   ;;  %v6378_v16 = vld [vmem:[#allocation8 + $0x640] ss:$16 sps:$4 sm:$0xff]  }
 0x1ff   :  { %4337 = vmatpush2.bf16.msra.mxu1 %v6270_v30  ;;  %4295 = vmatprep.subr.bf16.mxu0 %v6275_v33  ;;  %v6386_v28 = vld [vmem:[#allocation8 + $0x624] ss:$16 sps:$4 sm:$0xff]   ;;  %v6315_v29 = vld [vmem:[#allocation8 + $0x420] ss:$16 sps:$4 sm:$0xff]  }
 0x200   :  { %4346 = vmatprep.mubr.bf16.mxu1 %v7186_v37  ;;  %4338 = vmatprep.subr.bf16.mxu1 %v6278_v50  ;;  %v6320_v30 = vld [vmem:[#allocation8 + $0x404] ss:$16 sps:$4 sm:$0xff]   ;;  %v6384_v33 = vld [vmem:[#allocation8 + $0x620] ss:$16 sps:$4 sm:$0xff]  }
 0x201   :  { %v6392_v34 = vld [vmem:[#allocation8 + $0x604] ss:$16 sps:$4 sm:$0xff]   ;;  %v6318_v12 = vld [vmem:[#allocation8 + $0x400] ss:$16 sps:$4 sm:$0xff]  }
 0x202   :  { %4296 = vmatpush2.bf16.msra.mxu0 %v6273_v38  ;;  %v6323_v50 = vld [vmem:[#allocation8 + $0x5e4] ss:$16 sps:$4 sm:$0xff]   ;;  %v6327_v46 = vld [vmem:[#allocation8 + $0x5a0] ss:$16 sps:$4 sm:$0xff]  }
 0x203   :  { %4339 = vmatpush2.bf16.msra.mxu1 %v6276_v8  ;;  %4297 = vmatprep.subr.bf16.mxu0 %v6281_v39  ;;  %v6398_v38 = vld [vmem:[#allocation8 + $0x7e4] ss:$16 sps:$4 sm:$0xff]   ;;  %v6321_v8 = vld [vmem:[#allocation8 + $0x5e0] ss:$16 sps:$4 sm:$0xff]  }
 0x204   :  { %4340 = vmatprep.subr.bf16.mxu1 %v6284_v40  ;;  %v6326_v39 = vld [vmem:[#allocation8 + $0x5c4] ss:$16 sps:$4 sm:$0xff]   ;;  %v6396_v40 = vld [vmem:[#allocation8 + $0x7e0] ss:$16 sps:$4 sm:$0xff]  }
 0x205   :  { %v6404_v42 = vld [vmem:[#allocation8 + $0x7c4] ss:$16 sps:$4 sm:$0xff]   ;;  %v6408_v48 = vld [vmem:[#allocation8 + $0x7a0] ss:$16 sps:$4 sm:$0xff]  }
 0x206   :  { %4298 = vmatpush2.bf16.msra.mxu0 %v6279_v43  ;;  %v6324_v43 = vld [vmem:[#allocation8 + $0x5c0] ss:$16 sps:$4 sm:$0xff]   ;;  %v6341_v1 = vld [vmem:[#allocation8 + $0x524] ss:$16 sps:$4 sm:$0xff]  }
 0x207   :  { %4341 = vmatpush2.bf16.msra.mxu1 %v6282_v13  ;;  %4299 = vmatprep.subr.bf16.mxu0 %v6287_v36  ;;  %v6329_v13 = vld [vmem:[#allocation8 + $0x5a4] ss:$16 sps:$4 sm:$0xff]   ;;  %v6402_v36 = vld [vmem:[#allocation8 + $0x7c0] ss:$16 sps:$4 sm:$0xff]  }
 0x208   :  { %4342 = vmatprep.subr.bf16.mxu1 %v6290_v47  ;;  %v6332_v47 = vld [vmem:[#allocation8 + $0x584] ss:$16 sps:$4 sm:$0xff]   ;;  %v6414_v54 = vld [vmem:[#allocation8 + $0x780] ss:$16 sps:$4 sm:$0xff]  }
 0x209   :  { %v6333_v58 = vld [vmem:[#allocation8 + $0x560] ss:$16 sps:$4 sm:$0xff]  }
 0x20a   :  { %4300 = vmatpush2.bf16.msra.mxu0 %v6285_v49  ;;  %v6416_v49 = vld [vmem:[#allocation8 + $0x784] ss:$16 sps:$4 sm:$0xff]   ;;  %v6336_v63 = vld [vmem:[#allocation8 + $0x540] ss:$16 sps:$4 sm:$0xff]  }
 0x20b   :  { %4343 = vmatpush2.bf16.msra.mxu1 %v6288_v51  ;;  %4301 = vmatprep.subr.bf16.mxu0 %v6293_v52  ;;  %v6330_v51 = vld [vmem:[#allocation8 + $0x580] ss:$16 sps:$4 sm:$0xff]   ;;  %v6335_v52 = vld [vmem:[#allocation8 + $0x564] ss:$16 sps:$4 sm:$0xff]  }
 0x20c   :  { %4344 = vmatprep.subr.bf16.mxu1 %v6296_v55  ;;  %v6422_v55 = vld [vmem:[#allocation8 + $0x764] ss:$16 sps:$4 sm:$0xff]  }
 0x20e   :  { %4302 = vmatpush2.bf16.msra.mxu0 %v6291_v60  ;;  %v6338_v60 = vld [vmem:[#allocation8 + $0x544] ss:$16 sps:$4 sm:$0xff]  }
 0x20f   :  { %4345 = vmatpush2.bf16.msra.mxu1 %v6294_v45  ;;  %4357 = vmatprep.subr.bf16.mxu0 %v6299_v59  ;;  %v6420_v45 = vld [vmem:[#allocation8 + $0x760] ss:$16 sps:$4 sm:$0xff]   ;;  %v6428_v59 = vld [vmem:[#allocation8 + $0x744] ss:$16 sps:$4 sm:$0xff]  }
 0x210   :  { %4400 = vmatprep.subr.bf16.mxu1 %v6350_v0 }
 0x211   :  { %4304 = vmatmul.mubr.bf16.vlgmr.msra.gmra.mxu0 %v7154_v32 }
 0x212   :  { %4347 = vmatmul.mubr.bf16.vlgmr.msra.gmra.mxu1 %v7193_v5  ;;  %4358 = vmatpush1.bf16.msra.mxu0 %v6297_v3  ;;  %v6426_v3 = vld [vmem:[#allocation8 + $0x740] ss:$16 sps:$4 sm:$0xff]  }
 0x213   :  { %4359 = vmatprep.subr.bf16.mxu0 %v6302_v4  ;;  %4401 = vmatpush1.bf16.msra.mxu1 %v6348_v44  ;;  %v6434_v4 = vld [vmem:[#allocation8 + $0x724] ss:$16 sps:$4 sm:$0xff]   ;;  %v6339_v44 = vld [vmem:[#allocation8 + $0x520] ss:$16 sps:$4 sm:$0xff]  }
 0x214   :  { %4402 = vmatprep.subr.bf16.mxu1 %v6356_v6 }
 0x216   :  { %4360 = vmatpush1.bf16.msra.mxu0 %v6300_v7  ;;  %v6344_v7 = vld [vmem:[#allocation8 + $0x504] ss:$16 sps:$4 sm:$0xff]  }
 0x217   :  { %4361 = vmatprep.subr.bf16.mxu0 %v6305_v9  ;;  %4403 = vmatpush1.bf16.msra.mxu1 %v6354_v2  ;;  %v6432_v9 = vld [vmem:[#allocation8 + $0x720] ss:$16 sps:$4 sm:$0xff]   ;;  %v529_v2 = vsub.s32 5, %v7125_v23 }
 0x218   :  { %4404 = vmatprep.subr.bf16.mxu1 %v6362_v10  ;;  %v6440_v10 = vld [vmem:[#allocation8 + $0x704] ss:$16 sps:$4 sm:$0xff]  }
 0x21a   :  { %4362 = vmatpush1.bf16.msra.mxu0 %v6303_v11  ;;  %v525_v11 = vsub.s32 4, %v7125_v23 }
 0x21b   :  { %4363 = vmatprep.subr.bf16.mxu0 %v6308_v14  ;;  %4405 = vmatpush1.bf16.msra.mxu1 %v6360_v17  ;;  %v6342_v17 = vld [vmem:[#allocation8 + $0x500] ss:$16 sps:$4 sm:$0xff]  }
 0x21c   :  { %4406 = vmatprep.subr.bf16.mxu1 %v6368_v18 }
 0x21e   :  { %4364 = vmatpush1.bf16.msra.mxu0 %v6306_v57  ;;  %v6347_v57 = vld [vmem:[#allocation8 + $0xec] ss:$16 sps:$4 sm:$0xff]  }
 0x21f   :  { %4365 = vmatprep.subr.bf16.mxu0 %v6311_v19  ;;  %4407 = vmatpush1.bf16.msra.mxu1 %v6366_v20  ;;  %v6438_v19 = vld [vmem:[#allocation8 + $0x700] ss:$16 sps:$4 sm:$0xff]   ;;  %v7199_v20 = vld [vmem:[#allocation7] sm:$0xff] }
 0x220   :  { %4408 = vmatprep.subr.bf16.mxu1 %v6374_v21  ;;  %v530_v21 = vrot.slane %v7199_v20, %v529_v2  ;;  %v6399_v2 = vld [vmem:[#allocation8 + $0x1c8] ss:$16 sps:$4 sm:$0xff]  }
 0x222   :  { %4366 = vmatpush1.bf16.msra.mxu0 %v6309_v22  ;;  %v6446_v22 = vld [vmem:[#allocation8 + $0x2ec] ss:$16 sps:$4 sm:$0xff]  }
 0x223   :  { %4367 = vmatprep.subr.bf16.mxu0 %v6314_v24  ;;  %4409 = vmatpush1.bf16.msra.mxu1 %v6372_v25  ;;  %v526_v24 = vrot.slane %v7199_v20, %v525_v11 }
 0x224   :  { %4410 = vmatprep.subr.bf16.mxu1 %v6380_v61 }
 0x226   :  { %4368 = vmatpush1.bf16.msra.mxu0 %v6312_v62 }
 0x227   :  { %4369 = vmatprep.subr.bf16.mxu0 %v6317_v41  ;;  %4411 = vmatpush1.bf16.msra.mxu1 %v6378_v16 }
 0x228   :  { %4412 = vmatprep.subr.bf16.mxu1 %v6386_v28 }
 0x22a   :  { %4370 = vmatpush1.bf16.msra.mxu0 %v6315_v29 }
 0x22b   :  { %4371 = vmatprep.subr.bf16.mxu0 %v6320_v30  ;;  %4413 = vmatpush1.bf16.msra.mxu1 %v6384_v33 }
 0x22c   :  { %4414 = vmatprep.subr.bf16.mxu1 %v6392_v34 }
 0x22e   :  { %4372 = vmatpush1.bf16.msra.mxu0 %v6318_v12 }
 0x22f   :  { %4373 = vmatprep.subr.bf16.mxu0 %v6323_v50  ;;  %4415 = vmatpush1.bf16.msra.mxu1 %v6390_v35 }
 0x230   :  { %4416 = vmatprep.subr.bf16.mxu1 %v6398_v38 }
 0x231   :  { %v2465_v0 = vpop.f32.mrf.mxu0 }
 0x232   :  { %4374 = vmatpush2.bf16.msra.mxu0 %v6321_v8  ;;  %v2508_v14 = vpop.f32.mrf.mxu1  ;;  %v2466_v16 = vadd.f32 %v2465_v0, %v526_v24  ;;  %v6377_v0 = vld [vmem:[#allocation8 + $0x4c] ss:$16 sps:$4 sm:$0xff]  }
 0x233   :  { %4375 = vmatprep.subr.bf16.mxu0 %v6326_v39  ;;  %4417 = vmatpush2.bf16.msra.mxu1 %v6396_v40  ;;  %v2467_v6 = vpop.f32.mrf.mxu0 }
 0x234   :  { %4418 = vmatprep.subr.bf16.mxu1 %v6404_v42  ;;  %v2510_v25 = vpop.f32.mrf.mxu1  ;;  %v2468_v62 = vadd.f32 %v2467_v6, %v530_v21  ;;  %v2509_v50 = vadd.f32 %v2508_v14, %v2466_v16  ;;  %v6395_v6 = vld [vmem:[#allocation8 + $0x1ec] ss:$16 sps:$4 sm:$0xff]   ;;  %v6405_v14 = vld [vmem:[#allocation8 + $0x1a8] ss:$16 sps:$4 sm:$0xff]  }
 0x235   :  { %v2469_v18 = vpop.f32.mrf.mxu0 }
 0x236   :  { %4376 = vmatpush2.bf16.msra.mxu0 %v6324_v43  ;;  %v2470_v41 = vadd.f32 %v2469_v18, %v526_v24  ;;  %v2512_v28 = vpop.f32.mrf.mxu1  ;;  %v2511_v34 = vadd.f32 %v2510_v25, %v2468_v62  ;;  %v6417_v25 = vld [vmem:[#allocation8 + $0x168] ss:$16 sps:$4 sm:$0xff]  }
 0x237   :  { %4377 = vmatprep.subr.bf16.mxu0 %v6329_v13  ;;  %4419 = vmatpush2.bf16.msra.mxu1 %v6402_v36  ;;  %v2471_v61 = vpop.f32.mrf.mxu0 }
 0x238   :  { %4420 = vmatprep.subr.bf16.mxu1 %v6410_v56  ;;  %v2472_v30 = vadd.f32 %v2471_v61, %v530_v21  ;;  %v2513_v12 = vadd.f32 %v2512_v28, %v2470_v41  ;;  %v2514_v35 = vpop.f32.mrf.mxu1  ;;  %v537_v21 = vsub.s32 7, %v7125_v23  ;;  %v6425_v61 = vld [vmem:[#allocation8 + $0x14c] ss:$16 sps:$4 sm:$0xff]   ;;  %v6423_v28 = vld [vmem:[#allocation8 + $0x148] ss:$16 sps:$4 sm:$0xff]  }
 0x23a   :  { %4378 = vmatpush2.bf16.msra.mxu0 %v6327_v46  ;;  %v2515_v8 = vadd.f32 %v2514_v35, %v2472_v30  ;;  %v538_v62 = vrot.slane %v7199_v20, %v537_v21  ;;  %v6431_v30 = vld [vmem:[#allocation8 + $0x12c] ss:$16 sps:$4 sm:$0xff]  }
 0x23b   :  { %4379 = vmatprep.subr.bf16.mxu0 %v6332_v47  ;;  %4421 = vmatpush2.bf16.msra.mxu1 %v6408_v48  ;;  %v6473_v21 = vld [vmem:[#allocation8 + $0x44c] ss:$16 sps:$4 sm:$0xff]  }
 0x23c   :  { %4422 = vmatprep.subr.bf16.mxu1 %v6416_v49  ;;  %v6345_v49 = vld [vmem:[#allocation8 + $0xe8] ss:$16 sps:$4 sm:$0xff]  }
 0x23e   :  { %4380 = vmatpush2.bf16.msra.mxu0 %v6330_v51 }
 0x23f   :  { %4381 = vmatprep.subr.bf16.mxu0 %v6335_v52  ;;  %4423 = vmatpush2.bf16.msra.mxu1 %v6414_v54  ;;  %v6353_v52 = vld [vmem:[#allocation8 + $0xcc] ss:$16 sps:$4 sm:$0xff]   ;;  %v6351_v54 = vld [vmem:[#allocation8 + $0xc8] ss:$16 sps:$4 sm:$0xff]  }
 0x240   :  { %4424 = vmatprep.subr.bf16.mxu1 %v6422_v55  ;;  %v6359_v55 = vld [vmem:[#allocation8 + $0xac] ss:$16 sps:$4 sm:$0xff]  }
 0x242   :  { %4382 = vmatpush2.bf16.msra.mxu0 %v6333_v58  ;;  %v6357_v58 = vld [vmem:[#allocation8 + $0xa8] ss:$16 sps:$4 sm:$0xff]  }
 0x243   :  { %4383 = vmatprep.subr.bf16.mxu0 %v6338_v60  ;;  %4425 = vmatpush2.bf16.msra.mxu1 %v6420_v45  ;;  %v6365_v60 = vld [vmem:[#allocation8 + $0x8c] ss:$16 sps:$4 sm:$0xff]   ;;  %v6363_v45 = vld [vmem:[#allocation8 + $0x88] ss:$16 sps:$4 sm:$0xff]  }
 0x244   :  { %4426 = vmatprep.subr.bf16.mxu1 %v6428_v59  ;;  %v6371_v59 = vld [vmem:[#allocation8 + $0x6c] ss:$16 sps:$4 sm:$0xff]  }
 0x246   :  { %4384 = vmatpush2.bf16.msra.mxu0 %v6336_v63  ;;  %v6369_v63 = vld [vmem:[#allocation8 + $0x68] ss:$16 sps:$4 sm:$0xff]  }
 0x247   :  { %4385 = vmatprep.subr.bf16.mxu0 %v6341_v1  ;;  %4427 = vmatpush2.bf16.msra.mxu1 %v6426_v3  ;;  %v6375_v1 = vld [vmem:[#allocation8 + $0x48] ss:$16 sps:$4 sm:$0xff]   ;;  %v6383_v3 = vld [vmem:[#allocation8 + $0x2c] ss:$16 sps:$4 sm:$0xff]  }
 0x248   :  { %4428 = vmatprep.subr.bf16.mxu1 %v6434_v4  ;;  %v6389_v4 = vld [vmem:[#allocation8 + $0xc] ss:$16 sps:$4 sm:$0xff]  }
 0x24a   :  { %4386 = vmatpush2.bf16.msra.mxu0 %v6339_v44  ;;  %v6387_v44 = vld [vmem:[#allocation8 + $0x8] ss:$16 sps:$4 sm:$0xff]  }
 0x24b   :  { %4387 = vmatprep.subr.bf16.mxu0 %v6344_v7  ;;  %4429 = vmatpush2.bf16.msra.mxu1 %v6432_v9  ;;  %v6393_v7 = vld [vmem:[#allocation8 + $0x1e8] ss:$16 sps:$4 sm:$0xff]   ;;  %v6401_v9 = vld [vmem:[#allocation8 + $0x1cc] ss:$16 sps:$4 sm:$0xff]  }
 0x24c   :  { %4430 = vmatprep.subr.bf16.mxu1 %v6440_v10  ;;  %v6407_v10 = vld [vmem:[#allocation8 + $0x1ac] ss:$16 sps:$4 sm:$0xff]  }
 0x24e   :  { %4388 = vmatpush2.bf16.msra.mxu0 %v6342_v17  ;;  %v6413_v17 = vld [vmem:[#allocation8 + $0x18c] ss:$16 sps:$4 sm:$0xff]  }
 0x24f   :  { %4443 = vmatprep.subr.bf16.mxu0 %v6347_v57  ;;  %4431 = vmatpush2.bf16.msra.mxu1 %v6438_v19  ;;  %v6411_v57 = vld [vmem:[#allocation8 + $0x188] ss:$16 sps:$4 sm:$0xff]   ;;  %v6419_v19 = vld [vmem:[#allocation8 + $0x16c] ss:$16 sps:$4 sm:$0xff]  }
 0x250   :  { %4486 = vmatprep.subr.bf16.mxu1 %v6446_v22  ;;  %v533_v22 = vsub.s32 6, %v7125_v23 }
 0x251   :  { %v2551_v29 = vpop.f32.mrf.mxu0 }
 0x252   :  { %v2552_v42 = vadd.f32 %v2551_v29, %v2509_v50  ;;  %v534_v41 = vrot.slane %v7199_v20, %v533_v22  ;;  %v6468_v22 = vld [vmem:[#allocation8 + $0x268] ss:$16 sps:$4 sm:$0xff]  }
 0x253   :  { %v2553_v33 = vpop.f32.mrf.mxu0 }
 0x254   :  { %v2554_v39 = vadd.f32 %v2553_v33, %v2511_v34  ;;  %v2693_v47 = vmax.f32 %v2552_v42, 0.0  ;;  %v6437_v42 = vld [vmem:[#allocation8 + $0x10c] ss:$16 sps:$4 sm:$0xff]  }
 0x255   :  { %v2555_v38 = vpop.f32.mrf.mxu0 }
 0x256   :  { %v2556_v40 = vadd.f32 %v2555_v38, %v2513_v12  ;;  %v2694_v56 = vmax.f32 %v2554_v39, 0.0  ;;  %v6429_v39 = vld [vmem:[#allocation8 + $0x128] ss:$16 sps:$4 sm:$0xff]  }
 0x257   :  { %v2557_v43 = vpop.f32.mrf.mxu0 }
 0x258   :  { %v2558_v13 = vadd.f32 %v2557_v43, %v2515_v8  ;;  %v2701_v36 = vmax.f32 %v2556_v40, 0.0 }
 0x25a   :  { %v2702_v46 = vmax.f32 %v2558_v13, 0.0  ;;  %v7205_v51 = vpack.c.bf16 %v2701_v36, %v2693_v47 }
 0x25c   :  { %v7203_v48 = vpack.c.bf16 %v2702_v46, %v2694_v56 }
 0x25e   :  { %4389 = vmatprep.mubr.bf16.mxu0 %v7203_v48 }
 0x25f   :  { %4390 = vmatmul.mubr.bf16.vlgmr.msra.gmra.mxu0 %v7205_v51 }
 0x260   :  { %4444 = vmatpush1.bf16.msra.mxu0 %v6345_v49  ;;  %4475 = vmatprep.mubr.bf16.mxu0 %v7165_v26  ;;  %v6381_v26 = vld [vmem:[#allocation8 + $0x28] ss:$16 sps:$4 sm:$0xff]  }
 0x261   :  { %4445 = vmatprep.subr.bf16.mxu0 %v6353_v52  ;;  %v6435_v52 = vld [vmem:[#allocation8 + $0x108] ss:$16 sps:$4 sm:$0xff]  }
 0x264   :  { %4446 = vmatpush1.bf16.msra.mxu0 %v6351_v54 }
 0x265   :  { %4447 = vmatprep.subr.bf16.mxu0 %v6359_v55  ;;  %v6443_v55 = vld [vmem:[#allocation8 + $0x4ec] ss:$16 sps:$4 sm:$0xff]  }
 0x268   :  { %4448 = vmatpush1.bf16.msra.mxu0 %v6357_v58 }
 0x269   :  { %4449 = vmatprep.subr.bf16.mxu0 %v6365_v60 }
 0x26c   :  { %4450 = vmatpush1.bf16.msra.mxu0 %v6363_v45 }
 0x26d   :  { %4451 = vmatprep.subr.bf16.mxu0 %v6371_v59 }
 0x270   :  { %4452 = vmatpush1.bf16.msra.mxu0 %v6369_v63 }
 0x271   :  { %4453 = vmatprep.subr.bf16.mxu0 %v6377_v0  ;;  %v6441_v0 = vld [vmem:[#allocation8 + $0x4e8] ss:$16 sps:$4 sm:$0xff]  }
 0x272   :  { %v2594_v11 = vpop.f32.mrf.mxu1 }
 0x273   :  { %v2595_v50 = vadd.f32 %v2594_v11, %v534_v41  ;;  %v6461_v11 = vld [vmem:[#allocation8 + $0x48c] ss:$16 sps:$4 sm:$0xff]  }
 0x274   :  { %4454 = vmatpush1.bf16.msra.mxu0 %v6375_v1  ;;  %v2596_v18 = vpop.f32.mrf.mxu1  ;;  %v6449_v1 = vld [vmem:[#allocation8 + $0x4cc] ss:$16 sps:$4 sm:$0xff]  }
 0x275   :  { %4455 = vmatprep.subr.bf16.mxu0 %v6383_v3  ;;  %v2597_v33 = vadd.f32 %v2596_v18, %v538_v62  ;;  %v6467_v18 = vld [vmem:[#allocation8 + $0x46c] ss:$16 sps:$4 sm:$0xff]  }
 0x276   :  { %v2598_v24 = vpop.f32.mrf.mxu1 }
 0x277   :  { %v2599_v35 = vadd.f32 %v2598_v24, %v534_v41  ;;  %v6471_v24 = vld [vmem:[#allocation8 + $0x448] ss:$16 sps:$4 sm:$0xff]  }
 0x278   :  { %4456 = vmatpush1.bf16.msra.mxu0 %v6381_v26  ;;  %v2600_v16 = vpop.f32.mrf.mxu1  ;;  %v6477_v41 = vld [vmem:[#allocation8 + $0x428] ss:$16 sps:$4 sm:$0xff]  }
 0x279   :  { %4457 = vmatprep.subr.bf16.mxu0 %v6389_v4  ;;  %v2601_v43 = vadd.f32 %v2600_v16, %v538_v62  ;;  %v6444_v4 = vld [vmem:[#allocation8 + $0x2e8] ss:$16 sps:$4 sm:$0xff]   ;;  %v6482_v16 = vld [vmem:[#allocation8 + $0x22c] ss:$16 sps:$4 sm:$0xff]  }
 0x27a   :  { %v6474_v62 = vld [vmem:[#allocation8 + $0x248] ss:$16 sps:$4 sm:$0xff]  }
 0x27c   :  { %4458 = vmatpush1.bf16.msra.mxu0 %v6387_v44 }
 0x27d   :  { %4459 = vmatprep.subr.bf16.mxu0 %v6395_v6  ;;  %v6447_v6 = vld [vmem:[#allocation8 + $0x4c8] ss:$16 sps:$4 sm:$0xff]  }
 0x280   :  { %4460 = vmatpush2.bf16.msra.mxu0 %v6393_v7  ;;  %v6452_v7 = vld [vmem:[#allocation8 + $0x2cc] ss:$16 sps:$4 sm:$0xff]  }
 0x281   :  { %4461 = vmatprep.subr.bf16.mxu0 %v6401_v9  ;;  %v6455_v9 = vld [vmem:[#allocation8 + $0x4ac] ss:$16 sps:$4 sm:$0xff]  }
 0x284   :  { %4462 = vmatpush2.bf16.msra.mxu0 %v6399_v2  ;;  %v6450_v2 = vld [vmem:[#allocation8 + $0x2c8] ss:$16 sps:$4 sm:$0xff]  }
 0x285   :  { %4463 = vmatprep.subr.bf16.mxu0 %v6407_v10  ;;  %v6458_v10 = vld [vmem:[#allocation8 + $0x2ac] ss:$16 sps:$4 sm:$0xff]  }
 0x288   :  { %4464 = vmatpush2.bf16.msra.mxu0 %v6405_v14  ;;  %v6459_v14 = vld [vmem:[#allocation8 + $0x488] ss:$16 sps:$4 sm:$0xff]  }
 0x289   :  { %4465 = vmatprep.subr.bf16.mxu0 %v6413_v17  ;;  %v6464_v17 = vld [vmem:[#allocation8 + $0x28c] ss:$16 sps:$4 sm:$0xff]  }
 0x28c   :  { %4466 = vmatpush2.bf16.msra.mxu0 %v6411_v57  ;;  %v6462_v57 = vld [vmem:[#allocation8 + $0x288] ss:$16 sps:$4 sm:$0xff]  }
 0x28d   :  { %4467 = vmatprep.subr.bf16.mxu0 %v6419_v19  ;;  %v6470_v19 = vld [vmem:[#allocation8 + $0x26c] ss:$16 sps:$4 sm:$0xff]  }
 0x290   :  { %4468 = vmatpush2.bf16.msra.mxu0 %v6417_v25  ;;  %v6476_v25 = vld [vmem:[#allocation8 + $0x24c] ss:$16 sps:$4 sm:$0xff]  }
 0x291   :  { %v2637_v29 = vpop.f32.mrf.mxu0  ;;  %4469 = vmatprep.subr.bf16.mxu0 %v6425_v61  ;;  %v6479_v61 = vld [vmem:[#allocation8 + $0x42c] ss:$16 sps:$4 sm:$0xff]  }
 0x292   :  { %v2680_v34 = vpop.f32.mrf.mxu1  ;;  %v2638_v20 = vadd.f32 %v2637_v29, %v2595_v50  ;;  %v6480_v29 = vld [vmem:[#allocation8 + $0x228] ss:$16 sps:$4 sm:$0xff]  }
 0x293   :  { %v2639_v12 = vpop.f32.mrf.mxu0  ;;  %v6489_v50 = vld [vmem:[#allocation8 + $0x5e8] ss:$16 sps:$4 sm:$0xff]  }
 0x294   :  { %v2640_v38 = vadd.f32 %v2639_v12, %v2597_v33  ;;  %v2682_v8 = vpop.f32.mrf.mxu1  ;;  %4470 = vmatpush2.bf16.msra.mxu0 %v6423_v28  ;;  %v2681_v58 = vadd.f32 %v2680_v34, %v2638_v20  ;;  %v6485_v28 = vld [vmem:[#allocation8 + $0x40c] ss:$16 sps:$4 sm:$0xff]   ;;  %v6486_v12 = vld [vmem:[#allocation8 + $0x208] ss:$16 sps:$4 sm:$0xff]  }
 0x295   :  { %v2641_v40 = vpop.f32.mrf.mxu0  ;;  %4471 = vmatprep.subr.bf16.mxu0 %v6431_v30  ;;  %v6483_v30 = vld [vmem:[#allocation8 + $0x408] ss:$16 sps:$4 sm:$0xff]   ;;  %v6488_v33 = vld [vmem:[#allocation8 + $0x20c] ss:$16 sps:$4 sm:$0xff]  }
 0x296   :  { %v2642_v13 = vadd.f32 %v2641_v40, %v2599_v35  ;;  %v2684_v36 = vpop.f32.mrf.mxu1  ;;  %v2683_v46 = vadd.f32 %v2682_v8, %v2640_v38  ;;  %v2695_v3 = vmax.f32 %v2681_v58, 0.0  ;;  %v6491_v34 = vld [vmem:[#allocation8 + $0x5ec] ss:$16 sps:$4 sm:$0xff]   ;;  %v6492_v8 = vld [vmem:[#allocation8 + $0x3e8] ss:$16 sps:$4 sm:$0xff]  }
 0x297   :  { %v2643_v56 = vpop.f32.mrf.mxu0  ;;  %v6494_v35 = vld [vmem:[#allocation8 + $0x3ec] ss:$16 sps:$4 sm:$0xff]   ;;  %v6501_v20 = vld [vmem:[#allocation8 + $0x5a8] ss:$16 sps:$4 sm:$0xff]  }
 0x298   :  { %v2685_v47 = vadd.f32 %v2684_v36, %v2642_v13  ;;  %v2644_v49 = vadd.f32 %v2643_v56, %v2601_v43  ;;  %4472 = vmatpush2.bf16.msra.mxu0 %v6429_v39  ;;  %v2686_v54 = vpop.f32.mrf.mxu1  ;;  %v2696_v45 = vmax.f32 %v2683_v46, 0.0  ;;  %v6497_v38 = vld [vmem:[#allocation8 + $0x5cc] ss:$16 sps:$4 sm:$0xff]   ;;  %v6495_v39 = vld [vmem:[#allocation8 + $0x5c8] ss:$16 sps:$4 sm:$0xff]  }
 0x299   :  { %4473 = vmatprep.subr.bf16.mxu0 %v6437_v42  ;;  %v6500_v40 = vld [vmem:[#allocation8 + $0x3cc] ss:$16 sps:$4 sm:$0xff]   ;;  %v6498_v43 = vld [vmem:[#allocation8 + $0x3c8] ss:$16 sps:$4 sm:$0xff]  }
 0x29a   :  { %v2687_v60 = vadd.f32 %v2686_v54, %v2644_v49  ;;  %v2703_v59 = vmax.f32 %v2685_v47, 0.0  ;;  %v6503_v42 = vld [vmem:[#allocation8 + $0x5ac] ss:$16 sps:$4 sm:$0xff]   ;;  %v6504_v56 = vld [vmem:[#allocation8 + $0x3a8] ss:$16 sps:$4 sm:$0xff]  }
 0x29b   :  { %v6506_v13 = vld [vmem:[#allocation8 + $0x3ac] ss:$16 sps:$4 sm:$0xff]   ;;  %v6507_v46 = vld [vmem:[#allocation8 + $0x588] ss:$16 sps:$4 sm:$0xff]  }
 0x29c   :  { %v2704_v63 = vmax.f32 %v2687_v60, 0.0  ;;  %4474 = vmatpush2.bf16.msra.mxu0 %v6435_v52  ;;  %v7217_v44 = vpack.c.bf16 %v2703_v59, %v2695_v3  ;;  %v6509_v36 = vld [vmem:[#allocation8 + $0x58c] ss:$16 sps:$4 sm:$0xff]   ;;  %v6510_v52 = vld [vmem:[#allocation8 + $0x388] ss:$16 sps:$4 sm:$0xff]  }
 0x29d   :  { %4529 = vmatprep.subr.bf16.mxu0 %v6443_v55  ;;  %v6512_v47 = vld [vmem:[#allocation8 + $0x38c] ss:$16 sps:$4 sm:$0xff]   ;;  %v6513_v54 = vld [vmem:[#allocation8 + $0x568] ss:$16 sps:$4 sm:$0xff]  }
 0x29e   :  { %v7214_v26 = vpack.c.bf16 %v2704_v63, %v2696_v45  ;;  %v6515_v49 = vld [vmem:[#allocation8 + $0x56c] ss:$16 sps:$4 sm:$0xff]   ;;  %v6516_v60 = vld [vmem:[#allocation8 + $0x368] ss:$16 sps:$4 sm:$0xff]  }
 0x29f   :  { %4476 = vmatmul.mubr.bf16.vlgmr.msra.gmra.mxu0 %v7154_v32  ;;  %v6453_v32 = vld [vmem:[#allocation8 + $0x4a8] ss:$16 sps:$4 sm:$0xff]   ;;  %v6518_v55 = vld [vmem:[#allocation8 + $0x36c] ss:$16 sps:$4 sm:$0xff]  }
 0x2a0   :  { %4530 = vmatpush1.bf16.msra.mxu0 %v6441_v0  ;;  %4561 = vmatprep.mubr.bf16.mxu0 %v7203_v48  ;;  %v6456_v48 = vld [vmem:[#allocation8 + $0x2a8] ss:$16 sps:$4 sm:$0xff]   ;;  %v6521_v58 = vld [vmem:[#allocation8 + $0x54c] ss:$16 sps:$4 sm:$0xff]  }
 0x2a1   :  { %4432 = vmatprep.mubr.bf16.mxu1 %v7214_v26  ;;  %4531 = vmatprep.subr.bf16.mxu0 %v6449_v1  ;;  %v6519_v45 = vld [vmem:[#allocation8 + $0x548] ss:$16 sps:$4 sm:$0xff]   ;;  %v6524_v59 = vld [vmem:[#allocation8 + $0x34c] ss:$16 sps:$4 sm:$0xff]  }
 0x2a2   :  { %4433 = vmatmul.mubr.bf16.vlgmr.msra.gmra.mxu1 %v7217_v44  ;;  %v6527_v63 = vld [vmem:[#allocation8 + $0x52c] ss:$16 sps:$4 sm:$0xff]   ;;  %v6522_v0 = vld [vmem:[#allocation8 + $0x348] ss:$16 sps:$4 sm:$0xff]  }
 0x2a3   :  { %4487 = vmatpush1.bf16.msra.mxu1 %v6444_v4  ;;  %4518 = vmatprep.mubr.bf16.mxu1 %v7186_v37  ;;  %v6465_v37 = vld [vmem:[#allocation8 + $0x468] ss:$16 sps:$4 sm:$0xff]   ;;  %v6530_v3 = vld [vmem:[#allocation8 + $0x32c] ss:$16 sps:$4 sm:$0xff]  }
 0x2a4   :  { %4532 = vmatpush1.bf16.msra.mxu0 %v6447_v6  ;;  %4488 = vmatprep.subr.bf16.mxu1 %v6452_v7  ;;  %v6525_v1 = vld [vmem:[#allocation8 + $0x528] ss:$16 sps:$4 sm:$0xff]   ;;  %v6533_v4 = vld [vmem:[#allocation8 + $0x50c] ss:$16 sps:$4 sm:$0xff]  }
 0x2a5   :  { %4533 = vmatprep.subr.bf16.mxu0 %v6455_v9  ;;  %v6528_v6 = vld [vmem:[#allocation8 + $0x328] ss:$16 sps:$4 sm:$0xff]   ;;  %v6536_v9 = vld [vmem:[#allocation8 + $0x30c] ss:$16 sps:$4 sm:$0xff]  }
 0x2a6   :  { %v6531_v7 = vld [vmem:[#allocation8 + $0x508] ss:$16 sps:$4 sm:$0xff]  }
 0x2a7   :  { %4489 = vmatpush1.bf16.msra.mxu1 %v6450_v2  ;;  %v6587_v2 = vld [vmem:[#allocation11 + $0x74] ss:$8 sps:$4 sm:$0xff]  }
 0x2a8   :  { %4534 = vmatpush1.bf16.msra.mxu0 %v6453_v32  ;;  %4490 = vmatprep.subr.bf16.mxu1 %v6458_v10  ;;  %v6534_v32 = vld [vmem:[#allocation8 + $0x308] ss:$16 sps:$4 sm:$0xff]   ;;  %v6539_v10 = vld [vmem:[#allocation8 + $0x6ec] ss:$16 sps:$4 sm:$0xff]  }
 0x2a9   :  { %4535 = vmatprep.subr.bf16.mxu0 %v6461_v11  ;;  %v6585_v11 = vld [vmem:[#allocation11 + $0x70] ss:$8 sps:$4 sm:$0xff]  }
 0x2ab   :  { %4491 = vmatpush1.bf16.msra.mxu1 %v6456_v48  ;;  %v6590_v48 = vld [vmem:[#allocation11 + $0x64] ss:$8 sps:$4 sm:$0xff]  }
 0x2ac   :  { %4536 = vmatpush1.bf16.msra.mxu0 %v6459_v14  ;;  %4492 = vmatprep.subr.bf16.mxu1 %v6464_v17  ;;  %v6537_v14 = vld [vmem:[#allocation8 + $0x6e8] ss:$16 sps:$4 sm:$0xff]   ;;  %v6542_v17 = vld [vmem:[#allocation8 + $0x6cc] ss:$16 sps:$4 sm:$0xff]  }
 0x2ad   :  { %4537 = vmatprep.subr.bf16.mxu0 %v6467_v18  ;;  %v6588_v18 = vld [vmem:[#allocation11 + $0x60] ss:$8 sps:$4 sm:$0xff]  }
 0x2af   :  { %4493 = vmatpush1.bf16.msra.mxu1 %v6462_v57  ;;  %v6593_v57 = vld [vmem:[#allocation11 + $0x54] ss:$8 sps:$4 sm:$0xff]  }
 0x2b0   :  { %4538 = vmatpush1.bf16.msra.mxu0 %v6465_v37  ;;  %4494 = vmatprep.subr.bf16.mxu1 %v6470_v19  ;;  %v6540_v37 = vld [vmem:[#allocation8 + $0x6c8] ss:$16 sps:$4 sm:$0xff]   ;;  %v6545_v19 = vld [vmem:[#allocation8 + $0x6ac] ss:$16 sps:$4 sm:$0xff]  }
 0x2b1   :  { %4539 = vmatprep.subr.bf16.mxu0 %v6473_v21  ;;  %v6591_v21 = vld [vmem:[#allocation11 + $0x50] ss:$8 sps:$4 sm:$0xff]  }
 0x2b3   :  { %4495 = vmatpush1.bf16.msra.mxu1 %v6468_v22  ;;  %v6596_v22 = vld [vmem:[#allocation11 + $0x44] ss:$8 sps:$4 sm:$0xff]  }
 0x2b4   :  { %4540 = vmatpush1.bf16.msra.mxu0 %v6471_v24  ;;  %4496 = vmatprep.subr.bf16.mxu1 %v6476_v25  ;;  %v6548_v24 = vld [vmem:[#allocation8 + $0x68c] ss:$16 sps:$4 sm:$0xff]  }
 0x2b5   :  { %4541 = vmatprep.subr.bf16.mxu0 %v6479_v61  ;;  %v6594_v25 = vld [vmem:[#allocation11 + $0x40] ss:$8 sps:$4 sm:$0xff]   ;;  %v6599_v61 = vld [vmem:[#allocation11 + $0x34] ss:$8 sps:$4 sm:$0xff]  }
 0x2b7   :  { %4497 = vmatpush1.bf16.msra.mxu1 %v6474_v62  ;;  %v6551_v62 = vld [vmem:[#allocation8 + $0x66c] ss:$16 sps:$4 sm:$0xff]  }
 0x2b8   :  { %4542 = vmatpush1.bf16.msra.mxu0 %v6477_v41  ;;  %4498 = vmatprep.subr.bf16.mxu1 %v6482_v16  ;;  %v6602_v41 = vld [vmem:[#allocation11 + $0x24] ss:$8 sps:$4 sm:$0xff]  }
 0x2b9   :  { %4543 = vmatprep.subr.bf16.mxu0 %v6485_v28  ;;  %v6549_v16 = vld [vmem:[#allocation8 + $0x668] ss:$16 sps:$4 sm:$0xff]   ;;  %v6554_v28 = vld [vmem:[#allocation8 + $0x64c] ss:$16 sps:$4 sm:$0xff]  }
 0x2bb   :  { %4499 = vmatpush1.bf16.msra.mxu1 %v6480_v29  ;;  %v6600_v29 = vld [vmem:[#allocation11 + $0x20] ss:$8 sps:$4 sm:$0xff]  }
 0x2bc   :  { %4544 = vmatpush1.bf16.msra.mxu0 %v6483_v30  ;;  %4500 = vmatprep.subr.bf16.mxu1 %v6488_v33  ;;  %v6605_v30 = vld [vmem:[#allocation11 + $0x14] ss:$8 sps:$4 sm:$0xff]  }
 0x2bd   :  { %4545 = vmatprep.subr.bf16.mxu0 %v6491_v34  ;;  %v6552_v33 = vld [vmem:[#allocation8 + $0x648] ss:$16 sps:$4 sm:$0xff]   ;;  %v6557_v34 = vld [vmem:[#allocation8 + $0x62c] ss:$16 sps:$4 sm:$0xff]  }
 0x2bf   :  { %4501 = vmatpush1.bf16.msra.mxu1 %v6486_v12  ;;  %v6603_v12 = vld [vmem:[#allocation11 + $0x10] ss:$8 sps:$4 sm:$0xff]  }
 0x2c0   :  { %4546 = vmatpush2.bf16.msra.mxu0 %v6489_v50  ;;  %4502 = vmatprep.subr.bf16.mxu1 %v6494_v35  ;;  %v6608_v50 = vld [vmem:[#allocation11 + $0x4] ss:$8 sps:$4 sm:$0xff]  }
 0x2c1   :  { %4547 = vmatprep.subr.bf16.mxu0 %v6497_v38  ;;  %v6555_v35 = vld [vmem:[#allocation8 + $0x628] ss:$16 sps:$4 sm:$0xff]   ;;  %v6560_v38 = vld [vmem:[#allocation8 + $0x60c] ss:$16 sps:$4 sm:$0xff]  }
 0x2c3   :  { %4503 = vmatpush2.bf16.msra.mxu1 %v6492_v8  ;;  %v6606_v8 = vld [vmem:[#allocation11] ss:$8 sps:$4 sm:$0xff]  }
 0x2c4   :  { %4548 = vmatpush2.bf16.msra.mxu0 %v6495_v39  ;;  %4504 = vmatprep.subr.bf16.mxu1 %v6500_v40  ;;  %v6611_v39 = vld [vmem:[#allocation11 + $0xf4] ss:$8 sps:$4 sm:$0xff]  }
 0x2c5   :  { %4549 = vmatprep.subr.bf16.mxu0 %v6503_v42  ;;  %v6558_v40 = vld [vmem:[#allocation8 + $0x608] ss:$16 sps:$4 sm:$0xff]   ;;  %v6563_v42 = vld [vmem:[#allocation8 + $0x7ec] ss:$16 sps:$4 sm:$0xff]  }
 0x2c7   :  { %4505 = vmatpush2.bf16.msra.mxu1 %v6498_v43  ;;  %v6609_v43 = vld [vmem:[#allocation11 + $0xf0] ss:$8 sps:$4 sm:$0xff]  }
 0x2c8   :  { %4550 = vmatpush2.bf16.msra.mxu0 %v6501_v20  ;;  %4506 = vmatprep.subr.bf16.mxu1 %v6506_v13  ;;  %v6614_v20 = vld [vmem:[#allocation11 + $0xe4] ss:$8 sps:$4 sm:$0xff]  }
 0x2c9   :  { %4551 = vmatprep.subr.bf16.mxu0 %v6509_v36  ;;  %v6561_v13 = vld [vmem:[#allocation8 + $0x7e8] ss:$16 sps:$4 sm:$0xff]   ;;  %v6566_v36 = vld [vmem:[#allocation8 + $0x7cc] ss:$16 sps:$4 sm:$0xff]  }
 0x2cb   :  { %4507 = vmatpush2.bf16.msra.mxu1 %v6504_v56  ;;  %v6612_v56 = vld [vmem:[#allocation11 + $0xe0] ss:$8 sps:$4 sm:$0xff]  }
 0x2cc   :  { %4552 = vmatpush2.bf16.msra.mxu0 %v6507_v46  ;;  %4508 = vmatprep.subr.bf16.mxu1 %v6512_v47  ;;  %v6617_v46 = vld [vmem:[#allocation11 + $0xd4] ss:$8 sps:$4 sm:$0xff]  }
 0x2cd   :  { %4553 = vmatprep.subr.bf16.mxu0 %v6515_v49  ;;  %v6564_v47 = vld [vmem:[#allocation8 + $0x7c8] ss:$16 sps:$4 sm:$0xff]   ;;  %v6569_v49 = vld [vmem:[#allocation8 + $0x7ac] ss:$16 sps:$4 sm:$0xff]  }
 0x2cf   :  { %4509 = vmatpush2.bf16.msra.mxu1 %v6510_v52  ;;  %v6615_v52 = vld [vmem:[#allocation11 + $0xd0] ss:$8 sps:$4 sm:$0xff]  }
 0x2d0   :  { %4554 = vmatpush2.bf16.msra.mxu0 %v6513_v54  ;;  %4510 = vmatprep.subr.bf16.mxu1 %v6518_v55  ;;  %v6620_v54 = vld [vmem:[#allocation11 + $0xc4] ss:$8 sps:$4 sm:$0xff]  }
 0x2d1   :  { %4555 = vmatprep.subr.bf16.mxu0 %v6521_v58  ;;  %v6567_v55 = vld [vmem:[#allocation8 + $0x7a8] ss:$16 sps:$4 sm:$0xff]   ;;  %v6572_v58 = vld [vmem:[#allocation8 + $0x78c] ss:$16 sps:$4 sm:$0xff]  }
 0x2d3   :  { %4511 = vmatpush2.bf16.msra.mxu1 %v6516_v60  ;;  %v6618_v60 = vld [vmem:[#allocation11 + $0xc0] ss:$8 sps:$4 sm:$0xff]  }
 0x2d4   :  { %4556 = vmatpush2.bf16.msra.mxu0 %v6519_v45  ;;  %4512 = vmatprep.subr.bf16.mxu1 %v6524_v59  ;;  %v6623_v45 = vld [vmem:[#allocation11 + $0xb4] ss:$8 sps:$4 sm:$0xff]  }
 0x2d5   :  { %4557 = vmatprep.subr.bf16.mxu0 %v6527_v63  ;;  %v6570_v59 = vld [vmem:[#allocation8 + $0x788] ss:$16 sps:$4 sm:$0xff]   ;;  %v6575_v63 = vld [vmem:[#allocation8 + $0x76c] ss:$16 sps:$4 sm:$0xff]  }
 0x2d7   :  { %4513 = vmatpush2.bf16.msra.mxu1 %v6522_v0  ;;  %v6621_v0 = vld [vmem:[#allocation11 + $0xb0] ss:$8 sps:$4 sm:$0xff]  }
 0x2d8   :  { %4558 = vmatpush2.bf16.msra.mxu0 %v6525_v1  ;;  %4514 = vmatprep.subr.bf16.mxu1 %v6530_v3  ;;  %v6626_v1 = vld [vmem:[#allocation11 + $0xa4] ss:$8 sps:$4 sm:$0xff]  }
 0x2d9   :  { %4559 = vmatprep.subr.bf16.mxu0 %v6533_v4  ;;  %v6573_v3 = vld [vmem:[#allocation8 + $0x768] ss:$16 sps:$4 sm:$0xff]   ;;  %v6578_v4 = vld [vmem:[#allocation8 + $0x74c] ss:$16 sps:$4 sm:$0xff]  }
 0x2db   :  { %4515 = vmatpush2.bf16.msra.mxu1 %v6528_v6  ;;  %v6624_v6 = vld [vmem:[#allocation11 + $0xa0] ss:$8 sps:$4 sm:$0xff]  }
 0x2dc   :  { %4560 = vmatpush2.bf16.msra.mxu0 %v6531_v7  ;;  %4516 = vmatprep.subr.bf16.mxu1 %v6536_v9  ;;  %v6629_v7 = vld [vmem:[#allocation11 + $0x94] ss:$8 sps:$4 sm:$0xff]  }
 0x2dd   :  { %5023 = vmatprep.subr.bf16.mxu0 %v6587_v2  ;;  %v6576_v9 = vld [vmem:[#allocation8 + $0x748] ss:$16 sps:$4 sm:$0xff]   ;;  %v6581_v2 = vld [vmem:[#allocation8 + $0x72c] ss:$16 sps:$4 sm:$0xff]  }
 0x2df   :  { %4517 = vmatpush2.bf16.msra.mxu1 %v6534_v32  ;;  %4562 = vmatmul.mubr.bf16.vlgmr.msra.gmra.mxu0 %v7205_v51  ;;  %v6543_v51 = vld [vmem:[#allocation8 + $0x6a8] ss:$16 sps:$4 sm:$0xff]   ;;  %v6627_v32 = vld [vmem:[#allocation11 + $0x90] ss:$8 sps:$4 sm:$0xff]  }
 0x2e0   :  { %4572 = vmatprep.subr.bf16.mxu1 %v6539_v10  ;;  %5024 = vmatpush1.bf16.msra.mxu0 %v6585_v11  ;;  %v6632_v10 = vld [vmem:[#allocation11 + $0x84] ss:$8 sps:$4 sm:$0xff]  }
 0x2e1   :  { %5025 = vmatprep.subr.bf16.mxu0 %v6590_v48  ;;  %v6579_v11 = vld [vmem:[#allocation8 + $0x728] ss:$16 sps:$4 sm:$0xff]   ;;  %v6584_v48 = vld [vmem:[#allocation8 + $0x70c] ss:$16 sps:$4 sm:$0xff]  }
 0x2e2   :  { %4519 = vmatmul.mubr.bf16.vlgmr.msra.gmra.mxu1 %v7193_v5  ;;  %v6546_v5 = vld [vmem:[#allocation8 + $0x688] ss:$16 sps:$4 sm:$0xff]  }
 0x2e3   :  { %4573 = vmatpush1.bf16.msra.mxu1 %v6537_v14  ;;  %4604 = vmatprep.mubr.bf16.mxu1 %v7214_v26  ;;  %v6597_v26 = vld [vmem:[#allocation11 + $0x30] ss:$8 sps:$4 sm:$0xff]   ;;  %v6630_v14 = vld [vmem:[#allocation11 + $0x80] ss:$8 sps:$4 sm:$0xff]  }
 0x2e4   :  { %4574 = vmatprep.subr.bf16.mxu1 %v6542_v17  ;;  %5026 = vmatpush1.bf16.msra.mxu0 %v6588_v18  ;;  %v6582_v17 = vld [vmem:[#allocation8 + $0x708] ss:$16 sps:$4 sm:$0xff]   ;;  %v6633_v18 = vld [vmem:[#allocation11 + $0x170] ss:$8 sps:$4 sm:$0xff]  }
 0x2e5   :  { %5027 = vmatprep.subr.bf16.mxu0 %v6593_v57  ;;  %v6635_v57 = vld [vmem:[#allocation11 + $0x174] ss:$8 sps:$4 sm:$0xff]  }
 0x2e7   :  { %4575 = vmatpush1.bf16.msra.mxu1 %v6540_v37  ;;  %v6638_v37 = vld [vmem:[#allocation11 + $0x164] ss:$8 sps:$4 sm:$0xff]  }
 0x2e8   :  { %4576 = vmatprep.subr.bf16.mxu1 %v6545_v19  ;;  %5028 = vmatpush1.bf16.msra.mxu0 %v6591_v21  ;;  %v6636_v19 = vld [vmem:[#allocation11 + $0x160] ss:$8 sps:$4 sm:$0xff]   ;;  %v6641_v21 = vld [vmem:[#allocation11 + $0x154] ss:$8 sps:$4 sm:$0xff]  }
 0x2e9   :  { %5029 = vmatprep.subr.bf16.mxu0 %v6596_v22  ;;  %v6639_v22 = vld [vmem:[#allocation11 + $0x150] ss:$8 sps:$4 sm:$0xff]  }
 0x2eb   :  { %4577 = vmatpush1.bf16.msra.mxu1 %v6543_v51  ;;  %v6644_v51 = vld [vmem:[#allocation11 + $0x144] ss:$8 sps:$4 sm:$0xff]  }
 0x2ec   :  { %4578 = vmatprep.subr.bf16.mxu1 %v6548_v24  ;;  %5030 = vmatpush1.bf16.msra.mxu0 %v6594_v25  ;;  %v6642_v24 = vld [vmem:[#allocation11 + $0x140] ss:$8 sps:$4 sm:$0xff]   ;;  %v6647_v25 = vld [vmem:[#allocation11 + $0x134] ss:$8 sps:$4 sm:$0xff]  }
 0x2ed   :  { %5031 = vmatprep.subr.bf16.mxu0 %v6599_v61  ;;  %v6645_v61 = vld [vmem:[#allocation11 + $0x130] ss:$8 sps:$4 sm:$0xff]  }
 0x2ef   :  { %4579 = vmatpush1.bf16.msra.mxu1 %v6546_v5  ;;  %v6648_v5 = vld [vmem:[#allocation11 + $0x120] ss:$8 sps:$4 sm:$0xff]  }
 0x2f0   :  { %4580 = vmatprep.subr.bf16.mxu1 %v6551_v62  ;;  %5032 = vmatpush1.bf16.msra.mxu0 %v6597_v26  ;;  %v6653_v62 = vld [vmem:[#allocation11 + $0x114] ss:$8 sps:$4 sm:$0xff]   ;;  %v6651_v26 = vld [vmem:[#allocation11 + $0x110] ss:$8 sps:$4 sm:$0xff]  }
 0x2f1   :  { %5033 = vmatprep.subr.bf16.mxu0 %v6602_v41  ;;  %v6656_v41 = vld [vmem:[#allocation11 + $0x104] ss:$8 sps:$4 sm:$0xff]  }
 0x2f3   :  { %4581 = vmatpush1.bf16.msra.mxu1 %v6549_v16  ;;  %v6654_v16 = vld [vmem:[#allocation11 + $0x100] ss:$8 sps:$4 sm:$0xff]  }
 0x2f4   :  { %4582 = vmatprep.subr.bf16.mxu1 %v6554_v28  ;;  %5034 = vmatpush1.bf16.msra.mxu0 %v6600_v29  ;;  %v6659_v28 = vld [vmem:[#allocation11 + $0x1f4] ss:$8 sps:$4 sm:$0xff]   ;;  %v6657_v29 = vld [vmem:[#allocation11 + $0x1f0] ss:$8 sps:$4 sm:$0xff]  }
 0x2f5   :  { %5035 = vmatprep.subr.bf16.mxu0 %v6605_v30  ;;  %v6662_v30 = vld [vmem:[#allocation11 + $0x1e4] ss:$8 sps:$4 sm:$0xff]  }
 0x2f7   :  { %4583 = vmatpush1.bf16.msra.mxu1 %v6552_v33  ;;  %v4305_v33 = vpop.f32.mrf.mxu0 }
 0x2f8   :  { %4584 = vmatprep.subr.bf16.mxu1 %v6557_v34  ;;  %5036 = vmatpush1.bf16.msra.mxu0 %v6603_v12  ;;  %v6660_v34 = vld [vmem:[#allocation11 + $0x1e0] ss:$8 sps:$4 sm:$0xff]   ;;  %v6665_v12 = vld [vmem:[#allocation11 + $0x1d4] ss:$8 sps:$4 sm:$0xff]  }
 0x2f9   :  { %5037 = vmatprep.subr.bf16.mxu0 %v6608_v50  ;;  %v4307_v50 = vpop.f32.mrf.mxu0 }
 0x2fb   :  { %4585 = vmatpush1.bf16.msra.mxu1 %v6555_v35  ;;  %v6663_v35 = vld [vmem:[#allocation11 + $0x1d0] ss:$8 sps:$4 sm:$0xff]  }
 0x2fc   :  { %4586 = vmatprep.subr.bf16.mxu1 %v6560_v38  ;;  %5038 = vmatpush1.bf16.msra.mxu0 %v6606_v8  ;;  %v6668_v38 = vld [vmem:[#allocation11 + $0x1c4] ss:$8 sps:$4 sm:$0xff]   ;;  %v4309_v8 = vpop.f32.mrf.mxu0 }
 0x2fd   :  { %5039 = vmatprep.subr.bf16.mxu0 %v6611_v39  ;;  %v4348_v39 = vpop.f32.mrf.mxu1 }
 0x2ff   :  { %4587 = vmatpush1.bf16.msra.mxu1 %v6558_v40  ;;  %v6666_v40 = vld [vmem:[#allocation11 + $0x1c0] ss:$8 sps:$4 sm:$0xff]  }
 0x300   :  { %4588 = vmatprep.subr.bf16.mxu1 %v6563_v42  ;;  %5040 = vmatpush2.bf16.msra.mxu0 %v6609_v43  ;;  %v6671_v42 = vld [vmem:[#allocation11 + $0x1b4] ss:$8 sps:$4 sm:$0xff]   ;;  %v4311_v43 = vpop.f32.mrf.mxu0 }
 0x301   :  { %5041 = vmatprep.subr.bf16.mxu0 %v6614_v20  ;;  %v4350_v20 = vpop.f32.mrf.mxu1 }
 0x303   :  { %4589 = vmatpush2.bf16.msra.mxu1 %v6561_v13 }
 0x304   :  { %4590 = vmatprep.subr.bf16.mxu1 %v6566_v36  ;;  %5042 = vmatpush2.bf16.msra.mxu0 %v6612_v56  ;;  %v6669_v36 = vld [vmem:[#allocation11 + $0x1b0] ss:$8 sps:$4 sm:$0xff]   ;;  %v7227_v56 = vld [vmem:[#allocation10] sm:$0xf] }
 0x305   :  { %5043 = vmatprep.subr.bf16.mxu0 %v6617_v46  ;;  %v2978_v46 = vrot.slane %v7227_v56, %v7157_v15 }
 0x307   :  { %4591 = vmatpush2.bf16.msra.mxu1 %v6564_v47  ;;  %v2974_v47 = vrot.slane %v7227_v56, %v7128_v31 }
 0x308   :  { %4592 = vmatprep.subr.bf16.mxu1 %v6569_v49  ;;  %5044 = vmatpush2.bf16.msra.mxu0 %v6615_v52  ;;  %v4352_v49 = vpop.f32.mrf.mxu1 }
 0x309   :  { %5045 = vmatprep.subr.bf16.mxu0 %v6620_v54  ;;  %v4308_v54 = vadd.f32 %v4307_v50, %v2978_v46  ;;  %v6689_v50 = vld [vmem:[#allocation14 + $0x58] sm:$0xff]  }
 0x30b   :  { %4593 = vmatpush2.bf16.msra.mxu1 %v6567_v55  ;;  %v4310_v55 = vadd.f32 %v4309_v8, %v2974_v47 }
 0x30c   :  { %4594 = vmatprep.subr.bf16.mxu1 %v6572_v58  ;;  %5046 = vmatpush2.bf16.msra.mxu0 %v6618_v60  ;;  %v4306_v58 = vadd.f32 %v4305_v33, %v2974_v47  ;;  %v4354_v60 = vpop.f32.mrf.mxu1  ;;  %v6686_v33 = vld [vmem:[#allocation14 + $0x28] sm:$0xff]  }
 0x30d   :  { %5047 = vmatprep.subr.bf16.mxu0 %v6623_v45 }
 0x30f   :  { %4595 = vmatpush2.bf16.msra.mxu1 %v6570_v59  ;;  %v4312_v59 = vadd.f32 %v4311_v43, %v2978_v46 }
 0x310   :  { %4596 = vmatprep.subr.bf16.mxu1 %v6575_v63  ;;  %5048 = vmatpush2.bf16.msra.mxu0 %v6621_v0  ;;  %v6674_v0 = vld [vmem:[#allocation11 + $0x1a4] ss:$8 sps:$4 sm:$0xff]  }
 0x311   :  { %5049 = vmatprep.subr.bf16.mxu0 %v6626_v1  ;;  %v4351_v1 = vadd.f32 %v4350_v20, %v4308_v54 }
 0x313   :  { %4597 = vmatpush2.bf16.msra.mxu1 %v6573_v3  ;;  %v4353_v3 = vadd.f32 %v4352_v49, %v4310_v55 }
 0x314   :  { %4598 = vmatprep.subr.bf16.mxu1 %v6578_v4  ;;  %5050 = vmatpush2.bf16.msra.mxu0 %v6624_v6  ;;  %v6672_v4 = vld [vmem:[#allocation11 + $0x1a0] ss:$8 sps:$4 sm:$0xff]   ;;  %v4349_v6 = vadd.f32 %v4348_v39, %v4306_v58 }
 0x315   :  { %5051 = vmatprep.subr.bf16.mxu0 %v6629_v7 }
 0x317   :  { %4599 = vmatpush2.bf16.msra.mxu1 %v6576_v9 }
 0x318   :  { %4600 = vmatprep.subr.bf16.mxu1 %v6581_v2  ;;  %5052 = vmatpush2.bf16.msra.mxu0 %v6627_v32  ;;  %v4355_v2 = vadd.f32 %v4354_v60, %v4312_v59 }
 0x319   :  { %5053 = vmatprep.subr.bf16.mxu0 %v6632_v10 }
 0x31b   :  { %4601 = vmatpush2.bf16.msra.mxu1 %v6579_v11 }
 0x31c   :  { %4602 = vmatprep.subr.bf16.mxu1 %v6584_v48  ;;  %5054 = vmatpush2.bf16.msra.mxu0 %v6630_v14  ;;  %v6677_v14 = vld [vmem:[#allocation11 + $0x194] ss:$8 sps:$4 sm:$0xff]  }
 0x31f   :  { %4603 = vmatpush2.bf16.msra.mxu1 %v6582_v17  ;;  %v4391_v13 = vpop.f32.mrf.mxu0 }
 0x320   :  { %5066 = vmatprep.subr.bf16.mxu1 %v6635_v57  ;;  %v4392_v11 = vadd.f32 %v4391_v13, %v4349_v6  ;;  %v2986_v13 = vrot.slane %v7227_v56, %v521_v53 }
 0x321   :  { %v4393_v52 = vpop.f32.mrf.mxu0 }
 0x322   :  { %4605 = vmatmul.mubr.bf16.vlgmr.msra.gmra.mxu1 %v7217_v44  ;;  %v6650_v44 = vld [vmem:[#allocation11 + $0x124] ss:$8 sps:$4 sm:$0xff]   ;;  %v4394_v32 = vadd.f32 %v4393_v52, %v4351_v1 }
 0x323   :  { %5067 = vmatpush1.bf16.msra.mxu1 %v6633_v18  ;;  %v4395_v45 = vpop.f32.mrf.mxu0 }
 0x324   :  { %5068 = vmatprep.subr.bf16.mxu1 %v6638_v37  ;;  %v4396_v10 = vadd.f32 %v4395_v45, %v4353_v3  ;;  %v6675_v37 = vld [vmem:[#allocation11 + $0x190] ss:$8 sps:$4 sm:$0xff]  }
 0x325   :  { %v4397_v7 = vpop.f32.mrf.mxu0 }
 0x326   :  { %v4398_v17 = vadd.f32 %v4397_v7, %v4355_v2 }
 0x327   :  { %5069 = vmatpush1.bf16.msra.mxu1 %v6636_v19 }
 0x328   :  { %5070 = vmatprep.subr.bf16.mxu1 %v6641_v21 }
 0x32b   :  { %5071 = vmatpush1.bf16.msra.mxu1 %v6639_v22 }
 0x32c   :  { %5072 = vmatprep.subr.bf16.mxu1 %v6644_v51 }
 0x32f   :  { %5073 = vmatpush1.bf16.msra.mxu1 %v6642_v24  ;;  %v6680_v24 = vld [vmem:[#allocation11 + $0x184] ss:$8 sps:$4 sm:$0xff]  }
 0x330   :  { %5074 = vmatprep.subr.bf16.mxu1 %v6647_v25 }
 0x333   :  { %5075 = vmatpush1.bf16.msra.mxu1 %v6645_v61 }
 0x334   :  { %5076 = vmatprep.subr.bf16.mxu1 %v6650_v44  ;;  %v6678_v44 = vld [vmem:[#allocation11 + $0x180] ss:$8 sps:$4 sm:$0xff]  }
 0x337   :  { %5077 = vmatpush1.bf16.msra.mxu1 %v6648_v5 }
 0x338   :  { %5078 = vmatprep.subr.bf16.mxu1 %v6653_v62 }
 0x33b   :  { %5079 = vmatpush1.bf16.msra.mxu1 %v6651_v26 }
 0x33c   :  { %5080 = vmatprep.subr.bf16.mxu1 %v6656_v41  ;;  %v6681_v41 = vld [vmem:[#allocation14 + $0x78] sm:$0xff]  }
 0x33d   :  { %6118 = vmatprep.subr.bf16.mxu0 %v6681_v41 }
 0x33f   :  { %5081 = vmatpush1.bf16.msra.mxu1 %v6654_v16  ;;  %v6682_v16 = vld [vmem:[#allocation14 + $0x38] sm:$0xff]  }
 0x340   :  { %5082 = vmatprep.subr.bf16.mxu1 %v6659_v28  ;;  %v6683_v28 = vld [vmem:[#allocation14 + $0x70] sm:$0xff]  }
 0x343   :  { %5083 = vmatpush2.bf16.msra.mxu1 %v6657_v29  ;;  %v6684_v29 = vld [vmem:[#allocation14 + $0x30] sm:$0xff]  }
 0x344   :  { %5084 = vmatprep.subr.bf16.mxu1 %v6662_v30  ;;  %v6685_v30 = vld [vmem:[#allocation14 + $0x68] sm:$0xff]  }
 0x347   :  { %5085 = vmatpush2.bf16.msra.mxu1 %v6660_v34  ;;  %v6687_v34 = vld [vmem:[#allocation14 + $0x60] sm:$0xff]  }
 0x348   :  { %5086 = vmatprep.subr.bf16.mxu1 %v6665_v12  ;;  %v6688_v12 = vld [vmem:[#allocation14 + $0x20] sm:$0xff]  }
 0x34b   :  { %5087 = vmatpush2.bf16.msra.mxu1 %v6663_v35  ;;  %v6690_v35 = vld [vmem:[#allocation14 + $0x18] sm:$0xff]  }
 0x34c   :  { %5088 = vmatprep.subr.bf16.mxu1 %v6668_v38 }
 0x34f   :  { %5089 = vmatpush2.bf16.msra.mxu1 %v6666_v40 }
 0x350   :  { %5090 = vmatprep.subr.bf16.mxu1 %v6671_v42 }
 0x353   :  { %5091 = vmatpush2.bf16.msra.mxu1 %v6669_v36  ;;  %v2982_v36 = vrot.slane %v7227_v56, %v517_v27 }
 0x354   :  { %5092 = vmatprep.subr.bf16.mxu1 %v6674_v0 }
 0x357   :  { %5093 = vmatpush2.bf16.msra.mxu1 %v6672_v4 }
 0x358   :  { %5094 = vmatprep.subr.bf16.mxu1 %v6677_v14 }
 0x35b   :  { %5095 = vmatpush2.bf16.msra.mxu1 %v6675_v37  ;;  %v6691_v37 = vld [vmem:[#allocation14 + $0x50] sm:$0xff]  }
 0x35c   :  { %5096 = vmatprep.subr.bf16.mxu1 %v6680_v24  ;;  %v6696_v24 = vld [vmem:[#allocation14] sm:$0xff]  }
 0x35f   :  { %5097 = vmatpush2.bf16.msra.mxu1 %v6678_v44  ;;  %v4477_v38 = vpop.f32.mrf.mxu0  ;;  %v6698_v44 = vld [vmem:[#allocation17 + $0x30] sm:$0xff]  }
 0x360   :  { %v4478_v54 = vadd.f32 %v4477_v38, %v2982_v36 }
 0x361   :  { %v4479_v8 = vpop.f32.mrf.mxu0 }
 0x362   :  { %v4434_v63 = vpop.f32.mrf.mxu1  ;;  %v4480_v49 = vadd.f32 %v4479_v8, %v2986_v13 }
 0x363   :  { %v4435_v19 = vadd.f32 %v4434_v63, %v4392_v11  ;;  %v4481_v39 = vpop.f32.mrf.mxu0 }
 0x364   :  { %v4436_v9 = vpop.f32.mrf.mxu1  ;;  %v4482_v52 = vadd.f32 %v4481_v39, %v2982_v36 }
 0x365   :  { %v4437_v18 = vadd.f32 %v4436_v9, %v4394_v32  ;;  %v4615_v5 = vmax.f32 %v4435_v19, 0.0  ;;  %v4483_v42 = vpop.f32.mrf.mxu0  ;;  %v6692_v19 = vld [vmem:[#allocation14 + $0x10] sm:$0xff]  }
 0x366   :  { %v4438_v48 = vpop.f32.mrf.mxu1  ;;  %v4484_v58 = vadd.f32 %v4483_v42, %v2986_v13 }
 0x367   :  { %v4439_v57 = vadd.f32 %v4438_v48, %v4396_v10  ;;  %v4616_v25 = vmax.f32 %v4437_v18, 0.0 }
 0x368   :  { %v4440_v21 = vpop.f32.mrf.mxu1 }
 0x369   :  { %v4441_v22 = vadd.f32 %v4440_v21, %v4398_v17  ;;  %v4619_v51 = vmax.f32 %v4439_v57, 0.0  ;;  %v6693_v21 = vld [vmem:[#allocation14 + $0x48] sm:$0xff]  }
 0x36b   :  { %v4620_v61 = vmax.f32 %v4441_v22, 0.0  ;;  %v4623_v26 = vpack.c.bf16 %v4619_v51, %v4615_v5  ;;  %v6694_v22 = vld [vmem:[#allocation14 + $0x8] sm:$0xff]   ;;  %v6695_v51 = vld [vmem:[#allocation14 + $0x40] sm:$0xff]  }
 0x36c   :  { %v6699_v5 = vld [vmem:[#allocation17 + $0x28] sm:$0xff]  }
 0x36d   :  { %v4624_v62 = vpack.c.bf16 %v4620_v61, %v4616_v25  ;;  %v6697_v25 = vld [vmem:[#allocation17 + $0x38] sm:$0xff]   ;;  %v6987_v61 = vmov 0.0  }
 0x36e   :  { %6149 = vmatprep.subr.bf16.mxu1 %v6987_v61 }
 0x36f   :  { %5055 = vmatprep.mubr.bf16.mxu0 %v4624_v62  ;;  %v6700_v62 = vld [vmem:[#allocation17 + $0x20] sm:$0xff]  }
 0x370   :  { %5056 = vmatmul.mubr.bf16.vlgmr.msra.gmra.mxu0 %v4623_v26 }
 0x371   :  { %6119 = vmatpush3.bf16.msra.mxu0 %v6682_v16  ;;  %v4691_v16 = vld [vmem:[#allocation13] sm:$0x3] }
 0x372   :  { %6120 = vmatprep.subr.bf16.mxu0 %v6683_v28 }
 0x375   :  { %6121 = vmatpush3.bf16.msra.mxu0 %v6684_v29  ;;  %v4700_v29 = vrot.slane %v4691_v16, %v7157_v15 }
 0x376   :  { %6122 = vmatprep.subr.bf16.mxu0 %v6685_v30  ;;  %v4696_v30 = vrot.slane %v4691_v16, %v7128_v31  ;;  %v6701_v31 = vld [vmem:[#allocation17 + $0x18] sm:$0xff]  }
 0x379   :  { %6123 = vmatpush3.bf16.msra.mxu0 %v6686_v33 }
 0x37a   :  { %6124 = vmatprep.subr.bf16.mxu0 %v6687_v34 }
 0x37d   :  { %6125 = vmatpush3.bf16.msra.mxu0 %v6688_v12 }
 0x37e   :  { %6126 = vmatprep.subr.bf16.mxu0 %v6689_v50 }
 0x381   :  { %6127 = vmatpush3.bf16.msra.mxu0 %v6690_v35 }
 0x382   :  { %6128 = vmatprep.subr.bf16.mxu0 %v6691_v37 }
 0x385   :  { %6129 = vmatpush3.bf16.msra.mxu0 %v6692_v19 }
 0x386   :  { %6130 = vmatprep.subr.bf16.mxu0 %v6693_v21 }
 0x389   :  { %6131 = vmatpush3.bf16.msra.mxu0 %v6694_v22 }
 0x38a   :  { %6132 = vmatprep.subr.bf16.mxu0 %v6695_v51 }
 0x38d   :  { %6133 = vmatpush3.bf16.msra.mxu0 %v6696_v24 }
 0x39f   :  { %v4563_v20 = vpop.f32.mrf.mxu0 }
 0x3a1   :  { %v4565_v47 = vpop.f32.mrf.mxu0 }
 0x3a2   :  { %v4520_v40 = vpop.f32.mrf.mxu1 }
 0x3a3   :  { %v4521_v59 = vadd.f32 %v4520_v40, %v4478_v54  ;;  %v4567_v63 = vpop.f32.mrf.mxu0  ;;  %v6702_v54 = vld [vmem:[#allocation17 + $0x10] sm:$0xff]  }
 0x3a4   :  { %v4522_v43 = vpop.f32.mrf.mxu1 }
 0x3a5   :  { %v4523_v60 = vadd.f32 %v4522_v43, %v4480_v49  ;;  %v4569_v6 = vpop.f32.mrf.mxu0  ;;  %v4564_v23 = vadd.f32 %v4563_v20, %v4521_v59 }
 0x3a6   :  { %v4524_v46 = vpop.f32.mrf.mxu1 }
 0x3a7   :  { %v4525_v45 = vadd.f32 %v4524_v46, %v4482_v52  ;;  %v4566_v4 = vadd.f32 %v4565_v47, %v4523_v60 }
 0x3a8   :  { %v4526_v55 = vpop.f32.mrf.mxu1 }
 0x3a9   :  { %v4527_v1 = vadd.f32 %v4526_v55, %v4484_v58  ;;  %v4568_v53 = vadd.f32 %v4567_v63, %v4525_v45  ;;  %v6703_v55 = vld [vmem:[#allocation17 + $0x8] sm:$0xff]   ;;  %v6704_v58 = vld [vmem:[#allocation17] sm:$0xff]   ;;  %v6083_v63 = vld [vmem:[#allocation16] ss:$0 sm:$0xff] }
 0x3ab   :  { %v4570_v9 = vadd.f32 %v4569_v6, %v4527_v1 }
 0x3e2   :  { %v4606_v0 = vpop.f32.mrf.mxu1 }
 0x3e3   :  { %v4607_v2 = vadd.f32 %v4606_v0, %v4564_v23 }
 0x3e4   :  { %v4608_v3 = vpop.f32.mrf.mxu1 }
 0x3e5   :  { %v4609_v27 = vadd.f32 %v4608_v3, %v4566_v4  ;;  %v4617_v17 = vmax.f32 %v4607_v2, 0.0 }
 0x3e6   :  { %v4610_v7 = vpop.f32.mrf.mxu1 }
 0x3e7   :  { %v4611_v56 = vadd.f32 %v4610_v7, %v4568_v53  ;;  %v4618_v48 = vmax.f32 %v4609_v27, 0.0 }
 0x3e8   :  { %v4612_v32 = vpop.f32.mrf.mxu1 }
 0x3e9   :  { %v4613_v10 = vadd.f32 %v4612_v32, %v4570_v9  ;;  %v4621_v11 = vmax.f32 %v4611_v56, 0.0  ;;  %v6100_v56 = vld [vmem:[#allocation19] ss:$0 sm:$0xff] }
 0x3eb   :  { %v4622_v14 = vmax.f32 %v4613_v10, 0.0  ;;  %v4625_v57 = vpack.c.bf16 %v4621_v11, %v4617_v17 }
 0x3ed   :  { %v4626_v18 = vpack.c.bf16 %v4622_v14, %v4618_v48 }
 0x3ef   :  { %5098 = vmatprep.mubr.bf16.mxu1 %v4626_v18 }
 0x3f0   :  { %5099 = vmatmul.mubr.bf16.vlgmr.msra.gmra.mxu1 %v4625_v57 }
 0x3f1   :  { %6150 = vmatpush3.bf16.msra.mxu1 %v6697_v25  ;;  %6165 = vmatprep.mubr.msk.bf16.mxu1 %vm6988_vm0, %v6987_v61 }
 0x3f2   :  { %6151 = vmatprep.subr.bf16.mxu1 %v6987_v61 }
 0x3f5   :  { %6152 = vmatpush3.bf16.msra.mxu1 %v6698_v44 }
 0x3f6   :  { %6153 = vmatprep.subr.bf16.mxu1 %v6987_v61 }
 0x3f9   :  { %6154 = vmatpush3.bf16.msra.mxu1 %v6699_v5 }
 0x3fa   :  { %6155 = vmatprep.subr.bf16.mxu1 %v6987_v61 }
 0x3fd   :  { %6156 = vmatpush3.bf16.msra.mxu1 %v6700_v62 }
 0x3fe   :  { %6157 = vmatprep.subr.bf16.mxu1 %v6987_v61 }
 0x401   :  { %6158 = vmatpush3.bf16.msra.mxu1 %v6701_v31 }
 0x402   :  { %6159 = vmatprep.subr.bf16.mxu1 %v6987_v61 }
 0x405   :  { %6160 = vmatpush3.bf16.msra.mxu1 %v6702_v54 }
 0x406   :  { %6161 = vmatprep.subr.bf16.mxu1 %v6987_v61 }
 0x409   :  { %6162 = vmatpush3.bf16.msra.mxu1 %v6703_v55 }
 0x40a   :  { %6163 = vmatprep.subr.bf16.mxu1 %v6987_v61 }
 0x40d   :  { %6164 = vmatpush3.bf16.msra.mxu1 %v6704_v58 }
 0x430   :  { %v5057_v26 = vpop.f32.mrf.mxu0 }
 0x431   :  { %v5058_v38 = vadd.f32 %v5057_v26, %v4696_v30 }
 0x432   :  { %v5059_v41 = vpop.f32.mrf.mxu0 }
 0x433   :  { %v5060_v50 = vadd.f32 %v5059_v41, %v4700_v29 }
 0x434   :  { %v5061_v28 = vpop.f32.mrf.mxu0 }
 0x435   :  { %v5062_v35 = vadd.f32 %v5061_v28, %v4696_v30 }
 0x436   :  { %v5063_v34 = vpop.f32.mrf.mxu0 }
 0x437   :  { %v5064_v39 = vadd.f32 %v5063_v34, %v4700_v29 }
 0x4b0   :  { %v5100_v33 = vpop.f32.mrf.mxu1 }
 0x4b1   :  { %v5101_v43 = vadd.f32 %v5100_v33, %v5058_v38 }
 0x4b2   :  { %v5102_v12 = vpop.f32.mrf.mxu1 }
 0x4b3   :  { %v5103_v40 = vadd.f32 %v5102_v12, %v5060_v50  ;;  %v5109_v49 = vmax.f32 %v5101_v43, 0.0 }
 0x4b4   :  { %v5104_v8 = vpop.f32.mrf.mxu1 }
 0x4b5   :  { %v5105_v42 = vadd.f32 %v5104_v8, %v5062_v35  ;;  %v5110_v46 = vmax.f32 %v5103_v40, 0.0 }
 0x4b6   :  { %v5106_v20 = vpop.f32.mrf.mxu1 }
 0x4b7   :  { %v5107_v13 = vadd.f32 %v5106_v20, %v5064_v39  ;;  %v5111_v36 = vmax.f32 %v5105_v42, 0.0 }
 0x4b9   :  { %v5112_v47 = vmax.f32 %v5107_v13, 0.0  ;;  %v5113_v52 = vpack.c.bf16 %v5111_v36, %v5109_v49 }
 0x4bb   :  { %v5114_v15 = vpack.c.bf16 %v5112_v47, %v5110_v46 }
 0x4bd   :  { %5282 = vmatprep.mubr.bf16.mxu0 %v5114_v15 }
 0x4be   :  { %5283 = vmatmul.mubr.bf16.vlgmr.msra.gmra.mxu0 %v5113_v52 }
 0x57e   :  { %v6134_v60 = vpop.f32.mrf.mxu0 }
 0x580   :  { %v6135_v45 = vpop.f32.mrf.mxu0 }
 0x581   :  { %v6136_v59 = vadd.f32 %v6135_v45, %v6134_v60 }
 0x582   :  { %v6137_v0 = vpop.f32.mrf.mxu0 }
 0x583   :  { %v5285_v3 = vadd.f32 %v6136_v59, %v6083_v63 }
 0x584   :  { %v6138_v1 = vpop.f32.mrf.mxu0 }
 0x585   :  { %v6139_v4 = vadd.f32 %v6138_v1, %v6137_v0  ;;  %v5291_v6 = vmax.f32 %v5285_v3, 0.0 }
 0x587   :  { %v5288_v53 = vadd.f32 %v6139_v4, %v6083_v63 }
 0x589   :  { %v5292_v23 = vmax.f32 %v5288_v53, 0.0 }
 0x58b   :  { %v5293_v7 = vpack.c.bf16 %v5292_v23, %v5291_v6 }
 0x58d   :  { %6166 = vmatmul.mubr.bf16.vlgmr.msra.gmra.mxu1 %v5293_v7 }
 0x64d   :  { %v5399_v27 = vpop.f32.mrf.mxu1 }
 0x64e   :  { %v5400_v32 = vadd.f32 %v6100_v56, %v5399_v27 }
 0x64f   :  { %v6167_v9 = vpop.f32.mrf.mxu1 }
 0x651   :  { %v5402_v2 = vpop.f32.mrf.mxu1 }
 0x652   :  { %v5403_v10 = vadd.f32 %v6100_v56, %v5402_v2 }
 0x653   :  { %v6168_v11 = vpop.f32.mrf.mxu1 }
 0x654   :  { %v6116_v48 = vpack.c.bf16 %v5403_v10, %v5400_v32 }
 0x656   :  { %6117 = vst [vmem:[#allocation20] sm:$0xff] %v6116_v48  }
 0x657   :  { %6942 = shalt.err (!%p6939_p3)
}
 0x658   :  { %5427 = dma.vmem_to_hbm [thread:$0]  %s5422_s10, 128, %s7258_s11, [#allocation4], %s6975_s20, %s6975_s20, %s6976_s21  }
 0x659   :  { %6963 = dma.done.wait [#allocation4], 128  }
 0x65a   :  { %6964 = vsyncadd [#allocation4], 4294967168 }
 0x65b   :  { %5431 = vsyncpa [#allocation3], 1 }
 0x65c   :  { %5432 = vsyncpa [#allocation6], 1 }
 0x65d   :  { %5433 = vsyncpa [#allocation9], 1 }
 0x65e   :  { %5434 = vsyncpa [#allocation12], 1 }
 0x65f   :  { %5435 = vsyncpa [#allocation15], 1 }
 0x660   :  { %5436 = vsyncpa [#allocation18], 1 }
 0x661   :  { %5437 = vsyncpa [#allocation4], 1 }

</bundles_post_ra>
